<compile_context>
chip_gen: v7x
topology: tpu7x:2x2x1
jax: 0.10.0
libtpu: 0.0.40
codegen_flags: <defaults>
</compile_context>

<pallas_src>
import jax
import jax.numpy as jnp
from jax import lax
from jax.experimental import pallas as pl
from jax.experimental.pallas import tpu as pltpu

# Small shapes consistent with the module (in_channels is a constructor arg; the
# 256-wide hidden convs are fixed by the module definition).
N = 2          # batch
CIN = 128      # in_channels (module default 1024, reduced for a small example)
CMID = 256     # hidden conv width (fixed in the module)
H = 8
W = 8
B_BLK = 2      # batch elements fused per grid step (M = B_BLK*H*W = 128)


def cxt_kernel(xpad_ref, w1_ref, b1_ref, w2_ref, b2_ref, w3_ref, b3_ref,
               out_ref, pad_ref):
    bsz = xpad_ref.shape[0]
    m = bsz * H * W

    # Zero the shared padded scratch ONCE: only its 1-px border is read as "padding"
    # later on; the interior is fully rewritten every step and the border never is.
    @pl.when(pl.program_id(0) == 0)
    def _init():
        pad_ref[...] = jnp.zeros(pad_ref.shape, pad_ref.dtype)

    def conv3x3_mxu(xp, w_ref, b_ref):
        """3x3 'same' conv of a zero-bordered (bsz, H+2, W+2, cin) slab.

        Returns (bsz*H*W, cout) f32.  dx (sublane) shifts are hoisted (3 per conv),
        dy taps are leading-dim slices (free), and the reshape to (M, cin) is
        layout-preserving because W == 8.
        """
        cin = w_ref.shape[2]
        cout = w_ref.shape[3]
        # fold the bias into the accumulator init
        acc = jnp.broadcast_to(b_ref[...].astype(jnp.float32), (m, cout))
        for dx in range(3):
            vs = xp[:, :, dx:dx + W, :]                      # (bsz, H+2, W, cin)
            for dy in range(3):
                patch = vs[:, dy:dy + H].reshape(m, cin)     # layout-preserving
                acc = acc + jnp.dot(patch, w_ref[dy, dx],
                                    preferred_element_type=jnp.float32)
        return acc

    xpad = xpad_ref[...]                                     # (bsz, H+2, W+2, CIN)

    # conv1 + (BN=Identity) + ReLU  -> interior of padded scratch
    h1 = jnp.maximum(conv3x3_mxu(xpad, w1_ref, b1_ref), 0.0)
    pad_ref[:, 1:1 + H, 1:1 + W, :] = h1.reshape(bsz, H, W, CMID)

    # conv2 + (BN=Identity) + ReLU  -> reuse the same scratch slab
    h1p = pad_ref[...]                                       # (bsz, H+2, W+2, CMID)
    h2 = jnp.maximum(conv3x3_mxu(h1p, w2_ref, b2_ref), 0.0)
    pad_ref[:, 1:1 + H, 1:1 + W, :] = h2.reshape(bsz, H, W, CMID)

    # conv3 (Cout=1) on the VPU: broadcast multiply-accumulate over the 9 taps,
    # then a single channel (lane) reduction.  Avoids (256 -> 1) MXU matmuls.
    h2p = pad_ref[...]
    acc3 = jnp.zeros((bsz, H, W, CMID), jnp.float32)
    for dx in range(3):
        vs = h2p[:, :, dx:dx + W, :]                         # (bsz, H+2, W, CMID)
        for dy in range(3):
            k = dy * 3 + dx
            acc3 = acc3 + vs[:, dy:dy + H] * w3_ref[k:k + 1, :]
    a3 = jnp.sum(acc3, axis=-1, keepdims=True) + b3_ref[0]   # (bsz, H, W, 1)
    attn = jax.nn.sigmoid(jnp.maximum(a3, 0.0))              # ReLU then Sigmoid (as in module)

    # residual modulation folded:  y = x * (attn + 1);  then AdaptiveMaxPool2d(1)
    x_in = xpad[:, 1:1 + H, 1:1 + W, :]                      # (bsz, H, W, CIN)
    y = x_in * (attn + 1.0)
    pooled = jnp.max(jnp.max(y, axis=2), axis=1)             # (bsz, CIN)
    out_ref[...] = pooled[None]                              # (1, bsz, CIN)


def context_extractor1(x, params):
    """x: (N, CIN, H, W) float32 (NCHW, like PyTorch). Returns (N, CIN, 1, 1)."""
    w1, b1, w2, b2, w3, b3 = params
    n = x.shape[0]
    assert n % B_BLK == 0, "batch must be a multiple of B_BLK"

    x_nhwc = jnp.transpose(x, (0, 2, 3, 1)).astype(jnp.float32)
    xpad = jnp.pad(x_nhwc, ((0, 0), (1, 1), (1, 1), (0, 0)))   # NHWC, 1-px zero border
    w3k = w3.reshape(9, CMID).astype(jnp.float32)              # (3,3,CMID,1) -> (9,CMID)
    b3s = b3.reshape(1).astype(jnp.float32)                    # scalar bias -> SMEM

    out = pl.pallas_call(
        cxt_kernel,
        out_shape=jax.ShapeDtypeStruct((n // B_BLK, B_BLK, CIN), jnp.float32),
        grid_spec=pltpu.PrefetchScalarGridSpec(
            num_scalar_prefetch=0,
            grid=(n // B_BLK,),
            in_specs=[
                pl.BlockSpec((B_BLK, H + 2, W + 2, CIN), lambda i: (i, 0, 0, 0)),
                pl.BlockSpec((3, 3, CIN, CMID), lambda i: (0, 0, 0, 0)),
                pl.BlockSpec((1, CMID), lambda i: (0, 0)),
                pl.BlockSpec((3, 3, CMID, CMID), lambda i: (0, 0, 0, 0)),
                pl.BlockSpec((1, CMID), lambda i: (0, 0)),
                pl.BlockSpec((9, CMID), lambda i: (0, 0)),
                pl.BlockSpec(memory_space=pltpu.MemorySpace.SMEM),
            ],
            out_specs=pl.BlockSpec((1, B_BLK, CIN), lambda i: (i, 0, 0)),
            scratch_shapes=[
                # single shared padded activation slab (reused for conv1 & conv2)
                pltpu.VMEM((B_BLK, H + 2, W + 2, CMID), jnp.float32),
            ],
        ),
        # "arbitrary" is required by the init-once scratch border; at demo sizes the
        # grid has a single step anyway.  For v7x megacore on large N, zero the border
        # every step instead and mark this axis "parallel".
        compiler_params=pltpu.CompilerParams(
            dimension_semantics=("arbitrary",)),
    )(xpad, w1, b1, w2, b2, w3k, b3s)

    return out.reshape(n, CIN)[..., None, None]


def reference(x, params):
    """Pure-JAX reference matching the PyTorch forward (use_bn=False)."""
    w1, b1, w2, b2, w3, b3 = params

    def conv(h, w, b):
        y = lax.conv_general_dilated(
            h, w, window_strides=(1, 1), padding="SAME",
            dimension_numbers=("NHWC", "HWIO", "NHWC"),
            precision=lax.Precision.HIGHEST)
        return y + b.reshape(1, 1, 1, -1)

    h = jnp.transpose(x, (0, 2, 3, 1)).astype(jnp.float32)
    a = jax.nn.relu(conv(h, w1, b1))
    a = jax.nn.relu(conv(a, w2, b2))
    a = jax.nn.sigmoid(jax.nn.relu(conv(a, w3, b3)))
    y = h * a + h
    pooled = jnp.max(y, axis=(1, 2))                     # (N, C)
    return pooled.reshape(x.shape[0], -1, 1, 1)


def make_params(key):
    k1, k2, k3, k4, k5, k6 = jax.random.split(key, 6)
    w1 = jax.random.normal(k1, (3, 3, CIN, CMID), jnp.float32) * 0.05
    b1 = jax.random.normal(k2, (1, CMID), jnp.float32) * 0.05
    w2 = jax.random.normal(k3, (3, 3, CMID, CMID), jnp.float32) * 0.05
    b2 = jax.random.normal(k4, (1, CMID), jnp.float32) * 0.05
    w3 = jax.random.normal(k5, (3, 3, CMID, 1), jnp.float32) * 0.05
    b3 = jax.random.normal(k6, (1, 1), jnp.float32) * 0.05
    return (w1, b1, w2, b2, w3, b3)


if __name__ == "__main__":
    key = jax.random.PRNGKey(0)
    kx, kp = jax.random.split(key)
    x = jax.random.normal(kx, (N, CIN, H, W), jnp.float32)
    params = make_params(kp)

    out = jax.block_until_ready(context_extractor1(x, params))
    ref = jax.block_until_ready(reference(x, params))

    assert out.shape == (N, CIN, 1, 1), out.shape
    assert jnp.allclose(out, ref, rtol=1e-3, atol=1e-3), (
        float(jnp.max(jnp.abs(out - ref))))

    print("KERNEL_OK")
</pallas_src>

<mosaic_0001>
module attributes {stable_mosaic.version = 11 : i64} {
  func.func @cxt_kernel(%arg0: i32, %arg1: memref<2x10x10x128xf32, #tpu.memory_space<vmem>>, %arg2: memref<3x3x128x256xf32, #tpu.memory_space<vmem>>, %arg3: memref<1x256xf32, #tpu.memory_space<vmem>>, %arg4: memref<3x3x256x256xf32, #tpu.memory_space<vmem>>, %arg5: memref<1x256xf32, #tpu.memory_space<vmem>>, %arg6: memref<9x256xf32, #tpu.memory_space<vmem>>, %arg7: memref<1xf32, #tpu.memory_space<smem>>, %arg8: memref<1x2x128xf32, #tpu.memory_space<vmem>>, %arg9: memref<2x10x10x256xf32, #tpu.memory_space<vmem>>) attributes {dimension_semantics = [#tpu.dimension_semantics<arbitrary>], iteration_bounds = array<i64: 1>, scalar_prefetch = 0 : i64, scratch_operands = 1 : i64, tpu.core_type = #tpu.core_type<tc>, window_params = [{transform_indices = @transform_0, window_bounds = array<i64: 2, 10, 10, 128>}, {pipeline_mode = #tpu.pipeline_mode<synchronous>, transform_indices = @transform_1, window_bounds = array<i64: 3, 3, 128, 256>}, {pipeline_mode = #tpu.pipeline_mode<synchronous>, transform_indices = @transform_2, window_bounds = array<i64: 1, 256>}, {pipeline_mode = #tpu.pipeline_mode<synchronous>, transform_indices = @transform_3, window_bounds = array<i64: 3, 3, 256, 256>}, {pipeline_mode = #tpu.pipeline_mode<synchronous>, transform_indices = @transform_4, window_bounds = array<i64: 1, 256>}, {pipeline_mode = #tpu.pipeline_mode<synchronous>, transform_indices = @transform_5, window_bounds = array<i64: 9, 256>}, {transform_indices = @transform_6, window_bounds = array<i64: 1>}, {transform_indices = @transform_7, window_bounds = array<i64: 1, 2, 128>}]} {
    %c0_i32 = arith.constant 0 : i32
    %0 = arith.cmpi eq, %arg0, %c0_i32 : i32
    %1 = arith.extui %0 : i1 to i32
    %c0_i32_0 = arith.constant 0 : i32
    %2 = arith.cmpi ne, %1, %c0_i32_0 : i32
    scf.if %2 {
      %cst_136 = arith.constant 0.000000e+00 : f32
      %213 = vector.broadcast %cst_136 : f32 to vector<2x10x10x256xf32>
      %c0_137 = arith.constant 0 : index
      %c0_138 = arith.constant 0 : index
      %c0_139 = arith.constant 0 : index
      %c0_140 = arith.constant 0 : index
      %214 = vector.load %arg9[%c0_137, %c0_138, %c0_139, %c0_140] : memref<2x10x10x256xf32, #tpu.memory_space<vmem>>, vector<2x10x10x256xf32>
      tpu.vector_store %arg9[%c0_137, %c0_138, %c0_139, %c0_140], %213 {strides = array<i32>} : memref<2x10x10x256xf32, #tpu.memory_space<vmem>>, vector<2x10x10x256xf32>,
    } else {
    }
    %c0 = arith.constant 0 : index
    %c0_1 = arith.constant 0 : index
    %c0_2 = arith.constant 0 : index
    %c0_3 = arith.constant 0 : index
    %3 = vector.load %arg1[%c0, %c0_1, %c0_2, %c0_3] : memref<2x10x10x128xf32, #tpu.memory_space<vmem>>, vector<2x10x10x128xf32>
    %c0_4 = arith.constant 0 : index
    %c0_5 = arith.constant 0 : index
    %4 = vector.load %arg3[%c0_4, %c0_5] : memref<1x256xf32, #tpu.memory_space<vmem>>, vector<1x256xf32>
    %5 = vector.shape_cast %4 : vector<1x256xf32> to vector<1x256xf32>
    %6 = vector.broadcast %5 : vector<1x256xf32> to vector<128x256xf32>
    %7 = vector.extract_strided_slice %3 {offsets = [0, 0, 0, 0], sizes = [2, 10, 8, 128], strides = [1, 1, 1, 1]} : vector<2x10x10x128xf32> to vector<2x10x8x128xf32>
    %8 = vector.extract_strided_slice %7 {offsets = [0, 0, 0, 0], sizes = [2, 8, 8, 128], strides = [1, 1, 1, 1]} : vector<2x10x8x128xf32> to vector<2x8x8x128xf32>
    %9 = vector.shape_cast %8 : vector<2x8x8x128xf32> to vector<128x128xf32>
    %c0_6 = arith.constant 0 : index
    %c0_7 = arith.constant 0 : index
    %c0_8 = arith.constant 0 : index
    %c0_9 = arith.constant 0 : index
    %10 = vector.load %arg2[%c0_6, %c0_7, %c0_8, %c0_9] : memref<3x3x128x256xf32, #tpu.memory_space<vmem>>, vector<1x1x128x256xf32>
    %11 = vector.shape_cast %10 : vector<1x1x128x256xf32> to vector<128x256xf32>
    %cst = arith.constant dense<0.000000e+00> : vector<128x256xf32>
    %12 = tpu.matmul %9, %11, %cst {dimension_numbers = #tpu.dot_dimension_numbers<[1], [0], [0], [1], [0, 0, 1, 1], [], []>} : vector<128x128xf32>, vector<128x256xf32>, vector<128x256xf32> -> vector<128x256xf32>
    %13 = arith.addf %6, %12 : vector<128x256xf32>
    %14 = vector.extract_strided_slice %7 {offsets = [0, 1, 0, 0], sizes = [2, 8, 8, 128], strides = [1, 1, 1, 1]} : vector<2x10x8x128xf32> to vector<2x8x8x128xf32>
    %15 = vector.shape_cast %14 : vector<2x8x8x128xf32> to vector<128x128xf32>
    %c1 = arith.constant 1 : index
    %c0_10 = arith.constant 0 : index
    %c0_11 = arith.constant 0 : index
    %c0_12 = arith.constant 0 : index
    %16 = vector.load %arg2[%c1, %c0_10, %c0_11, %c0_12] : memref<3x3x128x256xf32, #tpu.memory_space<vmem>>, vector<1x1x128x256xf32>
    %17 = vector.shape_cast %16 : vector<1x1x128x256xf32> to vector<128x256xf32>
    %cst_13 = arith.constant dense<0.000000e+00> : vector<128x256xf32>
    %18 = tpu.matmul %15, %17, %cst_13 {dimension_numbers = #tpu.dot_dimension_numbers<[1], [0], [0], [1], [0, 0, 1, 1], [], []>} : vector<128x128xf32>, vector<128x256xf32>, vector<128x256xf32> -> vector<128x256xf32>
    %19 = arith.addf %13, %18 : vector<128x256xf32>
    %20 = vector.extract_strided_slice %7 {offsets = [0, 2, 0, 0], sizes = [2, 8, 8, 128], strides = [1, 1, 1, 1]} : vector<2x10x8x128xf32> to vector<2x8x8x128xf32>
    %21 = vector.shape_cast %20 : vector<2x8x8x128xf32> to vector<128x128xf32>
    %c2 = arith.constant 2 : index
    %c0_14 = arith.constant 0 : index
    %c0_15 = arith.constant 0 : index
    %c0_16 = arith.constant 0 : index
    %22 = vector.load %arg2[%c2, %c0_14, %c0_15, %c0_16] : memref<3x3x128x256xf32, #tpu.memory_space<vmem>>, vector<1x1x128x256xf32>
    %23 = vector.shape_cast %22 : vector<1x1x128x256xf32> to vector<128x256xf32>
    %cst_17 = arith.constant dense<0.000000e+00> : vector<128x256xf32>
    %24 = tpu.matmul %21, %23, %cst_17 {dimension_numbers = #tpu.dot_dimension_numbers<[1], [0], [0], [1], [0, 0, 1, 1], [], []>} : vector<128x128xf32>, vector<128x256xf32>, vector<128x256xf32> -> vector<128x256xf32>
    %25 = arith.addf %19, %24 : vector<128x256xf32>
    %26 = vector.extract_strided_slice %3 {offsets = [0, 0, 1, 0], sizes = [2, 10, 8, 128], strides = [1, 1, 1, 1]} : vector<2x10x10x128xf32> to vector<2x10x8x128xf32>
    %27 = vector.extract_strided_slice %26 {offsets = [0, 0, 0, 0], sizes = [2, 8, 8, 128], strides = [1, 1, 1, 1]} : vector<2x10x8x128xf32> to vector<2x8x8x128xf32>
    %28 = vector.shape_cast %27 : vector<2x8x8x128xf32> to vector<128x128xf32>
    %c0_18 = arith.constant 0 : index
    %c1_19 = arith.constant 1 : index
    %c0_20 = arith.constant 0 : index
    %c0_21 = arith.constant 0 : index
    %29 = vector.load %arg2[%c0_18, %c1_19, %c0_20, %c0_21] : memref<3x3x128x256xf32, #tpu.memory_space<vmem>>, vector<1x1x128x256xf32>
    %30 = vector.shape_cast %29 : vector<1x1x128x256xf32> to vector<128x256xf32>
    %cst_22 = arith.constant dense<0.000000e+00> : vector<128x256xf32>
    %31 = tpu.matmul %28, %30, %cst_22 {dimension_numbers = #tpu.dot_dimension_numbers<[1], [0], [0], [1], [0, 0, 1, 1], [], []>} : vector<128x128xf32>, vector<128x256xf32>, vector<128x256xf32> -> vector<128x256xf32>
    %32 = arith.addf %25, %31 : vector<128x256xf32>
    %33 = vector.extract_strided_slice %26 {offsets = [0, 1, 0, 0], sizes = [2, 8, 8, 128], strides = [1, 1, 1, 1]} : vector<2x10x8x128xf32> to vector<2x8x8x128xf32>
    %34 = vector.shape_cast %33 : vector<2x8x8x128xf32> to vector<128x128xf32>
    %c1_23 = arith.constant 1 : index
    %c1_24 = arith.constant 1 : index
    %c0_25 = arith.constant 0 : index
    %c0_26 = arith.constant 0 : index
    %35 = vector.load %arg2[%c1_23, %c1_24, %c0_25, %c0_26] : memref<3x3x128x256xf32, #tpu.memory_space<vmem>>, vector<1x1x128x256xf32>
    %36 = vector.shape_cast %35 : vector<1x1x128x256xf32> to vector<128x256xf32>
    %cst_27 = arith.constant dense<0.000000e+00> : vector<128x256xf32>
    %37 = tpu.matmul %34, %36, %cst_27 {dimension_numbers = #tpu.dot_dimension_numbers<[1], [0], [0], [1], [0, 0, 1, 1], [], []>} : vector<128x128xf32>, vector<128x256xf32>, vector<128x256xf32> -> vector<128x256xf32>
    %38 = arith.addf %32, %37 : vector<128x256xf32>
    %39 = vector.extract_strided_slice %26 {offsets = [0, 2, 0, 0], sizes = [2, 8, 8, 128], strides = [1, 1, 1, 1]} : vector<2x10x8x128xf32> to vector<2x8x8x128xf32>
    %40 = vector.shape_cast %39 : vector<2x8x8x128xf32> to vector<128x128xf32>
    %c2_28 = arith.constant 2 : index
    %c1_29 = arith.constant 1 : index
    %c0_30 = arith.constant 0 : index
    %c0_31 = arith.constant 0 : index
    %41 = vector.load %arg2[%c2_28, %c1_29, %c0_30, %c0_31] : memref<3x3x128x256xf32, #tpu.memory_space<vmem>>, vector<1x1x128x256xf32>
    %42 = vector.shape_cast %41 : vector<1x1x128x256xf32> to vector<128x256xf32>
    %cst_32 = arith.constant dense<0.000000e+00> : vector<128x256xf32>
    %43 = tpu.matmul %40, %42, %cst_32 {dimension_numbers = #tpu.dot_dimension_numbers<[1], [0], [0], [1], [0, 0, 1, 1], [], []>} : vector<128x128xf32>, vector<128x256xf32>, vector<128x256xf32> -> vector<128x256xf32>
    %44 = arith.addf %38, %43 : vector<128x256xf32>
    %45 = vector.extract_strided_slice %3 {offsets = [0, 0, 2, 0], sizes = [2, 10, 8, 128], strides = [1, 1, 1, 1]} : vector<2x10x10x128xf32> to vector<2x10x8x128xf32>
    %46 = vector.extract_strided_slice %45 {offsets = [0, 0, 0, 0], sizes = [2, 8, 8, 128], strides = [1, 1, 1, 1]} : vector<2x10x8x128xf32> to vector<2x8x8x128xf32>
    %47 = vector.shape_cast %46 : vector<2x8x8x128xf32> to vector<128x128xf32>
    %c0_33 = arith.constant 0 : index
    %c2_34 = arith.constant 2 : index
    %c0_35 = arith.constant 0 : index
    %c0_36 = arith.constant 0 : index
    %48 = vector.load %arg2[%c0_33, %c2_34, %c0_35, %c0_36] : memref<3x3x128x256xf32, #tpu.memory_space<vmem>>, vector<1x1x128x256xf32>
    %49 = vector.shape_cast %48 : vector<1x1x128x256xf32> to vector<128x256xf32>
    %cst_37 = arith.constant dense<0.000000e+00> : vector<128x256xf32>
    %50 = tpu.matmul %47, %49, %cst_37 {dimension_numbers = #tpu.dot_dimension_numbers<[1], [0], [0], [1], [0, 0, 1, 1], [], []>} : vector<128x128xf32>, vector<128x256xf32>, vector<128x256xf32> -> vector<128x256xf32>
    %51 = arith.addf %44, %50 : vector<128x256xf32>
    %52 = vector.extract_strided_slice %45 {offsets = [0, 1, 0, 0], sizes = [2, 8, 8, 128], strides = [1, 1, 1, 1]} : vector<2x10x8x128xf32> to vector<2x8x8x128xf32>
    %53 = vector.shape_cast %52 : vector<2x8x8x128xf32> to vector<128x128xf32>
    %c1_38 = arith.constant 1 : index
    %c2_39 = arith.constant 2 : index
    %c0_40 = arith.constant 0 : index
    %c0_41 = arith.constant 0 : index
    %54 = vector.load %arg2[%c1_38, %c2_39, %c0_40, %c0_41] : memref<3x3x128x256xf32, #tpu.memory_space<vmem>>, vector<1x1x128x256xf32>
    %55 = vector.shape_cast %54 : vector<1x1x128x256xf32> to vector<128x256xf32>
    %cst_42 = arith.constant dense<0.000000e+00> : vector<128x256xf32>
    %56 = tpu.matmul %53, %55, %cst_42 {dimension_numbers = #tpu.dot_dimension_numbers<[1], [0], [0], [1], [0, 0, 1, 1], [], []>} : vector<128x128xf32>, vector<128x256xf32>, vector<128x256xf32> -> vector<128x256xf32>
    %57 = arith.addf %51, %56 : vector<128x256xf32>
    %58 = vector.extract_strided_slice %45 {offsets = [0, 2, 0, 0], sizes = [2, 8, 8, 128], strides = [1, 1, 1, 1]} : vector<2x10x8x128xf32> to vector<2x8x8x128xf32>
    %59 = vector.shape_cast %58 : vector<2x8x8x128xf32> to vector<128x128xf32>
    %c2_43 = arith.constant 2 : index
    %c2_44 = arith.constant 2 : index
    %c0_45 = arith.constant 0 : index
    %c0_46 = arith.constant 0 : index
    %60 = vector.load %arg2[%c2_43, %c2_44, %c0_45, %c0_46] : memref<3x3x128x256xf32, #tpu.memory_space<vmem>>, vector<1x1x128x256xf32>
    %61 = vector.shape_cast %60 : vector<1x1x128x256xf32> to vector<128x256xf32>
    %cst_47 = arith.constant dense<0.000000e+00> : vector<128x256xf32>
    %62 = tpu.matmul %59, %61, %cst_47 {dimension_numbers = #tpu.dot_dimension_numbers<[1], [0], [0], [1], [0, 0, 1, 1], [], []>} : vector<128x128xf32>, vector<128x256xf32>, vector<128x256xf32> -> vector<128x256xf32>
    %63 = arith.addf %57, %62 : vector<128x256xf32>
    %cst_48 = arith.constant 0.000000e+00 : f32
    %64 = vector.broadcast %cst_48 : f32 to vector<128x256xf32>
    %65 = arith.maximumf %63, %64 : vector<128x256xf32>
    %66 = vector.shape_cast %65 : vector<128x256xf32> to vector<2x8x8x256xf32>
    %c0_49 = arith.constant 0 : index
    %c1_50 = arith.constant 1 : index
    %c1_51 = arith.constant 1 : index
    %c0_52 = arith.constant 0 : index
    %67 = vector.load %arg9[%c0_49, %c1_50, %c1_51, %c0_52] : memref<2x10x10x256xf32, #tpu.memory_space<vmem>>, vector<2x8x8x256xf32>
    tpu.vector_store %arg9[%c0_49, %c1_50, %c1_51, %c0_52], %66 {strides = array<i32>} : memref<2x10x10x256xf32, #tpu.memory_space<vmem>>, vector<2x8x8x256xf32>,
    %c0_53 = arith.constant 0 : index
    %c0_54 = arith.constant 0 : index
    %c0_55 = arith.constant 0 : index
    %c0_56 = arith.constant 0 : index
    %68 = vector.load %arg9[%c0_53, %c0_54, %c0_55, %c0_56] : memref<2x10x10x256xf32, #tpu.memory_space<vmem>>, vector<2x10x10x256xf32>
    %c0_57 = arith.constant 0 : index
    %c0_58 = arith.constant 0 : index
    %69 = vector.load %arg5[%c0_57, %c0_58] : memref<1x256xf32, #tpu.memory_space<vmem>>, vector<1x256xf32>
    %70 = vector.shape_cast %69 : vector<1x256xf32> to vector<1x256xf32>
    %71 = vector.broadcast %70 : vector<1x256xf32> to vector<128x256xf32>
    %72 = vector.extract_strided_slice %68 {offsets = [0, 0, 0, 0], sizes = [2, 10, 8, 256], strides = [1, 1, 1, 1]} : vector<2x10x10x256xf32> to vector<2x10x8x256xf32>
    %73 = vector.extract_strided_slice %72 {offsets = [0, 0, 0, 0], sizes = [2, 8, 8, 256], strides = [1, 1, 1, 1]} : vector<2x10x8x256xf32> to vector<2x8x8x256xf32>
    %74 = vector.shape_cast %73 : vector<2x8x8x256xf32> to vector<128x256xf32>
    %c0_59 = arith.constant 0 : index
    %c0_60 = arith.constant 0 : index
    %c0_61 = arith.constant 0 : index
    %c0_62 = arith.constant 0 : index
    %75 = vector.load %arg4[%c0_59, %c0_60, %c0_61, %c0_62] : memref<3x3x256x256xf32, #tpu.memory_space<vmem>>, vector<1x1x256x256xf32>
    %76 = vector.shape_cast %75 : vector<1x1x256x256xf32> to vector<256x256xf32>
    %cst_63 = arith.constant dense<0.000000e+00> : vector<128x256xf32>
    %77 = tpu.matmul %74, %76, %cst_63 {dimension_numbers = #tpu.dot_dimension_numbers<[1], [0], [0], [1], [0, 0, 1, 1], [], []>} : vector<128x256xf32>, vector<256x256xf32>, vector<128x256xf32> -> vector<128x256xf32>
    %78 = arith.addf %71, %77 : vector<128x256xf32>
    %79 = vector.extract_strided_slice %72 {offsets = [0, 1, 0, 0], sizes = [2, 8, 8, 256], strides = [1, 1, 1, 1]} : vector<2x10x8x256xf32> to vector<2x8x8x256xf32>
    %80 = vector.shape_cast %79 : vector<2x8x8x256xf32> to vector<128x256xf32>
    %c1_64 = arith.constant 1 : index
    %c0_65 = arith.constant 0 : index
    %c0_66 = arith.constant 0 : index
    %c0_67 = arith.constant 0 : index
    %81 = vector.load %arg4[%c1_64, %c0_65, %c0_66, %c0_67] : memref<3x3x256x256xf32, #tpu.memory_space<vmem>>, vector<1x1x256x256xf32>
    %82 = vector.shape_cast %81 : vector<1x1x256x256xf32> to vector<256x256xf32>
    %cst_68 = arith.constant dense<0.000000e+00> : vector<128x256xf32>
    %83 = tpu.matmul %80, %82, %cst_68 {dimension_numbers = #tpu.dot_dimension_numbers<[1], [0], [0], [1], [0, 0, 1, 1], [], []>} : vector<128x256xf32>, vector<256x256xf32>, vector<128x256xf32> -> vector<128x256xf32>
    %84 = arith.addf %78, %83 : vector<128x256xf32>
    %85 = vector.extract_strided_slice %72 {offsets = [0, 2, 0, 0], sizes = [2, 8, 8, 256], strides = [1, 1, 1, 1]} : vector<2x10x8x256xf32> to vector<2x8x8x256xf32>
    %86 = vector.shape_cast %85 : vector<2x8x8x256xf32> to vector<128x256xf32>
    %c2_69 = arith.constant 2 : index
    %c0_70 = arith.constant 0 : index
    %c0_71 = arith.constant 0 : index
    %c0_72 = arith.constant 0 : index
    %87 = vector.load %arg4[%c2_69, %c0_70, %c0_71, %c0_72] : memref<3x3x256x256xf32, #tpu.memory_space<vmem>>, vector<1x1x256x256xf32>
    %88 = vector.shape_cast %87 : vector<1x1x256x256xf32> to vector<256x256xf32>
    %cst_73 = arith.constant dense<0.000000e+00> : vector<128x256xf32>
    %89 = tpu.matmul %86, %88, %cst_73 {dimension_numbers = #tpu.dot_dimension_numbers<[1], [0], [0], [1], [0, 0, 1, 1], [], []>} : vector<128x256xf32>, vector<256x256xf32>, vector<128x256xf32> -> vector<128x256xf32>
    %90 = arith.addf %84, %89 : vector<128x256xf32>
    %91 = vector.extract_strided_slice %68 {offsets = [0, 0, 1, 0], sizes = [2, 10, 8, 256], strides = [1, 1, 1, 1]} : vector<2x10x10x256xf32> to vector<2x10x8x256xf32>
    %92 = vector.extract_strided_slice %91 {offsets = [0, 0, 0, 0], sizes = [2, 8, 8, 256], strides = [1, 1, 1, 1]} : vector<2x10x8x256xf32> to vector<2x8x8x256xf32>
    %93 = vector.shape_cast %92 : vector<2x8x8x256xf32> to vector<128x256xf32>
    %c0_74 = arith.constant 0 : index
    %c1_75 = arith.constant 1 : index
    %c0_76 = arith.constant 0 : index
    %c0_77 = arith.constant 0 : index
    %94 = vector.load %arg4[%c0_74, %c1_75, %c0_76, %c0_77] : memref<3x3x256x256xf32, #tpu.memory_space<vmem>>, vector<1x1x256x256xf32>
    %95 = vector.shape_cast %94 : vector<1x1x256x256xf32> to vector<256x256xf32>
    %cst_78 = arith.constant dense<0.000000e+00> : vector<128x256xf32>
    %96 = tpu.matmul %93, %95, %cst_78 {dimension_numbers = #tpu.dot_dimension_numbers<[1], [0], [0], [1], [0, 0, 1, 1], [], []>} : vector<128x256xf32>, vector<256x256xf32>, vector<128x256xf32> -> vector<128x256xf32>
    %97 = arith.addf %90, %96 : vector<128x256xf32>
    %98 = vector.extract_strided_slice %91 {offsets = [0, 1, 0, 0], sizes = [2, 8, 8, 256], strides = [1, 1, 1, 1]} : vector<2x10x8x256xf32> to vector<2x8x8x256xf32>
    %99 = vector.shape_cast %98 : vector<2x8x8x256xf32> to vector<128x256xf32>
    %c1_79 = arith.constant 1 : index
    %c1_80 = arith.constant 1 : index
    %c0_81 = arith.constant 0 : index
    %c0_82 = arith.constant 0 : index
    %100 = vector.load %arg4[%c1_79, %c1_80, %c0_81, %c0_82] : memref<3x3x256x256xf32, #tpu.memory_space<vmem>>, vector<1x1x256x256xf32>
    %101 = vector.shape_cast %100 : vector<1x1x256x256xf32> to vector<256x256xf32>
    %cst_83 = arith.constant dense<0.000000e+00> : vector<128x256xf32>
    %102 = tpu.matmul %99, %101, %cst_83 {dimension_numbers = #tpu.dot_dimension_numbers<[1], [0], [0], [1], [0, 0, 1, 1], [], []>} : vector<128x256xf32>, vector<256x256xf32>, vector<128x256xf32> -> vector<128x256xf32>
    %103 = arith.addf %97, %102 : vector<128x256xf32>
    %104 = vector.extract_strided_slice %91 {offsets = [0, 2, 0, 0], sizes = [2, 8, 8, 256], strides = [1, 1, 1, 1]} : vector<2x10x8x256xf32> to vector<2x8x8x256xf32>
    %105 = vector.shape_cast %104 : vector<2x8x8x256xf32> to vector<128x256xf32>
    %c2_84 = arith.constant 2 : index
    %c1_85 = arith.constant 1 : index
    %c0_86 = arith.constant 0 : index
    %c0_87 = arith.constant 0 : index
    %106 = vector.load %arg4[%c2_84, %c1_85, %c0_86, %c0_87] : memref<3x3x256x256xf32, #tpu.memory_space<vmem>>, vector<1x1x256x256xf32>
    %107 = vector.shape_cast %106 : vector<1x1x256x256xf32> to vector<256x256xf32>
    %cst_88 = arith.constant dense<0.000000e+00> : vector<128x256xf32>
    %108 = tpu.matmul %105, %107, %cst_88 {dimension_numbers = #tpu.dot_dimension_numbers<[1], [0], [0], [1], [0, 0, 1, 1], [], []>} : vector<128x256xf32>, vector<256x256xf32>, vector<128x256xf32> -> vector<128x256xf32>
    %109 = arith.addf %103, %108 : vector<128x256xf32>
    %110 = vector.extract_strided_slice %68 {offsets = [0, 0, 2, 0], sizes = [2, 10, 8, 256], strides = [1, 1, 1, 1]} : vector<2x10x10x256xf32> to vector<2x10x8x256xf32>
    %111 = vector.extract_strided_slice %110 {offsets = [0, 0, 0, 0], sizes = [2, 8, 8, 256], strides = [1, 1, 1, 1]} : vector<2x10x8x256xf32> to vector<2x8x8x256xf32>
    %112 = vector.shape_cast %111 : vector<2x8x8x256xf32> to vector<128x256xf32>
    %c0_89 = arith.constant 0 : index
    %c2_90 = arith.constant 2 : index
    %c0_91 = arith.constant 0 : index
    %c0_92 = arith.constant 0 : index
    %113 = vector.load %arg4[%c0_89, %c2_90, %c0_91, %c0_92] : memref<3x3x256x256xf32, #tpu.memory_space<vmem>>, vector<1x1x256x256xf32>
    %114 = vector.shape_cast %113 : vector<1x1x256x256xf32> to vector<256x256xf32>
    %cst_93 = arith.constant dense<0.000000e+00> : vector<128x256xf32>
    %115 = tpu.matmul %112, %114, %cst_93 {dimension_numbers = #tpu.dot_dimension_numbers<[1], [0], [0], [1], [0, 0, 1, 1], [], []>} : vector<128x256xf32>, vector<256x256xf32>, vector<128x256xf32> -> vector<128x256xf32>
    %116 = arith.addf %109, %115 : vector<128x256xf32>
    %117 = vector.extract_strided_slice %110 {offsets = [0, 1, 0, 0], sizes = [2, 8, 8, 256], strides = [1, 1, 1, 1]} : vector<2x10x8x256xf32> to vector<2x8x8x256xf32>
    %118 = vector.shape_cast %117 : vector<2x8x8x256xf32> to vector<128x256xf32>
    %c1_94 = arith.constant 1 : index
    %c2_95 = arith.constant 2 : index
    %c0_96 = arith.constant 0 : index
    %c0_97 = arith.constant 0 : index
    %119 = vector.load %arg4[%c1_94, %c2_95, %c0_96, %c0_97] : memref<3x3x256x256xf32, #tpu.memory_space<vmem>>, vector<1x1x256x256xf32>
    %120 = vector.shape_cast %119 : vector<1x1x256x256xf32> to vector<256x256xf32>
    %cst_98 = arith.constant dense<0.000000e+00> : vector<128x256xf32>
    %121 = tpu.matmul %118, %120, %cst_98 {dimension_numbers = #tpu.dot_dimension_numbers<[1], [0], [0], [1], [0, 0, 1, 1], [], []>} : vector<128x256xf32>, vector<256x256xf32>, vector<128x256xf32> -> vector<128x256xf32>
    %122 = arith.addf %116, %121 : vector<128x256xf32>
    %123 = vector.extract_strided_slice %110 {offsets = [0, 2, 0, 0], sizes = [2, 8, 8, 256], strides = [1, 1, 1, 1]} : vector<2x10x8x256xf32> to vector<2x8x8x256xf32>
    %124 = vector.shape_cast %123 : vector<2x8x8x256xf32> to vector<128x256xf32>
    %c2_99 = arith.constant 2 : index
    %c2_100 = arith.constant 2 : index
    %c0_101 = arith.constant 0 : index
    %c0_102 = arith.constant 0 : index
    %125 = vector.load %arg4[%c2_99, %c2_100, %c0_101, %c0_102] : memref<3x3x256x256xf32, #tpu.memory_space<vmem>>, vector<1x1x256x256xf32>
    %126 = vector.shape_cast %125 : vector<1x1x256x256xf32> to vector<256x256xf32>
    %cst_103 = arith.constant dense<0.000000e+00> : vector<128x256xf32>
    %127 = tpu.matmul %124, %126, %cst_103 {dimension_numbers = #tpu.dot_dimension_numbers<[1], [0], [0], [1], [0, 0, 1, 1], [], []>} : vector<128x256xf32>, vector<256x256xf32>, vector<128x256xf32> -> vector<128x256xf32>
    %128 = arith.addf %122, %127 : vector<128x256xf32>
    %cst_104 = arith.constant 0.000000e+00 : f32
    %129 = vector.broadcast %cst_104 : f32 to vector<128x256xf32>
    %130 = arith.maximumf %128, %129 : vector<128x256xf32>
    %131 = vector.shape_cast %130 : vector<128x256xf32> to vector<2x8x8x256xf32>
    %c0_105 = arith.constant 0 : index
    %c1_106 = arith.constant 1 : index
    %c1_107 = arith.constant 1 : index
    %c0_108 = arith.constant 0 : index
    %132 = vector.load %arg9[%c0_105, %c1_106, %c1_107, %c0_108] : memref<2x10x10x256xf32, #tpu.memory_space<vmem>>, vector<2x8x8x256xf32>
    tpu.vector_store %arg9[%c0_105, %c1_106, %c1_107, %c0_108], %131 {strides = array<i32>} : memref<2x10x10x256xf32, #tpu.memory_space<vmem>>, vector<2x8x8x256xf32>,
    %c0_109 = arith.constant 0 : index
    %c0_110 = arith.constant 0 : index
    %c0_111 = arith.constant 0 : index
    %c0_112 = arith.constant 0 : index
    %133 = vector.load %arg9[%c0_109, %c0_110, %c0_111, %c0_112] : memref<2x10x10x256xf32, #tpu.memory_space<vmem>>, vector<2x10x10x256xf32>
    %cst_113 = arith.constant 0.000000e+00 : f32
    %134 = vector.broadcast %cst_113 : f32 to vector<2x8x8x256xf32>
    %135 = vector.extract_strided_slice %133 {offsets = [0, 0, 0, 0], sizes = [2, 10, 8, 256], strides = [1, 1, 1, 1]} : vector<2x10x10x256xf32> to vector<2x10x8x256xf32>
    %136 = vector.extract_strided_slice %135 {offsets = [0, 0, 0, 0], sizes = [2, 8, 8, 256], strides = [1, 1, 1, 1]} : vector<2x10x8x256xf32> to vector<2x8x8x256xf32>
    %c0_114 = arith.constant 0 : index
    %c0_115 = arith.constant 0 : index
    %137 = vector.load %arg6[%c0_114, %c0_115] : memref<9x256xf32, #tpu.memory_space<vmem>>, vector<1x256xf32>
    %138 = vector.shape_cast %137 : vector<1x256xf32> to vector<1x1x1x256xf32>
    %139 = vector.broadcast %138 : vector<1x1x1x256xf32> to vector<2x8x8x256xf32>
    %140 = arith.mulf %136, %139 : vector<2x8x8x256xf32>
    %141 = arith.addf %134, %140 : vector<2x8x8x256xf32>
    %142 = vector.extract_strided_slice %135 {offsets = [0, 1, 0, 0], sizes = [2, 8, 8, 256], strides = [1, 1, 1, 1]} : vector<2x10x8x256xf32> to vector<2x8x8x256xf32>
    %c3 = arith.constant 3 : index
    %c0_116 = arith.constant 0 : index
    %143 = vector.load %arg6[%c3, %c0_116] : memref<9x256xf32, #tpu.memory_space<vmem>>, vector<1x256xf32>
    %144 = vector.shape_cast %143 : vector<1x256xf32> to vector<1x1x1x256xf32>
    %145 = vector.broadcast %144 : vector<1x1x1x256xf32> to vector<2x8x8x256xf32>
    %146 = arith.mulf %142, %145 : vector<2x8x8x256xf32>
    %147 = arith.addf %141, %146 : vector<2x8x8x256xf32>
    %148 = vector.extract_strided_slice %135 {offsets = [0, 2, 0, 0], sizes = [2, 8, 8, 256], strides = [1, 1, 1, 1]} : vector<2x10x8x256xf32> to vector<2x8x8x256xf32>
    %c6 = arith.constant 6 : index
    %c0_117 = arith.constant 0 : index
    %149 = vector.load %arg6[%c6, %c0_117] : memref<9x256xf32, #tpu.memory_space<vmem>>, vector<1x256xf32>
    %150 = vector.shape_cast %149 : vector<1x256xf32> to vector<1x1x1x256xf32>
    %151 = vector.broadcast %150 : vector<1x1x1x256xf32> to vector<2x8x8x256xf32>
    %152 = arith.mulf %148, %151 : vector<2x8x8x256xf32>
    %153 = arith.addf %147, %152 : vector<2x8x8x256xf32>
    %154 = vector.extract_strided_slice %133 {offsets = [0, 0, 1, 0], sizes = [2, 10, 8, 256], strides = [1, 1, 1, 1]} : vector<2x10x10x256xf32> to vector<2x10x8x256xf32>
    %155 = vector.extract_strided_slice %154 {offsets = [0, 0, 0, 0], sizes = [2, 8, 8, 256], strides = [1, 1, 1, 1]} : vector<2x10x8x256xf32> to vector<2x8x8x256xf32>
    %c1_118 = arith.constant 1 : index
    %c0_119 = arith.constant 0 : index
    %156 = vector.load %arg6[%c1_118, %c0_119] : memref<9x256xf32, #tpu.memory_space<vmem>>, vector<1x256xf32>
    %157 = vector.shape_cast %156 : vector<1x256xf32> to vector<1x1x1x256xf32>
    %158 = vector.broadcast %157 : vector<1x1x1x256xf32> to vector<2x8x8x256xf32>
    %159 = arith.mulf %155, %158 : vector<2x8x8x256xf32>
    %160 = arith.addf %153, %159 : vector<2x8x8x256xf32>
    %161 = vector.extract_strided_slice %154 {offsets = [0, 1, 0, 0], sizes = [2, 8, 8, 256], strides = [1, 1, 1, 1]} : vector<2x10x8x256xf32> to vector<2x8x8x256xf32>
    %c4 = arith.constant 4 : index
    %c0_120 = arith.constant 0 : index
    %162 = vector.load %arg6[%c4, %c0_120] : memref<9x256xf32, #tpu.memory_space<vmem>>, vector<1x256xf32>
    %163 = vector.shape_cast %162 : vector<1x256xf32> to vector<1x1x1x256xf32>
    %164 = vector.broadcast %163 : vector<1x1x1x256xf32> to vector<2x8x8x256xf32>
    %165 = arith.mulf %161, %164 : vector<2x8x8x256xf32>
    %166 = arith.addf %160, %165 : vector<2x8x8x256xf32>
    %167 = vector.extract_strided_slice %154 {offsets = [0, 2, 0, 0], sizes = [2, 8, 8, 256], strides = [1, 1, 1, 1]} : vector<2x10x8x256xf32> to vector<2x8x8x256xf32>
    %c7 = arith.constant 7 : index
    %c0_121 = arith.constant 0 : index
    %168 = vector.load %arg6[%c7, %c0_121] : memref<9x256xf32, #tpu.memory_space<vmem>>, vector<1x256xf32>
    %169 = vector.shape_cast %168 : vector<1x256xf32> to vector<1x1x1x256xf32>
    %170 = vector.broadcast %169 : vector<1x1x1x256xf32> to vector<2x8x8x256xf32>
    %171 = arith.mulf %167, %170 : vector<2x8x8x256xf32>
    %172 = arith.addf %166, %171 : vector<2x8x8x256xf32>
    %173 = vector.extract_strided_slice %133 {offsets = [0, 0, 2, 0], sizes = [2, 10, 8, 256], strides = [1, 1, 1, 1]} : vector<2x10x10x256xf32> to vector<2x10x8x256xf32>
    %174 = vector.extract_strided_slice %173 {offsets = [0, 0, 0, 0], sizes = [2, 8, 8, 256], strides = [1, 1, 1, 1]} : vector<2x10x8x256xf32> to vector<2x8x8x256xf32>
    %c2_122 = arith.constant 2 : index
    %c0_123 = arith.constant 0 : index
    %175 = vector.load %arg6[%c2_122, %c0_123] : memref<9x256xf32, #tpu.memory_space<vmem>>, vector<1x256xf32>
    %176 = vector.shape_cast %175 : vector<1x256xf32> to vector<1x1x1x256xf32>
    %177 = vector.broadcast %176 : vector<1x1x1x256xf32> to vector<2x8x8x256xf32>
    %178 = arith.mulf %174, %177 : vector<2x8x8x256xf32>
    %179 = arith.addf %172, %178 : vector<2x8x8x256xf32>
    %180 = vector.extract_strided_slice %173 {offsets = [0, 1, 0, 0], sizes = [2, 8, 8, 256], strides = [1, 1, 1, 1]} : vector<2x10x8x256xf32> to vector<2x8x8x256xf32>
    %c5 = arith.constant 5 : index
    %c0_124 = arith.constant 0 : index
    %181 = vector.load %arg6[%c5, %c0_124] : memref<9x256xf32, #tpu.memory_space<vmem>>, vector<1x256xf32>
    %182 = vector.shape_cast %181 : vector<1x256xf32> to vector<1x1x1x256xf32>
    %183 = vector.broadcast %182 : vector<1x1x1x256xf32> to vector<2x8x8x256xf32>
    %184 = arith.mulf %180, %183 : vector<2x8x8x256xf32>
    %185 = arith.addf %179, %184 : vector<2x8x8x256xf32>
    %186 = vector.extract_strided_slice %173 {offsets = [0, 2, 0, 0], sizes = [2, 8, 8, 256], strides = [1, 1, 1, 1]} : vector<2x10x8x256xf32> to vector<2x8x8x256xf32>
    %c8 = arith.constant 8 : index
    %c0_125 = arith.constant 0 : index
    %187 = vector.load %arg6[%c8, %c0_125] : memref<9x256xf32, #tpu.memory_space<vmem>>, vector<1x256xf32>
    %188 = vector.shape_cast %187 : vector<1x256xf32> to vector<1x1x1x256xf32>
    %189 = vector.broadcast %188 : vector<1x1x1x256xf32> to vector<2x8x8x256xf32>
    %190 = arith.mulf %186, %189 : vector<2x8x8x256xf32>
    %191 = arith.addf %185, %190 : vector<2x8x8x256xf32>
    %cst_126 = arith.constant dense<0.000000e+00> : vector<2x8x8xf32>
    %192 = vector.multi_reduction <add>, %191, %cst_126 [3] : vector<2x8x8x256xf32> to vector<2x8x8xf32>
    %193 = vector.shape_cast %192 : vector<2x8x8xf32> to vector<2x8x8x1xf32>
    %c0_127 = arith.constant 0 : index
    %194 = memref.load %arg7[%c0_127] : memref<1xf32, #tpu.memory_space<smem>>
    %195 = vector.broadcast %194 : f32 to vector<2x8x8x1xf32>
    %196 = arith.addf %193, %195 : vector<2x8x8x1xf32>
    %cst_128 = arith.constant 0.000000e+00 : f32
    %197 = vector.broadcast %cst_128 : f32 to vector<2x8x8x1xf32>
    %198 = arith.maximumf %196, %197 : vector<2x8x8x1xf32>
    %199 = arith.negf %198 : vector<2x8x8x1xf32>
    %200 = math.exp %199 : vector<2x8x8x1xf32>
    %cst_129 = arith.constant 1.000000e+00 : f32
    %201 = vector.broadcast %cst_129 : f32 to vector<2x8x8x1xf32>
    %202 = arith.addf %201, %200 : vector<2x8x8x1xf32>
    %203 = arith.divf %201, %202 : vector<2x8x8x1xf32>
    %204 = vector.extract_strided_slice %3 {offsets = [0, 1, 1, 0], sizes = [2, 8, 8, 128], strides = [1, 1, 1, 1]} : vector<2x10x10x128xf32> to vector<2x8x8x128xf32>
    %cst_130 = arith.constant 1.000000e+00 : f32
    %205 = vector.broadcast %cst_130 : f32 to vector<2x8x8x1xf32>
    %206 = arith.addf %203, %205 : vector<2x8x8x1xf32>
    %207 = vector.broadcast %206 : vector<2x8x8x1xf32> to vector<2x8x8x128xf32>
    %208 = arith.mulf %204, %207 : vector<2x8x8x128xf32>
    %cst_131 = arith.constant dense<0xFF800000> : vector<2x8x128xf32>
    %209 = vector.multi_reduction <maximumf>, %208, %cst_131 [2] : vector<2x8x8x128xf32> to vector<2x8x128xf32>
    %cst_132 = arith.constant dense<0xFF800000> : vector<2x128xf32>
    %210 = vector.multi_reduction <maximumf>, %209, %cst_132 [1] : vector<2x8x128xf32> to vector<2x128xf32>
    %211 = vector.shape_cast %210 : vector<2x128xf32> to vector<1x2x128xf32>
    %c0_133 = arith.constant 0 : index
    %c0_134 = arith.constant 0 : index
    %c0_135 = arith.constant 0 : index
    %212 = vector.load %arg8[%c0_133, %c0_134, %c0_135] : memref<1x2x128xf32, #tpu.memory_space<vmem>>, vector<1x2x128xf32>
    tpu.vector_store %arg8[%c0_133, %c0_134, %c0_135], %211 {strides = array<i32>} : memref<1x2x128xf32, #tpu.memory_space<vmem>>, vector<1x2x128xf32>,
    return
  }
  func.func @transform_0(%arg0: i32) -> (i32, i32, i32, i32) {
    %c0_i32 = arith.constant 0 : i32
    %c0_i32_0 = arith.constant 0 : i32
    %c0_i32_1 = arith.constant 0 : i32
    %c0_i32_2 = arith.constant 0 : i32
    return %arg0, %c0_i32, %c0_i32_0, %c0_i32_1 : i32, i32, i32, i32
  }
  func.func @transform_1(%arg0: i32) -> (i32, i32, i32, i32) {
    %c0_i32 = arith.constant 0 : i32
    %c0_i32_0 = arith.constant 0 : i32
    %c0_i32_1 = arith.constant 0 : i32
    %c0_i32_2 = arith.constant 0 : i32
    %c0_i32_3 = arith.constant 0 : i32
    return %c0_i32, %c0_i32_0, %c0_i32_1, %c0_i32_2 : i32, i32, i32, i32
  }
  func.func @transform_2(%arg0: i32) -> (i32, i32) {
    %c0_i32 = arith.constant 0 : i32
    %c0_i32_0 = arith.constant 0 : i32
    %c0_i32_1 = arith.constant 0 : i32
    return %c0_i32, %c0_i32_0 : i32, i32
  }
  func.func @transform_3(%arg0: i32) -> (i32, i32, i32, i32) {
    %c0_i32 = arith.constant 0 : i32
    %c0_i32_0 = arith.constant 0 : i32
    %c0_i32_1 = arith.constant 0 : i32
    %c0_i32_2 = arith.constant 0 : i32
    %c0_i32_3 = arith.constant 0 : i32
    return %c0_i32, %c0_i32_0, %c0_i32_1, %c0_i32_2 : i32, i32, i32, i32
  }
  func.func @transform_4(%arg0: i32) -> (i32, i32) {
    %c0_i32 = arith.constant 0 : i32
    %c0_i32_0 = arith.constant 0 : i32
    %c0_i32_1 = arith.constant 0 : i32
    return %c0_i32, %c0_i32_0 : i32, i32
  }
  func.func @transform_5(%arg0: i32) -> (i32, i32) {
    %c0_i32 = arith.constant 0 : i32
    %c0_i32_0 = arith.constant 0 : i32
    %c0_i32_1 = arith.constant 0 : i32
    return %c0_i32, %c0_i32_0 : i32, i32
  }
  func.func @transform_6(%arg0: i32) -> i32 {
    %c0_i32 = arith.constant 0 : i32
    %c0_i32_0 = arith.constant 0 : i32
    return %c0_i32 : i32
  }
  func.func @transform_7(%arg0: i32) -> (i32, i32, i32) {
    %c0_i32 = arith.constant 0 : i32
    %c0_i32_0 = arith.constant 0 : i32
    %c0_i32_1 = arith.constant 0 : i32
    return %arg0, %c0_i32, %c0_i32_0 : i32, i32, i32
  }
}

</mosaic_0001>

<bundles_post_ra>
// kernel: tpu_custom_call.1
= control target key start
LH: loop header
LB: loop body
LE: loop exit
PB: predicated region body
PF: predicated region fallthrough
CT: control target
= control target key end

     0   :  { %13 = vsyncpa [#allocation5], 0  ;;  %s13353_s0 = inlined_call_operand.vmem [shape: f32[2,10,10,128], index: 0, kind: input, shape index: {}]   ;;  %s13354_s1 = inlined_call_operand.hbm [shape: f32[3,3,128,256], index: 1, kind: input, shape index: {}]   ;;  %s13355_s2 = inlined_call_operand.hbm [shape: f32[1,256], index: 2, kind: input, shape index: {}]   ;;  %s13356_s3 = inlined_call_operand.hbm [shape: f32[3,3,256,256], index: 3, kind: input, shape index: {}]   ;;  %s13357_s4 = inlined_call_operand.hbm [shape: f32[1,256], index: 4, kind: input, shape index: {}]   ;;  %s13358_s5 = inlined_call_operand.hbm [shape: f32[9,256], index: 5, kind: input, shape index: {}]   ;;  %s13359_s6 = inlined_call_operand.<no memory space> [shape: f32[1], index: 6, kind: input, shape index: {}]   ;;  %s13360_s7 = inlined_call_operand.hbm [shape: f32[1,2,128], index: 7, kind: output, shape index: {}]  }
   0x1   :  { %14 = vsyncpa [#allocation8], 0 }
   0x2   :  { %15 = vsyncpa [#allocation11], 0 }
   0x3   :  { %16 = vsyncpa [#allocation6], 0  ;;  %s10082_s24 = smov [#allocation7]   ;;  %s10083_s26 = smov [#allocation10]  }
   0x4   :  { %s37_s25 = sshll.u32 %s10082_s24, 4  ;;  %s59_s27 = sshll.u32 %s10083_s26, 4  ;;  %s38_s25 = int_to_ptr.vmem [resolvable:$true] %s37_s25  ;;  %s60_s27 = int_to_ptr.vmem [resolvable:$true] %s59_s27 }
   0x5   :  { %s9942_s30 = scalar_lea.hbm %s13355_s2, 32 }
   0x6   :  { %p9943_p0 = scmp.ne.s32.totalorder %s13355_s2, %s9942_s30  ;;  %p9946_p1 = scmp.lt.u32.totalorder %s9942_s30, %s13355_s2 }
   0x8   :  { %p9948_p2 = pnand %p9946_p1, %p9943_p0 }
   0xa   :  { %9951 = shalt.err (!%p9948_p2)
}
   0xb   :  { %s9952_s12 = scalar_lea.vmem %s38_s25, 32  ;;  %p9957_p4 = scmp.lt.s32.totalorder %s38_s25, %s38_s25 }
   0xc   :  { %p9953_p3 = scmp.ne.s32.totalorder %s38_s25, %s9952_s12  ;;  %p9958_p5 = scmp.lt.s32.totalorder %s9952_s12, %s9952_s12 }
   0xe   :  { %p9959_p6 = por %p9958_p5, %p9957_p4 }
  0x10   :  { %p9960_p7 = pnand %p9959_p6, %p9953_p3 }
  0x12   :  { %9963 = shalt.err (!%p9960_p7)
}
  0x13   :  { %40 = dma.hbm_to_vmem [thread:$0]  %s13355_s2, 32, %s38_s25, [#allocation8]  }
  0x14   :  { %s9964_s17 = scalar_lea.hbm %s13357_s4, 32 }
  0x15   :  { %p9965_p8 = scmp.ne.s32.totalorder %s13357_s4, %s9964_s17  ;;  %p9968_p9 = scmp.lt.u32.totalorder %s9964_s17, %s13357_s4 }
  0x17   :  { %p9970_p10 = pnand %p9968_p9, %p9965_p8 }
  0x19   :  { %9973 = shalt.err (!%p9970_p10)
}
  0x1a   :  { %s9974_s22 = scalar_lea.vmem %s60_s27, 32  ;;  %p9979_p12 = scmp.lt.s32.totalorder %s60_s27, %s60_s27 }
  0x1b   :  { %p9975_p11 = scmp.ne.s32.totalorder %s60_s27, %s9974_s22  ;;  %p9980_p13 = scmp.lt.s32.totalorder %s9974_s22, %s9974_s22 }
  0x1d   :  { %p9981_p0 = por %p9980_p13, %p9979_p12 }
  0x1f   :  { %p9982_p1 = pnand %p9981_p0, %p9975_p11 }
  0x21   :  { %9985 = shalt.err (!%p9982_p1)
}
  0x22   :  { %62 = dma.hbm_to_vmem [thread:$0]  %s13357_s4, 32, %s60_s27, [#allocation11]  }
  0x23   :  { %s10084_s24 = smov [#allocation4]   ;;  %s9986_s29 = scalar_lea.hbm %s13354_s1, 36864 }
  0x24   :  { %s24_s25 = sshll.u32 %s10084_s24, 4  ;;  %p9987_p2 = scmp.ne.s32.totalorder %s13354_s1, %s9986_s29  ;;  %s25_s25 = int_to_ptr.vmem [resolvable:$true] %s24_s25 }
  0x25   :  { %p9990_p3 = scmp.lt.u32.totalorder %s9986_s29, %s13354_s1 }
  0x27   :  { %p9992_p4 = pnand %p9990_p3, %p9987_p2 }
  0x29   :  { %9995 = shalt.err (!%p9992_p4)
}
  0x2a   :  { %s9996_s11 = scalar_lea.vmem %s25_s25, 36864  ;;  %p10001_p6 = scmp.lt.s32.totalorder %s25_s25, %s25_s25 }
  0x2b   :  { %p9997_p5 = scmp.ne.s32.totalorder %s25_s25, %s9996_s11  ;;  %p10002_p7 = scmp.lt.s32.totalorder %s9996_s11, %s9996_s11 }
  0x2d   :  { %p10003_p8 = por %p10002_p7, %p10001_p6 }
  0x2f   :  { %p10004_p9 = pnand %p10003_p8, %p9997_p5 }
  0x31   :  { %10007 = shalt.err (!%p10004_p9)
}
  0x32   :  { %s10085_s4 = smov 256   ;;  %s10086_s27 = smov 16  }
  0x33   :  { %30 = dma.hbm_to_vmem [thread:$0]  %s13354_s1, 36864, %s25_s25, [#allocation5], %s10085_s4, %s10085_s4, %s10086_s27  }
  0x34   :  { %s10087_s14 = smov [#allocation9]   ;;  %s10088_s16 = smov [#allocation12]  }
  0x35   :  { %s46_s15 = sshll.u32 %s10087_s14, 4  ;;  %s68_s17 = sshll.u32 %s10088_s16, 4  ;;  %s47_s15 = int_to_ptr.vmem [resolvable:$true] %s46_s15  ;;  %s69_s17 = int_to_ptr.vmem [resolvable:$true] %s68_s17 }
  0x36   :  { %s10008_s20 = scalar_lea.hbm %s13356_s3, 73728 }
  0x37   :  { %p10009_p10 = scmp.ne.s32.totalorder %s13356_s3, %s10008_s20  ;;  %p10012_p11 = scmp.lt.u32.totalorder %s10008_s20, %s13356_s3 }
  0x39   :  { %p10014_p12 = pnand %p10012_p11, %p10009_p10 }
  0x3b   :  { %10017 = shalt.err (!%p10014_p12)
}
  0x3c   :  { %s10018_s1 = scalar_lea.vmem %s47_s15, 73728  ;;  %p10023_p0 = scmp.lt.s32.totalorder %s47_s15, %s47_s15 }
  0x3d   :  { %p10019_p13 = scmp.ne.s32.totalorder %s47_s15, %s10018_s1  ;;  %p10024_p1 = scmp.lt.s32.totalorder %s10018_s1, %s10018_s1 }
  0x3f   :  { %p10025_p2 = por %p10024_p1, %p10023_p0 }
  0x41   :  { %p10026_p3 = pnand %p10025_p2, %p10019_p13 }
  0x43   :  { %10029 = shalt.err (!%p10026_p3)
}
  0x44   :  { %52 = dma.hbm_to_vmem [thread:$0]  %s13356_s3, 73728, %s47_s15, [#allocation8], %s10085_s4, %s10085_s4, %s10086_s27  }
  0x45   :  { %s10030_s29 = scalar_lea.hbm %s13358_s5, 512 }
  0x46   :  { %p10031_p4 = scmp.ne.s32.totalorder %s13358_s5, %s10030_s29  ;;  %p10034_p5 = scmp.lt.u32.totalorder %s10030_s29, %s13358_s5 }
  0x48   :  { %p10036_p6 = pnand %p10034_p5, %p10031_p4 }
  0x4a   :  { %10039 = shalt.err (!%p10036_p6)
}
  0x4b   :  { %s10040_s11 = scalar_lea.vmem %s69_s17, 512  ;;  %p10045_p8 = scmp.lt.s32.totalorder %s69_s17, %s69_s17 }
  0x4c   :  { %p10041_p7 = scmp.ne.s32.totalorder %s69_s17, %s10040_s11  ;;  %p10046_p9 = scmp.lt.s32.totalorder %s10040_s11, %s10040_s11 }
  0x4e   :  { %p10047_p10 = por %p10046_p9, %p10045_p8 }
  0x50   :  { %p10048_p11 = pnand %p10047_p10, %p10041_p7 }
  0x52   :  { %10051 = shalt.err (!%p10048_p11)
}
  0x53   :  { %74 = dma.hbm_to_vmem [thread:$0]  %s13358_s5, 512, %s69_s17, [#allocation11], %s10085_s4, %s10085_s4, %s10086_s27  }
  0x54   :  { %10074 = dma.done.wait [#allocation5], 36864  }
  0x55   :  { %10075 = vsyncadd [#allocation5], 4294930432 }
  0x56   :  { %10076 = dma.done.wait [#allocation8], 73760  }
  0x57   :  { %10077 = vsyncadd [#allocation8], 4294893536 }
  0x58   :  { %10078 = dma.done.wait [#allocation11], 544  }
  0x59   :  { %10079 = vsyncadd [#allocation11], 4294966752  ;;  %v10089_v0 = vmov 0.0   ;;  %v229_v1 = vld [vmem:[#allocation4 + $0x8] sm:$0xff]  ;;  %v231_v2 = vld [vmem:[#allocation4 + $0x18] sm:$0xff]  ;;  %vm937_vm0 = vcmask 1046528  }
  0x5a   :  { %324 = vmatprep.mubr.f32.mxu0 %v10089_v0  ;;  %96 = vst [vmem:[#allocation2] sm:$0xff] %v10089_v0  ;;  %98 = vst [vmem:[#allocation2 + $0x10] sm:$0x3] %v10089_v0  ;;  %2876 = vmatprep.mubr.f32.mxu1 %v10089_v0  ;;  %v228_v3 = vld [vmem:[#allocation4] sm:$0xff]  ;;  %v8250_v4 = vpack.c.bf16 %v231_v2, %v229_v1  ;;  %v230_v5 = vld [vmem:[#allocation4 + $0x10] sm:$0xff]  ;;  %vm1704_vm1 = vcmask 1045504  }
  0x5b   :  { %99 = vst [vmem:[#allocation2 + $0x18] sm:$0x3] %v10089_v0  ;;  %100 = vst [vmem:[#allocation2 + $0x20] sm:$0xff] %v10089_v0  ;;  %v233_v6 = vld [vmem:[#allocation4 + $0x28] sm:$0xff]  ;;  %v235_v7 = vld [vmem:[#allocation4 + $0x38] sm:$0xff]  ;;  %v8252_v8 = vpack.c.bf16 %v230_v5, %v228_v3  ;;  %vm8051_vm2 = vcmask 1047553  }
  0x5c   :  { %101 = vst [vmem:[#allocation2 + $0x28] sm:$0xff] %v10089_v0  ;;  %102 = vst [vmem:[#allocation2 + $0x30] sm:$0x3] %v10089_v0  ;;  %v8254_v9 = vpack.c.bf16 %v235_v7, %v233_v6  ;;  %v232_v10 = vld [vmem:[#allocation4 + $0x20] sm:$0xff]  ;;  %v234_v11 = vld [vmem:[#allocation4 + $0x30] sm:$0xff]  ;;  %8251 = vmatprep.subr.bf16.mxu0 %v8250_v4  ;;  %vm8053_vm3 = vcmask 1040384  }
  0x5d   :  { %103 = vst [vmem:[#allocation2 + $0x38] sm:$0x3] %v10089_v0  ;;  %104 = vst [vmem:[#allocation2 + $0x40] sm:$0xff] %v10089_v0  ;;  %v237_v12 = vld [vmem:[#allocation4 + $0x48] sm:$0xff]  ;;  %v239_v13 = vld [vmem:[#allocation4 + $0x58] sm:$0xff]  ;;  %8253 = vmatpush1.bf16.msra.mxu0 %v8252_v8  ;;  %v8256_v14 = vpack.c.bf16 %v234_v11, %v232_v10  ;;  %vm8213_vm4 = vcmask 1041409  }
  0x5e   :  { %105 = vst [vmem:[#allocation2 + $0x48] sm:$0xff] %v10089_v0  ;;  %106 = vst [vmem:[#allocation2 + $0x50] sm:$0x3] %v10089_v0  ;;  %8255 = vmatprep.subr.bf16.mxu0 %v8254_v9  ;;  %v8258_v15 = vpack.c.bf16 %v239_v13, %v237_v12  ;;  %v236_v16 = vld [vmem:[#allocation4 + $0x40] sm:$0xff]  ;;  %v238_v17 = vld [vmem:[#allocation4 + $0x50] sm:$0xff] }
  0x5f   :  { %107 = vst [vmem:[#allocation2 + $0x58] sm:$0x3] %v10089_v0  ;;  %108 = vst [vmem:[#allocation2 + $0x60] sm:$0xff] %v10089_v0  ;;  %v241_v18 = vld [vmem:[#allocation4 + $0x68] sm:$0xff]  ;;  %v243_v19 = vld [vmem:[#allocation4 + $0x78] sm:$0xff]  ;;  %v8260_v20 = vpack.c.bf16 %v238_v17, %v236_v16 }
  0x60   :  { %109 = vst [vmem:[#allocation2 + $0x68] sm:$0xff] %v10089_v0  ;;  %110 = vst [vmem:[#allocation2 + $0x70] sm:$0x3] %v10089_v0  ;;  %v8262_v21 = vpack.c.bf16 %v243_v19, %v241_v18  ;;  %v240_v22 = vld [vmem:[#allocation4 + $0x60] sm:$0xff]  ;;  %v242_v23 = vld [vmem:[#allocation4 + $0x70] sm:$0xff] }
  0x61   :  { %111 = vst [vmem:[#allocation2 + $0x78] sm:$0x3] %v10089_v0  ;;  %112 = vst [vmem:[#allocation2 + $0x80] sm:$0xff] %v10089_v0  ;;  %8257 = vmatpush1.bf16.msra.mxu0 %v8256_v14  ;;  %v245_v24 = vld [vmem:[#allocation4 + $0x88] sm:$0xff]  ;;  %v247_v25 = vld [vmem:[#allocation4 + $0x98] sm:$0xff]  ;;  %v8264_v26 = vpack.c.bf16 %v242_v23, %v240_v22 }
  0x62   :  { %113 = vst [vmem:[#allocation2 + $0x88] sm:$0xff] %v10089_v0  ;;  %114 = vst [vmem:[#allocation2 + $0x90] sm:$0x3] %v10089_v0  ;;  %8259 = vmatprep.subr.bf16.mxu0 %v8258_v15  ;;  %v8266_v27 = vpack.c.bf16 %v247_v25, %v245_v24  ;;  %v244_v28 = vld [vmem:[#allocation4 + $0x80] sm:$0xff]  ;;  %v246_v29 = vld [vmem:[#allocation4 + $0x90] sm:$0xff] }
  0x63   :  { %115 = vst [vmem:[#allocation2 + $0x98] sm:$0x3] %v10089_v0  ;;  %116 = vst [vmem:[#allocation2 + $0xa0] sm:$0xff] %v10089_v0  ;;  %v249_v30 = vld [vmem:[#allocation4 + $0xa8] sm:$0xff]  ;;  %v251_v31 = vld [vmem:[#allocation4 + $0xb8] sm:$0xff]  ;;  %v8268_v32 = vpack.c.bf16 %v246_v29, %v244_v28 }
  0x64   :  { %117 = vst [vmem:[#allocation2 + $0xa8] sm:$0xff] %v10089_v0  ;;  %118 = vst [vmem:[#allocation2 + $0xb0] sm:$0x3] %v10089_v0  ;;  %v8270_v33 = vpack.c.bf16 %v251_v31, %v249_v30  ;;  %v248_v34 = vld [vmem:[#allocation4 + $0xa0] sm:$0xff]  ;;  %v250_v35 = vld [vmem:[#allocation4 + $0xb0] sm:$0xff] }
  0x65   :  { %119 = vst [vmem:[#allocation2 + $0xb8] sm:$0x3] %v10089_v0  ;;  %120 = vst [vmem:[#allocation2 + $0xc0] sm:$0xff] %v10089_v0  ;;  %8261 = vmatpush1.bf16.msra.mxu0 %v8260_v20  ;;  %v253_v36 = vld [vmem:[#allocation4 + $0xc8] sm:$0xff]  ;;  %v255_v37 = vld [vmem:[#allocation4 + $0xd8] sm:$0xff]  ;;  %v8272_v38 = vpack.c.bf16 %v250_v35, %v248_v34 }
  0x66   :  { %121 = vst [vmem:[#allocation2 + $0xc8] sm:$0xff] %v10089_v0  ;;  %122 = vst [vmem:[#allocation2 + $0xd0] sm:$0x3] %v10089_v0  ;;  %8263 = vmatprep.subr.bf16.mxu0 %v8262_v21  ;;  %v8274_v39 = vpack.c.bf16 %v255_v37, %v253_v36  ;;  %v252_v40 = vld [vmem:[#allocation4 + $0xc0] sm:$0xff]  ;;  %v254_v41 = vld [vmem:[#allocation4 + $0xd0] sm:$0xff] }
  0x67   :  { %123 = vst [vmem:[#allocation2 + $0xd8] sm:$0x3] %v10089_v0  ;;  %124 = vst [vmem:[#allocation2 + $0xe0] sm:$0xff] %v10089_v0  ;;  %v257_v42 = vld [vmem:[#allocation4 + $0xe8] sm:$0xff]  ;;  %v259_v43 = vld [vmem:[#allocation4 + $0xf8] sm:$0xff]  ;;  %v8276_v44 = vpack.c.bf16 %v254_v41, %v252_v40 }
  0x68   :  { %125 = vst [vmem:[#allocation2 + $0xe8] sm:$0xff] %v10089_v0  ;;  %126 = vst [vmem:[#allocation2 + $0xf0] sm:$0x3] %v10089_v0  ;;  %v8278_v45 = vpack.c.bf16 %v259_v43, %v257_v42  ;;  %v256_v46 = vld [vmem:[#allocation4 + $0xe0] sm:$0xff]  ;;  %v258_v47 = vld [vmem:[#allocation4 + $0xf0] sm:$0xff] }
  0x69   :  { %127 = vst [vmem:[#allocation2 + $0xf8] sm:$0x3] %v10089_v0  ;;  %128 = vst [vmem:[#allocation2 + $0x100] sm:$0xff] %v10089_v0  ;;  %8265 = vmatpush1.bf16.msra.mxu0 %v8264_v26  ;;  %v455_v48 = vld [vmem:[#allocation4 + $0x308] sm:$0xff]  ;;  %v457_v49 = vld [vmem:[#allocation4 + $0x318] sm:$0xff]  ;;  %v8280_v50 = vpack.c.bf16 %v258_v47, %v256_v46 }
  0x6a   :  { %129 = vst [vmem:[#allocation2 + $0x108] sm:$0xff] %v10089_v0  ;;  %130 = vst [vmem:[#allocation2 + $0x110] sm:$0x3] %v10089_v0  ;;  %8267 = vmatprep.subr.bf16.mxu0 %v8266_v27  ;;  %v8282_v51 = vpack.c.bf16 %v457_v49, %v455_v48  ;;  %v454_v52 = vld [vmem:[#allocation4 + $0x300] sm:$0xff]  ;;  %v456_v53 = vld [vmem:[#allocation4 + $0x310] sm:$0xff] }
  0x6b   :  { %131 = vst [vmem:[#allocation2 + $0x118] sm:$0x3] %v10089_v0  ;;  %134 = vst [vmem:[#allocation2 + $0x130] sm:$0x3] %v10089_v0  ;;  %v459_v54 = vld [vmem:[#allocation4 + $0x328] sm:$0xff]  ;;  %v461_v55 = vld [vmem:[#allocation4 + $0x338] sm:$0xff]  ;;  %v8284_v57 = vpack.c.bf16 %v456_v53, %v454_v52 }
  0x6c   :  { %135 = vst [vmem:[#allocation2 + $0x138] sm:$0x3] %v10089_v0  ;;  %138 = vst [vmem:[#allocation2 + $0x150] sm:$0x3] %v10089_v0  ;;  %v10278_v56 = vld [vmem:[%s13353_s0] sm:$0xff]  ;;  %v8286_v58 = vpack.c.bf16 %v461_v55, %v459_v54  ;;  %v460_v60 = vld [vmem:[#allocation4 + $0x330] sm:$0xff] }
  0x6d   :  { %139 = vst [vmem:[#allocation2 + $0x158] sm:$0x3] %v10089_v0  ;;  %140 = vst [vmem:[#allocation2 + $0x160] sm:$0xff] %v10089_v0  ;;  %8269 = vmatpush1.bf16.msra.mxu0 %v8268_v32  ;;  %v458_v59 = vld [vmem:[#allocation4 + $0x320] sm:$0xff]  ;;  %v463_v61 = vld [vmem:[#allocation4 + $0x348] sm:$0xff] }
  0x6e   :  { %141 = vst [vmem:[#allocation2 + $0x168] sm:$0xff] %v10089_v0  ;;  %142 = vst [vmem:[#allocation2 + $0x170] sm:$0x3] %v10089_v0  ;;  %8271 = vmatprep.subr.bf16.mxu0 %v8270_v33  ;;  %v465_v62 = vld [vmem:[#allocation4 + $0x358] sm:$0xff]  ;;  %v10285_v63 = vld [vmem:[%s13353_s0 + $0x10] sm:$0xff]  ;;  %v8288_v1 = vpack.c.bf16 %v460_v60, %v458_v59 }
  0x6f   :  { %143 = vst [vmem:[#allocation2 + $0x178] sm:$0x3] %v10089_v0  ;;  %144 = vst [vmem:[#allocation2 + $0x180] sm:$0xff] %v10089_v0  ;;  %v8290_v2 = vpack.c.bf16 %v465_v62, %v463_v61  ;;  %v462_v3 = vld [vmem:[#allocation4 + $0x340] sm:$0xff]  ;;  %v464_v4 = vld [vmem:[#allocation4 + $0x350] sm:$0xff] }
  0x70   :  { %145 = vst [vmem:[#allocation2 + $0x188] sm:$0xff] %v10089_v0  ;;  %146 = vst [vmem:[#allocation2 + $0x190] sm:$0x3] %v10089_v0  ;;  %v467_v5 = vld [vmem:[#allocation4 + $0x368] sm:$0xff]  ;;  %v469_v6 = vld [vmem:[#allocation4 + $0x378] sm:$0xff]  ;;  %v8292_v8 = vpack.c.bf16 %v464_v4, %v462_v3 }
  0x71   :  { %147 = vst [vmem:[#allocation2 + $0x198] sm:$0x3] %v10089_v0  ;;  %148 = vst [vmem:[#allocation2 + $0x1a0] sm:$0xff] %v10089_v0  ;;  %8273 = vmatpush1.bf16.msra.mxu0 %v8272_v38  ;;  %v10292_v7 = vld [vmem:[%s13353_s0 + $0x20] sm:$0xff]  ;;  %v8294_v9 = vpack.c.bf16 %v469_v6, %v467_v5  ;;  %v468_v11 = vld [vmem:[#allocation4 + $0x370] sm:$0xff] }
  0x72   :  { %149 = vst [vmem:[#allocation2 + $0x1a8] sm:$0xff] %v10089_v0  ;;  %150 = vst [vmem:[#allocation2 + $0x1b0] sm:$0x3] %v10089_v0  ;;  %8275 = vmatprep.subr.bf16.mxu0 %v8274_v39  ;;  %v466_v10 = vld [vmem:[#allocation4 + $0x360] sm:$0xff]  ;;  %v471_v12 = vld [vmem:[#allocation4 + $0x388] sm:$0xff] }
  0x73   :  { %151 = vst [vmem:[#allocation2 + $0x1b8] sm:$0x3] %v10089_v0  ;;  %152 = vst [vmem:[#allocation2 + $0x1c0] sm:$0xff] %v10089_v0  ;;  %v473_v13 = vld [vmem:[#allocation4 + $0x398] sm:$0xff]  ;;  %v10299_v14 = vld [vmem:[%s13353_s0 + $0x30] sm:$0xff]  ;;  %v8296_v15 = vpack.c.bf16 %v468_v11, %v466_v10 }
  0x74   :  { %153 = vst [vmem:[#allocation2 + $0x1c8] sm:$0xff] %v10089_v0  ;;  %154 = vst [vmem:[#allocation2 + $0x1d0] sm:$0x3] %v10089_v0  ;;  %v8298_v16 = vpack.c.bf16 %v473_v13, %v471_v12  ;;  %v470_v17 = vld [vmem:[#allocation4 + $0x380] sm:$0xff]  ;;  %v472_v18 = vld [vmem:[#allocation4 + $0x390] sm:$0xff] }
  0x75   :  { %155 = vst [vmem:[#allocation2 + $0x1d8] sm:$0x3] %v10089_v0  ;;  %156 = vst [vmem:[#allocation2 + $0x1e0] sm:$0xff] %v10089_v0  ;;  %8277 = vmatpush1.bf16.msra.mxu0 %v8276_v44  ;;  %v475_v19 = vld [vmem:[#allocation4 + $0x3a8] sm:$0xff]  ;;  %v477_v20 = vld [vmem:[#allocation4 + $0x3b8] sm:$0xff]  ;;  %v8300_v22 = vpack.c.bf16 %v472_v18, %v470_v17 }
  0x76   :  { %157 = vst [vmem:[#allocation2 + $0x1e8] sm:$0xff] %v10089_v0  ;;  %158 = vst [vmem:[#allocation2 + $0x1f0] sm:$0x3] %v10089_v0  ;;  %8279 = vmatprep.subr.bf16.mxu0 %v8278_v45  ;;  %v10306_v21 = vld [vmem:[%s13353_s0 + $0x40] sm:$0xff]  ;;  %v8302_v23 = vpack.c.bf16 %v477_v20, %v475_v19  ;;  %v476_v25 = vld [vmem:[#allocation4 + $0x3b0] sm:$0xff] }
  0x77   :  { %159 = vst [vmem:[#allocation2 + $0x1f8] sm:$0x3] %v10089_v0  ;;  %160 = vst [vmem:[#allocation2 + $0x200] sm:$0xff] %v10089_v0  ;;  %v474_v24 = vld [vmem:[#allocation4 + $0x3a0] sm:$0xff]  ;;  %v479_v26 = vld [vmem:[#allocation4 + $0x3c8] sm:$0xff] }
  0x78   :  { %161 = vst [vmem:[#allocation2 + $0x208] sm:$0xff] %v10089_v0  ;;  %162 = vst [vmem:[#allocation2 + $0x210] sm:$0x3] %v10089_v0  ;;  %v481_v27 = vld [vmem:[#allocation4 + $0x3d8] sm:$0xff]  ;;  %v10313_v28 = vld [vmem:[%s13353_s0 + $0x50] sm:$0xff]  ;;  %v8304_v29 = vpack.c.bf16 %v476_v25, %v474_v24 }
  0x79   :  { %163 = vst [vmem:[#allocation2 + $0x218] sm:$0x3] %v10089_v0  ;;  %164 = vst [vmem:[#allocation2 + $0x220] sm:$0xff] %v10089_v0  ;;  %8281 = vmatpush1.bf16.msra.mxu0 %v8280_v50  ;;  %v8306_v30 = vpack.c.bf16 %v481_v27, %v479_v26  ;;  %v478_v31 = vld [vmem:[#allocation4 + $0x3c0] sm:$0xff]  ;;  %v480_v32 = vld [vmem:[#allocation4 + $0x3d0] sm:$0xff] }
  0x7a   :  { %165 = vst [vmem:[#allocation2 + $0x228] sm:$0xff] %v10089_v0  ;;  %166 = vst [vmem:[#allocation2 + $0x230] sm:$0x3] %v10089_v0  ;;  %8283 = vmatprep.subr.bf16.mxu0 %v8282_v51  ;;  %v483_v33 = vld [vmem:[#allocation4 + $0x3e8] sm:$0xff]  ;;  %v485_v34 = vld [vmem:[#allocation4 + $0x3f8] sm:$0xff]  ;;  %v8308_v36 = vpack.c.bf16 %v480_v32, %v478_v31 }
  0x7b   :  { %167 = vst [vmem:[#allocation2 + $0x238] sm:$0x3] %v10089_v0  ;;  %168 = vst [vmem:[#allocation2 + $0x240] sm:$0xff] %v10089_v0  ;;  %v10320_v35 = vld [vmem:[%s13353_s0 + $0x60] sm:$0xff]  ;;  %v8310_v37 = vpack.c.bf16 %v485_v34, %v483_v33  ;;  %v484_v39 = vld [vmem:[#allocation4 + $0x3f0] sm:$0xff] }
  0x7c   :  { %169 = vst [vmem:[#allocation2 + $0x248] sm:$0xff] %v10089_v0  ;;  %170 = vst [vmem:[#allocation2 + $0x250] sm:$0x3] %v10089_v0  ;;  %325 = vmatmul.mubr.f32.vlgmr.msra.gmra.mrb[0].mxu0 %v10278_v56  ;;  %v482_v38 = vld [vmem:[#allocation4 + $0x3e0] sm:$0xff]  ;;  %v681_v40 = vld [vmem:[#allocation4 + $0x608] sm:$0xff] }
  0x7d   :  { %171 = vst [vmem:[#allocation2 + $0x258] sm:$0x3] %v10089_v0  ;;  %174 = vst [vmem:[#allocation2 + $0x270] sm:$0x3] %v10089_v0  ;;  %8285 = vmatpush1.bf16.msra.mxu0 %v8284_v57  ;;  %330 = vmatprep.mubr.f32.mxu0 %v10089_v0  ;;  %v683_v41 = vld [vmem:[#allocation4 + $0x618] sm:$0xff]  ;;  %v10327_v42 = vld [vmem:[%s13353_s0 + $0x70] sm:$0xff]  ;;  %v8312_v43 = vpack.c.bf16 %v484_v39, %v482_v38 }
  0x7e   :  { %175 = vst [vmem:[#allocation2 + $0x278] sm:$0x3] %v10089_v0  ;;  %8287 = vmatprep.subr.bf16.mxu0 %v8286_v58  ;;  %v8314_v44 = vpack.c.bf16 %v683_v41, %v681_v40  ;;  %v10334_v45 = vld [vmem:[%s13353_s0 + $0xa0] sm:$0xff]  ;;  %v10341_v46 = vld [vmem:[%s13353_s0 + $0xb0] sm:$0xff]  ;;  %v685_v55 = vld [vmem:[#allocation4 + $0x628] sm:$0xff] }
  0x7f   :  { %v10348_v47 = vld [vmem:[%s13353_s0 + $0xc0] sm:$0xff]  ;;  %v10355_v48 = vld [vmem:[%s13353_s0 + $0xd0] sm:$0xff]  ;;  %v687_v57 = vld [vmem:[#allocation4 + $0x638] sm:$0xff] }
  0x80   :  { %331 = vmatmul.mubr.f32.gmra.mrb[2].mxu0 %v10285_v63  ;;  %v10362_v49 = vld [vmem:[%s13353_s0 + $0xe0] sm:$0xff]  ;;  %v10369_v50 = vld [vmem:[%s13353_s0 + $0xf0] sm:$0xff]  ;;  %v8318_v59 = vpack.c.bf16 %v687_v57, %v685_v55  ;;  %v689_v62 = vld [vmem:[#allocation4 + $0x648] sm:$0xff] }
  0x81   :  { %336 = vmatprep.mubr.f32.mxu0 %v10089_v0  ;;  %8289 = vmatpush1.bf16.msra.mxu0 %v8288_v1  ;;  %v10376_v51 = vld [vmem:[%s13353_s0 + $0x100] sm:$0xff]  ;;  %v10383_v52 = vld [vmem:[%s13353_s0 + $0x110] sm:$0xff]  ;;  %v691_v1 = vld [vmem:[#allocation4 + $0x658] sm:$0xff] }
  0x82   :  { %8291 = vmatprep.subr.bf16.mxu0 %v8290_v2  ;;  %v680_v53 = vld [vmem:[#allocation4 + $0x600] sm:$0xff]  ;;  %v682_v54 = vld [vmem:[#allocation4 + $0x610] sm:$0xff]  ;;  %v8322_v3 = vpack.c.bf16 %v691_v1, %v689_v62  ;;  %v693_v6 = vld [vmem:[#allocation4 + $0x668] sm:$0xff] }
  0x83   :  { %v8316_v58 = vpack.c.bf16 %v682_v54, %v680_v53  ;;  %v684_v60 = vld [vmem:[#allocation4 + $0x620] sm:$0xff]  ;;  %v686_v61 = vld [vmem:[#allocation4 + $0x630] sm:$0xff]  ;;  %v697_v13 = vld [vmem:[#allocation4 + $0x688] sm:$0xff] }
  0x84   :  { %337 = vmatmul.mubr.f32.gmra.mrb[4].mxu0 %v10292_v7  ;;  %v8320_v2 = vpack.c.bf16 %v686_v61, %v684_v60  ;;  %v688_v4 = vld [vmem:[#allocation4 + $0x640] sm:$0xff]  ;;  %v690_v5 = vld [vmem:[#allocation4 + $0x650] sm:$0xff]  ;;  %v701_v20 = vld [vmem:[#allocation4 + $0x6a8] sm:$0xff] }
  0x85   :  { %342 = vmatprep.mubr.f32.mxu0 %v10089_v0  ;;  %8293 = vmatpush1.bf16.msra.mxu0 %v8292_v8  ;;  %v695_v8 = vld [vmem:[#allocation4 + $0x678] sm:$0xff]  ;;  %v692_v11 = vld [vmem:[#allocation4 + $0x660] sm:$0xff]  ;;  %v694_v12 = vld [vmem:[#allocation4 + $0x670] sm:$0xff] }
  0x86   :  { %8295 = vmatprep.subr.bf16.mxu0 %v8294_v9  ;;  %v8324_v9 = vpack.c.bf16 %v690_v5, %v688_v4  ;;  %v8326_v10 = vpack.c.bf16 %v695_v8, %v693_v6  ;;  %v696_v18 = vld [vmem:[#allocation4 + $0x680] sm:$0xff]  ;;  %v698_v19 = vld [vmem:[#allocation4 + $0x690] sm:$0xff]  ;;  %v705_v27 = vld [vmem:[#allocation4 + $0x6c8] sm:$0xff] }
  0x87   :  { %v700_v25 = vld [vmem:[#allocation4 + $0x6a0] sm:$0xff]  ;;  %v702_v26 = vld [vmem:[#allocation4 + $0x6b0] sm:$0xff]  ;;  %v709_v34 = vld [vmem:[#allocation4 + $0x6e8] sm:$0xff] }
  0x88   :  { %343 = vmatmul.mubr.f32.gmra.mrb[6].mxu0 %v10299_v14  ;;  %v704_v32 = vld [vmem:[#allocation4 + $0x6c0] sm:$0xff]  ;;  %v706_v33 = vld [vmem:[#allocation4 + $0x6d0] sm:$0xff]  ;;  %v1004_v41 = vld [vmem:[#allocation4 + $0x108] sm:$0xff] }
  0x89   :  { %348 = vmatprep.mubr.f32.mxu0 %v10089_v0  ;;  %8297 = vmatpush1.bf16.msra.mxu0 %v8296_v15  ;;  %v699_v15 = vld [vmem:[#allocation4 + $0x698] sm:$0xff]  ;;  %v708_v39 = vld [vmem:[#allocation4 + $0x6e0] sm:$0xff]  ;;  %v710_v40 = vld [vmem:[#allocation4 + $0x6f0] sm:$0xff] }
  0x8a   :  { %8299 = vmatprep.subr.bf16.mxu0 %v8298_v16  ;;  %v8328_v16 = vpack.c.bf16 %v694_v12, %v692_v11  ;;  %v8330_v17 = vpack.c.bf16 %v699_v15, %v697_v13  ;;  %v8344_v53 = vpack.c.bf16 %v710_v40, %v708_v39  ;;  %v10425_v55 = vld [vmem:[%s13353_s0 + $0x120] sm:$0xff]  ;;  %v1010_v60 = vld [vmem:[#allocation4 + $0x138] sm:$0xff] }
  0x8b   :  { %v1003_v57 = vld [vmem:[#allocation4 + $0x100] sm:$0xff]  ;;  %v1014_v4 = vld [vmem:[#allocation4 + $0x158] sm:$0xff] }
  0x8c   :  { %349 = vmatmul.mubr.f32.gmra.mrb[8].mxu0 %v10306_v21  ;;  %v1007_v1 = vld [vmem:[#allocation4 + $0x120] sm:$0xff]  ;;  %v1018_v11 = vld [vmem:[#allocation4 + $0x178] sm:$0xff] }
  0x8d   :  { %354 = vmatprep.mubr.f32.mxu0 %v10089_v0  ;;  %8301 = vmatpush1.bf16.msra.mxu0 %v8300_v22  ;;  %v703_v22 = vld [vmem:[#allocation4 + $0x6b8] sm:$0xff]  ;;  %v1011_v8 = vld [vmem:[#allocation4 + $0x140] sm:$0xff] }
  0x8e   :  { %8303 = vmatprep.subr.bf16.mxu0 %v8302_v23  ;;  %v8332_v23 = vpack.c.bf16 %v698_v19, %v696_v18  ;;  %v8334_v24 = vpack.c.bf16 %v703_v22, %v701_v20  ;;  %v1015_v15 = vld [vmem:[#allocation4 + $0x160] sm:$0xff]  ;;  %v1022_v18 = vld [vmem:[#allocation4 + $0x198] sm:$0xff] }
  0x8f   :  { %v1019_v22 = vld [vmem:[#allocation4 + $0x180] sm:$0xff]  ;;  %v1034_v39 = vld [vmem:[#allocation4 + $0x1f8] sm:$0xff] }
  0x90   :  { %355 = vmatmul.mubr.f32.gmra.mrb[10].mxu0 %v10313_v28 }
  0x91   :  { %360 = vmatprep.mubr.f32.mxu0 %v10089_v0  ;;  %8305 = vmatpush1.bf16.msra.mxu0 %v8304_v29  ;;  %v707_v29 = vld [vmem:[#allocation4 + $0x6d8] sm:$0xff] }
  0x92   :  { %8307 = vmatprep.subr.bf16.mxu0 %v8306_v30  ;;  %v8336_v30 = vpack.c.bf16 %v702_v26, %v700_v25  ;;  %v8338_v31 = vpack.c.bf16 %v707_v29, %v705_v27  ;;  %v1026_v25 = vld [vmem:[#allocation4 + $0x1b8] sm:$0xff]  ;;  %v1023_v29 = vld [vmem:[#allocation4 + $0x1a0] sm:$0xff] }
  0x94   :  { %361 = vmatmul.mubr.f32.gmra.mrb[12].mxu0 %v10320_v35 }
  0x95   :  { %366 = vmatprep.mubr.f32.mxu0 %v10089_v0  ;;  %8309 = vmatpush1.bf16.msra.mxu0 %v8308_v36  ;;  %v711_v36 = vld [vmem:[#allocation4 + $0x6f8] sm:$0xff] }
  0x96   :  { %8311 = vmatprep.subr.bf16.mxu0 %v8310_v37  ;;  %v8340_v37 = vpack.c.bf16 %v706_v33, %v704_v32  ;;  %v8342_v38 = vpack.c.bf16 %v711_v36, %v709_v34  ;;  %v1030_v32 = vld [vmem:[#allocation4 + $0x1d8] sm:$0xff]  ;;  %v1027_v36 = vld [vmem:[#allocation4 + $0x1c0] sm:$0xff] }
  0x98   :  { %367 = vmatmul.mubr.f32.gmra.mrb[14].mxu0 %v10327_v42 }
  0x99   :  { %372 = vmatprep.mubr.f32.mxu0 %v10089_v0  ;;  %8313 = vmatpush1.bf16.msra.mxu0 %v8312_v43  ;;  %v1006_v43 = vld [vmem:[#allocation4 + $0x118] sm:$0xff] }
  0x9a   :  { %8315 = vmatprep.subr.bf16.mxu0 %v8314_v44  ;;  %v10404_v44 = vld [vmem:[%s13353_s0 + $0x80] sm:$0xff]  ;;  %v8346_v54 = vpack.c.bf16 %v1006_v43, %v1004_v41 }
  0x9b   :  { %v1031_v43 = vld [vmem:[#allocation4 + $0x1e0] sm:$0xff] }
  0x9c   :  { %373 = vmatmul.mubr.f32.gmra.mrb[16].mxu0 %v10334_v45 }
  0x9d   :  { %378 = vmatprep.mubr.f32.mxu0 %v10089_v0 }
  0xa0   :  { %379 = vmatmul.mubr.f32.gmra.mrb[18].mxu0 %v10341_v46 }
  0xa1   :  { %384 = vmatprep.mubr.f32.mxu0 %v10089_v0 }
  0xa4   :  { %385 = vmatmul.mubr.f32.gmra.mrb[20].mxu0 %v10348_v47 }
  0xa5   :  { %390 = vmatprep.mubr.f32.mxu0 %v10089_v0 }
  0xa8   :  { %391 = vmatmul.mubr.f32.gmra.mrb[22].mxu0 %v10355_v48 }
  0xa9   :  { %396 = vmatprep.mubr.f32.mxu0 %v10089_v0 }
  0xac   :  { %397 = vmatmul.mubr.f32.gmra.mrb[24].mxu0 %v10362_v49 }
  0xad   :  { %402 = vmatprep.mubr.f32.mxu0 %v10089_v0 }
  0xb0   :  { %403 = vmatmul.mubr.f32.gmra.mrb[26].mxu0 %v10369_v50 }
  0xb1   :  { %408 = vmatprep.mubr.f32.mxu0 %v10089_v0 }
  0xb4   :  { %409 = vmatmul.mubr.f32.gmra.mrb[28].mxu0 %v10376_v51 }
  0xb5   :  { %414 = vmatprep.mubr.f32.mxu0 %v10089_v0 }
  0xb8   :  { %415 = vmatmul.mubr.f32.gmra.mrb[30].mxu0 %v10383_v52 }
  0xb9   :  { %550 = vmatprep.mubr.f32.mxu0 %v10089_v0 }
  0xbc   :  { %551 = vmatmul.mubr.f32.vlgmr.msra.gmra.mrb[0].mxu0 %v10285_v63 }
  0xbd   :  { %8317 = vmatpush1.bf16.msra.mxu0 %v8316_v58  ;;  %556 = vmatprep.mubr.f32.mxu0 %v10089_v0  ;;  %v1005_v58 = vld [vmem:[#allocation4 + $0x110] sm:$0xff] }
  0xbe   :  { %8319 = vmatprep.subr.bf16.mxu0 %v8318_v59  ;;  %v1008_v59 = vld [vmem:[#allocation4 + $0x128] sm:$0xff]  ;;  %v8348_v61 = vpack.c.bf16 %v1005_v58, %v1003_v57  ;;  %v1244_v57 = vld [vmem:[#allocation4 + $0x418] sm:$0xff]  ;;  %v10446_v58 = vld [vmem:[%s13353_s0 + $0x90] sm:$0xff] }
  0xbf   :  { %v8350_v62 = vpack.c.bf16 %v1010_v60, %v1008_v59 }
  0xc0   :  { %557 = vmatmul.mubr.f32.gmra.mrb[2].mxu0 %v10292_v7 }
  0xc1   :  { %562 = vmatprep.mubr.f32.mxu0 %v10089_v0  ;;  %8321 = vmatpush1.bf16.msra.mxu0 %v8320_v2  ;;  %v1009_v2 = vld [vmem:[#allocation4 + $0x130] sm:$0xff] }
  0xc2   :  { %8323 = vmatprep.subr.bf16.mxu0 %v8322_v3  ;;  %v1012_v3 = vld [vmem:[#allocation4 + $0x148] sm:$0xff]  ;;  %v8352_v5 = vpack.c.bf16 %v1009_v2, %v1007_v1  ;;  %v10473_v1 = vld [vmem:[%s13353_s0 + $0x130] sm:$0xff] }
  0xc3   :  { %v8354_v6 = vpack.c.bf16 %v1014_v4, %v1012_v3  ;;  %v1241_v3 = vld [vmem:[#allocation4 + $0x400] sm:$0xff]  ;;  %v1243_v4 = vld [vmem:[#allocation4 + $0x410] sm:$0xff] }
  0xc4   :  { %563 = vmatmul.mubr.f32.gmra.mrb[4].mxu0 %v10299_v14 }
  0xc5   :  { %568 = vmatprep.mubr.f32.mxu0 %v10089_v0  ;;  %8325 = vmatpush1.bf16.msra.mxu0 %v8324_v9  ;;  %v1013_v9 = vld [vmem:[#allocation4 + $0x150] sm:$0xff] }
  0xc6   :  { %8327 = vmatprep.subr.bf16.mxu0 %v8326_v10  ;;  %v1016_v10 = vld [vmem:[#allocation4 + $0x168] sm:$0xff]  ;;  %v8356_v12 = vpack.c.bf16 %v1013_v9, %v1011_v8  ;;  %v1248_v8 = vld [vmem:[#allocation4 + $0x438] sm:$0xff]  ;;  %v8380_v9 = vpack.c.bf16 %v1243_v4, %v1241_v3 }
  0xc7   :  { %v8358_v13 = vpack.c.bf16 %v1018_v11, %v1016_v10  ;;  %v941_v10 = vrot.slane %v10285_v63, 1  ;;  %v944_v63 = vrot.slane %v10292_v7, 1 }
  0xc8   :  { %569 = vmatmul.mubr.f32.gmra.mrb[6].mxu0 %v10306_v21 }
  0xc9   :  { %574 = vmatprep.mubr.f32.mxu0 %v10089_v0  ;;  %8329 = vmatpush1.bf16.msra.mxu0 %v8328_v16  ;;  %v1017_v16 = vld [vmem:[#allocation4 + $0x170] sm:$0xff] }
  0xca   :  { %8331 = vmatprep.subr.bf16.mxu0 %v8330_v17  ;;  %v1020_v17 = vld [vmem:[#allocation4 + $0x188] sm:$0xff]  ;;  %v8360_v19 = vpack.c.bf16 %v1017_v16, %v1015_v15  ;;  %v1245_v15 = vld [vmem:[#allocation4 + $0x420] sm:$0xff]  ;;  %v1247_v16 = vld [vmem:[#allocation4 + $0x430] sm:$0xff] }
  0xcb   :  { %v8362_v20 = vpack.c.bf16 %v1022_v18, %v1020_v17  ;;  %v1250_v17 = vld [vmem:[#allocation4 + $0x448] sm:$0xff]  ;;  %v1252_v18 = vld [vmem:[#allocation4 + $0x458] sm:$0xff] }
  0xcc   :  { %575 = vmatmul.mubr.f32.gmra.mrb[8].mxu0 %v10313_v28 }
  0xcd   :  { %580 = vmatprep.mubr.f32.mxu0 %v10089_v0  ;;  %8333 = vmatpush1.bf16.msra.mxu0 %v8332_v23  ;;  %v1021_v23 = vld [vmem:[#allocation4 + $0x190] sm:$0xff] }
  0xce   :  { %8335 = vmatprep.subr.bf16.mxu0 %v8334_v24  ;;  %v1024_v24 = vld [vmem:[#allocation4 + $0x1a8] sm:$0xff]  ;;  %v8364_v26 = vpack.c.bf16 %v1021_v23, %v1019_v22  ;;  %v8384_v22 = vpack.c.bf16 %v1247_v16, %v1245_v15  ;;  %v10500_v23 = vld [vmem:[%s13353_s0 + $0x38] sm:$0x3] }
  0xcf   :  { %v8366_v27 = vpack.c.bf16 %v1026_v25, %v1024_v24  ;;  %v8386_v24 = vpack.c.bf16 %v1252_v18, %v1250_v17  ;;  %v1249_v25 = vld [vmem:[#allocation4 + $0x440] sm:$0xff]  ;;  %v10550_v17 = vld [vmem:[%s13353_s0 + $0x78] sm:$0x3] }
  0xd0   :  { %581 = vmatmul.mubr.f32.gmra.mrb[10].mxu0 %v10320_v35 }
  0xd1   :  { %586 = vmatprep.mubr.f32.mxu0 %v10089_v0  ;;  %8337 = vmatpush1.bf16.msra.mxu0 %v8336_v30  ;;  %v1025_v30 = vld [vmem:[#allocation4 + $0x1b0] sm:$0xff] }
  0xd2   :  { %8339 = vmatprep.subr.bf16.mxu0 %v8338_v31  ;;  %v1028_v31 = vld [vmem:[#allocation4 + $0x1c8] sm:$0xff]  ;;  %v8368_v33 = vpack.c.bf16 %v1025_v30, %v1023_v29  ;;  %v1256_v29 = vld [vmem:[#allocation4 + $0x478] sm:$0xff]  ;;  %v947_v30 = vrot.slane %v10299_v14, 1 }
  0xd3   :  { %v8370_v34 = vpack.c.bf16 %v1030_v32, %v1028_v31  ;;  %v948_v31 = vrot.slane %v10500_v23, 1 }
  0xd4   :  { %587 = vmatmul.mubr.f32.gmra.mrb[12].mxu0 %v10327_v42 }
  0xd5   :  { %592 = vmatprep.mubr.f32.mxu0 %v10089_v0  ;;  %8341 = vmatpush1.bf16.msra.mxu0 %v8340_v37  ;;  %v1029_v37 = vld [vmem:[#allocation4 + $0x1d0] sm:$0xff] }
  0xd6   :  { %8343 = vmatprep.subr.bf16.mxu0 %v8342_v38  ;;  %v1032_v38 = vld [vmem:[#allocation4 + $0x1e8] sm:$0xff]  ;;  %v8372_v40 = vpack.c.bf16 %v1029_v37, %v1027_v36  ;;  %v1253_v36 = vld [vmem:[#allocation4 + $0x460] sm:$0xff]  ;;  %v1255_v37 = vld [vmem:[#allocation4 + $0x470] sm:$0xff] }
  0xd7   :  { %v8374_v41 = vpack.c.bf16 %v1034_v39, %v1032_v38  ;;  %v1258_v38 = vld [vmem:[#allocation4 + $0x488] sm:$0xff]  ;;  %v1260_v39 = vld [vmem:[#allocation4 + $0x498] sm:$0xff] }
  0xd8   :  { %593 = vmatmul.mubr.f32.gmra.mrb[14].mxu0 %v10404_v44 }
  0xd9   :  { %598 = vmatprep.mubr.f32.mxu0 %v10089_v0  ;;  %8345 = vmatpush1.bf16.msra.mxu0 %v8344_v53  ;;  %v1033_v53 = vld [vmem:[#allocation4 + $0x1f0] sm:$0xff] }
  0xda   :  { %8347 = vmatprep.subr.bf16.mxu0 %v8346_v54  ;;  %v1242_v54 = vld [vmem:[#allocation4 + $0x408] sm:$0xff]  ;;  %v8376_v59 = vpack.c.bf16 %v1033_v53, %v1031_v43  ;;  %v8392_v43 = vpack.c.bf16 %v1255_v37, %v1253_v36  ;;  %v10524_v53 = vld [vmem:[%s13353_s0 + $0x58] sm:$0x3]  ;;  %v962_v37 = vrot.slane %v10334_v45, 1 }
  0xdb   :  { %v8378_v60 = vpack.c.bf16 %v1244_v57, %v1242_v54  ;;  %v8394_v54 = vpack.c.bf16 %v1260_v39, %v1258_v38  ;;  %v1257_v57 = vld [vmem:[#allocation4 + $0x480] sm:$0xff]  ;;  %v954_v3 = vrot.slane %v10524_v53, 1  ;;  %v1482_v36 = vld [vmem:[#allocation4 + $0x718] sm:$0xff] }
  0xdc   :  { %599 = vmatmul.mubr.f32.gmra.mrb[16].mxu0 %v10341_v46 }
  0xdd   :  { %604 = vmatprep.mubr.f32.mxu0 %v10089_v0 }
  0xe0   :  { %605 = vmatmul.mubr.f32.gmra.mrb[18].mxu0 %v10348_v47 }
  0xe1   :  { %610 = vmatprep.mubr.f32.mxu0 %v10089_v0 }
  0xe4   :  { %611 = vmatmul.mubr.f32.gmra.mrb[20].mxu0 %v10355_v48 }
  0xe5   :  { %616 = vmatprep.mubr.f32.mxu0 %v10089_v0 }
  0xe8   :  { %617 = vmatmul.mubr.f32.gmra.mrb[22].mxu0 %v10362_v49 }
  0xe9   :  { %622 = vmatprep.mubr.f32.mxu0 %v10089_v0 }
  0xec   :  { %623 = vmatmul.mubr.f32.gmra.mrb[24].mxu0 %v10369_v50 }
  0xed   :  { %628 = vmatprep.mubr.f32.mxu0 %v10089_v0 }
  0xf0   :  { %629 = vmatmul.mubr.f32.gmra.mrb[26].mxu0 %v10376_v51 }
  0xf1   :  { %634 = vmatprep.mubr.f32.mxu0 %v10089_v0 }
  0xf4   :  { %635 = vmatmul.mubr.f32.gmra.mrb[28].mxu0 %v10383_v52 }
  0xf5   :  { %640 = vmatprep.mubr.f32.mxu0 %v10089_v0 }
  0xf8   :  { %641 = vmatmul.mubr.f32.gmra.mrb[30].mxu0 %v10425_v55 }
  0xf9   :  { %776 = vmatprep.mubr.f32.mxu0 %v10089_v0 }
  0xfc   :  { %777 = vmatmul.mubr.f32.vlgmr.msra.gmra.mrb[0].mxu0 %v10292_v7 }
  0xfd   :  { %8349 = vmatpush1.bf16.msra.mxu0 %v8348_v61  ;;  %782 = vmatprep.mubr.f32.mxu0 %v10089_v0  ;;  %v10465_v61 = vld [vmem:[%s13353_s0 + $0x8] sm:$0x3] }
  0xfe   :  { %8351 = vmatprep.subr.bf16.mxu0 %v8350_v62  ;;  %v938_v62 = vrot.slane %v10278_v56, 1  ;;  %v939_v2 = vrot.slane %v10465_v61, 1 }
 0x100   :  { %783 = vmatmul.mubr.f32.gmra.mrb[2].mxu0 %v10299_v14  ;;  %v940_v56 = vsel %vm937_vm0, %v938_v62, %v939_v2  ;;  %v10517_v14 = vsel %vm937_vm0, %v947_v30, %v948_v31  ;;  %v10527_v62 = vld [vmem:[#allocation2] sm:$0xff]  ;;  %v953_v2 = vrot.slane %v10313_v28, 1 }
 0x101   :  { %788 = vmatprep.mubr.f32.mxu0 %v10089_v0  ;;  %8353 = vmatpush1.bf16.msra.mxu0 %v8352_v5  ;;  %v10479_v5 = vld [vmem:[%s13353_s0 + $0x18] sm:$0x3]  ;;  %v1269_v31 = vld [vmem:[#allocation4 + $0x4e0] sm:$0xff] }
 0x102   :  { %8355 = vmatprep.subr.bf16.mxu0 %v8354_v6  ;;  %v1246_v6 = vld [vmem:[#allocation4 + $0x428] sm:$0xff]  ;;  %v942_v11 = vrot.slane %v10479_v5, 1 }
 0x104   :  { %789 = vmatmul.mubr.f32.gmra.mrb[4].mxu0 %v10306_v21 }
 0x105   :  { %794 = vmatprep.mubr.f32.mxu0 %v10089_v0  ;;  %8357 = vmatpush1.bf16.msra.mxu0 %v8356_v12  ;;  %v10489_v12 = vld [vmem:[%s13353_s0 + $0x28] sm:$0x3] }
 0x106   :  { %8359 = vmatprep.subr.bf16.mxu0 %v8358_v13  ;;  %v8382_v13 = vpack.c.bf16 %v1248_v8, %v1246_v6  ;;  %v10538_v6 = vld [vmem:[%s13353_s0 + $0x68] sm:$0x3] }
 0x107   :  { %v957_v15 = vrot.slane %v10538_v6, 1 }
 0x108   :  { %795 = vmatmul.mubr.f32.gmra.mrb[6].mxu0 %v10313_v28  ;;  %v10543_v28 = vsel %vm937_vm0, %v953_v2, %v954_v3  ;;  %v971_v3 = vrot.slane %v10355_v48, 1 }
 0x109   :  { %800 = vmatprep.mubr.f32.mxu0 %v10089_v0  ;;  %8361 = vmatpush1.bf16.msra.mxu0 %v8360_v19  ;;  %v10493_v19 = vsel %vm937_vm0, %v941_v10, %v942_v11  ;;  %v1266_v10 = vld [vmem:[#allocation4 + $0x4c8] sm:$0xff]  ;;  %v1268_v11 = vld [vmem:[#allocation4 + $0x4d8] sm:$0xff] }
 0x10a   :  { %8363 = vmatprep.subr.bf16.mxu0 %v8362_v20  ;;  %v945_v20 = vrot.slane %v10489_v12, 1  ;;  %v8402_v18 = vpack.c.bf16 %v1268_v11, %v1266_v10  ;;  %v977_v11 = vrot.slane %v10369_v50, 1 }
 0x10c   :  { %801 = vmatmul.mubr.f32.gmra.mrb[8].mxu0 %v10320_v35  ;;  %v10505_v7 = vsel %vm937_vm0, %v944_v63, %v945_v20  ;;  %v1265_v63 = vld [vmem:[#allocation4 + $0x4c0] sm:$0xff]  ;;  %v1267_v20 = vld [vmem:[#allocation4 + $0x4d0] sm:$0xff] }
 0x10d   :  { %806 = vmatprep.mubr.f32.mxu0 %v10089_v0  ;;  %8365 = vmatpush1.bf16.msra.mxu0 %v8364_v26  ;;  %v1251_v26 = vld [vmem:[#allocation4 + $0x450] sm:$0xff] }
 0x10e   :  { %8367 = vmatprep.subr.bf16.mxu0 %v8366_v27  ;;  %v1254_v27 = vld [vmem:[#allocation4 + $0x468] sm:$0xff]  ;;  %v8388_v32 = vpack.c.bf16 %v1251_v26, %v1249_v25  ;;  %v959_v25 = vrot.slane %v10327_v42, 1  ;;  %v960_v26 = vrot.slane %v10550_v17, 1 }
 0x110   :  { %807 = vmatmul.mubr.f32.gmra.mrb[10].mxu0 %v10327_v42  ;;  %v10568_v42 = vsel %vm937_vm0, %v959_v25, %v960_v26  ;;  %v1481_v25 = vld [vmem:[#allocation4 + $0x710] sm:$0xff]  ;;  %v1484_v26 = vld [vmem:[#allocation4 + $0x728] sm:$0xff] }
 0x111   :  { %812 = vmatprep.mubr.f32.mxu0 %v10089_v0  ;;  %8369 = vmatpush1.bf16.msra.mxu0 %v8368_v33  ;;  %v10512_v33 = vld [vmem:[%s13353_s0 + $0x48] sm:$0x3] }
 0x112   :  { %8371 = vmatprep.subr.bf16.mxu0 %v8370_v34  ;;  %v8390_v34 = vpack.c.bf16 %v1256_v29, %v1254_v27  ;;  %v8404_v27 = vpack.c.bf16 %v1267_v20, %v1265_v63  ;;  %v10562_v29 = vld [vmem:[%s13353_s0 + $0xa8] sm:$0x3]  ;;  %v983_v20 = vrot.slane %v10383_v52, 1 }
 0x113   :  { %v963_v38 = vrot.slane %v10562_v29, 1 }
 0x114   :  { %813 = vmatmul.mubr.f32.gmra.mrb[12].mxu0 %v10404_v44 }
 0x115   :  { %818 = vmatprep.mubr.f32.mxu0 %v10089_v0  ;;  %8373 = vmatpush1.bf16.msra.mxu0 %v8372_v40  ;;  %v950_v40 = vrot.slane %v10306_v21, 1  ;;  %v964_v45 = vsel %vm937_vm0, %v962_v37, %v963_v38 }
 0x116   :  { %8375 = vmatprep.subr.bf16.mxu0 %v8374_v41  ;;  %v951_v41 = vrot.slane %v10512_v33, 1 }
 0x118   :  { %819 = vmatmul.mubr.f32.gmra.mrb[14].mxu0 %v10446_v58  ;;  %v10531_v21 = vsel %vm937_vm0, %v950_v40, %v951_v41  ;;  %v10574_v40 = vld [vmem:[%s13353_s0 + $0xb8] sm:$0x3] }
 0x119   :  { %824 = vmatprep.mubr.f32.mxu0 %v10089_v0  ;;  %8377 = vmatpush1.bf16.msra.mxu0 %v8376_v59  ;;  %v1259_v59 = vld [vmem:[#allocation4 + $0x490] sm:$0xff] }
 0x11a   :  { %8379 = vmatprep.subr.bf16.mxu0 %v8378_v60  ;;  %v1262_v60 = vld [vmem:[#allocation4 + $0x4a8] sm:$0xff]  ;;  %v8396_v4 = vpack.c.bf16 %v1259_v59, %v1257_v57 }
 0x11b   :  { %v10584_v57 = vld [vmem:[%s13353_s0 + $0xc8] sm:$0x3] }
 0x11c   :  { %825 = vmatmul.mubr.f32.gmra.mrb[16].mxu0 %v10348_v47 }
 0x11d   :  { %830 = vmatprep.mubr.f32.mxu0 %v10089_v0 }
 0x120   :  { %831 = vmatmul.mubr.f32.gmra.mrb[18].mxu0 %v10355_v48  ;;  %v10619_v48 = vld [vmem:[%s13353_s0 + $0xf8] sm:$0x3] }
 0x121   :  { %836 = vmatprep.mubr.f32.mxu0 %v10089_v0 }
 0x124   :  { %837 = vmatmul.mubr.f32.gmra.mrb[20].mxu0 %v10362_v49 }
 0x125   :  { %842 = vmatprep.mubr.f32.mxu0 %v10089_v0 }
 0x128   :  { %843 = vmatmul.mubr.f32.gmra.mrb[22].mxu0 %v10369_v50  ;;  %v10643_v50 = vld [vmem:[%s13353_s0 + $0x118] sm:$0x3] }
 0x129   :  { %848 = vmatprep.mubr.f32.mxu0 %v10089_v0 }
 0x12c   :  { %849 = vmatmul.mubr.f32.gmra.mrb[24].mxu0 %v10376_v51 }
 0x12d   :  { %854 = vmatprep.mubr.f32.mxu0 %v10089_v0 }
 0x130   :  { %855 = vmatmul.mubr.f32.gmra.mrb[26].mxu0 %v10383_v52  ;;  %v1483_v52 = vld [vmem:[#allocation4 + $0x720] sm:$0xff] }
 0x131   :  { %860 = vmatprep.mubr.f32.mxu0 %v10089_v0 }
 0x134   :  { %861 = vmatmul.mubr.f32.gmra.mrb[28].mxu0 %v10425_v55 }
 0x135   :  { %866 = vmatprep.mubr.f32.mxu0 %v10089_v0 }
 0x138   :  { %867 = vmatmul.mubr.f32.gmra.mrb[30].mxu0 %v10473_v1 }
 0x139   :  { %1099 = vmatprep.mubr.f32.mxu0 %v10089_v0 }
 0x13c   :  { %1100 = vmatmul.mubr.f32.vlgmr.msra.gmra.mrb[0].mxu0 %v940_v56  ;;  %v1261_v56 = vld [vmem:[#allocation4 + $0x4a0] sm:$0xff] }
 0x13d   :  { %8381 = vmatpush1.bf16.msra.mxu0 %v8380_v9  ;;  %1105 = vmatprep.mubr.f32.mxu0 %v10089_v0  ;;  %v1263_v9 = vld [vmem:[#allocation4 + $0x4b0] sm:$0xff] }
 0x13e   :  { %8383 = vmatprep.subr.bf16.mxu0 %v8382_v13  ;;  %v956_v13 = vrot.slane %v10320_v35, 1  ;;  %v8400_v16 = vpack.c.bf16 %v1263_v9, %v1261_v56  ;;  %v974_v56 = vrot.slane %v10362_v49, 1  ;;  %v10631_v49 = vld [vmem:[%s13353_s0 + $0x108] sm:$0x3] }
 0x140   :  { %1106 = vmatmul.mubr.f32.gmra.mrb[2].mxu0 %v10493_v19  ;;  %v10555_v35 = vsel %vm937_vm0, %v956_v13, %v957_v15  ;;  %v978_v13 = vrot.slane %v10619_v48, 1 }
 0x141   :  { %1111 = vmatprep.mubr.f32.mxu0 %v10089_v0  ;;  %8385 = vmatpush1.bf16.msra.mxu0 %v8384_v22  ;;  %v1270_v22 = vld [vmem:[#allocation4 + $0x4e8] sm:$0xff] }
 0x142   :  { %8387 = vmatprep.subr.bf16.mxu0 %v8386_v24  ;;  %v1272_v24 = vld [vmem:[#allocation4 + $0x4f8] sm:$0xff]  ;;  %v10636_v15 = vsel %vm937_vm0, %v977_v11, %v978_v13  ;;  %v1495_v11 = vld [vmem:[#allocation4 + $0x780] sm:$0xff]  ;;  %v1497_v13 = vld [vmem:[#allocation4 + $0x790] sm:$0xff] }
 0x143   :  { %v8406_v30 = vpack.c.bf16 %v1272_v24, %v1270_v22  ;;  %v984_v22 = vrot.slane %v10643_v50, 1  ;;  %v1479_v24 = vld [vmem:[#allocation4 + $0x700] sm:$0xff] }
 0x144   :  { %1112 = vmatmul.mubr.f32.gmra.mrb[4].mxu0 %v10505_v7 }
 0x145   :  { %1117 = vmatprep.mubr.f32.mxu0 %v10089_v0  ;;  %8389 = vmatpush1.bf16.msra.mxu0 %v8388_v32  ;;  %v1264_v0 = vld [vmem:[#allocation4 + $0x4b8] sm:$0xff]  ;;  %v1271_v32 = vld [vmem:[#allocation4 + $0x4f0] sm:$0xff] }
 0x146   :  { %8391 = vmatprep.subr.bf16.mxu0 %v8390_v34  ;;  %v8398_v8 = vpack.c.bf16 %v1264_v0, %v1262_v60  ;;  %v1480_v34 = vld [vmem:[#allocation4 + $0x708] sm:$0xff]  ;;  %v8408_v39 = vpack.c.bf16 %v1271_v32, %v1269_v31  ;;  %v968_v60 = vrot.slane %v10348_v47, 1  ;;  %v969_v0 = vrot.slane %v10584_v57, 1  ;;  %v1485_v32 = vld [vmem:[#allocation4 + $0x730] sm:$0xff] }
 0x147   :  { %v8410_v41 = vpack.c.bf16 %v1482_v36, %v1480_v34  ;;  %v10607_v47 = vld [vmem:[%s13353_s0 + $0xe8] sm:$0x3]  ;;  %v1490_v36 = vld [vmem:[#allocation4 + $0x758] sm:$0xff]  ;;  %v8416_v37 = vpack.c.bf16 %v1485_v32, %v1483_v52  ;;  %v1503_v32 = vld [vmem:[#allocation4 + $0x7c0] sm:$0xff] }
 0x148   :  { %1118 = vmatmul.mubr.f32.gmra.mrb[6].mxu0 %v10517_v14  ;;  %v10600_v2 = vsel %vm937_vm0, %v968_v60, %v969_v0  ;;  %v975_v9 = vrot.slane %v10607_v47, 1  ;;  %v1488_v34 = vld [vmem:[#allocation4 + $0x748] sm:$0xff]  ;;  %v1491_v0 = vld [vmem:[#allocation4 + $0x760] sm:$0xff] }
 0x149   :  { %1123 = vmatprep.mubr.f32.mxu0 %v10527_v62  ;;  %8393 = vmatpush1.bf16.msra.mxu0 %v8392_v43  ;;  %v965_v43 = vrot.slane %v10341_v46, 1  ;;  %v10595_v46 = vld [vmem:[%s13353_s0 + $0xd8] sm:$0x3]  ;;  %v8418_v38 = vpack.c.bf16 %v1490_v36, %v1488_v34  ;;  %v1505_v34 = vld [vmem:[#allocation4 + $0x7d0] sm:$0xff]  ;;  %v1508_v36 = vld [vmem:[#allocation4 + $0x7e8] sm:$0xff] }
 0x14a   :  { %8395 = vmatprep.subr.bf16.mxu0 %v8394_v54  ;;  %v966_v54 = vrot.slane %v10574_v40, 1  ;;  %v10624_v10 = vsel %vm937_vm0, %v974_v56, %v975_v9 }
 0x14c   :  { %1124 = vmatmul.mubr.f32.gmra.mrb[8].mxu0 %v10531_v21  ;;  %v10588_v59 = vsel %vm937_vm0, %v965_v43, %v966_v54  ;;  %v1494_v43 = vld [vmem:[#allocation4 + $0x778] sm:$0xff] }
 0x14d   :  { %1129 = vmatprep.mubr.f32.mxu0 %v10527_v62  ;;  %8397 = vmatpush1.bf16.msra.mxu0 %v8396_v4  ;;  %v972_v4 = vrot.slane %v10595_v46, 1 }
 0x14e   :  { %8399 = vmatprep.subr.bf16.mxu0 %v8398_v8 }
 0x14f   :  { %v10612_v8 = vsel %vm937_vm0, %v971_v3, %v972_v4  ;;  %v1496_v3 = vld [vmem:[#allocation4 + $0x788] sm:$0xff]  ;;  %v1498_v4 = vld [vmem:[#allocation4 + $0x798] sm:$0xff] }
 0x150   :  { %1130 = vmatmul.mubr.f32.gmra.mrb[10].mxu0 %v10543_v28  ;;  %v8426_v9 = vpack.c.bf16 %v1498_v4, %v1496_v3  ;;  %v1235_v4 = vrot.slane %v10425_v55, 1  ;;  %v1774_v55 = vld [vmem:[#allocation4 + $0x220] sm:$0xff] }
 0x151   :  { %1135 = vmatprep.mubr.f32.mxu0 %v10527_v62  ;;  %8401 = vmatpush1.bf16.msra.mxu0 %v8400_v16  ;;  %v980_v16 = vrot.slane %v10376_v51, 1  ;;  %v10655_v51 = vsel %vm937_vm0, %v983_v20, %v984_v22  ;;  %v8428_v20 = vpack.c.bf16 %v1497_v13, %v1495_v11  ;;  %v1770_v11 = vld [vmem:[#allocation4 + $0x200] sm:$0xff]  ;;  %v1772_v13 = vld [vmem:[#allocation4 + $0x210] sm:$0xff] }
 0x152   :  { %8403 = vmatprep.subr.bf16.mxu0 %v8402_v18  ;;  %v981_v18 = vrot.slane %v10631_v49, 1 }
 0x154   :  { %1136 = vmatmul.mubr.f32.gmra.mrb[12].mxu0 %v10555_v35  ;;  %v10648_v63 = vsel %vm937_vm0, %v980_v16, %v981_v18  ;;  %v1500_v16 = vld [vmem:[#allocation4 + $0x7a8] sm:$0xff]  ;;  %v1502_v18 = vld [vmem:[#allocation4 + $0x7b8] sm:$0xff] }
 0x155   :  { %1141 = vmatprep.mubr.f32.mxu0 %v10527_v62  ;;  %8405 = vmatpush1.bf16.msra.mxu0 %v8404_v27  ;;  %v1486_v27 = vld [vmem:[#allocation4 + $0x738] sm:$0xff]  ;;  %v8430_v22 = vpack.c.bf16 %v1502_v18, %v1500_v16  ;;  %v1775_v16 = vld [vmem:[#allocation4 + $0x228] sm:$0xff] }
 0x156   :  { %8407 = vmatprep.subr.bf16.mxu0 %v8406_v30  ;;  %v8412_v30 = vpack.c.bf16 %v1481_v25, %v1479_v24  ;;  %v8414_v31 = vpack.c.bf16 %v1486_v27, %v1484_v26  ;;  %v1499_v24 = vld [vmem:[#allocation4 + $0x7a0] sm:$0xff]  ;;  %v1501_v25 = vld [vmem:[#allocation4 + $0x7b0] sm:$0xff]  ;;  %v1504_v26 = vld [vmem:[#allocation4 + $0x7c8] sm:$0xff] }
 0x157   :  { %v1506_v27 = vld [vmem:[#allocation4 + $0x7d8] sm:$0xff] }
 0x158   :  { %1142 = vmatmul.mubr.f32.gmra.mrb[14].mxu0 %v10568_v42  ;;  %v8434_v52 = vpack.c.bf16 %v1506_v27, %v1504_v26  ;;  %v1777_v18 = vld [vmem:[#allocation4 + $0x238] sm:$0xff] }
 0x159   :  { %1147 = vmatprep.mubr.f32.mxu0 %v10527_v62  ;;  %8409 = vmatpush1.bf16.msra.mxu0 %v8408_v39  ;;  %v1487_v39 = vld [vmem:[#allocation4 + $0x740] sm:$0xff]  ;;  %v1781_v26 = vld [vmem:[#allocation4 + $0x258] sm:$0xff] }
 0x15a   :  { %8411 = vmatprep.subr.bf16.mxu0 %v8410_v41  ;;  %v1489_v41 = vld [vmem:[#allocation4 + $0x750] sm:$0xff] }
 0x15b   :  { %v8420_v54 = vpack.c.bf16 %v1489_v41, %v1487_v39  ;;  %v8436_v41 = vpack.c.bf16 %v1505_v34, %v1503_v32  ;;  %v1780_v32 = vld [vmem:[#allocation4 + $0x250] sm:$0xff]  ;;  %v1783_v34 = vld [vmem:[#allocation4 + $0x268] sm:$0xff] }
 0x15c   :  { %1148 = vmatmul.mubr.f32.gmra.mrb[16].mxu0 %v964_v45  ;;  %v1492_v45 = vld [vmem:[#allocation4 + $0x768] sm:$0xff] }
 0x15d   :  { %1153 = vmatprep.mubr.f32.mxu0 %v10527_v62  ;;  %v8422_v60 = vpack.c.bf16 %v1494_v43, %v1492_v45  ;;  %v1507_v43 = vld [vmem:[#allocation4 + $0x7e0] sm:$0xff] }
 0x160   :  { %1154 = vmatmul.mubr.f32.gmra.mrb[18].mxu0 %v10588_v59 }
 0x161   :  { %1159 = vmatprep.mubr.f32.mxu0 %v10527_v62 }
 0x164   :  { %1160 = vmatmul.mubr.f32.gmra.mrb[20].mxu0 %v10600_v2 }
 0x165   :  { %1165 = vmatprep.mubr.f32.mxu0 %v10527_v62 }
 0x168   :  { %1166 = vmatmul.mubr.f32.gmra.mrb[22].mxu0 %v10612_v8 }
 0x169   :  { %1171 = vmatprep.mubr.f32.mxu0 %v10527_v62 }
 0x16c   :  { %1172 = vmatmul.mubr.f32.gmra.mrb[24].mxu0 %v10624_v10 }
 0x16d   :  { %1177 = vmatprep.mubr.f32.mxu0 %v10527_v62 }
 0x170   :  { %1178 = vmatmul.mubr.f32.gmra.mrb[26].mxu0 %v10636_v15 }
 0x171   :  { %1183 = vmatprep.mubr.f32.mxu0 %v10527_v62 }
 0x174   :  { %1184 = vmatmul.mubr.f32.gmra.mrb[28].mxu0 %v10648_v63 }
 0x175   :  { %1189 = vmatprep.mubr.f32.mxu0 %v10527_v62 }
 0x178   :  { %1190 = vmatmul.mubr.f32.gmra.mrb[30].mxu0 %v10655_v51 }
 0x179   :  { %1337 = vmatprep.mubr.f32.mxu0 %v10527_v62 }
 0x17c   :  { %1338 = vmatmul.mubr.f32.vlgmr.msra.gmra.mrb[0].mxu0 %v10493_v19  ;;  %v1493_v19 = vld [vmem:[#allocation4 + $0x770] sm:$0xff] }
 0x17d   :  { %8413 = vmatpush1.bf16.msra.mxu0 %v8412_v30  ;;  %1343 = vmatprep.mubr.f32.mxu0 %v10527_v62  ;;  %v8424_v56 = vpack.c.bf16 %v1493_v19, %v1491_v0  ;;  %v8432_v30 = vpack.c.bf16 %v1501_v25, %v1499_v24  ;;  %v1773_v0 = vld [vmem:[#allocation4 + $0x218] sm:$0xff]  ;;  %v1776_v24 = vld [vmem:[#allocation4 + $0x230] sm:$0xff]  ;;  %v1779_v25 = vld [vmem:[#allocation4 + $0x248] sm:$0xff] }
 0x17e   :  { %8415 = vmatprep.subr.bf16.mxu0 %v8414_v31  ;;  %v10672_v31 = vld [vmem:[%s13353_s0 + $0x88] sm:$0x3]  ;;  %v8448_v27 = vpack.c.bf16 %v1776_v24, %v1774_v55  ;;  %v1801_v24 = vld [vmem:[#allocation4 + $0x2f8] sm:$0xff] }
 0x17f   :  { %v1233_v39 = vrot.slane %v10672_v31, 1  ;;  %v1799_v55 = vld [vmem:[#allocation4 + $0x2e8] sm:$0xff] }
 0x180   :  { %1344 = vmatmul.mubr.f32.gmra.mrb[2].mxu0 %v10505_v7 }
 0x181   :  { %1349 = vmatprep.mubr.f32.mxu0 %v10527_v62  ;;  %8417 = vmatpush1.bf16.msra.mxu0 %v8416_v37  ;;  %v1510_v37 = vld [vmem:[#allocation4 + $0x7f8] sm:$0xff] }
 0x182   :  { %8419 = vmatprep.subr.bf16.mxu0 %v8418_v38  ;;  %v1232_v38 = vrot.slane %v10404_v44, 1  ;;  %v8438_v45 = vpack.c.bf16 %v1510_v37, %v1508_v36  ;;  %v1785_v36 = vld [vmem:[#allocation4 + $0x278] sm:$0xff] }
 0x184   :  { %1350 = vmatmul.mubr.f32.gmra.mrb[4].mxu0 %v10517_v14  ;;  %v10681_v19 = vsel %vm937_vm0, %v1232_v38, %v1233_v39  ;;  %v8454_v38 = vpack.c.bf16 %v1785_v36, %v1783_v34  ;;  %v1782_v39 = vld [vmem:[#allocation4 + $0x260] sm:$0xff]  ;;  %v2007_v34 = vld [vmem:[#allocation4 + $0x518] sm:$0xff] }
 0x185   :  { %1355 = vmatprep.mubr.f32.mxu0 %v10527_v62  ;;  %8421 = vmatpush1.bf16.msra.mxu0 %v8420_v54  ;;  %v1509_v54 = vld [vmem:[#allocation4 + $0x7f0] sm:$0xff] }
 0x186   :  { %8423 = vmatprep.subr.bf16.mxu0 %v8422_v60  ;;  %v1771_v60 = vld [vmem:[#allocation4 + $0x208] sm:$0xff]  ;;  %v8440_v3 = vpack.c.bf16 %v1509_v54, %v1507_v43 }
 0x187   :  { %v8442_v44 = vpack.c.bf16 %v1773_v0, %v1771_v60  ;;  %v1786_v60 = vld [vmem:[#allocation4 + $0x280] sm:$0xff]  ;;  %v1791_v0 = vld [vmem:[#allocation4 + $0x2a8] sm:$0xff] }
 0x188   :  { %1356 = vmatmul.mubr.f32.gmra.mrb[6].mxu0 %v10531_v21 }
 0x189   :  { %1361 = vmatprep.mubr.f32.mxu0 %v10527_v62  ;;  %8425 = vmatpush1.bf16.msra.mxu0 %v8424_v56 }
 0x18a   :  { %8427 = vmatprep.subr.bf16.mxu0 %v8426_v9 }
 0x18c   :  { %1362 = vmatmul.mubr.f32.gmra.mrb[8].mxu0 %v10543_v28 }
 0x18d   :  { %1367 = vmatprep.mubr.f32.mxu0 %v10527_v62  ;;  %8429 = vmatpush1.bf16.msra.mxu0 %v8428_v20  ;;  %v8444_v20 = vpack.c.bf16 %v1772_v13, %v1770_v11  ;;  %v1795_v11 = vld [vmem:[#allocation4 + $0x2c8] sm:$0xff]  ;;  %v1797_v13 = vld [vmem:[#allocation4 + $0x2d8] sm:$0xff] }
 0x18e   :  { %8431 = vmatprep.subr.bf16.mxu0 %v8430_v22  ;;  %v8446_v22 = vpack.c.bf16 %v1777_v18, %v1775_v16  ;;  %v8466_v18 = vpack.c.bf16 %v1797_v13, %v1795_v11  ;;  %v2012_v11 = vld [vmem:[#allocation4 + $0x540] sm:$0xff]  ;;  %v2014_v13 = vld [vmem:[#allocation4 + $0x550] sm:$0xff] }
 0x190   :  { %1368 = vmatmul.mubr.f32.gmra.mrb[10].mxu0 %v10555_v35 }
 0x191   :  { %1373 = vmatprep.mubr.f32.mxu0 %v10527_v62  ;;  %8433 = vmatpush1.bf16.msra.mxu0 %v8432_v30  ;;  %v8450_v30 = vpack.c.bf16 %v1781_v26, %v1779_v25  ;;  %v1470_v25 = vrot.slane %v10446_v58, 1 }
 0x192   :  { %8435 = vmatprep.subr.bf16.mxu0 %v8434_v52  ;;  %v1778_v52 = vld [vmem:[#allocation4 + $0x240] sm:$0xff] }
 0x193   :  { %v8452_v37 = vpack.c.bf16 %v1780_v32, %v1778_v52  ;;  %v1800_v52 = vld [vmem:[#allocation4 + $0x2f0] sm:$0xff]  ;;  %v2005_v32 = vld [vmem:[#allocation4 + $0x508] sm:$0xff] }
 0x194   :  { %1374 = vmatmul.mubr.f32.gmra.mrb[12].mxu0 %v10568_v42  ;;  %v8474_v36 = vpack.c.bf16 %v2007_v34, %v2005_v32  ;;  %v9800_v32 = vld [vmem:[%s13353_s0 + $0x40] sm:$0xff] }
 0x195   :  { %1379 = vmatprep.mubr.f32.mxu0 %v10527_v62  ;;  %8437 = vmatpush1.bf16.msra.mxu0 %v8436_v41  ;;  %v1787_v41 = vld [vmem:[#allocation4 + $0x288] sm:$0xff]  ;;  %v1717_v34 = vrot.slane %v9800_v32, 2  ;;  %v1733_v32 = vrot.slane %v10574_v40, 2 }
 0x196   :  { %8439 = vmatprep.subr.bf16.mxu0 %v8438_v45  ;;  %v1789_v45 = vld [vmem:[#allocation4 + $0x298] sm:$0xff] }
 0x197   :  { %v8458_v54 = vpack.c.bf16 %v1789_v45, %v1787_v41  ;;  %v9797_v41 = vld [vmem:[%s13353_s0 + $0x10] sm:$0xff] }
 0x198   :  { %1380 = vmatmul.mubr.f32.gmra.mrb[14].mxu0 %v10681_v19  ;;  %v1708_v45 = vrot.slane %v9797_v41, 2 }
 0x199   :  { %1385 = vmatprep.mubr.f32.mxu0 %v10527_v62  ;;  %8441 = vmatpush1.bf16.msra.mxu0 %v8440_v3  ;;  %v1793_v3 = vld [vmem:[#allocation4 + $0x2b8] sm:$0xff] }
 0x19a   :  { %8443 = vmatprep.subr.bf16.mxu0 %v8442_v44 }
 0x19c   :  { %1386 = vmatmul.mubr.f32.gmra.mrb[16].mxu0 %v10588_v59  ;;  %v10698_v59 = vld [vmem:[%s13353_s0 + $0x128] sm:$0x3] }
 0x19d   :  { %1391 = vmatprep.mubr.f32.mxu0 %v10527_v62  ;;  %v1236_v56 = vrot.slane %v10698_v59, 1 }
 0x19f   :  { %v10707_v9 = vsel %vm937_vm0, %v1235_v4, %v1236_v56  ;;  %v8462_v4 = vpack.c.bf16 %v1793_v3, %v1791_v0  ;;  %v1790_v56 = vld [vmem:[#allocation4 + $0x2a0] sm:$0xff]  ;;  %v2015_v0 = vld [vmem:[#allocation4 + $0x558] sm:$0xff] }
 0x1a0   :  { %1392 = vmatmul.mubr.f32.gmra.mrb[18].mxu0 %v10600_v2 }
 0x1a1   :  { %1397 = vmatprep.mubr.f32.mxu0 %v10527_v62 }
 0x1a4   :  { %1398 = vmatmul.mubr.f32.gmra.mrb[20].mxu0 %v10612_v8 }
 0x1a5   :  { %1403 = vmatprep.mubr.f32.mxu0 %v10527_v62 }
 0x1a8   :  { %1404 = vmatmul.mubr.f32.gmra.mrb[22].mxu0 %v10624_v10 }
 0x1a9   :  { %1409 = vmatprep.mubr.f32.mxu0 %v10527_v62 }
 0x1ac   :  { %1410 = vmatmul.mubr.f32.gmra.mrb[24].mxu0 %v10636_v15 }
 0x1ad   :  { %1415 = vmatprep.mubr.f32.mxu0 %v10527_v62 }
 0x1b0   :  { %1416 = vmatmul.mubr.f32.gmra.mrb[26].mxu0 %v10648_v63 }
 0x1b1   :  { %1421 = vmatprep.mubr.f32.mxu0 %v10527_v62 }
 0x1b4   :  { %1422 = vmatmul.mubr.f32.gmra.mrb[28].mxu0 %v10655_v51 }
 0x1b5   :  { %1427 = vmatprep.mubr.f32.mxu0 %v10527_v62 }
 0x1b8   :  { %1428 = vmatmul.mubr.f32.gmra.mrb[30].mxu0 %v10707_v9 }
 0x1b9   :  { %1575 = vmatprep.mubr.f32.mxu0 %v10527_v62 }
 0x1bc   :  { %1576 = vmatmul.mubr.f32.vlgmr.msra.gmra.mrb[0].mxu0 %v10505_v7  ;;  %v1784_v7 = vld [vmem:[#allocation4 + $0x270] sm:$0xff] }
 0x1bd   :  { %8445 = vmatpush1.bf16.msra.mxu0 %v8444_v20  ;;  %1581 = vmatprep.mubr.f32.mxu0 %v10527_v62  ;;  %v8456_v43 = vpack.c.bf16 %v1784_v7, %v1782_v39  ;;  %v1794_v20 = vld [vmem:[#allocation4 + $0x2c0] sm:$0xff]  ;;  %v2011_v39 = vld [vmem:[#allocation4 + $0x538] sm:$0xff] }
 0x1be   :  { %8447 = vmatprep.subr.bf16.mxu0 %v8446_v22  ;;  %v1796_v22 = vld [vmem:[#allocation4 + $0x2d0] sm:$0xff] }
 0x1bf   :  { %v8468_v26 = vpack.c.bf16 %v1796_v22, %v1794_v20  ;;  %v9799_v22 = vld [vmem:[%s13353_s0 + $0x30] sm:$0xff] }
 0x1c0   :  { %1582 = vmatmul.mubr.f32.gmra.mrb[2].mxu0 %v10517_v14  ;;  %v1788_v14 = vld [vmem:[#allocation4 + $0x290] sm:$0xff] }
 0x1c1   :  { %1587 = vmatprep.mubr.f32.mxu0 %v10527_v62  ;;  %8449 = vmatpush1.bf16.msra.mxu0 %v8448_v27  ;;  %v8460_v44 = vpack.c.bf16 %v1788_v14, %v1786_v60  ;;  %v8470_v27 = vpack.c.bf16 %v1801_v24, %v1799_v55  ;;  %v2010_v60 = vld [vmem:[#allocation4 + $0x530] sm:$0xff]  ;;  %v2013_v14 = vld [vmem:[#allocation4 + $0x548] sm:$0xff]  ;;  %v1715_v55 = vrot.slane %v10500_v23, 2  ;;  %v8484_v24 = vpack.c.bf16 %v2014_v13, %v2012_v11  ;;  %v2032_v13 = vld [vmem:[#allocation4 + $0x5e0] sm:$0xff] }
 0x1c2   :  { %8451 = vmatprep.subr.bf16.mxu0 %v8450_v30  ;;  %v1798_v30 = vld [vmem:[#allocation4 + $0x2e0] sm:$0xff]  ;;  %v1718_v23 = vrot.slane %v10512_v33, 2 }
 0x1c3   :  { %v8472_v58 = vpack.c.bf16 %v1800_v52, %v1798_v30  ;;  %v2023_v30 = vld [vmem:[#allocation4 + $0x598] sm:$0xff] }
 0x1c4   :  { %1588 = vmatmul.mubr.f32.gmra.mrb[4].mxu0 %v10531_v21  ;;  %v1792_v21 = vld [vmem:[#allocation4 + $0x2b0] sm:$0xff] }
 0x1c5   :  { %1593 = vmatprep.mubr.f32.mxu0 %v10527_v62  ;;  %8453 = vmatpush1.bf16.msra.mxu0 %v8452_v37  ;;  %v8464_v16 = vpack.c.bf16 %v1792_v21, %v1790_v56  ;;  %v1706_v37 = vrot.slane %v10465_v61, 2  ;;  %v2008_v61 = vld [vmem:[#allocation4 + $0x520] sm:$0xff]  ;;  %v1712_v56 = vrot.slane %v10489_v12, 2  ;;  %v8482_v21 = vpack.c.bf16 %v2015_v0, %v2013_v14  ;;  %v2030_v14 = vld [vmem:[#allocation4 + $0x5d0] sm:$0xff]  ;;  %v2033_v0 = vld [vmem:[#allocation4 + $0x5e8] sm:$0xff] }
 0x1c6   :  { %8455 = vmatprep.subr.bf16.mxu0 %v8454_v38  ;;  %v2009_v38 = vld [vmem:[#allocation4 + $0x528] sm:$0xff]  ;;  %v1714_v12 = vrot.slane %v9799_v22, 2  ;;  %v2241_v22 = vld [vmem:[#allocation4 + $0x818] sm:$0xff] }
 0x1c8   :  { %1594 = vmatmul.mubr.f32.gmra.mrb[6].mxu0 %v10543_v28  ;;  %v10724_v28 = vld [vmem:[%s13353_s0 + $0x98] sm:$0x3]  ;;  %v10786_v52 = vsel %vm1704_vm1, %v1714_v12, %v1715_v55  ;;  %v9804_v12 = vld [vmem:[%s13353_s0 + $0xa0] sm:$0xff] }
 0x1c9   :  { %1599 = vmatprep.mubr.f32.mxu0 %v10527_v62  ;;  %8457 = vmatpush1.bf16.msra.mxu0 %v8456_v43  ;;  %v1709_v43 = vrot.slane %v10479_v5, 2  ;;  %v8480_v5 = vpack.c.bf16 %v2010_v60, %v2008_v61  ;;  %v2028_v60 = vld [vmem:[#allocation4 + $0x5c0] sm:$0xff]  ;;  %v1729_v55 = vrot.slane %v9804_v12, 2 }
 0x1ca   :  { %8459 = vmatprep.subr.bf16.mxu0 %v8458_v54  ;;  %v8478_v54 = vpack.c.bf16 %v2011_v39, %v2009_v38  ;;  %v2024_v38 = vld [vmem:[#allocation4 + $0x5a0] sm:$0xff]  ;;  %v2026_v39 = vld [vmem:[#allocation4 + $0x5b0] sm:$0xff] }
 0x1cb   :  { %v10768_v3 = vsel %vm1704_vm1, %v1708_v45, %v1709_v43  ;;  %v9802_v45 = vld [vmem:[%s13353_s0 + $0x60] sm:$0xff]  ;;  %v1724_v43 = vrot.slane %v10538_v6, 2 }
 0x1cc   :  { %1600 = vmatmul.mubr.f32.gmra.mrb[8].mxu0 %v10555_v35  ;;  %v1471_v35 = vrot.slane %v10724_v28, 1  ;;  %v2752_v12 = vld [vmem:[#allocation9 + $0x20] sm:$0xff] }
 0x1cd   :  { %1605 = vmatprep.mubr.f32.mxu0 %v10527_v62  ;;  %8461 = vmatpush1.bf16.msra.mxu0 %v8460_v44  ;;  %v9798_v44 = vld [vmem:[%s13353_s0 + $0x20] sm:$0xff] }
 0x1ce   :  { %8463 = vmatprep.subr.bf16.mxu0 %v8462_v4  ;;  %v1711_v4 = vrot.slane %v9798_v44, 2  ;;  %v2035_v44 = vld [vmem:[#allocation4 + $0x5f8] sm:$0xff] }
 0x1cf   :  { %v8502_v11 = vpack.c.bf16 %v2035_v44, %v2033_v0  ;;  %v2749_v0 = vld [vmem:[#allocation9 + $0x8] sm:$0xff]  ;;  %v2751_v44 = vld [vmem:[#allocation9 + $0x18] sm:$0xff] }
 0x1d0   :  { %1606 = vmatmul.mubr.f32.gmra.mrb[10].mxu0 %v10568_v42  ;;  %v1472_v42 = vsel %vm937_vm0, %v1470_v25, %v1471_v35  ;;  %v10777_v20 = vsel %vm1704_vm1, %v1711_v4, %v1712_v56  ;;  %v2016_v35 = vld [vmem:[#allocation4 + $0x560] sm:$0xff]  ;;  %v9803_v56 = vld [vmem:[%s13353_s0 + $0x70] sm:$0xff] }
 0x1d1   :  { %1611 = vmatprep.mubr.f32.mxu0 %v10527_v62  ;;  %8465 = vmatpush1.bf16.msra.mxu0 %v8464_v16  ;;  %v2017_v16 = vld [vmem:[#allocation4 + $0x568] sm:$0xff]  ;;  %v1726_v6 = vrot.slane %v9803_v56, 2 }
 0x1d2   :  { %8467 = vmatprep.subr.bf16.mxu0 %v8466_v18  ;;  %v2019_v18 = vld [vmem:[#allocation4 + $0x578] sm:$0xff]  ;;  %v2748_v56 = vld [vmem:[#allocation9] sm:$0xff] }
 0x1d3   :  { %v8486_v25 = vpack.c.bf16 %v2019_v18, %v2017_v16  ;;  %v2034_v16 = vld [vmem:[#allocation4 + $0x5f0] sm:$0xff]  ;;  %v2239_v18 = vld [vmem:[#allocation4 + $0x808] sm:$0xff] }
 0x1d4   :  { %1612 = vmatmul.mubr.f32.gmra.mrb[12].mxu0 %v10681_v19 }
 0x1d5   :  { %1617 = vmatprep.mubr.f32.mxu0 %v10527_v62  ;;  %8469 = vmatpush1.bf16.msra.mxu0 %v8468_v26  ;;  %v2018_v26 = vld [vmem:[#allocation4 + $0x570] sm:$0xff] }
 0x1d6   :  { %8471 = vmatprep.subr.bf16.mxu0 %v8470_v27  ;;  %v2021_v27 = vld [vmem:[#allocation4 + $0x588] sm:$0xff] }
 0x1d8   :  { %1618 = vmatmul.mubr.f32.gmra.mrb[14].mxu0 %v1472_v42  ;;  %v8488_v42 = vpack.c.bf16 %v2018_v26, %v2016_v35  ;;  %v8506_v35 = vpack.c.bf16 %v2241_v22, %v2239_v18 }
 0x1d9   :  { %1623 = vmatprep.mubr.f32.mxu0 %v10527_v62  ;;  %8473 = vmatpush1.bf16.msra.mxu0 %v8472_v58  ;;  %v8490_v58 = vpack.c.bf16 %v2023_v30, %v2021_v27  ;;  %v9805_v27 = vld [vmem:[%s13353_s0 + $0xb0] sm:$0xff] }
 0x1da   :  { %8475 = vmatprep.subr.bf16.mxu0 %v8474_v36  ;;  %v2020_v36 = vld [vmem:[#allocation4 + $0x580] sm:$0xff]  ;;  %v1732_v30 = vrot.slane %v9805_v27, 2 }
 0x1dc   :  { %1624 = vmatmul.mubr.f32.gmra.mrb[16].mxu0 %v10600_v2  ;;  %v10747_v2 = vld [vmem:[%s13353_s0 + $0x138] sm:$0x3] }
 0x1dd   :  { %1629 = vmatprep.mubr.f32.mxu0 %v10527_v62 }
 0x1e0   :  { %1630 = vmatmul.mubr.f32.gmra.mrb[18].mxu0 %v10612_v8  ;;  %v1473_v8 = vrot.slane %v10473_v1, 1  ;;  %v2006_v1 = vld [vmem:[#allocation4 + $0x510] sm:$0xff] }
 0x1e1   :  { %1635 = vmatprep.mubr.f32.mxu0 %v10527_v62 }
 0x1e4   :  { %1636 = vmatmul.mubr.f32.gmra.mrb[20].mxu0 %v10624_v10  ;;  %v1474_v10 = vrot.slane %v10747_v2, 1 }
 0x1e5   :  { %1641 = vmatprep.mubr.f32.mxu0 %v10527_v62 }
 0x1e6   :  { %v1475_v19 = vsel %vm937_vm0, %v1473_v8, %v1474_v10  ;;  %v2022_v8 = vld [vmem:[#allocation4 + $0x590] sm:$0xff]  ;;  %v2025_v10 = vld [vmem:[#allocation4 + $0x5a8] sm:$0xff] }
 0x1e8   :  { %1642 = vmatmul.mubr.f32.gmra.mrb[22].mxu0 %v10636_v15  ;;  %v9796_v15 = vld [vmem:[%s13353_s0] sm:$0xff] }
 0x1e9   :  { %1647 = vmatprep.mubr.f32.mxu0 %v10527_v62 }
 0x1ec   :  { %1648 = vmatmul.mubr.f32.gmra.mrb[24].mxu0 %v10648_v63  ;;  %v1705_v63 = vrot.slane %v9796_v15, 2  ;;  %v2027_v15 = vld [vmem:[#allocation4 + $0x5b8] sm:$0xff] }
 0x1ed   :  { %1653 = vmatprep.mubr.f32.mxu0 %v10527_v62 }
 0x1f0   :  { %1654 = vmatmul.mubr.f32.gmra.mrb[26].mxu0 %v10655_v51  ;;  %v2004_v51 = vld [vmem:[#allocation4 + $0x500] sm:$0xff] }
 0x1f1   :  { %1659 = vmatprep.mubr.f32.mxu0 %v10527_v62  ;;  %v8476_v7 = vpack.c.bf16 %v2006_v1, %v2004_v51  ;;  %v8492_v51 = vpack.c.bf16 %v2022_v8, %v2020_v36  ;;  %v8494_v1 = vpack.c.bf16 %v2027_v15, %v2025_v10  ;;  %v1739_v8 = vrot.slane %v10595_v46, 2  ;;  %v9808_v10 = vld [vmem:[%s13353_s0 + $0xe0] sm:$0xff] }
 0x1f2   :  { %v1741_v15 = vrot.slane %v9808_v10, 2  ;;  %v2761_v10 = vld [vmem:[#allocation9 + $0x68] sm:$0xff] }
 0x1f4   :  { %1660 = vmatmul.mubr.f32.gmra.mrb[28].mxu0 %v10707_v9  ;;  %v1707_v9 = vsel %vm1704_vm1, %v1705_v63, %v1706_v37  ;;  %v10795_v63 = vsel %vm1704_vm1, %v1717_v34, %v1718_v23  ;;  %v1721_v37 = vrot.slane %v10524_v53, 2  ;;  %v1723_v53 = vrot.slane %v9802_v45, 2  ;;  %v9806_v34 = vld [vmem:[%s13353_s0 + $0xc0] sm:$0xff] }
 0x1f5   :  { %1665 = vmatprep.mubr.f32.mxu0 %v10527_v62  ;;  %v1735_v23 = vrot.slane %v9806_v34, 2  ;;  %v1751_v45 = vrot.slane %v10643_v50, 2 }
 0x1f6   :  { %v10813_v4 = vsel %vm1704_vm1, %v1723_v53, %v1724_v43  ;;  %v2238_v53 = vld [vmem:[#allocation4 + $0x800] sm:$0xff]  ;;  %v2240_v43 = vld [vmem:[#allocation4 + $0x810] sm:$0xff] }
 0x1f7   :  { %v8508_v50 = vpack.c.bf16 %v2240_v43, %v2238_v53  ;;  %v2767_v53 = vld [vmem:[#allocation9 + $0x98] sm:$0xff] }
 0x1f8   :  { %1666 = vmatmul.mubr.f32.gmra.mrb[30].mxu0 %v1475_v19  ;;  %v9801_v19 = vld [vmem:[%s13353_s0 + $0x50] sm:$0xff] }
 0x1f9   :  { %1866 = vmatprep.mubr.f32.mxu0 %v10527_v62  ;;  %v1720_v33 = vrot.slane %v9801_v19, 2  ;;  %v1742_v19 = vrot.slane %v10607_v47, 2 }
 0x1fb   :  { %v10804_v41 = vsel %vm1704_vm1, %v1720_v33, %v1721_v37  ;;  %v10864_v46 = vsel %vm1704_vm1, %v1741_v15, %v1742_v19  ;;  %v9809_v33 = vld [vmem:[%s13353_s0 + $0xf0] sm:$0xff]  ;;  %v2763_v15 = vld [vmem:[#allocation9 + $0x78] sm:$0xff] }
 0x1fc   :  { %1867 = vmatmul.mubr.f32.vlgmr.msra.gmra.mrb[0].mxu0 %v1707_v9  ;;  %v2029_v9 = vld [vmem:[#allocation4 + $0x5c8] sm:$0xff]  ;;  %v1744_v37 = vrot.slane %v9809_v33, 2 }
 0x1fd   :  { %8477 = vmatpush1.bf16.msra.mxu0 %v8476_v7  ;;  %1872 = vmatprep.mubr.f32.mxu0 %v10527_v62  ;;  %v2031_v7 = vld [vmem:[#allocation4 + $0x5d8] sm:$0xff]  ;;  %v2760_v33 = vld [vmem:[#allocation9 + $0x60] sm:$0xff] }
 0x1fe   :  { %8479 = vmatprep.subr.bf16.mxu0 %v8478_v54  ;;  %v8496_v54 = vpack.c.bf16 %v2026_v39, %v2024_v38  ;;  %v8498_v61 = vpack.c.bf16 %v2031_v7, %v2029_v9  ;;  %v1748_v39 = vrot.slane %v10631_v49, 2  ;;  %v9811_v9 = vld [vmem:[%s13353_s0 + $0x110] sm:$0xff] }
 0x1ff   :  { %v1750_v7 = vrot.slane %v9811_v9, 2  ;;  %v8550_v9 = vpack.c.bf16 %v2763_v15, %v2761_v10  ;;  %v2269_v15 = vld [vmem:[#allocation4 + $0x8f8] sm:$0xff] }
 0x200   :  { %1873 = vmatmul.mubr.f32.gmra.mrb[2].mxu0 %v10768_v3 }
 0x201   :  { %1878 = vmatprep.mubr.f32.mxu0 %v10527_v62  ;;  %8481 = vmatpush1.bf16.msra.mxu0 %v8480_v5  ;;  %v1727_v5 = vrot.slane %v10550_v17, 2  ;;  %v1730_v17 = vrot.slane %v10562_v29, 2  ;;  %v10837_v29 = vsel %vm1704_vm1, %v1732_v30, %v1733_v32  ;;  %v10891_v49 = vsel %vm1704_vm1, %v1750_v7, %v1751_v45  ;;  %v2756_v30 = vld [vmem:[#allocation9 + $0x40] sm:$0xff]  ;;  %v2758_v32 = vld [vmem:[#allocation9 + $0x50] sm:$0xff]  ;;  %v2765_v45 = vld [vmem:[#allocation9 + $0x88] sm:$0xff] }
 0x202   :  { %8483 = vmatprep.subr.bf16.mxu0 %v8482_v21  ;;  %v8500_v21 = vpack.c.bf16 %v2030_v14, %v2028_v60  ;;  %v2242_v60 = vld [vmem:[#allocation4 + $0x820] sm:$0xff]  ;;  %v2244_v14 = vld [vmem:[#allocation4 + $0x830] sm:$0xff]  ;;  %v2257_v7 = vld [vmem:[#allocation4 + $0x898] sm:$0xff] }
 0x203   :  { %v1731_v26 = vsel %vm1704_vm1, %v1729_v55, %v1730_v17  ;;  %v2754_v55 = vld [vmem:[#allocation9 + $0x30] sm:$0xff]  ;;  %v8512_v27 = vpack.c.bf16 %v2244_v14, %v2242_v60 }
 0x204   :  { %1879 = vmatmul.mubr.f32.gmra.mrb[4].mxu0 %v10777_v20  ;;  %v2249_v17 = vld [vmem:[#allocation4 + $0x858] sm:$0xff] }
 0x205   :  { %1884 = vmatprep.mubr.f32.mxu0 %v10527_v62  ;;  %8485 = vmatpush1.bf16.msra.mxu0 %v8484_v24  ;;  %v10825_v24 = vsel %vm1704_vm1, %v1726_v6, %v1727_v5  ;;  %v8538_v6 = vpack.c.bf16 %v2751_v44, %v2749_v0  ;;  %v2750_v5 = vld [vmem:[#allocation9 + $0x10] sm:$0xff]  ;;  %v2254_v0 = vld [vmem:[#allocation4 + $0x880] sm:$0xff] }
 0x206   :  { %8487 = vmatprep.subr.bf16.mxu0 %v8486_v25  ;;  %v8504_v25 = vpack.c.bf16 %v2034_v16, %v2032_v13  ;;  %v2247_v16 = vld [vmem:[#allocation4 + $0x848] sm:$0xff]  ;;  %v8540_v18 = vpack.c.bf16 %v2750_v5, %v2748_v56  ;;  %v2766_v60 = vld [vmem:[#allocation9 + $0x90] sm:$0xff] }
 0x207   :  { %8539 = vmatprep.subr.bf16.mxu1 %v8538_v6  ;;  %v8514_v34 = vpack.c.bf16 %v2249_v17, %v2247_v16  ;;  %v2256_v44 = vld [vmem:[#allocation4 + $0x890] sm:$0xff]  ;;  %v2259_v56 = vld [vmem:[#allocation4 + $0x8a8] sm:$0xff]  ;;  %v2261_v6 = vld [vmem:[#allocation4 + $0x8b8] sm:$0xff] }
 0x208   :  { %1885 = vmatmul.mubr.f32.gmra.mrb[6].mxu0 %v10786_v52  ;;  %8541 = vmatpush1.bf16.msra.mxu1 %v8540_v18  ;;  %v2769_v5 = vld [vmem:[#allocation9 + $0xa8] sm:$0xff]  ;;  %v2768_v16 = vld [vmem:[#allocation9 + $0xa0] sm:$0xff]  ;;  %v2770_v18 = vld [vmem:[#allocation9 + $0xb0] sm:$0xff] }
 0x209   :  { %1890 = vmatprep.mubr.f32.mxu0 %v10527_v62  ;;  %8489 = vmatpush1.bf16.msra.mxu0 %v8488_v42  ;;  %v1736_v42 = vrot.slane %v10584_v57, 2  ;;  %v2263_v17 = vld [vmem:[#allocation4 + $0x8c8] sm:$0xff] }
 0x20a   :  { %8491 = vmatprep.subr.bf16.mxu0 %v8490_v58  ;;  %v9807_v58 = vld [vmem:[%s13353_s0 + $0xd0] sm:$0xff] }
 0x20b   :  { %v10846_v40 = vsel %vm1704_vm1, %v1735_v23, %v1736_v42  ;;  %v1738_v36 = vrot.slane %v9807_v58, 2  ;;  %v2246_v23 = vld [vmem:[#allocation4 + $0x840] sm:$0xff]  ;;  %v2248_v42 = vld [vmem:[#allocation4 + $0x850] sm:$0xff]  ;;  %v2251_v58 = vld [vmem:[#allocation4 + $0x868] sm:$0xff] }
 0x20c   :  { %1891 = vmatmul.mubr.f32.gmra.mrb[8].mxu0 %v10795_v63  ;;  %v8516_v19 = vpack.c.bf16 %v2248_v42, %v2246_v23  ;;  %v2774_v23 = vld [vmem:[#allocation9 + $0xd0] sm:$0xff] }
 0x20d   :  { %1896 = vmatprep.mubr.f32.mxu0 %v10527_v62  ;;  %8493 = vmatpush1.bf16.msra.mxu0 %v8492_v51  ;;  %v10855_v57 = vsel %vm1704_vm1, %v1738_v36, %v1739_v8  ;;  %v1745_v51 = vrot.slane %v10619_v48, 2  ;;  %v2253_v8 = vld [vmem:[#allocation4 + $0x878] sm:$0xff] }
 0x20e   :  { %8495 = vmatprep.subr.bf16.mxu0 %v8494_v1  ;;  %v9810_v1 = vld [vmem:[%s13353_s0 + $0x100] sm:$0xff] }
 0x20f   :  { %v10873_v47 = vsel %vm1704_vm1, %v1744_v37, %v1745_v51  ;;  %v1747_v38 = vrot.slane %v9810_v1, 2  ;;  %v2762_v37 = vld [vmem:[#allocation9 + $0x70] sm:$0xff]  ;;  %v8518_v51 = vpack.c.bf16 %v2253_v8, %v2251_v58  ;;  %v2250_v1 = vld [vmem:[#allocation4 + $0x860] sm:$0xff]  ;;  %v2267_v8 = vld [vmem:[#allocation4 + $0x8e8] sm:$0xff] }
 0x210   :  { %1897 = vmatmul.mubr.f32.gmra.mrb[10].mxu0 %v10804_v41  ;;  %v8552_v43 = vpack.c.bf16 %v2762_v37, %v2760_v33  ;;  %v2262_v58 = vld [vmem:[#allocation4 + $0x8c0] sm:$0xff] }
 0x211   :  { %1902 = vmatprep.mubr.f32.mxu0 %v10527_v62  ;;  %8497 = vmatpush1.bf16.msra.mxu0 %v8496_v54  ;;  %v10882_v48 = vsel %vm1704_vm1, %v1747_v38, %v1748_v39  ;;  %v2243_v54 = vld [vmem:[#allocation4 + $0x828] sm:$0xff]  ;;  %v2252_v38 = vld [vmem:[#allocation4 + $0x870] sm:$0xff]  ;;  %v9813_v37 = vld [vmem:[%s13353_s0 + $0x80] sm:$0xff] }
 0x212   :  { %8499 = vmatprep.subr.bf16.mxu0 %v8498_v61  ;;  %v2245_v61 = vld [vmem:[#allocation4 + $0x838] sm:$0xff]  ;;  %v2255_v39 = vld [vmem:[#allocation4 + $0x888] sm:$0xff] }
 0x213   :  { %v8510_v13 = vpack.c.bf16 %v2245_v61, %v2243_v54  ;;  %v10900_v54 = vld [vmem:[#allocation2] sm:$0xff]  ;;  %v8522_v14 = vpack.c.bf16 %v2257_v7, %v2255_v39  ;;  %v8534_v7 = vpack.c.bf16 %v2269_v15, %v2267_v8  ;;  %v2798_v15 = vld [vmem:[#allocation9 + $0x190] sm:$0xff] }
 0x214   :  { %1903 = vmatmul.mubr.f32.gmra.mrb[12].mxu0 %v10813_v4  ;;  %v2764_v61 = vld [vmem:[#allocation9 + $0x80] sm:$0xff] }
 0x215   :  { %1908 = vmatprep.mubr.f32.mxu0 %v10527_v62  ;;  %8501 = vmatpush1.bf16.msra.mxu0 %v8500_v21  ;;  %v2753_v21 = vld [vmem:[#allocation9 + $0x28] sm:$0xff]  ;;  %v2776_v39 = vld [vmem:[#allocation9 + $0xe0] sm:$0xff] }
 0x216   :  { %8503 = vmatprep.subr.bf16.mxu0 %v8502_v11  ;;  %v2755_v11 = vld [vmem:[#allocation9 + $0x38] sm:$0xff] }
 0x217   :  { %v8542_v22 = vpack.c.bf16 %v2755_v11, %v2753_v21  ;;  %v2771_v21 = vld [vmem:[#allocation9 + $0xb8] sm:$0xff]  ;;  %v8556_v11 = vpack.c.bf16 %v2766_v60, %v2764_v61  ;;  %v2781_v60 = vld [vmem:[#allocation9 + $0x108] sm:$0xff] }
 0x218   :  { %1909 = vmatmul.mubr.f32.gmra.mrb[14].mxu0 %v10825_v24  ;;  %v5215_v61 = vld [vmem:[#allocation9 + $0x1018] sm:$0xff] }
 0x219   :  { %1914 = vmatprep.mubr.f32.mxu0 %v10527_v62  ;;  %8505 = vmatpush1.bf16.msra.mxu0 %v8504_v25  ;;  %v2757_v25 = vld [vmem:[#allocation9 + $0x48] sm:$0xff] }
 0x21a   :  { %8507 = vmatprep.subr.bf16.mxu0 %v8506_v35  ;;  %v2759_v35 = vld [vmem:[#allocation9 + $0x58] sm:$0xff]  ;;  %8543 = vmatprep.subr.bf16.mxu1 %v8542_v22  ;;  %v8526_v22 = vpack.c.bf16 %v2261_v6, %v2259_v56  ;;  %v2780_v56 = vld [vmem:[#allocation9 + $0x100] sm:$0xff] }
 0x21b   :  { %v8546_v36 = vpack.c.bf16 %v2759_v35, %v2757_v25  ;;  %v8558_v25 = vpack.c.bf16 %v2771_v21, %v2769_v5  ;;  %v2265_v35 = vld [vmem:[#allocation4 + $0x8d8] sm:$0xff]  ;;  %v2785_v21 = vld [vmem:[#allocation9 + $0x128] sm:$0xff] }
 0x21c   :  { %1915 = vmatmul.mubr.f32.gmra.mrb[16].mxu0 %v1731_v26  ;;  %v8544_v26 = vpack.c.bf16 %v2754_v55, %v2752_v12  ;;  %v2258_v12 = vld [vmem:[#allocation4 + $0x8a0] sm:$0xff]  ;;  %v2260_v55 = vld [vmem:[#allocation4 + $0x8b0] sm:$0xff]  ;;  %v8530_v42 = vpack.c.bf16 %v2265_v35, %v2263_v17 }
 0x21d   :  { %1920 = vmatprep.mubr.f32.mxu0 %v10527_v62  ;;  %v2788_v35 = vld [vmem:[#allocation9 + $0x140] sm:$0xff] }
 0x21e   :  { %8545 = vmatpush1.bf16.msra.mxu1 %v8544_v26  ;;  %v2773_v26 = vld [vmem:[#allocation9 + $0xc8] sm:$0xff] }
 0x21f   :  { %8547 = vmatprep.subr.bf16.mxu1 %v8546_v36  ;;  %v2264_v36 = vld [vmem:[#allocation4 + $0x8d0] sm:$0xff] }
 0x220   :  { %1921 = vmatmul.mubr.f32.gmra.mrb[18].mxu0 %v10837_v29 }
 0x221   :  { %1926 = vmatprep.mubr.f32.mxu0 %v10527_v62 }
 0x224   :  { %1927 = vmatmul.mubr.f32.gmra.mrb[20].mxu0 %v10846_v40 }
 0x225   :  { %1932 = vmatprep.mubr.f32.mxu0 %v10527_v62 }
 0x228   :  { %1933 = vmatmul.mubr.f32.gmra.mrb[22].mxu0 %v10855_v57 }
 0x229   :  { %1938 = vmatprep.mubr.f32.mxu0 %v10527_v62 }
 0x22c   :  { %1939 = vmatmul.mubr.f32.gmra.mrb[24].mxu0 %v10864_v46 }
 0x22d   :  { %1944 = vmatprep.mubr.f32.mxu0 %v10527_v62 }
 0x230   :  { %1945 = vmatmul.mubr.f32.gmra.mrb[26].mxu0 %v10873_v47 }
 0x231   :  { %1950 = vmatprep.mubr.f32.mxu0 %v10527_v62 }
 0x234   :  { %1951 = vmatmul.mubr.f32.gmra.mrb[28].mxu0 %v10882_v48 }
 0x235   :  { %1956 = vmatprep.mubr.f32.mxu0 %v10527_v62 }
 0x238   :  { %1957 = vmatmul.mubr.f32.gmra.mrb[30].mxu0 %v10891_v49 }
 0x239   :  { %2100 = vmatprep.mubr.f32.mxu0 %v10527_v62 }
 0x23c   :  { %2101 = vmatmul.mubr.f32.vlgmr.msra.gmra.mrb[0].mxu0 %v10768_v3  ;;  %v8548_v3 = vpack.c.bf16 %v2758_v32, %v2756_v30  ;;  %v8560_v30 = vpack.c.bf16 %v2770_v18, %v2768_v16  ;;  %v8528_v32 = vpack.c.bf16 %v2260_v55, %v2258_v12  ;;  %v2784_v18 = vld [vmem:[#allocation9 + $0x120] sm:$0xff]  ;;  %v2789_v12 = vld [vmem:[#allocation9 + $0x148] sm:$0xff]  ;;  %v2791_v55 = vld [vmem:[#allocation9 + $0x158] sm:$0xff] }
 0x23d   :  { %8509 = vmatpush1.bf16.msra.mxu0 %v8508_v50  ;;  %2106 = vmatprep.mubr.f32.mxu0 %v10527_v62  ;;  %v8554_v50 = vpack.c.bf16 %v2767_v53, %v2765_v45  ;;  %v2266_v45 = vld [vmem:[#allocation4 + $0x8e0] sm:$0xff]  ;;  %v2268_v53 = vld [vmem:[#allocation4 + $0x8f0] sm:$0xff] }
 0x23e   :  { %8511 = vmatprep.subr.bf16.mxu0 %v8510_v13  ;;  %8549 = vmatpush1.bf16.msra.mxu1 %v8548_v3  ;;  %v8524_v13 = vpack.c.bf16 %v2256_v44, %v2254_v0  ;;  %v2777_v3 = vld [vmem:[#allocation9 + $0xe8] sm:$0xff]  ;;  %v8536_v44 = vpack.c.bf16 %v2268_v53, %v2266_v45  ;;  %v5218_v53 = vld [vmem:[#allocation9 + $0x1030] sm:$0xff] }
 0x23f   :  { %8551 = vmatprep.subr.bf16.mxu1 %v8550_v9  ;;  %v2778_v9 = vld [vmem:[#allocation9 + $0xf0] sm:$0xff] }
 0x240   :  { %2107 = vmatmul.mubr.f32.gmra.mrb[2].mxu0 %v10777_v20  ;;  %v8568_v0 = vpack.c.bf16 %v2778_v9, %v2776_v39  ;;  %v5217_v39 = vld [vmem:[#allocation9 + $0x1028] sm:$0xff]  ;;  %v5219_v9 = vld [vmem:[#allocation9 + $0x1038] sm:$0xff] }
 0x241   :  { %2112 = vmatprep.mubr.f32.mxu0 %v10527_v62  ;;  %8513 = vmatpush1.bf16.msra.mxu0 %v8512_v27  ;;  %v8520_v62 = vpack.c.bf16 %v2252_v38, %v2250_v1  ;;  %v2775_v27 = vld [vmem:[#allocation9 + $0xd8] sm:$0xff]  ;;  %v1996_v1 = vrot.slane %v10672_v31, 2  ;;  %v8532_v38 = vpack.c.bf16 %v2264_v36, %v2262_v58  ;;  %v10948_v45 = vpack.c.bf16 %v5219_v9, %v5217_v39 }
 0x242   :  { %8515 = vmatprep.subr.bf16.mxu0 %v8514_v34  ;;  %8553 = vmatpush1.bf16.msra.mxu1 %v8552_v43  ;;  %v2772_v34 = vld [vmem:[#allocation9 + $0xc0] sm:$0xff]  ;;  %v8562_v10 = vpack.c.bf16 %v2775_v27, %v2773_v26  ;;  %v5213_v43 = vld [vmem:[#allocation9 + $0x1008] sm:$0xff]  ;;  %v2790_v26 = vld [vmem:[#allocation9 + $0x150] sm:$0xff] }
 0x243   :  { %8555 = vmatprep.subr.bf16.mxu1 %v8554_v50  ;;  %v8564_v33 = vpack.c.bf16 %v2774_v23, %v2772_v34  ;;  %v2782_v50 = vld [vmem:[#allocation9 + $0x110] sm:$0xff]  ;;  %v10918_v6 = vpack.c.bf16 %v5215_v61, %v5213_v43  ;;  %v2793_v27 = vld [vmem:[#allocation9 + $0x168] sm:$0xff]  ;;  %v2792_v23 = vld [vmem:[#allocation9 + $0x160] sm:$0xff] }
 0x244   :  { %2113 = vmatmul.mubr.f32.gmra.mrb[4].mxu0 %v10786_v52  ;;  %v2799_v58 = vld [vmem:[#allocation9 + $0x198] sm:$0xff]  ;;  %v5221_v43 = vld [vmem:[#allocation9 + $0x1048] sm:$0xff] }
 0x245   :  { %2118 = vmatprep.mubr.f32.mxu0 %v10900_v54  ;;  %8517 = vmatpush1.bf16.msra.mxu0 %v8516_v19  ;;  %v2779_v19 = vld [vmem:[#allocation9 + $0xf8] sm:$0xff] }
 0x246   :  { %8519 = vmatprep.subr.bf16.mxu0 %v8518_v51  ;;  %8557 = vmatpush1.bf16.msra.mxu1 %v8556_v11  ;;  %v1995_v51 = vrot.slane %v9813_v37, 2  ;;  %v2787_v11 = vld [vmem:[#allocation9 + $0x138] sm:$0xff]  ;;  %v1999_v37 = vrot.slane %v10698_v59, 2  ;;  %v5216_v59 = vld [vmem:[#allocation9 + $0x1020] sm:$0xff] }
 0x247   :  { %8559 = vmatprep.subr.bf16.mxu1 %v8558_v25  ;;  %v8574_v16 = vpack.c.bf16 %v2787_v11, %v2785_v21  ;;  %v8578_v25 = vpack.c.bf16 %v2791_v55, %v2789_v12  ;;  %v10953_v61 = vpack.c.bf16 %v5218_v53, %v5216_v59  ;;  %v5226_v21 = vld [vmem:[#allocation9 + $0x1070] sm:$0xff]  ;;  %v5229_v11 = vld [vmem:[#allocation9 + $0x1088] sm:$0xff]  ;;  %v5235_v55 = vld [vmem:[#allocation9 + $0x10b8] sm:$0xff] }
 0x248   :  { %2119 = vmatmul.mubr.f32.gmra.mrb[6].mxu0 %v10795_v63  ;;  %v10916_v31 = vsel %vm1704_vm1, %v1995_v51, %v1996_v1  ;;  %v5212_v1 = vld [vmem:[#allocation9 + $0x1000] sm:$0xff]  ;;  %v5233_v12 = vld [vmem:[#allocation9 + $0x10a8] sm:$0xff]  ;;  %v5251_v39 = vld [vmem:[#allocation9 + $0x1138] sm:$0xff] }
 0x249   :  { %2124 = vmatprep.mubr.f32.mxu0 %v10900_v54  ;;  %8521 = vmatpush1.bf16.msra.mxu0 %v8520_v62  ;;  %v8566_v62 = vpack.c.bf16 %v2779_v19, %v2777_v3  ;;  %v9814_v19 = vld [vmem:[%s13353_s0 + $0x120] sm:$0xff]  ;;  %v5250_v53 = vld [vmem:[#allocation9 + $0x1130] sm:$0xff] }
 0x24a   :  { %8523 = vmatprep.subr.bf16.mxu0 %v8522_v14  ;;  %8561 = vmatpush1.bf16.msra.mxu1 %v8560_v30  ;;  %v2783_v14 = vld [vmem:[#allocation9 + $0x118] sm:$0xff]  ;;  %v5248_v59 = vld [vmem:[#allocation9 + $0x1120] sm:$0xff] }
 0x24b   :  { %8563 = vmatprep.subr.bf16.mxu1 %v8562_v10  ;;  %v8570_v5 = vpack.c.bf16 %v2783_v14, %v2781_v60  ;;  %v2795_v30 = vld [vmem:[#allocation9 + $0x178] sm:$0xff]  ;;  %v2796_v10 = vld [vmem:[#allocation9 + $0x180] sm:$0xff] }
 0x24c   :  { %2125 = vmatmul.mubr.f32.gmra.mrb[8].mxu0 %v10804_v41  ;;  %v8582_v34 = vpack.c.bf16 %v2795_v30, %v2793_v27  ;;  %v8588_v3 = vpack.c.bf16 %v2798_v15, %v2796_v10  ;;  %v5220_v14 = vld [vmem:[#allocation9 + $0x1040] sm:$0xff]  ;;  %v5239_v27 = vld [vmem:[#allocation9 + $0x10d8] sm:$0xff]  ;;  %v5242_v15 = vld [vmem:[#allocation9 + $0x10f0] sm:$0xff] }
 0x24d   :  { %2130 = vmatprep.mubr.f32.mxu0 %v10900_v54  ;;  %8525 = vmatpush1.bf16.msra.mxu0 %v8524_v13  ;;  %v8572_v13 = vpack.c.bf16 %v2782_v50, %v2780_v56  ;;  %v5227_v56 = vld [vmem:[#allocation9 + $0x1078] sm:$0xff]  ;;  %v5240_v10 = vld [vmem:[#allocation9 + $0x10e0] sm:$0xff] }
 0x24e   :  { %8527 = vmatprep.subr.bf16.mxu0 %v8526_v22  ;;  %8565 = vmatpush1.bf16.msra.mxu1 %v8564_v33  ;;  %v2786_v22 = vld [vmem:[#allocation9 + $0x130] sm:$0xff]  ;;  %v1998_v33 = vrot.slane %v9814_v19, 2 }
 0x24f   :  { %8567 = vmatprep.subr.bf16.mxu1 %v8566_v62  ;;  %v8576_v17 = vpack.c.bf16 %v2786_v22, %v2784_v18  ;;  %v5223_v62 = vld [vmem:[#allocation9 + $0x1058] sm:$0xff]  ;;  %v5228_v18 = vld [vmem:[#allocation9 + $0x1080] sm:$0xff]  ;;  %v5230_v22 = vld [vmem:[#allocation9 + $0x1090] sm:$0xff] }
 0x250   :  { %2131 = vmatmul.mubr.f32.gmra.mrb[10].mxu0 %v10813_v4  ;;  %v10942_v51 = vsel %vm1704_vm1, %v1998_v33, %v1999_v37  ;;  %v10956_v60 = vpack.c.bf16 %v5223_v62, %v5221_v43  ;;  %v5244_v37 = vld [vmem:[#allocation9 + $0x1100] sm:$0xff]  ;;  %v11021_v43 = vpack.c.bf16 %v5250_v53, %v5248_v59  ;;  %v5255_v62 = vld [vmem:[#allocation9 + $0x1158] sm:$0xff] }
 0x251   :  { %2136 = vmatprep.mubr.f32.mxu0 %v10900_v54  ;;  %8529 = vmatpush1.bf16.msra.mxu0 %v8528_v32  ;;  %v8580_v32 = vpack.c.bf16 %v2790_v26, %v2788_v35  ;;  %v5234_v35 = vld [vmem:[#allocation9 + $0x10b0] sm:$0xff]  ;;  %v5237_v26 = vld [vmem:[#allocation9 + $0x10c8] sm:$0xff]  ;;  %v5267_v59 = vld [vmem:[#allocation9 + $0x11b8] sm:$0xff] }
 0x252   :  { %8531 = vmatprep.subr.bf16.mxu0 %v8530_v42  ;;  %8569 = vmatpush1.bf16.msra.mxu1 %v8568_v0  ;;  %v2797_v42 = vld [vmem:[#allocation9 + $0x188] sm:$0xff]  ;;  %v5222_v0 = vld [vmem:[#allocation9 + $0x1050] sm:$0xff]  ;;  %v10988_v30 = vpack.c.bf16 %v5239_v27, %v5237_v26  ;;  %13401 = vst [vmem:[#allocation29_spill] sm:$0xff] %v11021_v43  ;;  %v2804_v27 = vld [vmem:[#allocation9 + $0x1c0] sm:$0xff] }
 0x253   :  { %8571 = vmatprep.subr.bf16.mxu1 %v8570_v5  ;;  %v8586_v8 = vpack.c.bf16 %v2799_v58, %v2797_v42  ;;  %v5224_v5 = vld [vmem:[#allocation9 + $0x1060] sm:$0xff]  ;;  %v2230_v58 = vrot.slane %v10724_v28, 2  ;;  %v11006_v28 = vpack.c.bf16 %v5242_v15, %v5240_v10  ;;  %v5258_v26 = vld [vmem:[#allocation9 + $0x1170] sm:$0xff]  ;;  %v2811_v10 = vld [vmem:[#allocation9 + $0x1f8] sm:$0xff] }
 0x254   :  { %2137 = vmatmul.mubr.f32.gmra.mrb[12].mxu0 %v10825_v24  ;;  %13394 = vst [vmem:[#allocation22_spill] sm:$0xff] %v10988_v30  ;;  %v5260_v15 = vld [vmem:[#allocation9 + $0x1180] sm:$0xff] }
 0x255   :  { %2142 = vmatprep.mubr.f32.mxu0 %v10900_v54  ;;  %8533 = vmatpush1.bf16.msra.mxu0 %v8532_v38  ;;  %v5214_v38 = vld [vmem:[#allocation9 + $0x1010] sm:$0xff]  ;;  %13397 = vst [vmem:[#allocation25_spill] sm:$0xff] %v11006_v28 }
 0x256   :  { %8535 = vmatprep.subr.bf16.mxu0 %v8534_v7  ;;  %8573 = vmatpush1.bf16.msra.mxu1 %v8572_v13  ;;  %v10946_v7 = vpack.c.bf16 %v5214_v38, %v5212_v1  ;;  %v5231_v13 = vld [vmem:[#allocation9 + $0x1098] sm:$0xff]  ;;  %v5246_v1 = vld [vmem:[#allocation9 + $0x1110] sm:$0xff]  ;;  %v5249_v38 = vld [vmem:[#allocation9 + $0x1128] sm:$0xff] }
 0x257   :  { %8575 = vmatprep.subr.bf16.mxu1 %v8574_v16  ;;  %v10972_v16 = vpack.c.bf16 %v5231_v13, %v5229_v11  ;;  %v11016_v9 = vpack.c.bf16 %v5251_v39, %v5249_v38  ;;  %v2802_v11 = vld [vmem:[#allocation9 + $0x1b0] sm:$0xff]  ;;  %v5257_v13 = vld [vmem:[#allocation9 + $0x1168] sm:$0xff] }
 0x258   :  { %2143 = vmatmul.mubr.f32.gmra.mrb[14].mxu0 %v10916_v31  ;;  %v5265_v39 = vld [vmem:[#allocation9 + $0x11a8] sm:$0xff] }
 0x259   :  { %2148 = vmatprep.mubr.f32.mxu0 %v10900_v54  ;;  %8537 = vmatpush1.bf16.msra.mxu0 %v8536_v44  ;;  %v5225_v44 = vld [vmem:[#allocation9 + $0x1068] sm:$0xff]  ;;  %13390 = vst [vmem:[#allocation18_spill] sm:$0xff] %v10972_v16  ;;  %13400 = vst [vmem:[#allocation28_spill] sm:$0xff] %v11016_v9  ;;  %v11060_v53 = vpack.c.bf16 %v5267_v59, %v5265_v39  ;;  %v3018_v59 = vld [vmem:[#allocation9 + $0x660] sm:$0xff] }
 0x25a   :  { %9051 = vmatprep.subr.bf16.mxu0 %v10918_v6  ;;  %8577 = vmatpush1.bf16.msra.mxu1 %v8576_v17  ;;  %v10964_v50 = vpack.c.bf16 %v5227_v56, %v5225_v44  ;;  %v10980_v17 = vpack.c.bf16 %v5235_v55, %v5233_v12  ;;  %v5252_v44 = vld [vmem:[#allocation9 + $0x1140] sm:$0xff]  ;;  %v2805_v12 = vld [vmem:[#allocation9 + $0x1c8] sm:$0xff]  ;;  %v2807_v55 = vld [vmem:[#allocation9 + $0x1d8] sm:$0xff] }
 0x25b   :  { %8579 = vmatprep.subr.bf16.mxu1 %v8578_v25  ;;  %v5232_v25 = vld [vmem:[#allocation9 + $0x10a0] sm:$0xff]  ;;  %13408 = vst [vmem:[#allocation36_spill] sm:$0xff] %v11060_v53 }
 0x25c   :  { %2149 = vmatmul.mubr.f32.gmra.mrb[16].mxu0 %v10837_v29  ;;  %v2794_v29 = vld [vmem:[#allocation9 + $0x170] sm:$0xff]  ;;  %13392 = vst [vmem:[#allocation20_spill] sm:$0xff] %v10980_v17 }
 0x25d   :  { %2154 = vmatprep.mubr.f32.mxu0 %v10900_v54  ;;  %v8584_v36 = vpack.c.bf16 %v2794_v29, %v2792_v23  ;;  %v5241_v23 = vld [vmem:[#allocation9 + $0x10e8] sm:$0xff]  ;;  %v5243_v29 = vld [vmem:[#allocation9 + $0x10f8] sm:$0xff] }
 0x25e   :  { %8581 = vmatpush1.bf16.msra.mxu1 %v8580_v32  ;;  %v5236_v32 = vld [vmem:[#allocation9 + $0x10c0] sm:$0xff] }
 0x25f   :  { %8583 = vmatprep.subr.bf16.mxu1 %v8582_v34  ;;  %v5238_v34 = vld [vmem:[#allocation9 + $0x10d0] sm:$0xff] }
 0x260   :  { %2155 = vmatmul.mubr.f32.gmra.mrb[18].mxu0 %v10846_v40 }
 0x261   :  { %2160 = vmatprep.mubr.f32.mxu0 %v10900_v54 }
 0x262   :  { %8585 = vmatpush1.bf16.msra.mxu1 %v8584_v36  ;;  %v10997_v36 = vpack.c.bf16 %v5238_v34, %v5236_v32  ;;  %v2806_v32 = vld [vmem:[#allocation9 + $0x1d0] sm:$0xff] }
 0x263   :  { %8587 = vmatprep.subr.bf16.mxu1 %v8586_v8  ;;  %v11000_v8 = vpack.c.bf16 %v5243_v29, %v5241_v23  ;;  %v8596_v23 = vpack.c.bf16 %v2806_v32, %v2804_v27  ;;  %v5261_v29 = vld [vmem:[#allocation9 + $0x1188] sm:$0xff]  ;;  %v5275_v27 = vld [vmem:[#allocation9 + $0x11f8] sm:$0xff] }
 0x264   :  { %2161 = vmatmul.mubr.f32.gmra.mrb[20].mxu0 %v10855_v57  ;;  %13395 = vst [vmem:[#allocation23_spill] sm:$0xff] %v10997_v36  ;;  %v3015_v32 = vld [vmem:[#allocation9 + $0x648] sm:$0xff] }
 0x265   :  { %2166 = vmatprep.mubr.f32.mxu0 %v10900_v54  ;;  %13396 = vst [vmem:[#allocation24_spill] sm:$0xff] %v11000_v8 }
 0x266   :  { %8589 = vmatpush1.bf16.msra.mxu1 %v8588_v3  ;;  %v5247_v3 = vld [vmem:[#allocation9 + $0x1118] sm:$0xff] }
 0x268   :  { %2167 = vmatmul.mubr.f32.gmra.mrb[22].mxu0 %v10864_v46 }
 0x269   :  { %2172 = vmatprep.mubr.f32.mxu0 %v10900_v54 }
 0x26c   :  { %2173 = vmatmul.mubr.f32.gmra.mrb[24].mxu0 %v10873_v47 }
 0x26d   :  { %2178 = vmatprep.mubr.f32.mxu0 %v10900_v54 }
 0x270   :  { %2179 = vmatmul.mubr.f32.gmra.mrb[26].mxu0 %v10882_v48 }
 0x271   :  { %2184 = vmatprep.mubr.f32.mxu0 %v10900_v54 }
 0x274   :  { %2185 = vmatmul.mubr.f32.gmra.mrb[28].mxu0 %v10891_v49 }
 0x275   :  { %2190 = vmatprep.mubr.f32.mxu0 %v10900_v54 }
 0x278   :  { %2191 = vmatmul.mubr.f32.gmra.mrb[30].mxu0 %v10942_v51 }
 0x279   :  { %2334 = vmatprep.mubr.f32.mxu0 %v10900_v54 }
 0x27c   :  { %2335 = vmatmul.mubr.f32.vlgmr.msra.gmra.mrb[0].mxu0 %v10777_v20  ;;  %v10961_v20 = vpack.c.bf16 %v5222_v0, %v5220_v14  ;;  %v2803_v0 = vld [vmem:[#allocation9 + $0x1b8] sm:$0xff] }
 0x27d   :  { %2340 = vmatprep.mubr.f32.mxu0 %v10900_v54  ;;  %9053 = vmatpush1.bf16.msra.mxu0 %v10946_v7 }
 0x27e   :  { %9055 = vmatprep.subr.bf16.mxu0 %v10948_v45 }
 0x280   :  { %2341 = vmatmul.mubr.f32.gmra.mrb[2].mxu0 %v10786_v52  ;;  %v10969_v52 = vpack.c.bf16 %v5226_v21, %v5224_v5  ;;  %v5254_v5 = vld [vmem:[#allocation9 + $0x1150] sm:$0xff]  ;;  %v2800_v21 = vld [vmem:[#allocation9 + $0x1a0] sm:$0xff] }
 0x281   :  { %2346 = vmatprep.mubr.f32.mxu0 %v10900_v54  ;;  %9057 = vmatpush1.bf16.msra.mxu0 %v10953_v61 }
 0x282   :  { %9059 = vmatprep.subr.bf16.mxu0 %v10956_v60 }
 0x284   :  { %2347 = vmatmul.mubr.f32.gmra.mrb[4].mxu0 %v10795_v63  ;;  %v10977_v63 = vpack.c.bf16 %v5230_v22, %v5228_v18  ;;  %v5259_v18 = vld [vmem:[#allocation9 + $0x1178] sm:$0xff] }
 0x285   :  { %2352 = vmatprep.mubr.f32.mxu0 %v10900_v54  ;;  %9061 = vmatpush1.bf16.msra.mxu0 %v10961_v20  ;;  %v11048_v22 = vpack.c.bf16 %v5259_v18, %v5257_v13  ;;  %v5268_v13 = vld [vmem:[#allocation9 + $0x11c0] sm:$0xff]  ;;  %v5270_v18 = vld [vmem:[#allocation9 + $0x11d0] sm:$0xff] }
 0x286   :  { %9063 = vmatprep.subr.bf16.mxu0 %v10964_v50  ;;  %13391 = vst [vmem:[#allocation19_spill] sm:$0xff] %v10977_v63 }
 0x287   :  { %13404 = vst [vmem:[#allocation32_spill] sm:$0xff] %v11048_v22 }
 0x288   :  { %2353 = vmatmul.mubr.f32.gmra.mrb[6].mxu0 %v10804_v41  ;;  %v10985_v41 = vpack.c.bf16 %v5234_v35, %v5232_v25  ;;  %v5256_v25 = vld [vmem:[#allocation9 + $0x1160] sm:$0xff]  ;;  %v8594_v35 = vpack.c.bf16 %v2807_v55, %v2805_v12 }
 0x289   :  { %2358 = vmatprep.mubr.f32.mxu0 %v10900_v54  ;;  %9065 = vmatpush1.bf16.msra.mxu0 %v10969_v52  ;;  %v11051_v34 = vpack.c.bf16 %v5258_v26, %v5256_v25  ;;  %v3010_v55 = vld [vmem:[#allocation9 + $0x620] sm:$0xff]  ;;  %v3012_v25 = vld [vmem:[#allocation9 + $0x630] sm:$0xff] }
 0x28a   :  { %9067 = vmatprep.subr.bf16.mxu0 %v10972_v16  ;;  %13393 = vst [vmem:[#allocation21_spill] sm:$0xff] %v10985_v41  ;;  %v8608_v26 = vpack.c.bf16 %v3012_v25, %v3010_v55  ;;  %v3033_v55 = vld [vmem:[#allocation9 + $0x6d8] sm:$0xff] }
 0x28b   :  { %13405 = vst [vmem:[#allocation33_spill] sm:$0xff] %v11051_v34 }
 0x28c   :  { %2359 = vmatmul.mubr.f32.gmra.mrb[8].mxu0 %v10813_v4  ;;  %v9815_v4 = vld [vmem:[%s13353_s0 + $0x90] sm:$0xff] }
 0x28d   :  { %2364 = vmatprep.mubr.f32.mxu0 %v10900_v54  ;;  %9069 = vmatpush1.bf16.msra.mxu0 %v10977_v63  ;;  %v2229_v42 = vrot.slane %v9815_v4, 2  ;;  %v5263_v4 = vld [vmem:[#allocation9 + $0x1198] sm:$0xff] }
 0x28e   :  { %9071 = vmatprep.subr.bf16.mxu0 %v10980_v17  ;;  %v3309_v17 = vld [vmem:[#allocation9 + $0xd68] sm:$0xff]  ;;  %v4059_v63 = vld [vmem:[#allocation9 + $0x9f8] sm:$0xff] }
 0x28f   :  { %v2231_v19 = vsel %vm1704_vm1, %v2229_v42, %v2230_v58  ;;  %v11054_v42 = vpack.c.bf16 %v5263_v4, %v5261_v29  ;;  %v2809_v58 = vld [vmem:[#allocation9 + $0x1e8] sm:$0xff] }
 0x290   :  { %2365 = vmatmul.mubr.f32.gmra.mrb[10].mxu0 %v10825_v24  ;;  %v5245_v24 = vld [vmem:[#allocation9 + $0x1108] sm:$0xff] }
 0x291   :  { %2370 = vmatprep.mubr.f32.mxu0 %v10900_v54  ;;  %9073 = vmatpush1.bf16.msra.mxu0 %v10985_v41  ;;  %v11009_v33 = vpack.c.bf16 %v5247_v3, %v5245_v24  ;;  %13406 = vst [vmem:[#allocation34_spill] sm:$0xff] %v11054_v42  ;;  %v8598_v24 = vpack.c.bf16 %v2811_v10, %v2809_v58  ;;  %v5262_v3 = vld [vmem:[#allocation9 + $0x1190] sm:$0xff]  ;;  %v5272_v58 = vld [vmem:[#allocation9 + $0x11e0] sm:$0xff]  ;;  %v3279_v41 = vld [vmem:[#allocation9 + $0xc78] sm:$0xff] }
 0x292   :  { %9075 = vmatprep.subr.bf16.mxu0 %v10988_v30  ;;  %v5274_v10 = vld [vmem:[#allocation9 + $0x11f0] sm:$0xff]  ;;  %v3277_v30 = vld [vmem:[#allocation9 + $0xc68] sm:$0xff] }
 0x293   :  { %13398 = vst [vmem:[#allocation26_spill] sm:$0xff] %v11009_v33 }
 0x294   :  { %2371 = vmatmul.mubr.f32.gmra.mrb[12].mxu0 %v10916_v31  ;;  %v11013_v31 = vpack.c.bf16 %v5246_v1, %v5244_v37  ;;  %v2810_v37 = vld [vmem:[#allocation9 + $0x1f0] sm:$0xff]  ;;  %v11057_v1 = vpack.c.bf16 %v5262_v3, %v5260_v15  ;;  %v3014_v15 = vld [vmem:[#allocation9 + $0x640] sm:$0xff]  ;;  %v11075_v3 = vpack.c.bf16 %v5274_v10, %v5272_v58 }
 0x295   :  { %2376 = vmatprep.mubr.f32.mxu0 %v10900_v54  ;;  %9077 = vmatpush1.bf16.msra.mxu0 %v10997_v36  ;;  %v3034_v58 = vld [vmem:[#allocation9 + $0x6e0] sm:$0xff]  ;;  %v3036_v10 = vld [vmem:[#allocation9 + $0x6f0] sm:$0xff] }
 0x296   :  { %9079 = vmatprep.subr.bf16.mxu0 %v11000_v8  ;;  %13399 = vst [vmem:[#allocation27_spill] sm:$0xff] %v11013_v31  ;;  %13407 = vst [vmem:[#allocation35_spill] sm:$0xff] %v11057_v1  ;;  %v3272_v8 = vld [vmem:[#allocation9 + $0xc40] sm:$0xff]  ;;  %v3274_v36 = vld [vmem:[#allocation9 + $0xc50] sm:$0xff] }
 0x297   :  { %13413 = vst [vmem:[#allocation41_spill] sm:$0xff] %v11075_v3 }
 0x298   :  { %2377 = vmatmul.mubr.f32.gmra.mrb[14].mxu0 %v2231_v19  ;;  %v2808_v19 = vld [vmem:[#allocation9 + $0x1e0] sm:$0xff] }
 0x299   :  { %2382 = vmatprep.mubr.f32.mxu0 %v10900_v54  ;;  %9081 = vmatpush1.bf16.msra.mxu0 %v11006_v28  ;;  %v8600_v38 = vpack.c.bf16 %v2810_v37, %v2808_v19  ;;  %v3019_v37 = vld [vmem:[#allocation9 + $0x668] sm:$0xff] }
 0x29a   :  { %9083 = vmatprep.subr.bf16.mxu0 %v11009_v33 }
 0x29c   :  { %2383 = vmatmul.mubr.f32.gmra.mrb[16].mxu0 %v10846_v40  ;;  %v9816_v40 = vld [vmem:[%s13353_s0 + $0x130] sm:$0xff] }
 0x29d   :  { %2388 = vmatprep.mubr.f32.mxu0 %v10900_v54  ;;  %9085 = vmatpush1.bf16.msra.mxu0 %v11013_v31  ;;  %v3275_v31 = vld [vmem:[#allocation9 + $0xc58] sm:$0xff] }
 0x29e   :  { %9087 = vmatprep.subr.bf16.mxu0 %v11016_v9  ;;  %v3273_v9 = vld [vmem:[#allocation9 + $0xc48] sm:$0xff] }
 0x29f   :  { %v8674_v28 = vpack.c.bf16 %v3275_v31, %v3273_v9 }
 0x2a0   :  { %2389 = vmatmul.mubr.f32.gmra.mrb[18].mxu0 %v10855_v57  ;;  %v2232_v57 = vrot.slane %v9816_v40, 2  ;;  %v3007_v40 = vld [vmem:[#allocation9 + $0x608] sm:$0xff] }
 0x2a1   :  { %2394 = vmatprep.mubr.f32.mxu0 %v10900_v54  ;;  %9089 = vmatpush1.bf16.msra.mxu0 %v11021_v43 }
 0x2a4   :  { %2395 = vmatmul.mubr.f32.gmra.mrb[20].mxu0 %v10864_v46  ;;  %v2233_v46 = vrot.slane %v10747_v2, 2  ;;  %v11045_v2 = vpack.c.bf16 %v5254_v5, %v5252_v44  ;;  %v5271_v5 = vld [vmem:[#allocation9 + $0x11d8] sm:$0xff] }
 0x2a5   :  { %2400 = vmatprep.mubr.f32.mxu0 %v10900_v54 }
 0x2a6   :  { %13403 = vst [vmem:[#allocation31_spill] sm:$0xff] %v11045_v2 }
 0x2a8   :  { %2401 = vmatmul.mubr.f32.gmra.mrb[22].mxu0 %v10873_v47  ;;  %v2234_v47 = vsel %vm1704_vm1, %v2232_v57, %v2233_v46  ;;  %v3009_v57 = vld [vmem:[#allocation9 + $0x618] sm:$0xff] }
 0x2a9   :  { %2406 = vmatprep.mubr.f32.mxu0 %v10900_v54  ;;  %v8602_v46 = vpack.c.bf16 %v3009_v57, %v3007_v40  ;;  %v3020_v40 = vld [vmem:[#allocation9 + $0x670] sm:$0xff] }
 0x2aa   :  { %v8616_v57 = vpack.c.bf16 %v3020_v40, %v3018_v59  ;;  %v3043_v40 = vld [vmem:[#allocation9 + $0x728] sm:$0xff] }
 0x2ac   :  { %2407 = vmatmul.mubr.f32.gmra.mrb[24].mxu0 %v10882_v48  ;;  %v5253_v48 = vld [vmem:[#allocation9 + $0x1148] sm:$0xff] }
 0x2ad   :  { %2412 = vmatprep.mubr.f32.mxu0 %v10900_v54  ;;  %v11042_v14 = vpack.c.bf16 %v5255_v62, %v5253_v48  ;;  %v5266_v48 = vld [vmem:[#allocation9 + $0x11b0] sm:$0xff]  ;;  %v3006_v62 = vld [vmem:[#allocation9 + $0x600] sm:$0xff] }
 0x2af   :  { %13402 = vst [vmem:[#allocation30_spill] sm:$0xff] %v11042_v14  ;;  %9091 = vmatprep.subr.bf16.mxu0 %v11042_v14 }
 0x2b0   :  { %2413 = vmatmul.mubr.f32.gmra.mrb[26].mxu0 %v10891_v49  ;;  %v2801_v49 = vld [vmem:[#allocation9 + $0x1a8] sm:$0xff] }
 0x2b1   :  { %2418 = vmatprep.mubr.f32.mxu0 %v10900_v54  ;;  %v8590_v56 = vpack.c.bf16 %v2803_v0, %v2801_v49  ;;  %9093 = vmatpush1.bf16.msra.mxu0 %v11045_v2  ;;  %v3008_v49 = vld [vmem:[#allocation9 + $0x610] sm:$0xff] }
 0x2b2   :  { %9095 = vmatprep.subr.bf16.mxu0 %v11048_v22  ;;  %v8604_v44 = vpack.c.bf16 %v3008_v49, %v3006_v62  ;;  %v3022_v62 = vld [vmem:[#allocation9 + $0x680] sm:$0xff]  ;;  %v3024_v49 = vld [vmem:[#allocation9 + $0x690] sm:$0xff] }
 0x2b3   :  { %8591 = vmatprep.subr.bf16.mxu1 %v8590_v56  ;;  %v5269_v56 = vld [vmem:[#allocation9 + $0x11c8] sm:$0xff] }
 0x2b4   :  { %2419 = vmatmul.mubr.f32.gmra.mrb[28].mxu0 %v10942_v51  ;;  %v8592_v51 = vpack.c.bf16 %v2802_v11, %v2800_v21  ;;  %v3011_v21 = vld [vmem:[#allocation9 + $0x628] sm:$0xff]  ;;  %v11066_v11 = vpack.c.bf16 %v5271_v5, %v5269_v56  ;;  %v3029_v5 = vld [vmem:[#allocation9 + $0x6b8] sm:$0xff] }
 0x2b5   :  { %2424 = vmatprep.mubr.f32.mxu0 %v10900_v54  ;;  %9097 = vmatpush1.bf16.msra.mxu0 %v11051_v34  ;;  %v3027_v56 = vld [vmem:[#allocation9 + $0x6a8] sm:$0xff] }
 0x2b6   :  { %8593 = vmatpush1.bf16.msra.mxu1 %v8592_v51  ;;  %9099 = vmatprep.subr.bf16.mxu0 %v11054_v42  ;;  %13410 = vst [vmem:[#allocation38_spill] sm:$0xff] %v11066_v11  ;;  %v3013_v51 = vld [vmem:[#allocation9 + $0x638] sm:$0xff] }
 0x2b7   :  { %8595 = vmatprep.subr.bf16.mxu1 %v8594_v35  ;;  %v8606_v12 = vpack.c.bf16 %v3013_v51, %v3011_v21  ;;  %v5273_v35 = vld [vmem:[#allocation9 + $0x11e8] sm:$0xff]  ;;  %v8622_v21 = vpack.c.bf16 %v3029_v5, %v3027_v56  ;;  %v3026_v51 = vld [vmem:[#allocation9 + $0x6a0] sm:$0xff] }
 0x2b8   :  { %2425 = vmatmul.mubr.f32.gmra.mrb[30].mxu0 %v2234_v47  ;;  %v5264_v47 = vld [vmem:[#allocation9 + $0x11a0] sm:$0xff]  ;;  %v11072_v29 = vpack.c.bf16 %v5275_v27, %v5273_v35 }
 0x2b9   :  { %9101 = vmatpush1.bf16.msra.mxu0 %v11057_v1  ;;  %v11064_v0 = vpack.c.bf16 %v5266_v48, %v5264_v47  ;;  %v3025_v47 = vld [vmem:[#allocation9 + $0x698] sm:$0xff]  ;;  %v3030_v35 = vld [vmem:[#allocation9 + $0x6c0] sm:$0xff] }
 0x2ba   :  { %8597 = vmatpush1.bf16.msra.mxu1 %v8596_v23  ;;  %9103 = vmatprep.subr.bf16.mxu0 %v11060_v53  ;;  %v3017_v23 = vld [vmem:[#allocation9 + $0x658] sm:$0xff]  ;;  %13412 = vst [vmem:[#allocation40_spill] sm:$0xff] %v11072_v29  ;;  %v3046_v5 = vld [vmem:[#allocation9 + $0x740] sm:$0xff] }
 0x2bb   :  { %8599 = vmatprep.subr.bf16.mxu1 %v8598_v24  ;;  %13409 = vst [vmem:[#allocation37_spill] sm:$0xff] %v11064_v0  ;;  %v8610_v4 = vpack.c.bf16 %v3017_v23, %v3015_v32  ;;  %v3016_v24 = vld [vmem:[#allocation9 + $0x650] sm:$0xff]  ;;  %v3035_v32 = vld [vmem:[#allocation9 + $0x6e8] sm:$0xff]  ;;  %v3037_v23 = vld [vmem:[#allocation9 + $0x6f8] sm:$0xff] }
 0x2bc   :  { %v8612_v19 = vpack.c.bf16 %v3016_v24, %v3014_v15  ;;  %v8632_v15 = vpack.c.bf16 %v3036_v10, %v3034_v58  ;;  %v3039_v24 = vld [vmem:[#allocation9 + $0x708] sm:$0xff] }
 0x2bd   :  { %9105 = vmatpush1.bf16.msra.mxu0 %v11064_v0  ;;  %v3059_v10 = vld [vmem:[#allocation9 + $0x7a8] sm:$0xff] }
 0x2be   :  { %8601 = vmatpush1.bf16.msra.mxu1 %v8600_v38  ;;  %9107 = vmatprep.subr.bf16.mxu0 %v11066_v11  ;;  %v3021_v38 = vld [vmem:[#allocation9 + $0x678] sm:$0xff] }
 0x2bf   :  { %8603 = vmatprep.subr.bf16.mxu1 %v8602_v46  ;;  %v8614_v39 = vpack.c.bf16 %v3021_v38, %v3019_v37  ;;  %v3023_v46 = vld [vmem:[#allocation9 + $0x688] sm:$0xff]  ;;  %v3038_v38 = vld [vmem:[#allocation9 + $0x700] sm:$0xff] }
 0x2c0   :  { %v8618_v48 = vpack.c.bf16 %v3025_v47, %v3023_v46  ;;  %v3042_v47 = vld [vmem:[#allocation9 + $0x720] sm:$0xff] }
 0x2c1   :  { %2877 = vmatmul.mubr.f32.vlgmr.msra.gmra.mrb[0].mxu1 %v10900_v54  ;;  %v11069_v54 = vpack.c.bf16 %v5270_v18, %v5268_v13  ;;  %v3028_v13 = vld [vmem:[#allocation9 + $0x6b0] sm:$0xff] }
 0x2c2   :  { %8605 = vmatpush1.bf16.msra.mxu1 %v8604_v44  ;;  %v8620_v44 = vpack.c.bf16 %v3024_v49, %v3022_v62  ;;  %v8624_v18 = vpack.c.bf16 %v3028_v13, %v3026_v51  ;;  %v3047_v49 = vld [vmem:[#allocation9 + $0x748] sm:$0xff] }
 0x2c3   :  { %13411 = vst [vmem:[#allocation39_spill] sm:$0xff] %v11069_v54  ;;  %8607 = vmatprep.subr.bf16.mxu1 %v8606_v12  ;;  %9109 = vmatpush1.bf16.msra.mxu0 %v11069_v54  ;;  %v3031_v12 = vld [vmem:[#allocation9 + $0x6c8] sm:$0xff] }
 0x2c4   :  { %9111 = vmatprep.subr.bf16.mxu0 %v11072_v29  ;;  %v8626_v25 = vpack.c.bf16 %v3033_v55, %v3031_v12  ;;  %v3051_v13 = vld [vmem:[#allocation9 + $0x768] sm:$0xff]  ;;  %v3050_v55 = vld [vmem:[#allocation9 + $0x760] sm:$0xff] }
 0x2c6   :  { %8609 = vmatpush1.bf16.msra.mxu1 %v8608_v26  ;;  %v3032_v26 = vld [vmem:[#allocation9 + $0x6d0] sm:$0xff] }
 0x2c7   :  { %8611 = vmatprep.subr.bf16.mxu1 %v8610_v4  ;;  %9113 = vmatpush1.bf16.msra.mxu0 %v11075_v3  ;;  %v8628_v27 = vpack.c.bf16 %v3032_v26, %v3030_v35  ;;  %v8630_v4 = vpack.c.bf16 %v3037_v23, %v3035_v32  ;;  %v3055_v26 = vld [vmem:[#allocation9 + $0x788] sm:$0xff]  ;;  %v3054_v23 = vld [vmem:[#allocation9 + $0x780] sm:$0xff] }
 0x2ca   :  { %8613 = vmatpush1.bf16.msra.mxu1 %v8612_v19  ;;  %v3041_v19 = vld [vmem:[#allocation9 + $0x718] sm:$0xff] }
 0x2cb   :  { %8615 = vmatprep.subr.bf16.mxu1 %v8614_v39  ;;  %v8634_v37 = vpack.c.bf16 %v3041_v19, %v3039_v24  ;;  %v3040_v39 = vld [vmem:[#allocation9 + $0x710] sm:$0xff]  ;;  %v3058_v19 = vld [vmem:[#allocation9 + $0x7a0] sm:$0xff] }
 0x2cc   :  { %v8636_v59 = vpack.c.bf16 %v3040_v39, %v3038_v38  ;;  %v3063_v39 = vld [vmem:[#allocation9 + $0x7c8] sm:$0xff] }
 0x2ce   :  { %8617 = vmatpush1.bf16.msra.mxu1 %v8616_v57  ;;  %v3045_v57 = vld [vmem:[#allocation9 + $0x738] sm:$0xff] }
 0x2cf   :  { %8619 = vmatprep.subr.bf16.mxu1 %v8618_v48  ;;  %v8638_v46 = vpack.c.bf16 %v3045_v57, %v3043_v40  ;;  %v3044_v48 = vld [vmem:[#allocation9 + $0x730] sm:$0xff]  ;;  %v3062_v57 = vld [vmem:[#allocation9 + $0x7c0] sm:$0xff] }
 0x2d0   :  { %v8640_v62 = vpack.c.bf16 %v3044_v48, %v3042_v47  ;;  %v3067_v48 = vld [vmem:[#allocation9 + $0x7e8] sm:$0xff] }
 0x2d2   :  { %8621 = vmatpush1.bf16.msra.mxu1 %v8620_v44  ;;  %v3049_v44 = vld [vmem:[#allocation9 + $0x758] sm:$0xff] }
 0x2d3   :  { %8623 = vmatprep.subr.bf16.mxu1 %v8622_v21  ;;  %v8642_v56 = vpack.c.bf16 %v3049_v44, %v3047_v49  ;;  %v3048_v21 = vld [vmem:[#allocation9 + $0x750] sm:$0xff]  ;;  %v3066_v44 = vld [vmem:[#allocation9 + $0x7e0] sm:$0xff] }
 0x2d4   :  { %v8644_v51 = vpack.c.bf16 %v3048_v21, %v3046_v5  ;;  %v3265_v21 = vld [vmem:[#allocation9 + $0xc08] sm:$0xff] }
 0x2d6   :  { %8625 = vmatpush1.bf16.msra.mxu1 %v8624_v18  ;;  %v3053_v18 = vld [vmem:[#allocation9 + $0x778] sm:$0xff] }
 0x2d7   :  { %8627 = vmatprep.subr.bf16.mxu1 %v8626_v25  ;;  %v8646_v12 = vpack.c.bf16 %v3053_v18, %v3051_v13  ;;  %v3052_v25 = vld [vmem:[#allocation9 + $0x770] sm:$0xff]  ;;  %v218_v18 = vlaneseq }
 0x2d8   :  { %v8648_v35 = vpack.c.bf16 %v3052_v25, %v3050_v55  ;;  %v216_v25 = vld [vmem:[#allocation7] sm:$0x3] }
 0x2da   :  { %8629 = vmatpush1.bf16.msra.mxu1 %v8628_v27  ;;  %v3057_v27 = vld [vmem:[#allocation9 + $0x798] sm:$0xff] }
 0x2db   :  { %8631 = vmatprep.subr.bf16.mxu1 %v8630_v4  ;;  %v8650_v32 = vpack.c.bf16 %v3057_v27, %v3055_v26  ;;  %v3056_v4 = vld [vmem:[#allocation9 + $0x790] sm:$0xff] }
 0x2dc   :  { %v8652_v58 = vpack.c.bf16 %v3056_v4, %v3054_v23 }
 0x2de   :  { %8633 = vmatpush1.bf16.msra.mxu1 %v8632_v15  ;;  %v3061_v15 = vld [vmem:[#allocation9 + $0x7b8] sm:$0xff] }
 0x2df   :  { %8635 = vmatprep.subr.bf16.mxu1 %v8634_v37  ;;  %v8654_v24 = vpack.c.bf16 %v3061_v15, %v3059_v10  ;;  %v3060_v37 = vld [vmem:[#allocation9 + $0x7b0] sm:$0xff] }
 0x2e0   :  { %v8656_v38 = vpack.c.bf16 %v3060_v37, %v3058_v19 }
 0x2e2   :  { %8637 = vmatpush1.bf16.msra.mxu1 %v8636_v59  ;;  %v3065_v59 = vld [vmem:[#allocation9 + $0x7d8] sm:$0xff] }
 0x2e3   :  { %8639 = vmatprep.subr.bf16.mxu1 %v8638_v46  ;;  %v8658_v40 = vpack.c.bf16 %v3065_v59, %v3063_v39  ;;  %v3064_v46 = vld [vmem:[#allocation9 + $0x7d0] sm:$0xff] }
 0x2e4   :  { %v8660_v47 = vpack.c.bf16 %v3064_v46, %v3062_v57 }
 0x2e6   :  { %8641 = vmatpush1.bf16.msra.mxu1 %v8640_v62  ;;  %v3069_v62 = vld [vmem:[#allocation9 + $0x7f8] sm:$0xff] }
 0x2e7   :  { %8643 = vmatprep.subr.bf16.mxu1 %v8642_v56  ;;  %v8662_v49 = vpack.c.bf16 %v3069_v62, %v3067_v48  ;;  %v3068_v56 = vld [vmem:[#allocation9 + $0x7f0] sm:$0xff] }
 0x2e8   :  { %v8664_v5 = vpack.c.bf16 %v3068_v56, %v3066_v44 }
 0x2ea   :  { %8645 = vmatpush1.bf16.msra.mxu1 %v8644_v51  ;;  %v3267_v51 = vld [vmem:[#allocation9 + $0xc18] sm:$0xff] }
 0x2eb   :  { %8647 = vmatprep.subr.bf16.mxu1 %v8646_v12  ;;  %v8666_v13 = vpack.c.bf16 %v3267_v51, %v3265_v21  ;;  %v219_v12 = vshrl.u32 %v218_v18, 7 }
 0x2ed   :  { %v11079_v55 = vsub.s32 0, %v219_v12 }
 0x2ee   :  { %8649 = vmatpush1.bf16.msra.mxu1 %v8648_v35  ;;  %v11081_v35 = vsub.s32 1, %v219_v12 }
 0x2ef   :  { %8651 = vmatprep.subr.bf16.mxu1 %v8650_v32  ;;  %13414 = vst [vmem:[#allocation42_spill] sm:$0xff] %v11079_v55  ;;  %v11084_v26 = vrot.slane %v216_v25, %v11079_v55 }
 0x2f0   :  { %13415 = vst [vmem:[#allocation43_spill] sm:$0xff] %v11081_v35  ;;  %v11087_v27 = vrot.slane %v216_v25, %v11081_v35 }
 0x2f2   :  { %8653 = vmatpush1.bf16.msra.mxu1 %v8652_v58 }
 0x2f3   :  { %8655 = vmatprep.subr.bf16.mxu1 %v8654_v24 }
 0x2f6   :  { %8657 = vmatpush1.bf16.msra.mxu1 %v8656_v38 }
 0x2f7   :  { %8659 = vmatprep.subr.bf16.mxu1 %v8658_v40 }
 0x2fa   :  { %8661 = vmatpush1.bf16.msra.mxu1 %v8660_v47 }
 0x2fb   :  { %8663 = vmatprep.subr.bf16.mxu1 %v8662_v49 }
 0x2fe   :  { %8665 = vmatpush1.bf16.msra.mxu1 %v8664_v5 }
 0x2ff   :  { %8667 = vmatprep.subr.bf16.mxu1 %v8666_v13 }
 0x34f   :  { %v2336_v32 = vpop.f32.mrb[0].mxu0 }
 0x350   :  { %v9146_v23 = vadd.f32 %v2336_v32, %v11084_v26  ;;  %v2338_v4 = vpop.f32.mrb[1].mxu0 }
 0x351   :  { %v9147_v58 = vadd.f32 %v2338_v4, %v11087_v27 }
 0x352   :  { %v2463_v10 = vmax.f32 %v9146_v23, 0.0 }
 0x353   :  { %v2464_v15 = vmax.f32 %v9147_v58, 0.0  ;;  %v2342_v24 = vpop.f32.mrb[2].mxu0 }
 0x354   :  { %v2527_v19 = vrot.slane %v2463_v10, 7  ;;  %v9148_v37 = vadd.f32 %v2342_v24, %v11084_v26  ;;  %v2344_v38 = vpop.f32.mrb[3].mxu0 }
 0x355   :  { %v2528_v39 = vrot.slane %v2464_v15, 7  ;;  %v9149_v59 = vadd.f32 %v2344_v38, %v11087_v27 }
 0x356   :  { %2592 = vst [vmem:[#allocation2 + $0x20] sm:$0xfe] %v2527_v19  ;;  %2594 = vst [vmem:[#allocation2 + $0x30] sm:$0x1] %v2527_v19  ;;  %v2465_v40 = vmax.f32 %v9148_v37, 0.0 }
 0x357   :  { %2593 = vst [vmem:[#allocation2 + $0x28] sm:$0xfe] %v2528_v39  ;;  %2595 = vst [vmem:[#allocation2 + $0x38] sm:$0x1] %v2528_v39  ;;  %v2466_v57 = vmax.f32 %v9149_v59, 0.0  ;;  %v2348_v46 = vpop.f32.mrb[4].mxu0 }
 0x358   :  { %v2529_v47 = vrot.slane %v2465_v40, 7  ;;  %v9150_v48 = vadd.f32 %v2348_v46, %v11084_v26  ;;  %v2350_v62 = vpop.f32.mrb[5].mxu0 }
 0x359   :  { %v2530_v49 = vrot.slane %v2466_v57, 7  ;;  %v9151_v44 = vadd.f32 %v2350_v62, %v11087_v27 }
 0x35a   :  { %2596 = vst [vmem:[#allocation2 + $0x40] sm:$0xfe] %v2529_v47  ;;  %2598 = vst [vmem:[#allocation2 + $0x50] sm:$0x1] %v2529_v47  ;;  %v2467_v56 = vmax.f32 %v9150_v48, 0.0 }
 0x35b   :  { %2597 = vst [vmem:[#allocation2 + $0x48] sm:$0xfe] %v2530_v49  ;;  %2599 = vst [vmem:[#allocation2 + $0x58] sm:$0x1] %v2530_v49  ;;  %v2468_v5 = vmax.f32 %v9151_v44, 0.0  ;;  %v2354_v21 = vpop.f32.mrb[6].mxu0 }
 0x35c   :  { %v2531_v51 = vrot.slane %v2467_v56, 7  ;;  %v9152_v13 = vadd.f32 %v2354_v21, %v11084_v26  ;;  %v2356_v18 = vpop.f32.mrb[7].mxu0 }
 0x35d   :  { %v2532_v12 = vrot.slane %v2468_v5, 7  ;;  %v9153_v25 = vadd.f32 %v2356_v18, %v11087_v27  ;;  %v11100_v10 = vld [vmem:[#allocation2 + $0x20] sm:$0xff] }
 0x35e   :  { %2600 = vst [vmem:[#allocation2 + $0x60] sm:$0xfe] %v2531_v51  ;;  %2602 = vst [vmem:[#allocation2 + $0x70] sm:$0x1] %v2531_v51  ;;  %v2469_v32 = vmax.f32 %v9152_v13, 0.0  ;;  %v11097_v23 = vld [vmem:[#allocation2 + $0x28] sm:$0xff] }
 0x35f   :  { %2601 = vst [vmem:[#allocation2 + $0x68] sm:$0xfe] %v2532_v12  ;;  %2603 = vst [vmem:[#allocation2 + $0x78] sm:$0x1] %v2532_v12  ;;  %v2470_v4 = vmax.f32 %v9153_v25, 0.0  ;;  %v2360_v58 = vpop.f32.mrb[8].mxu0  ;;  %2882 = vmatprep.mubr.f32.mxu1 %v11097_v23 }
 0x360   :  { %v2533_v15 = vrot.slane %v2469_v32, 7  ;;  %v9154_v24 = vadd.f32 %v2360_v58, %v11084_v26  ;;  %v2362_v19 = vpop.f32.mrb[9].mxu0  ;;  %2883 = vmatmul.mubr.f32.gmra.mrb[2].mxu1 %v11100_v10 }
 0x361   :  { %v2534_v37 = vrot.slane %v2470_v4, 7  ;;  %v9155_v38 = vadd.f32 %v2362_v19, %v11087_v27  ;;  %v11105_v39 = vld [vmem:[#allocation2 + $0x40] sm:$0xff]  ;;  %v2666_v59 = vld [vmem:[#allocation2 + $0x50] sm:$0x3] }
 0x362   :  { %2604 = vst [vmem:[#allocation2 + $0x80] sm:$0xfe] %v2533_v15  ;;  %2606 = vst [vmem:[#allocation2 + $0x90] sm:$0x1] %v2533_v15  ;;  %v2471_v40 = vmax.f32 %v9154_v24, 0.0  ;;  %v11107_v57 = vld [vmem:[#allocation2 + $0x48] sm:$0xff] }
 0x363   :  { %v2667_v46 = vld [vmem:[#allocation2 + $0x58] sm:$0x3]  ;;  %v4547_v47 = vrot.slane %v11105_v39, 2  ;;  %v4548_v48 = vrot.slane %v2666_v59, 2  ;;  %2605 = vst [vmem:[#allocation2 + $0x88] sm:$0xfe] %v2534_v37  ;;  %2888 = vmatprep.mubr.f32.mxu1 %v11107_v57 }
 0x364   :  { %2607 = vst [vmem:[#allocation2 + $0x98] sm:$0x1] %v2534_v37  ;;  %v2472_v62 = vmax.f32 %v9155_v38, 0.0  ;;  %v2366_v49 = vpop.f32.mrb[10].mxu0  ;;  %v4550_v44 = vrot.slane %v11107_v57, 2  ;;  %v4551_v56 = vrot.slane %v2667_v46, 2  ;;  %2889 = vmatmul.mubr.f32.gmra.mrb[4].mxu1 %v11105_v39 }
 0x365   :  { %v2535_v5 = vrot.slane %v2471_v40, 7  ;;  %v9156_v21 = vadd.f32 %v2366_v49, %v11084_v26  ;;  %v2368_v51 = vpop.f32.mrb[11].mxu0  ;;  %v11118_v25 = vld [vmem:[#allocation2 + $0x60] sm:$0xff]  ;;  %v2670_v32 = vld [vmem:[#allocation2 + $0x70] sm:$0x3]  ;;  %v11124_v15 = vsel %vm1704_vm1, %v4547_v47, %v4548_v48 }
 0x366   :  { %v2536_v13 = vrot.slane %v2472_v62, 7  ;;  %v9157_v18 = vadd.f32 %v2368_v51, %v11087_v27  ;;  %v11116_v12 = vsel %vm1704_vm1, %v4550_v44, %v4551_v56  ;;  %v11121_v58 = vld [vmem:[#allocation2 + $0x68] sm:$0xff]  ;;  %v2671_v24 = vld [vmem:[#allocation2 + $0x78] sm:$0x3]  ;;  %v4553_v19 = vrot.slane %v11118_v25, 2 }
 0x367   :  { %2608 = vst [vmem:[#allocation2 + $0xa0] sm:$0xfe] %v2535_v5  ;;  %2610 = vst [vmem:[#allocation2 + $0xb0] sm:$0x1] %v2535_v5  ;;  %v2473_v4 = vmax.f32 %v9156_v21, 0.0  ;;  %5340 = vmatprep.mubr.f32.mxu0 %v11116_v12  ;;  %v4554_v37 = vrot.slane %v2670_v32, 2  ;;  %2894 = vmatprep.mubr.f32.mxu1 %v11121_v58 }
 0x368   :  { %2609 = vst [vmem:[#allocation2 + $0xa8] sm:$0xfe] %v2536_v13  ;;  %2611 = vst [vmem:[#allocation2 + $0xb8] sm:$0x1] %v2536_v13  ;;  %v2474_v38 = vmax.f32 %v9157_v18, 0.0  ;;  %v2372_v59 = vpop.f32.mrb[12].mxu0  ;;  %5341 = vmatmul.mubr.f32.vlgmr.msra.gmra.mrb[32].mxu0 %v11124_v15  ;;  %2895 = vmatmul.mubr.f32.gmra.mrb[6].mxu1 %v11118_v25 }
 0x369   :  { %v4556_v40 = vrot.slane %v11121_v58, 2  ;;  %v4557_v46 = vrot.slane %v2671_v24, 2  ;;  %v2537_v62 = vrot.slane %v2473_v4, 7  ;;  %v9158_v49 = vadd.f32 %v2372_v59, %v11084_v26  ;;  %v2374_v47 = vpop.f32.mrb[13].mxu0  ;;  %v11136_v5 = vld [vmem:[#allocation2 + $0x80] sm:$0xff] }
 0x36a   :  { %v2538_v48 = vrot.slane %v2474_v38, 7  ;;  %v9159_v44 = vadd.f32 %v2374_v47, %v11087_v27  ;;  %v2674_v21 = vld [vmem:[#allocation2 + $0x90] sm:$0x3]  ;;  %v11139_v13 = vld [vmem:[#allocation2 + $0x88] sm:$0xff]  ;;  %v11142_v18 = vsel %vm1704_vm1, %v4553_v19, %v4554_v37  ;;  %v4559_v4 = vrot.slane %v11136_v5, 2 }
 0x36b   :  { %v11134_v56 = vsel %vm1704_vm1, %v4556_v40, %v4557_v46  ;;  %2612 = vst [vmem:[#allocation2 + $0xc0] sm:$0xfe] %v2537_v62  ;;  %2614 = vst [vmem:[#allocation2 + $0xd0] sm:$0x1] %v2537_v62  ;;  %v2475_v51 = vmax.f32 %v9158_v49, 0.0  ;;  %v4560_v24 = vrot.slane %v2674_v21, 2  ;;  %2900 = vmatprep.mubr.f32.mxu1 %v11139_v13 }
 0x36c   :  { %5346 = vmatprep.mubr.f32.mxu0 %v11134_v56  ;;  %v2675_v32 = vld [vmem:[#allocation2 + $0x98] sm:$0x3]  ;;  %2613 = vst [vmem:[#allocation2 + $0xc8] sm:$0xfe] %v2538_v48  ;;  %2615 = vst [vmem:[#allocation2 + $0xd8] sm:$0x1] %v2538_v48  ;;  %2901 = vmatmul.mubr.f32.gmra.mrb[8].mxu1 %v11136_v5 }
 0x36d   :  { %v2476_v38 = vmax.f32 %v9159_v44, 0.0  ;;  %v2378_v59 = vpop.f32.mrb[14].mxu0  ;;  %5347 = vmatmul.mubr.f32.gmra.mrb[34].mxu0 %v11142_v18  ;;  %v4562_v40 = vrot.slane %v11139_v13, 2  ;;  %v4563_v46 = vrot.slane %v2675_v32, 2  ;;  %v2539_v62 = vrot.slane %v2475_v51, 7 }
 0x36e   :  { %v9160_v49 = vadd.f32 %v2378_v59, %v11084_v26  ;;  %v2380_v19 = vpop.f32.mrb[15].mxu0  ;;  %v11154_v44 = vld [vmem:[#allocation2 + $0xa0] sm:$0xff]  ;;  %v2678_v21 = vld [vmem:[#allocation2 + $0xb0] sm:$0x3]  ;;  %v11160_v32 = vsel %vm1704_vm1, %v4559_v4, %v4560_v24 }
 0x36f   :  { %v2540_v37 = vrot.slane %v2476_v38, 7  ;;  %v9161_v47 = vadd.f32 %v2380_v19, %v11087_v27  ;;  %v11152_v48 = vsel %vm1704_vm1, %v4562_v40, %v4563_v46  ;;  %2616 = vst [vmem:[#allocation2 + $0xe0] sm:$0xfe] %v2539_v62  ;;  %2618 = vst [vmem:[#allocation2 + $0xf0] sm:$0x1] %v2539_v62  ;;  %v11157_v51 = vld [vmem:[#allocation2 + $0xa8] sm:$0xff] }
 0x370   :  { %v2477_v35 = vmax.f32 %v9160_v49, 0.0  ;;  %5352 = vmatprep.mubr.f32.mxu0 %v11152_v48  ;;  %v2679_v59 = vld [vmem:[#allocation2 + $0xb8] sm:$0x3]  ;;  %v4565_v38 = vrot.slane %v11154_v44, 2  ;;  %v4566_v19 = vrot.slane %v2678_v21, 2  ;;  %v2384_v46 = vpop.f32.mrb[16].mxu0  ;;  %2906 = vmatprep.mubr.f32.mxu1 %v11157_v51 }
 0x371   :  { %2617 = vst [vmem:[#allocation2 + $0xe8] sm:$0xfe] %v2540_v37  ;;  %2619 = vst [vmem:[#allocation2 + $0xf8] sm:$0x1] %v2540_v37  ;;  %v2478_v40 = vmax.f32 %v9161_v47, 0.0  ;;  %5353 = vmatmul.mubr.f32.gmra.mrb[36].mxu0 %v11160_v32  ;;  %v4568_v62 = vrot.slane %v11157_v51, 2  ;;  %v9162_v3 = vadd.f32 %v2384_v46, %v11084_v26  ;;  %2907 = vmatmul.mubr.f32.gmra.mrb[10].mxu1 %v11154_v44 }
 0x372   :  { %v4569_v49 = vrot.slane %v2679_v59, 2  ;;  %v2541_v55 = vrot.slane %v2477_v35, 7  ;;  %v2386_v4 = vpop.f32.mrb[17].mxu0  ;;  %v11176_v35 = vsel %vm1704_vm1, %v4565_v38, %v4566_v19 }
 0x373   :  { %v2542_v24 = vrot.slane %v2478_v40, 7  ;;  %v9163_v21 = vadd.f32 %v2386_v4, %v11087_v27  ;;  %v2479_v47 = vmax.f32 %v9162_v3, 0.0  ;;  %v11173_v29 = vld [vmem:[#allocation2 + $0xc8] sm:$0xff]  ;;  %v2390_v46 = vpop.f32.mrb[18].mxu0  ;;  %v11180_v40 = vld [vmem:[#allocation2 + $0xc0] sm:$0xff] }
 0x374   :  { %v11170_v37 = vsel %vm1704_vm1, %v4568_v62, %v4569_v49  ;;  %2620 = vst [vmem:[#allocation2 + $0x100] sm:$0xfe] %v2541_v55  ;;  %2622 = vst [vmem:[#allocation2 + $0x110] sm:$0x1] %v2541_v55  ;;  %2912 = vmatprep.mubr.f32.mxu1 %v11173_v29  ;;  %v9164_v3 = vadd.f32 %v2390_v46, %v11084_v26  ;;  %v2392_v55 = vpop.f32.mrb[19].mxu0 }
 0x375   :  { %5358 = vmatprep.mubr.f32.mxu0 %v11170_v37  ;;  %2621 = vst [vmem:[#allocation2 + $0x108] sm:$0xfe] %v2542_v24  ;;  %2623 = vst [vmem:[#allocation2 + $0x118] sm:$0x1] %v2542_v24  ;;  %v2480_v59 = vmax.f32 %v9163_v21, 0.0  ;;  %v2543_v62 = vrot.slane %v2479_v47, 7  ;;  %2913 = vmatmul.mubr.f32.gmra.mrb[12].mxu1 %v11180_v40  ;;  %v9165_v38 = vadd.f32 %v2392_v55, %v11087_v27 }
 0x376   :  { %5359 = vmatmul.mubr.f32.gmra.mrb[38].mxu0 %v11176_v35  ;;  %v2481_v19 = vmax.f32 %v9164_v3, 0.0  ;;  %v11188_v47 = vld [vmem:[#allocation2 + $0xe0] sm:$0xff] }
 0x377   :  { %v2544_v49 = vrot.slane %v2480_v59, 7  ;;  %2624 = vst [vmem:[#allocation2 + $0x160] sm:$0xfe] %v2543_v62  ;;  %2626 = vst [vmem:[#allocation2 + $0x170] sm:$0x1] %v2543_v62  ;;  %v2482_v24 = vmax.f32 %v9165_v38, 0.0 }
 0x378   :  { %v11185_v4 = vld [vmem:[#allocation2 + $0xe8] sm:$0xff]  ;;  %v2396_v21 = vpop.f32.mrb[20].mxu0  ;;  %v2545_v46 = vrot.slane %v2481_v19, 7  ;;  %v11193_v3 = vld [vmem:[#allocation2] sm:$0xff] }
 0x379   :  { %2625 = vst [vmem:[#allocation2 + $0x168] sm:$0xfe] %v2544_v49  ;;  %2627 = vst [vmem:[#allocation2 + $0x178] sm:$0x1] %v2544_v49  ;;  %2918 = vmatprep.mubr.f32.mxu1 %v11185_v4  ;;  %v9166_v54 = vadd.f32 %v2396_v21, %v11084_v26  ;;  %v2398_v11 = vpop.f32.mrb[21].mxu0  ;;  %v2546_v59 = vrot.slane %v2482_v24, 7 }
 0x37a   :  { %2919 = vmatmul.mubr.f32.gmra.mrb[14].mxu1 %v11188_v47  ;;  %v9167_v62 = vadd.f32 %v2398_v11, %v11087_v27  ;;  %2628 = vst [vmem:[#allocation2 + $0x180] sm:$0xfe] %v2545_v46  ;;  %2630 = vst [vmem:[#allocation2 + $0x190] sm:$0x1] %v2545_v46 }
 0x37b   :  { %2924 = vmatprep.mubr.f32.mxu1 %v11193_v3  ;;  %v2483_v55 = vmax.f32 %v9166_v54, 0.0  ;;  %2629 = vst [vmem:[#allocation2 + $0x188] sm:$0xfe] %v2546_v59  ;;  %2631 = vst [vmem:[#allocation2 + $0x198] sm:$0x1] %v2546_v59  ;;  %v2402_v38 = vpop.f32.mrb[22].mxu0 }
 0x37c   :  { %v2484_v49 = vmax.f32 %v9167_v62, 0.0  ;;  %v9168_v21 = vadd.f32 %v2402_v38, %v11084_v26  ;;  %v2404_v0 = vpop.f32.mrb[23].mxu0 }
 0x37d   :  { %v2547_v19 = vrot.slane %v2483_v55, 7  ;;  %v9169_v11 = vadd.f32 %v2404_v0, %v11087_v27 }
 0x37e   :  { %2925 = vmatmul.mubr.f32.gmra.mrb[16].mxu1 %v11193_v3  ;;  %v2548_v24 = vrot.slane %v2484_v49, 7  ;;  %v2485_v53 = vmax.f32 %v9168_v21, 0.0  ;;  %v11202_v59 = vld [vmem:[#allocation2 + $0x160] sm:$0xff] }
 0x37f   :  { %2632 = vst [vmem:[#allocation2 + $0x1a0] sm:$0xfe] %v2547_v19  ;;  %2634 = vst [vmem:[#allocation2 + $0x1b0] sm:$0x1] %v2547_v19  ;;  %v2486_v54 = vmax.f32 %v9169_v11, 0.0  ;;  %v2408_v46 = vpop.f32.mrb[24].mxu0 }
 0x380   :  { %v11199_v1 = vld [vmem:[#allocation2 + $0x168] sm:$0xff]  ;;  %2633 = vst [vmem:[#allocation2 + $0x1a8] sm:$0xfe] %v2548_v24  ;;  %2635 = vst [vmem:[#allocation2 + $0x1b8] sm:$0x1] %v2548_v24  ;;  %v2549_v62 = vrot.slane %v2485_v53, 7  ;;  %v9170_v55 = vadd.f32 %v2408_v46, %v11084_v26 }
 0x381   :  { %2930 = vmatprep.mubr.f32.mxu1 %v11199_v1  ;;  %v2410_v38 = vpop.f32.mrb[25].mxu0  ;;  %v2550_v0 = vrot.slane %v2486_v54, 7  ;;  %v11210_v53 = vld [vmem:[#allocation2 + $0x180] sm:$0xff] }
 0x382   :  { %2931 = vmatmul.mubr.f32.gmra.mrb[18].mxu1 %v11202_v59  ;;  %v9171_v49 = vadd.f32 %v2410_v38, %v11087_v27  ;;  %2636 = vst [vmem:[#allocation2 + $0x1c0] sm:$0xfe] %v2549_v62  ;;  %2638 = vst [vmem:[#allocation2 + $0x1d0] sm:$0x1] %v2549_v62  ;;  %v2487_v19 = vmax.f32 %v9170_v55, 0.0  ;;  %v11207_v21 = vld [vmem:[#allocation2 + $0x188] sm:$0xff] }
 0x383   :  { %2637 = vst [vmem:[#allocation2 + $0x1c8] sm:$0xfe] %v2550_v0  ;;  %2639 = vst [vmem:[#allocation2 + $0x1d8] sm:$0x1] %v2550_v0  ;;  %v2414_v11 = vpop.f32.mrb[26].mxu0  ;;  %2936 = vmatprep.mubr.f32.mxu1 %v11207_v21 }
 0x384   :  { %v2488_v24 = vmax.f32 %v9171_v49, 0.0  ;;  %v2551_v46 = vrot.slane %v2487_v19, 7  ;;  %v9172_v42 = vadd.f32 %v2414_v11, %v11084_v26  ;;  %v2416_v34 = vpop.f32.mrb[27].mxu0 }
 0x385   :  { %v9173_v62 = vadd.f32 %v2416_v34, %v11087_v27 }
 0x386   :  { %2937 = vmatmul.mubr.f32.gmra.mrb[20].mxu1 %v11210_v53  ;;  %v2552_v54 = vrot.slane %v2488_v24, 7  ;;  %2640 = vst [vmem:[#allocation2 + $0x1e0] sm:$0xfe] %v2551_v46  ;;  %2642 = vst [vmem:[#allocation2 + $0x1f0] sm:$0x1] %v2551_v46  ;;  %v2489_v55 = vmax.f32 %v9172_v42, 0.0 }
 0x387   :  { %v11215_v38 = vld [vmem:[#allocation2 + $0x1a8] sm:$0xff]  ;;  %v2490_v0 = vmax.f32 %v9173_v62, 0.0  ;;  %v2420_v49 = vpop.f32.mrb[28].mxu0  ;;  %v11218_v19 = vld [vmem:[#allocation2 + $0x1a0] sm:$0xff] }
 0x388   :  { %2641 = vst [vmem:[#allocation2 + $0x1e8] sm:$0xfe] %v2552_v54  ;;  %2643 = vst [vmem:[#allocation2 + $0x1f8] sm:$0x1] %v2552_v54  ;;  %2942 = vmatprep.mubr.f32.mxu1 %v11215_v38  ;;  %v2553_v11 = vrot.slane %v2489_v55, 7  ;;  %v9174_v22 = vadd.f32 %v2420_v49, %v11084_v26  ;;  %v2422_v2 = vpop.f32.mrb[29].mxu0 }
 0x389   :  { %v2554_v34 = vrot.slane %v2490_v0, 7  ;;  %v9175_v24 = vadd.f32 %v2422_v2, %v11087_v27  ;;  %v11226_v55 = vld [vmem:[#allocation2 + $0x1c0] sm:$0xff] }
 0x38a   :  { %2943 = vmatmul.mubr.f32.gmra.mrb[22].mxu1 %v11218_v19  ;;  %2644 = vst [vmem:[#allocation2 + $0x200] sm:$0xfe] %v2553_v11  ;;  %2646 = vst [vmem:[#allocation2 + $0x210] sm:$0x1] %v2553_v11  ;;  %v2491_v42 = vmax.f32 %v9174_v22, 0.0  ;;  %v11223_v46 = vld [vmem:[#allocation2 + $0x1c8] sm:$0xff] }
 0x38b   :  { %2645 = vst [vmem:[#allocation2 + $0x208] sm:$0xfe] %v2554_v34  ;;  %2647 = vst [vmem:[#allocation2 + $0x218] sm:$0x1] %v2554_v34  ;;  %v2492_v54 = vmax.f32 %v9175_v24, 0.0  ;;  %v2426_v62 = vpop.f32.mrb[30].mxu0  ;;  %2948 = vmatprep.mubr.f32.mxu1 %v11223_v46 }
 0x38c   :  { %v2555_v49 = vrot.slane %v2491_v42, 7  ;;  %v9176_v14 = vadd.f32 %v2426_v62, %v11084_v26  ;;  %v2428_v43 = vpop.f32.mrb[31].mxu0  ;;  %v3266_v62 = vld [vmem:[#allocation9 + $0xc10] sm:$0xff] }
 0x38d   :  { %v2556_v2 = vrot.slane %v2492_v54, 7  ;;  %v9177_v0 = vadd.f32 %v2428_v43, %v11087_v27  ;;  %v11234_v24 = vld [vmem:[#allocation2 + $0x1e0] sm:$0xff] }
 0x38e   :  { %2949 = vmatmul.mubr.f32.gmra.mrb[24].mxu1 %v11226_v55  ;;  %2648 = vst [vmem:[#allocation2 + $0x220] sm:$0xfe] %v2555_v49  ;;  %2650 = vst [vmem:[#allocation2 + $0x230] sm:$0x1] %v2555_v49  ;;  %v2493_v22 = vmax.f32 %v9176_v14, 0.0  ;;  %v3264_v27 = vld [vmem:[#allocation9 + $0xc00] sm:$0xff] }
 0x38f   :  { %v11231_v11 = vld [vmem:[#allocation2 + $0x1e8] sm:$0xff]  ;;  %2649 = vst [vmem:[#allocation2 + $0x228] sm:$0xfe] %v2556_v2  ;;  %2651 = vst [vmem:[#allocation2 + $0x238] sm:$0x1] %v2556_v2  ;;  %v2494_v34 = vmax.f32 %v9177_v0, 0.0 }
 0x390   :  { %2954 = vmatprep.mubr.f32.mxu1 %v11231_v11  ;;  %v2557_v42 = vrot.slane %v2493_v22, 7  ;;  %v3269_v2 = vld [vmem:[#allocation9 + $0xc28] sm:$0xff]  ;;  %v3271_v0 = vld [vmem:[#allocation9 + $0xc38] sm:$0xff]  ;;  %v8668_v22 = vpack.c.bf16 %v3266_v62, %v3264_v27  ;;  %v8678_v27 = vpack.c.bf16 %v3279_v41, %v3277_v30  ;;  %v3276_v62 = vld [vmem:[#allocation9 + $0xc60] sm:$0xff] }
 0x391   :  { %v2558_v26 = vrot.slane %v2494_v34, 7  ;;  %v11240_v43 = vld [vmem:[#allocation2 + $0x200] sm:$0xff]  ;;  %v8670_v34 = vpack.c.bf16 %v3271_v0, %v3269_v2  ;;  %v3281_v2 = vld [vmem:[#allocation9 + $0xc88] sm:$0xff] }
 0x392   :  { %2955 = vmatmul.mubr.f32.gmra.mrb[26].mxu1 %v11234_v24  ;;  %2652 = vst [vmem:[#allocation2 + $0x240] sm:$0xfe] %v2557_v42  ;;  %2654 = vst [vmem:[#allocation2 + $0x250] sm:$0x1] %v2557_v42  ;;  %v11237_v54 = vld [vmem:[#allocation2 + $0x208] sm:$0xff]  ;;  %v3283_v0 = vld [vmem:[#allocation9 + $0xc98] sm:$0xff] }
 0x393   :  { %2653 = vst [vmem:[#allocation2 + $0x248] sm:$0xfe] %v2558_v26  ;;  %2655 = vst [vmem:[#allocation2 + $0x258] sm:$0x1] %v2558_v26  ;;  %2960 = vmatprep.mubr.f32.mxu1 %v11237_v54  ;;  %v3268_v42 = vld [vmem:[#allocation9 + $0xc20] sm:$0xff]  ;;  %v3270_v26 = vld [vmem:[#allocation9 + $0xc30] sm:$0xff]  ;;  %v8682_v9 = vpack.c.bf16 %v3283_v0, %v3281_v2 }
 0x394   :  { %v8672_v33 = vpack.c.bf16 %v3270_v26, %v3268_v42  ;;  %v3285_v42 = vld [vmem:[#allocation9 + $0xca8] sm:$0xff]  ;;  %v3287_v26 = vld [vmem:[#allocation9 + $0xcb8] sm:$0xff] }
 0x395   :  { %v11246_v49 = vld [vmem:[#allocation2 + $0x220] sm:$0xff]  ;;  %v8686_v30 = vpack.c.bf16 %v3287_v26, %v3285_v42  ;;  %v3293_v2 = vld [vmem:[#allocation9 + $0xce8] sm:$0xff] }
 0x396   :  { %2961 = vmatmul.mubr.f32.gmra.mrb[28].mxu1 %v11240_v43  ;;  %v11243_v14 = vld [vmem:[#allocation2 + $0x228] sm:$0xff]  ;;  %v3295_v0 = vld [vmem:[#allocation9 + $0xcf8] sm:$0xff] }
 0x397   :  { %2966 = vmatprep.mubr.f32.mxu1 %v11243_v14  ;;  %v3297_v42 = vld [vmem:[#allocation9 + $0xd08] sm:$0xff]  ;;  %v3299_v26 = vld [vmem:[#allocation9 + $0xd18] sm:$0xff] }
 0x39a   :  { %2967 = vmatmul.mubr.f32.gmra.mrb[30].mxu1 %v11246_v49 }
 0x39b   :  { %3134 = vmatprep.mubr.f32.mxu1 %v11097_v23  ;;  %v8676_v23 = vpack.c.bf16 %v3274_v36, %v3272_v8  ;;  %v3284_v36 = vld [vmem:[#allocation9 + $0xca0] sm:$0xff]  ;;  %v3286_v8 = vld [vmem:[#allocation9 + $0xcb0] sm:$0xff] }
 0x39e   :  { %3135 = vmatmul.mubr.f32.vlgmr.msra.gmra.mrb[0].mxu1 %v11100_v10  ;;  %v3278_v10 = vld [vmem:[#allocation9 + $0xc70] sm:$0xff] }
 0x39f   :  { %3140 = vmatprep.mubr.f32.mxu1 %v11107_v57  ;;  %8669 = vmatpush1.bf16.msra.mxu1 %v8668_v22  ;;  %v8680_v31 = vpack.c.bf16 %v3278_v10, %v3276_v62  ;;  %v3280_v22 = vld [vmem:[#allocation9 + $0xc80] sm:$0xff]  ;;  %v3290_v10 = vld [vmem:[#allocation9 + $0xcd0] sm:$0xff] }
 0x3a0   :  { %8671 = vmatprep.subr.bf16.mxu1 %v8670_v34  ;;  %v3282_v34 = vld [vmem:[#allocation9 + $0xc90] sm:$0xff]  ;;  %v3288_v62 = vld [vmem:[#allocation9 + $0xcc0] sm:$0xff] }
 0x3a1   :  { %v8684_v41 = vpack.c.bf16 %v3282_v34, %v3280_v22  ;;  %v3292_v22 = vld [vmem:[#allocation9 + $0xce0] sm:$0xff]  ;;  %v3294_v34 = vld [vmem:[#allocation9 + $0xcf0] sm:$0xff] }
 0x3a2   :  { %3141 = vmatmul.mubr.f32.gmra.mrb[2].mxu1 %v11105_v39 }
 0x3a3   :  { %3146 = vmatprep.mubr.f32.mxu1 %v11121_v58  ;;  %8673 = vmatpush1.bf16.msra.mxu1 %v8672_v33  ;;  %v3291_v33 = vld [vmem:[#allocation9 + $0xcd8] sm:$0xff] }
 0x3a4   :  { %8675 = vmatprep.subr.bf16.mxu1 %v8674_v28  ;;  %v3289_v28 = vld [vmem:[#allocation9 + $0xcc8] sm:$0xff] }
 0x3a6   :  { %3147 = vmatmul.mubr.f32.gmra.mrb[4].mxu1 %v11118_v25 }
 0x3a7   :  { %3152 = vmatprep.mubr.f32.mxu1 %v11139_v13  ;;  %8677 = vmatpush1.bf16.msra.mxu1 %v8676_v23  ;;  %v8688_v23 = vpack.c.bf16 %v3286_v8, %v3284_v36  ;;  %v8698_v36 = vpack.c.bf16 %v3299_v26, %v3297_v42  ;;  %v3296_v8 = vld [vmem:[#allocation9 + $0xd00] sm:$0xff]  ;;  %v3306_v26 = vld [vmem:[#allocation9 + $0xd50] sm:$0xff] }
 0x3a8   :  { %8679 = vmatprep.subr.bf16.mxu1 %v8678_v27  ;;  %v8690_v27 = vpack.c.bf16 %v3291_v33, %v3289_v28  ;;  %v3298_v28 = vld [vmem:[#allocation9 + $0xd10] sm:$0xff]  ;;  %v11266_v33 = vld [vmem:[#allocation2 + $0x100] sm:$0xff] }
 0x3a9   :  { %v3304_v42 = vld [vmem:[#allocation9 + $0xd40] sm:$0xff] }
 0x3aa   :  { %3153 = vmatmul.mubr.f32.gmra.mrb[6].mxu1 %v11136_v5 }
 0x3ab   :  { %3158 = vmatprep.mubr.f32.mxu1 %v11157_v51  ;;  %8681 = vmatpush1.bf16.msra.mxu1 %v8680_v31  ;;  %v8692_v31 = vpack.c.bf16 %v3290_v10, %v3288_v62  ;;  %v8700_v62 = vpack.c.bf16 %v3298_v28, %v3296_v8  ;;  %v3308_v8 = vld [vmem:[#allocation9 + $0xd60] sm:$0xff]  ;;  %v3313_v28 = vld [vmem:[#allocation9 + $0xd88] sm:$0xff] }
 0x3ac   :  { %8683 = vmatprep.subr.bf16.mxu1 %v8682_v9  ;;  %v8694_v9 = vpack.c.bf16 %v3295_v0, %v3293_v2  ;;  %v3300_v2 = vld [vmem:[#allocation9 + $0xd20] sm:$0xff]  ;;  %v3302_v0 = vld [vmem:[#allocation9 + $0xd30] sm:$0xff] }
 0x3ae   :  { %3159 = vmatmul.mubr.f32.gmra.mrb[8].mxu1 %v11154_v44 }
 0x3af   :  { %3164 = vmatprep.mubr.f32.mxu1 %v11173_v29  ;;  %8685 = vmatpush1.bf16.msra.mxu1 %v8684_v41  ;;  %v11263_v41 = vld [vmem:[#allocation2 + $0x108] sm:$0xff] }
 0x3b0   :  { %8687 = vmatprep.subr.bf16.mxu1 %v8686_v30  ;;  %v8696_v30 = vpack.c.bf16 %v3294_v34, %v3292_v22  ;;  %v3307_v22 = vld [vmem:[#allocation9 + $0xd58] sm:$0xff] }
 0x3b2   :  { %3165 = vmatmul.mubr.f32.gmra.mrb[10].mxu1 %v11180_v40 }
 0x3b3   :  { %3170 = vmatprep.mubr.f32.mxu1 %v11185_v4  ;;  %8689 = vmatpush1.bf16.msra.mxu1 %v8688_v23  ;;  %v3301_v23 = vld [vmem:[#allocation9 + $0xd28] sm:$0xff] }
 0x3b4   :  { %8691 = vmatprep.subr.bf16.mxu1 %v8690_v27  ;;  %v3303_v27 = vld [vmem:[#allocation9 + $0xd38] sm:$0xff] }
 0x3b5   :  { %v8702_v10 = vpack.c.bf16 %v3303_v27, %v3301_v23  ;;  %v3315_v23 = vld [vmem:[#allocation9 + $0xd98] sm:$0xff] }
 0x3b6   :  { %3171 = vmatmul.mubr.f32.gmra.mrb[12].mxu1 %v11188_v47 }
 0x3b7   :  { %3176 = vmatprep.mubr.f32.mxu1 %v11263_v41  ;;  %8693 = vmatpush1.bf16.msra.mxu1 %v8692_v31  ;;  %v3305_v31 = vld [vmem:[#allocation9 + $0xd48] sm:$0xff] }
 0x3b8   :  { %8695 = vmatprep.subr.bf16.mxu1 %v8694_v9  ;;  %v8704_v9 = vpack.c.bf16 %v3302_v0, %v3300_v2  ;;  %v8706_v34 = vpack.c.bf16 %v3307_v22, %v3305_v31  ;;  %v3314_v2 = vld [vmem:[#allocation9 + $0xd90] sm:$0xff]  ;;  %v3317_v0 = vld [vmem:[#allocation9 + $0xda8] sm:$0xff]  ;;  %v3319_v31 = vld [vmem:[#allocation9 + $0xdb8] sm:$0xff] }
 0x3b9   :  { %v8718_v22 = vpack.c.bf16 %v3319_v31, %v3317_v0  ;;  %v3717_v0 = vld [vmem:[#allocation9 + $0x218] sm:$0xff]  ;;  %v11283_v31 = vld [vmem:[#allocation2 + $0x248] sm:$0xff] }
 0x3ba   :  { %3177 = vmatmul.mubr.f32.gmra.mrb[14].mxu1 %v11266_v33 }
 0x3bb   :  { %3182 = vmatprep.mubr.f32.mxu1 %v11199_v1  ;;  %8697 = vmatpush1.bf16.msra.mxu1 %v8696_v30  ;;  %v3311_v1 = vld [vmem:[#allocation9 + $0xd78] sm:$0xff]  ;;  %v8708_v30 = vpack.c.bf16 %v3306_v26, %v3304_v42  ;;  %v3321_v42 = vld [vmem:[#allocation9 + $0xdc8] sm:$0xff] }
 0x3bc   :  { %8699 = vmatprep.subr.bf16.mxu1 %v8698_v36  ;;  %v8710_v36 = vpack.c.bf16 %v3311_v1, %v3309_v17  ;;  %v3323_v26 = vld [vmem:[#allocation9 + $0xdd8] sm:$0xff] }
 0x3be   :  { %3183 = vmatmul.mubr.f32.gmra.mrb[16].mxu1 %v11202_v59  ;;  %v3310_v59 = vld [vmem:[#allocation9 + $0xd70] sm:$0xff] }
 0x3bf   :  { %3188 = vmatprep.mubr.f32.mxu1 %v11207_v21  ;;  %8701 = vmatpush1.bf16.msra.mxu1 %v8700_v62  ;;  %v8712_v27 = vpack.c.bf16 %v3310_v59, %v3308_v8  ;;  %v8714_v62 = vpack.c.bf16 %v3315_v23, %v3313_v28  ;;  %v3322_v8 = vld [vmem:[#allocation9 + $0xdd0] sm:$0xff]  ;;  %v3325_v59 = vld [vmem:[#allocation9 + $0xde8] sm:$0xff]  ;;  %v3327_v28 = vld [vmem:[#allocation9 + $0xdf8] sm:$0xff] }
 0x3c0   :  { %8703 = vmatprep.subr.bf16.mxu1 %v8702_v10  ;;  %v3312_v10 = vld [vmem:[#allocation9 + $0xd80] sm:$0xff] }
 0x3c1   :  { %v8716_v17 = vpack.c.bf16 %v3314_v2, %v3312_v10  ;;  %v3326_v10 = vld [vmem:[#allocation9 + $0xdf0] sm:$0xff]  ;;  %v3715_v2 = vld [vmem:[#allocation9 + $0x208] sm:$0xff] }
 0x3c2   :  { %3189 = vmatmul.mubr.f32.gmra.mrb[18].mxu1 %v11210_v53 }
 0x3c3   :  { %3194 = vmatprep.mubr.f32.mxu1 %v11215_v38  ;;  %8705 = vmatpush1.bf16.msra.mxu1 %v8704_v9  ;;  %v3316_v9 = vld [vmem:[#allocation9 + $0xda0] sm:$0xff] }
 0x3c4   :  { %8707 = vmatprep.subr.bf16.mxu1 %v8706_v34  ;;  %v3318_v34 = vld [vmem:[#allocation9 + $0xdb0] sm:$0xff] }
 0x3c5   :  { %v8720_v1 = vpack.c.bf16 %v3318_v34, %v3316_v9  ;;  %v3714_v9 = vld [vmem:[#allocation9 + $0x200] sm:$0xff]  ;;  %v3716_v34 = vld [vmem:[#allocation9 + $0x210] sm:$0xff] }
 0x3c6   :  { %3195 = vmatmul.mubr.f32.gmra.mrb[20].mxu1 %v11218_v19 }
 0x3c7   :  { %3200 = vmatprep.mubr.f32.mxu1 %v11223_v46  ;;  %8709 = vmatpush1.bf16.msra.mxu1 %v8708_v30  ;;  %v8722_v30 = vpack.c.bf16 %v3323_v26, %v3321_v42  ;;  %v11286_v42 = vld [vmem:[#allocation2 + $0x240] sm:$0xff]  ;;  %v3719_v26 = vld [vmem:[#allocation9 + $0x228] sm:$0xff] }
 0x3c8   :  { %8711 = vmatprep.subr.bf16.mxu1 %v8710_v36  ;;  %v3320_v36 = vld [vmem:[#allocation9 + $0xdc0] sm:$0xff] }
 0x3c9   :  { %v8724_v23 = vpack.c.bf16 %v3322_v8, %v3320_v36  ;;  %v3718_v8 = vld [vmem:[#allocation9 + $0x220] sm:$0xff] }
 0x3ca   :  { %3201 = vmatmul.mubr.f32.gmra.mrb[22].mxu1 %v11226_v55 }
 0x3cb   :  { %3206 = vmatprep.mubr.f32.mxu1 %v11231_v11  ;;  %8713 = vmatpush1.bf16.msra.mxu1 %v8712_v27  ;;  %v8726_v27 = vpack.c.bf16 %v3327_v28, %v3325_v59  ;;  %v3720_v59 = vld [vmem:[#allocation9 + $0x230] sm:$0xff]  ;;  %v3723_v28 = vld [vmem:[#allocation9 + $0x248] sm:$0xff] }
 0x3cc   :  { %8715 = vmatprep.subr.bf16.mxu1 %v8714_v62  ;;  %v3324_v62 = vld [vmem:[#allocation9 + $0xde0] sm:$0xff] }
 0x3ce   :  { %3207 = vmatmul.mubr.f32.gmra.mrb[24].mxu1 %v11234_v24 }
 0x3cf   :  { %3212 = vmatprep.mubr.f32.mxu1 %v11237_v54  ;;  %8717 = vmatpush1.bf16.msra.mxu1 %v8716_v17  ;;  %v8728_v17 = vpack.c.bf16 %v3326_v10, %v3324_v62  ;;  %v3722_v10 = vld [vmem:[#allocation9 + $0x240] sm:$0xff] }
 0x3d0   :  { %8719 = vmatprep.subr.bf16.mxu1 %v8718_v22  ;;  %v8730_v22 = vpack.c.bf16 %v3717_v0, %v3715_v2  ;;  %v3724_v2 = vld [vmem:[#allocation9 + $0x250] sm:$0xff]  ;;  %v3727_v0 = vld [vmem:[#allocation9 + $0x268] sm:$0xff] }
 0x3d2   :  { %3213 = vmatmul.mubr.f32.gmra.mrb[26].mxu1 %v11240_v43 }
 0x3d3   :  { %3218 = vmatprep.mubr.f32.mxu1 %v11243_v14  ;;  %8721 = vmatpush1.bf16.msra.mxu1 %v8720_v1  ;;  %v3721_v1 = vld [vmem:[#allocation9 + $0x238] sm:$0xff] }
 0x3d4   :  { %8723 = vmatprep.subr.bf16.mxu1 %v8722_v30  ;;  %v8732_v30 = vpack.c.bf16 %v3716_v34, %v3714_v9  ;;  %v8734_v36 = vpack.c.bf16 %v3721_v1, %v3719_v26  ;;  %v3726_v9 = vld [vmem:[#allocation9 + $0x260] sm:$0xff]  ;;  %v3731_v34 = vld [vmem:[#allocation9 + $0x288] sm:$0xff] }
 0x3d6   :  { %3219 = vmatmul.mubr.f32.gmra.mrb[28].mxu1 %v11246_v49 }
 0x3d7   :  { %3224 = vmatprep.mubr.f32.mxu1 %v11283_v31  ;;  %8725 = vmatpush1.bf16.msra.mxu1 %v8724_v23  ;;  %v3725_v23 = vld [vmem:[#allocation9 + $0x258] sm:$0xff] }
 0x3d8   :  { %8727 = vmatprep.subr.bf16.mxu1 %v8726_v27  ;;  %v8736_v27 = vpack.c.bf16 %v3720_v59, %v3718_v8  ;;  %v8738_v62 = vpack.c.bf16 %v3725_v23, %v3723_v28  ;;  %v3734_v28 = vld [vmem:[#allocation9 + $0x2a0] sm:$0xff]  ;;  %v3739_v23 = vld [vmem:[#allocation9 + $0x2c8] sm:$0xff] }
 0x3da   :  { %3225 = vmatmul.mubr.f32.gmra.mrb[30].mxu1 %v11286_v42 }
 0x3db   :  { %8729 = vmatpush1.bf16.msra.mxu1 %v8728_v17  ;;  %3392 = vmatprep.mubr.f32.mxu1 %v11107_v57  ;;  %v3729_v17 = vld [vmem:[#allocation9 + $0x278] sm:$0xff]  ;;  %v8740_v57 = vpack.c.bf16 %v3724_v2, %v3722_v10  ;;  %v3738_v10 = vld [vmem:[#allocation9 + $0x2c0] sm:$0xff]  ;;  %v3743_v2 = vld [vmem:[#allocation9 + $0x2e8] sm:$0xff] }
 0x3dc   :  { %8731 = vmatprep.subr.bf16.mxu1 %v8730_v22  ;;  %v8742_v22 = vpack.c.bf16 %v3729_v17, %v3727_v0 }
 0x3de   :  { %3393 = vmatmul.mubr.f32.vlgmr.msra.gmra.mrb[0].mxu1 %v11105_v39  ;;  %v3728_v39 = vld [vmem:[#allocation9 + $0x270] sm:$0xff] }
 0x3df   :  { %3398 = vmatprep.mubr.f32.mxu1 %v11121_v58  ;;  %8733 = vmatpush1.bf16.msra.mxu1 %v8732_v30  ;;  %v3733_v58 = vld [vmem:[#allocation9 + $0x298] sm:$0xff]  ;;  %v8744_v26 = vpack.c.bf16 %v3728_v39, %v3726_v9  ;;  %v3730_v30 = vld [vmem:[#allocation9 + $0x280] sm:$0xff] }
 0x3e0   :  { %8735 = vmatprep.subr.bf16.mxu1 %v8734_v36  ;;  %v8746_v1 = vpack.c.bf16 %v3733_v58, %v3731_v34  ;;  %v3735_v36 = vld [vmem:[#allocation9 + $0x2a8] sm:$0xff]  ;;  %v3746_v34 = vld [vmem:[#allocation9 + $0x300] sm:$0xff] }
 0x3e1   :  { %v3751_v58 = vld [vmem:[#allocation9 + $0x328] sm:$0xff] }
 0x3e2   :  { %3399 = vmatmul.mubr.f32.gmra.mrb[2].mxu1 %v11118_v25  ;;  %v3732_v25 = vld [vmem:[#allocation9 + $0x290] sm:$0xff] }
 0x3e3   :  { %3404 = vmatprep.mubr.f32.mxu1 %v11139_v13  ;;  %8737 = vmatpush1.bf16.msra.mxu1 %v8736_v27  ;;  %v3737_v13 = vld [vmem:[#allocation9 + $0x2b8] sm:$0xff]  ;;  %v8748_v8 = vpack.c.bf16 %v3732_v25, %v3730_v30  ;;  %v3750_v30 = vld [vmem:[#allocation9 + $0x320] sm:$0xff]  ;;  %v3755_v25 = vld [vmem:[#allocation9 + $0x348] sm:$0xff] }
 0x3e4   :  { %8739 = vmatprep.subr.bf16.mxu1 %v8738_v62  ;;  %v8750_v59 = vpack.c.bf16 %v3737_v13, %v3735_v36  ;;  %v3757_v36 = vld [vmem:[#allocation9 + $0x358] sm:$0xff] }
 0x3e6   :  { %3405 = vmatmul.mubr.f32.gmra.mrb[4].mxu1 %v11136_v5  ;;  %v3736_v5 = vld [vmem:[#allocation9 + $0x2b0] sm:$0xff] }
 0x3e7   :  { %3410 = vmatprep.mubr.f32.mxu1 %v11157_v51  ;;  %8741 = vmatpush1.bf16.msra.mxu1 %v8740_v57  ;;  %v3741_v51 = vld [vmem:[#allocation9 + $0x2d8] sm:$0xff]  ;;  %v8752_v27 = vpack.c.bf16 %v3736_v5, %v3734_v28  ;;  %v3742_v57 = vld [vmem:[#allocation9 + $0x2e0] sm:$0xff]  ;;  %v3756_v28 = vld [vmem:[#allocation9 + $0x350] sm:$0xff] }
 0x3e8   :  { %8743 = vmatprep.subr.bf16.mxu1 %v8742_v22  ;;  %v8754_v62 = vpack.c.bf16 %v3741_v51, %v3739_v23  ;;  %v3747_v22 = vld [vmem:[#allocation9 + $0x308] sm:$0xff] }
 0x3e9   :  { %v3759_v5 = vld [vmem:[#allocation9 + $0x368] sm:$0xff] }
 0x3ea   :  { %3411 = vmatmul.mubr.f32.gmra.mrb[6].mxu1 %v11154_v44  ;;  %v3740_v44 = vld [vmem:[#allocation9 + $0x2d0] sm:$0xff] }
 0x3eb   :  { %3416 = vmatprep.mubr.f32.mxu1 %v11173_v29  ;;  %8745 = vmatpush1.bf16.msra.mxu1 %v8744_v26  ;;  %v3745_v29 = vld [vmem:[#allocation9 + $0x2f8] sm:$0xff]  ;;  %v8756_v0 = vpack.c.bf16 %v3740_v44, %v3738_v10 }
 0x3ec   :  { %8747 = vmatprep.subr.bf16.mxu1 %v8746_v1  ;;  %v8758_v17 = vpack.c.bf16 %v3745_v29, %v3743_v2  ;;  %v3762_v2 = vld [vmem:[#allocation9 + $0x380] sm:$0xff]  ;;  %v3767_v29 = vld [vmem:[#allocation9 + $0x3a8] sm:$0xff] }
 0x3ee   :  { %3417 = vmatmul.mubr.f32.gmra.mrb[8].mxu1 %v11180_v40  ;;  %v3744_v40 = vld [vmem:[#allocation9 + $0x2f0] sm:$0xff] }
 0x3ef   :  { %3422 = vmatprep.mubr.f32.mxu1 %v11185_v4  ;;  %8749 = vmatpush1.bf16.msra.mxu1 %v8748_v8  ;;  %v3749_v4 = vld [vmem:[#allocation9 + $0x318] sm:$0xff]  ;;  %v8760_v9 = vpack.c.bf16 %v3744_v40, %v3742_v57  ;;  %v8770_v8 = vpack.c.bf16 %v3757_v36, %v3755_v25  ;;  %v3766_v57 = vld [vmem:[#allocation9 + $0x3a0] sm:$0xff]  ;;  %v3771_v40 = vld [vmem:[#allocation9 + $0x3c8] sm:$0xff] }
 0x3f0   :  { %8751 = vmatprep.subr.bf16.mxu1 %v8750_v59  ;;  %v8762_v39 = vpack.c.bf16 %v3749_v4, %v3747_v22  ;;  %v3754_v59 = vld [vmem:[#allocation9 + $0x340] sm:$0xff]  ;;  %v2663_v25 = vld [vmem:[#allocation2 + $0x38] sm:$0x3] }
 0x3f1   :  { %v8772_v23 = vpack.c.bf16 %v3756_v28, %v3754_v59  ;;  %v3998_v59 = vld [vmem:[#allocation9 + $0x810] sm:$0xff]  ;;  %v4001_v28 = vld [vmem:[#allocation9 + $0x828] sm:$0xff] }
 0x3f2   :  { %3423 = vmatmul.mubr.f32.gmra.mrb[10].mxu1 %v11188_v47  ;;  %v3748_v47 = vld [vmem:[#allocation9 + $0x310] sm:$0xff] }
 0x3f3   :  { %3428 = vmatprep.mubr.f32.mxu1 %v11263_v41  ;;  %8753 = vmatpush1.bf16.msra.mxu1 %v8752_v27  ;;  %v3753_v41 = vld [vmem:[#allocation9 + $0x338] sm:$0xff]  ;;  %v8764_v26 = vpack.c.bf16 %v3748_v47, %v3746_v34  ;;  %v3758_v27 = vld [vmem:[#allocation9 + $0x360] sm:$0xff]  ;;  %v2659_v34 = vld [vmem:[#allocation2 + $0x18] sm:$0x3] }
 0x3f4   :  { %8755 = vmatprep.subr.bf16.mxu1 %v8754_v62  ;;  %v8766_v1 = vpack.c.bf16 %v3753_v41, %v3751_v58  ;;  %v3763_v62 = vld [vmem:[#allocation9 + $0x388] sm:$0xff]  ;;  %v11319_v58 = vrot.slane %v11193_v3, 1  ;;  %v3776_v41 = vld [vmem:[#allocation9 + $0x3f0] sm:$0xff] }
 0x3f6   :  { %3429 = vmatmul.mubr.f32.gmra.mrb[12].mxu1 %v11266_v33  ;;  %v3752_v33 = vld [vmem:[#allocation9 + $0x330] sm:$0xff] }
 0x3f7   :  { %8757 = vmatpush1.bf16.msra.mxu1 %v8756_v0  ;;  %3434 = vmatprep.mubr.f32.mxu1 %v11193_v3  ;;  %v8768_v13 = vpack.c.bf16 %v3752_v33, %v3750_v30  ;;  %v3997_v30 = vld [vmem:[#allocation9 + $0x808] sm:$0xff]  ;;  %v3999_v33 = vld [vmem:[#allocation9 + $0x818] sm:$0xff] }
 0x3f8   :  { %8759 = vmatprep.subr.bf16.mxu1 %v8758_v17 }
 0x3fa   :  { %3435 = vmatmul.mubr.f32.gmra.mrb[14].mxu1 %v11193_v3 }
 0x3fb   :  { %3440 = vmatprep.mubr.f32.mxu1 %v11207_v21  ;;  %8761 = vmatpush1.bf16.msra.mxu1 %v8760_v9  ;;  %v3761_v21 = vld [vmem:[#allocation9 + $0x378] sm:$0xff]  ;;  %v3770_v9 = vld [vmem:[#allocation9 + $0x3c0] sm:$0xff] }
 0x3fc   :  { %8763 = vmatprep.subr.bf16.mxu1 %v8762_v39  ;;  %v8774_v51 = vpack.c.bf16 %v3761_v21, %v3759_v5  ;;  %v3775_v39 = vld [vmem:[#allocation9 + $0x3e8] sm:$0xff]  ;;  %v4003_v5 = vld [vmem:[#allocation9 + $0x838] sm:$0xff] }
 0x3fd   :  { %v9818_v21 = vld [vmem:[#allocation2 + $0x28] sm:$0xff] }
 0x3fe   :  { %3441 = vmatmul.mubr.f32.gmra.mrb[16].mxu1 %v11210_v53  ;;  %v3760_v53 = vld [vmem:[#allocation9 + $0x370] sm:$0xff] }
 0x3ff   :  { %3446 = vmatprep.mubr.f32.mxu1 %v11215_v38  ;;  %8765 = vmatpush1.bf16.msra.mxu1 %v8764_v26  ;;  %v3765_v38 = vld [vmem:[#allocation9 + $0x398] sm:$0xff]  ;;  %v8776_v10 = vpack.c.bf16 %v3760_v53, %v3758_v27  ;;  %v3589_v26 = vrot.slane %v2659_v34, 1 }
 0x400   :  { %8767 = vmatprep.subr.bf16.mxu1 %v8766_v1  ;;  %v8778_v44 = vpack.c.bf16 %v3765_v38, %v3763_v62  ;;  %v2658_v1 = vld [vmem:[#allocation2 + $0x10] sm:$0x3]  ;;  %v8798_v62 = vpack.c.bf16 %v4003_v5, %v4001_v28  ;;  %v4000_v38 = vld [vmem:[#allocation9 + $0x820] sm:$0xff] }
 0x401   :  { %v3590_v36 = vsel %vm937_vm0, %v11319_v58, %v3589_v26  ;;  %v4013_v5 = vld [vmem:[#allocation9 + $0x888] sm:$0xff] }
 0x402   :  { %3447 = vmatmul.mubr.f32.gmra.mrb[18].mxu1 %v11218_v19  ;;  %v3764_v19 = vld [vmem:[#allocation9 + $0x390] sm:$0xff] }
 0x403   :  { %3452 = vmatprep.mubr.f32.mxu1 %v11223_v46  ;;  %8769 = vmatpush1.bf16.msra.mxu1 %v8768_v13  ;;  %v3769_v46 = vld [vmem:[#allocation9 + $0x3b8] sm:$0xff]  ;;  %v8780_v0 = vpack.c.bf16 %v3764_v19, %v3762_v2  ;;  %v8794_v13 = vpack.c.bf16 %v3999_v33, %v3997_v30 }
 0x404   :  { %8771 = vmatprep.subr.bf16.mxu1 %v8770_v8  ;;  %v8782_v17 = vpack.c.bf16 %v3769_v46, %v3767_v29  ;;  %v3996_v8 = vld [vmem:[#allocation9 + $0x800] sm:$0xff]  ;;  %v4005_v29 = vld [vmem:[#allocation9 + $0x848] sm:$0xff]  ;;  %v4007_v46 = vld [vmem:[#allocation9 + $0x858] sm:$0xff] }
 0x405   :  { %v8796_v53 = vpack.c.bf16 %v3998_v59, %v3996_v8  ;;  %v9827_v59 = vld [vmem:[#allocation2 + $0x70] sm:$0x3] }
 0x406   :  { %3453 = vmatmul.mubr.f32.gmra.mrb[20].mxu1 %v11226_v55  ;;  %v3768_v55 = vld [vmem:[#allocation9 + $0x3b0] sm:$0xff]  ;;  %v3604_v28 = vrot.slane %v9827_v59, 1  ;;  %v2682_v59 = vld [vmem:[#allocation2 + $0xd0] sm:$0x3] }
 0x407   :  { %3458 = vmatprep.mubr.f32.mxu1 %v11231_v11  ;;  %8773 = vmatpush1.bf16.msra.mxu1 %v8772_v23  ;;  %v3773_v11 = vld [vmem:[#allocation9 + $0x3d8] sm:$0xff]  ;;  %v8784_v22 = vpack.c.bf16 %v3768_v55, %v3766_v57  ;;  %v3594_v23 = vrot.slane %v9818_v21, 1  ;;  %v9821_v57 = vld [vmem:[#allocation2 + $0x58] sm:$0x3] }
 0x408   :  { %8775 = vmatprep.subr.bf16.mxu1 %v8774_v51  ;;  %v8786_v4 = vpack.c.bf16 %v3773_v11, %v3771_v40  ;;  %v2662_v51 = vld [vmem:[#allocation2 + $0x30] sm:$0x3]  ;;  %v3601_v55 = vrot.slane %v9821_v57, 1  ;;  %v8802_v11 = vpack.c.bf16 %v4007_v46, %v4005_v29  ;;  %v4015_v21 = vld [vmem:[#allocation9 + $0x898] sm:$0xff] }
 0x409   :  { %v3592_v19 = vrot.slane %v2662_v51, 1  ;;  %v9831_v46 = vld [vmem:[#allocation2 + $0x90] sm:$0x3]  ;;  %v4019_v57 = vld [vmem:[#allocation9 + $0x8b8] sm:$0xff] }
 0x40a   :  { %3459 = vmatmul.mubr.f32.gmra.mrb[22].mxu1 %v11234_v24  ;;  %v3772_v24 = vld [vmem:[#allocation9 + $0x3d0] sm:$0xff] }
 0x40b   :  { %3464 = vmatprep.mubr.f32.mxu1 %v11237_v54  ;;  %8777 = vmatpush1.bf16.msra.mxu1 %v8776_v10  ;;  %v3777_v54 = vld [vmem:[#allocation9 + $0x3f8] sm:$0xff]  ;;  %v8788_v47 = vpack.c.bf16 %v3772_v24, %v3770_v9  ;;  %v4002_v10 = vld [vmem:[#allocation9 + $0x830] sm:$0xff] }
 0x40c   :  { %8779 = vmatprep.subr.bf16.mxu1 %v8778_v44  ;;  %v9819_v44 = vld [vmem:[#allocation2 + $0x20] sm:$0xff]  ;;  %v8800_v40 = vpack.c.bf16 %v4002_v10, %v4000_v38  ;;  %v8810_v38 = vpack.c.bf16 %v4015_v21, %v4013_v5  ;;  %v2687_v5 = vld [vmem:[#allocation2 + $0xf8] sm:$0x3] }
 0x40d   :  { %v3591_v2 = vrot.slane %v9819_v44, 1  ;;  %v9822_v24 = vld [vmem:[#allocation2 + $0x40] sm:$0xff]  ;;  %v4014_v44 = vld [vmem:[#allocation9 + $0x890] sm:$0xff] }
 0x40e   :  { %3465 = vmatmul.mubr.f32.gmra.mrb[24].mxu1 %v11240_v43  ;;  %v8790_v43 = vpack.c.bf16 %v3777_v54, %v3775_v39  ;;  %v3597_v39 = vrot.slane %v9822_v24, 1  ;;  %v9823_v54 = vld [vmem:[#allocation2 + $0x50] sm:$0x3]  ;;  %v4012_v10 = vld [vmem:[#allocation9 + $0x880] sm:$0xff] }
 0x40f   :  { %3470 = vmatprep.mubr.f32.mxu1 %v11243_v14  ;;  %8781 = vmatpush1.bf16.msra.mxu1 %v8780_v0  ;;  %v3774_v14 = vld [vmem:[#allocation9 + $0x3e0] sm:$0xff]  ;;  %v11333_v9 = vsel %vm937_vm0, %v3591_v2, %v3592_v19  ;;  %v3598_v34 = vrot.slane %v9823_v54, 1  ;;  %v8812_v24 = vpack.c.bf16 %v4014_v44, %v4012_v10  ;;  %v4025_v10 = vld [vmem:[#allocation9 + $0x8e8] sm:$0xff]  ;;  %v4027_v44 = vld [vmem:[#allocation9 + $0x8f8] sm:$0xff] }
 0x410   :  { %8783 = vmatprep.subr.bf16.mxu1 %v8782_v17  ;;  %v9820_v0 = vld [vmem:[#allocation2 + $0x48] sm:$0xff]  ;;  %v9830_v19 = vld [vmem:[#allocation2 + $0x80] sm:$0xff] }
 0x411   :  { %v3600_v17 = vrot.slane %v9820_v0, 1  ;;  %v3609_v29 = vrot.slane %v9830_v19, 1  ;;  %v3610_v0 = vrot.slane %v9831_v46, 1  ;;  %v2699_v19 = vld [vmem:[#allocation2 + $0x158] sm:$0x3]  ;;  %v9838_v46 = vld [vmem:[#allocation2 + $0xe8] sm:$0xff] }
 0x412   :  { %3471 = vmatmul.mubr.f32.gmra.mrb[26].mxu1 %v11246_v49  ;;  %v8792_v49 = vpack.c.bf16 %v3776_v41, %v3774_v14  ;;  %v9824_v41 = vld [vmem:[#allocation2 + $0x68] sm:$0xff] }
 0x413   :  { %3476 = vmatprep.mubr.f32.mxu1 %v11283_v31  ;;  %8785 = vmatpush1.bf16.msra.mxu1 %v8784_v22  ;;  %v3586_v31 = vrot.slane %v2658_v1, 1  ;;  %v4004_v22 = vld [vmem:[#allocation9 + $0x840] sm:$0xff]  ;;  %v11337_v14 = vsel %vm937_vm0, %v3600_v17, %v3601_v55  ;;  %v3606_v26 = vrot.slane %v9824_v41, 1  ;;  %v9825_v1 = vld [vmem:[#allocation2 + $0x78] sm:$0x3]  ;;  %v4017_v17 = vld [vmem:[#allocation9 + $0x8a8] sm:$0xff] }
 0x414   :  { %8787 = vmatprep.subr.bf16.mxu1 %v8786_v4  ;;  %v4006_v4 = vld [vmem:[#allocation9 + $0x850] sm:$0xff]  ;;  %v3607_v30 = vrot.slane %v9825_v1, 1  ;;  %v8814_v54 = vpack.c.bf16 %v4019_v57, %v4017_v17  ;;  %v9834_v41 = vld [vmem:[#allocation2 + $0xa0] sm:$0xff]  ;;  %v9835_v1 = vld [vmem:[#allocation2 + $0xb0] sm:$0x3]  ;;  %v3631_v17 = vrot.slane %v2687_v5, 1 }
 0x415   :  { %v3587_v27 = vsel %vm937_vm0, %v11319_v58, %v3586_v31  ;;  %v8804_v33 = vpack.c.bf16 %v4006_v4, %v4004_v22  ;;  %v4008_v31 = vld [vmem:[#allocation9 + $0x860] sm:$0xff]  ;;  %v9833_v22 = vld [vmem:[#allocation2 + $0xb8] sm:$0x3]  ;;  %v2686_v57 = vld [vmem:[#allocation2 + $0xf0] sm:$0x3] }
 0x416   :  { %3477 = vmatmul.mubr.f32.gmra.mrb[28].mxu1 %v11286_v42  ;;  %v3595_v42 = vrot.slane %v2663_v25, 1  ;;  %v4010_v25 = vld [vmem:[#allocation9 + $0x870] sm:$0xff]  ;;  %v3619_v4 = vrot.slane %v9833_v22, 1  ;;  %v4024_v22 = vld [vmem:[#allocation9 + $0x8e0] sm:$0xff] }
 0x417   :  { %8789 = vmatpush1.bf16.msra.mxu1 %v8788_v47  ;;  %3482 = vmatprep.mubr.f32.mxu1 %v11193_v3  ;;  %v4009_v47 = vld [vmem:[#allocation9 + $0x868] sm:$0xff] }
 0x418   :  { %8791 = vmatprep.subr.bf16.mxu1 %v8790_v43  ;;  %v4011_v43 = vld [vmem:[#allocation9 + $0x878] sm:$0xff] }
 0x41a   :  { %3483 = vmatmul.mubr.f32.gmra.mrb[30].mxu1 %v11193_v3  ;;  %v11329_v3 = vsel %vm937_vm0, %v3594_v23, %v3595_v42  ;;  %v11345_v23 = vsel %vm937_vm0, %v3606_v26, %v3607_v30  ;;  %v9828_v42 = vld [vmem:[#allocation2 + $0x88] sm:$0xff]  ;;  %v3615_v26 = vrot.slane %v9834_v41, 1  ;;  %v3616_v30 = vrot.slane %v9835_v1, 1  ;;  %v4031_v1 = vld [vmem:[#allocation9 + $0x918] sm:$0xff] }
 0x41b   :  { %8793 = vmatpush1.bf16.msra.mxu1 %v8792_v49  ;;  %3842 = vmatprep.mubr.f32.mxu1 %v3590_v36  ;;  %v8806_v49 = vpack.c.bf16 %v4011_v43, %v4009_v47  ;;  %v11341_v36 = vsel %vm937_vm0, %v3597_v39, %v3598_v34  ;;  %v3612_v51 = vrot.slane %v9828_v42, 1  ;;  %v2683_v39 = vld [vmem:[#allocation2 + $0xd8] sm:$0x3]  ;;  %v4016_v34 = vld [vmem:[#allocation9 + $0x8a0] sm:$0xff]  ;;  %v11357_v43 = vsel %vm937_vm0, %v3609_v29, %v3610_v0 }
 0x41c   :  { %8795 = vmatprep.subr.bf16.mxu1 %v8794_v13  ;;  %v9826_v13 = vld [vmem:[#allocation2 + $0x60] sm:$0xff]  ;;  %v4018_v47 = vld [vmem:[#allocation9 + $0x8b0] sm:$0xff]  ;;  %v3630_v0 = vrot.slane %v9838_v46, 1  ;;  %v3628_v41 = vrot.slane %v2686_v57, 1 }
 0x41d   :  { %v3603_v8 = vrot.slane %v9826_v13, 1  ;;  %v4020_v42 = vld [vmem:[#allocation9 + $0x8c0] sm:$0xff]  ;;  %v4034_v57 = vld [vmem:[#allocation9 + $0x930] sm:$0xff] }
 0x41e   :  { %3843 = vmatmul.mubr.f32.vlgmr.msra.gmra.mrb[0].mxu1 %v3587_v27  ;;  %v9829_v27 = vld [vmem:[#allocation2 + $0x98] sm:$0x3] }
 0x41f   :  { %3848 = vmatprep.mubr.f32.mxu1 %v11329_v3  ;;  %8797 = vmatpush1.bf16.msra.mxu1 %v8796_v53  ;;  %v3613_v53 = vrot.slane %v9829_v27, 1  ;;  %v11349_v2 = vsel %vm937_vm0, %v3603_v8, %v3604_v28  ;;  %v3625_v8 = vrot.slane %v2683_v39, 1  ;;  %v8816_v28 = vpack.c.bf16 %v4018_v47, %v4016_v34  ;;  %v2698_v39 = vld [vmem:[#allocation2 + $0x150] sm:$0x3]  ;;  %v9839_v34 = vld [vmem:[#allocation2 + $0xe0] sm:$0xff] }
 0x420   :  { %8799 = vmatprep.subr.bf16.mxu1 %v8798_v62  ;;  %v8808_v62 = vpack.c.bf16 %v4010_v25, %v4008_v31  ;;  %v9836_v25 = vld [vmem:[#allocation2 + $0xc8] sm:$0xff]  ;;  %v11365_v27 = vsel %vm937_vm0, %v3615_v26, %v3616_v30  ;;  %v3627_v47 = vrot.slane %v9839_v34, 1  ;;  %v11377_v30 = vsel %vm937_vm0, %v3630_v0, %v3631_v17 }
 0x421   :  { %v11353_v55 = vsel %vm937_vm0, %v3612_v51, %v3613_v53  ;;  %v3624_v13 = vrot.slane %v9836_v25, 1  ;;  %v4022_v51 = vld [vmem:[#allocation9 + $0x8d0] sm:$0xff]  ;;  %v9837_v53 = vld [vmem:[#allocation2 + $0xc0] sm:$0xff]  ;;  %v4029_v26 = vld [vmem:[#allocation9 + $0x908] sm:$0xff] }
 0x422   :  { %3849 = vmatmul.mubr.f32.gmra.mrb[2].mxu1 %v11333_v9  ;;  %v2703_v25 = vld [vmem:[#allocation2 + $0x178] sm:$0x3]  ;;  %v11383_v5 = vsel %vm937_vm0, %v3627_v47, %v3628_v41  ;;  %v4032_v17 = vld [vmem:[#allocation9 + $0x920] sm:$0xff] }
 0x423   :  { %3854 = vmatprep.mubr.f32.mxu1 %v11337_v14  ;;  %8801 = vmatpush1.bf16.msra.mxu1 %v8800_v40  ;;  %v9832_v40 = vld [vmem:[#allocation2 + $0xa8] sm:$0xff]  ;;  %v11369_v29 = vsel %vm937_vm0, %v3624_v13, %v3625_v8  ;;  %v8826_v8 = vpack.c.bf16 %v4031_v1, %v4029_v26  ;;  %v2706_v26 = vld [vmem:[#allocation2 + $0x190] sm:$0x3]  ;;  %v8832_v1 = vpack.c.bf16 %v4034_v57, %v4032_v17  ;;  %v2715_v57 = vld [vmem:[#allocation2 + $0x1d8] sm:$0x3] }
 0x424   :  { %8803 = vmatprep.subr.bf16.mxu1 %v8802_v11  ;;  %v3618_v11 = vrot.slane %v9832_v40, 1  ;;  %v8820_v40 = vpack.c.bf16 %v4022_v51, %v4020_v42  ;;  %v4035_v42 = vld [vmem:[#allocation9 + $0x938] sm:$0xff]  ;;  %v9840_v51 = vld [vmem:[#allocation2 + $0x168] sm:$0xff] }
 0x426   :  { %3855 = vmatmul.mubr.f32.gmra.mrb[4].mxu1 %v11341_v36  ;;  %v11361_v31 = vsel %vm937_vm0, %v3618_v11, %v3619_v4  ;;  %v8822_v11 = vpack.c.bf16 %v4027_v44, %v4025_v10  ;;  %v4026_v4 = vld [vmem:[#allocation9 + $0x8f0] sm:$0xff] }
 0x427   :  { %3860 = vmatprep.mubr.f32.mxu1 %v11345_v23  ;;  %8805 = vmatpush1.bf16.msra.mxu1 %v8804_v33  ;;  %v4021_v33 = vld [vmem:[#allocation9 + $0x8c8] sm:$0xff] }
 0x428   :  { %8807 = vmatprep.subr.bf16.mxu1 %v8806_v49  ;;  %v4023_v49 = vld [vmem:[#allocation9 + $0x8d8] sm:$0xff] }
 0x429   :  { %v8818_v21 = vpack.c.bf16 %v4023_v49, %v4021_v33  ;;  %v8824_v33 = vpack.c.bf16 %v4026_v4, %v4024_v22  ;;  %v3634_v49 = vrot.slane %v2698_v39, 1  ;;  %v4039_v39 = vld [vmem:[#allocation9 + $0x958] sm:$0xff] }
 0x42a   :  { %3861 = vmatmul.mubr.f32.gmra.mrb[6].mxu1 %v11349_v2 }
 0x42b   :  { %3866 = vmatprep.mubr.f32.mxu1 %v11353_v55  ;;  %8809 = vmatpush1.bf16.msra.mxu1 %v8808_v62  ;;  %v3621_v62 = vrot.slane %v9837_v53, 1  ;;  %v3642_v53 = vrot.slane %v9840_v51, 1  ;;  %v3635_v10 = vsel %vm937_vm0, %v11319_v58, %v3634_v49  ;;  %v3646_v51 = vrot.slane %v2706_v26, 1 }
 0x42c   :  { %8811 = vmatprep.subr.bf16.mxu1 %v8810_v38  ;;  %v3622_v38 = vrot.slane %v2682_v59, 1  ;;  %v4028_v59 = vld [vmem:[#allocation9 + $0x900] sm:$0xff] }
 0x42e   :  { %3867 = vmatmul.mubr.f32.gmra.mrb[8].mxu1 %v11357_v43 }
 0x42f   :  { %3872 = vmatprep.mubr.f32.mxu1 %v11361_v31  ;;  %8813 = vmatpush1.bf16.msra.mxu1 %v8812_v24  ;;  %v3637_v24 = vrot.slane %v2699_v19, 1  ;;  %v2707_v19 = vld [vmem:[#allocation2 + $0x198] sm:$0x3] }
 0x430   :  { %8815 = vmatprep.subr.bf16.mxu1 %v8814_v54  ;;  %v11373_v54 = vsel %vm937_vm0, %v3621_v62, %v3622_v38  ;;  %v3643_v62 = vrot.slane %v2703_v25, 1  ;;  %v2702_v38 = vld [vmem:[#allocation2 + $0x170] sm:$0x3]  ;;  %v3649_v41 = vrot.slane %v2707_v19, 1 }
 0x431   :  { %v3638_v13 = vsel %vm937_vm0, %v11319_v58, %v3637_v24  ;;  %v3640_v4 = vrot.slane %v2702_v38, 1  ;;  %v4037_v24 = vld [vmem:[#allocation9 + $0x948] sm:$0xff] }
 0x432   :  { %3873 = vmatmul.mubr.f32.gmra.mrb[10].mxu1 %v11365_v27  ;;  %v11393_v34 = vsel %vm937_vm0, %v3642_v53, %v3643_v62  ;;  %v9842_v58 = vld [vmem:[#allocation2 + $0x188] sm:$0xff]  ;;  %v8834_v25 = vpack.c.bf16 %v4039_v39, %v4037_v24  ;;  %v4043_v62 = vld [vmem:[#allocation9 + $0x978] sm:$0xff]  ;;  %v4042_v24 = vld [vmem:[#allocation9 + $0x970] sm:$0xff] }
 0x433   :  { %3878 = vmatprep.mubr.f32.mxu1 %v11369_v29  ;;  %8817 = vmatpush1.bf16.msra.mxu1 %v8816_v28  ;;  %v4030_v28 = vld [vmem:[#allocation9 + $0x910] sm:$0xff]  ;;  %v3648_v47 = vrot.slane %v9842_v58, 1  ;;  %v4041_v53 = vld [vmem:[#allocation9 + $0x968] sm:$0xff] }
 0x434   :  { %8819 = vmatprep.subr.bf16.mxu1 %v8818_v21  ;;  %v4033_v21 = vld [vmem:[#allocation9 + $0x928] sm:$0xff]  ;;  %v8828_v44 = vpack.c.bf16 %v4030_v28, %v4028_v59 }
 0x435   :  { %v8830_v0 = vpack.c.bf16 %v4035_v42, %v4033_v21  ;;  %v9843_v21 = vld [vmem:[#allocation2 + $0x180] sm:$0xff]  ;;  %v11405_v38 = vsel %vm937_vm0, %v3648_v47, %v3649_v41 }
 0x436   :  { %3879 = vmatmul.mubr.f32.gmra.mrb[12].mxu1 %v11373_v54  ;;  %v3645_v42 = vrot.slane %v9843_v21, 1  ;;  %v9845_v47 = vld [vmem:[#allocation2 + $0x1a0] sm:$0xff] }
 0x437   :  { %3884 = vmatprep.mubr.f32.mxu1 %v11377_v30  ;;  %8821 = vmatpush1.bf16.msra.mxu1 %v8820_v40  ;;  %v3651_v41 = vrot.slane %v9845_v47, 1  ;;  %v4047_v21 = vld [vmem:[#allocation9 + $0x998] sm:$0xff]  ;;  %v4046_v47 = vld [vmem:[#allocation9 + $0x990] sm:$0xff] }
 0x438   :  { %8823 = vmatprep.subr.bf16.mxu1 %v8822_v11  ;;  %v9841_v11 = vld [vmem:[#allocation2 + $0x160] sm:$0xff]  ;;  %v11413_v58 = vsel %vm937_vm0, %v3645_v42, %v3646_v51  ;;  %v2719_v42 = vld [vmem:[#allocation2 + $0x1f8] sm:$0x3] }
 0x439   :  { %v3639_v22 = vrot.slane %v9841_v11, 1 }
 0x43a   :  { %3885 = vmatmul.mubr.f32.gmra.mrb[14].mxu1 %v11383_v5 }
 0x43b   :  { %8825 = vmatpush1.bf16.msra.mxu1 %v8824_v33  ;;  %3890 = vmatprep.mubr.f32.mxu1 %v3638_v13  ;;  %v11388_v46 = vpop.f32.mrb[32].mxu0  ;;  %v2711_v33 = vld [vmem:[#allocation2 + $0x1b8] sm:$0x3]  ;;  %v4036_v13 = vld [vmem:[#allocation9 + $0x940] sm:$0xff]  ;;  %v11401_v28 = vsel %vm937_vm0, %v3639_v22, %v3640_v4  ;;  %v8838_v22 = vpack.c.bf16 %v4043_v62, %v4041_v53  ;;  %v2714_v53 = vld [vmem:[#allocation2 + $0x1d0] sm:$0x3] }
 0x43c   :  { %13416 = vst [vmem:[#allocation44_spill] sm:$0xff] %v11388_v46  ;;  %8827 = vmatprep.subr.bf16.mxu1 %v8826_v8  ;;  %v11390_v40 = vpop.f32.mrb[33].mxu0  ;;  %v4038_v8 = vld [vmem:[#allocation9 + $0x950] sm:$0xff]  ;;  %v3655_v19 = vrot.slane %v2711_v33, 1  ;;  %v4040_v4 = vld [vmem:[#allocation9 + $0x960] sm:$0xff]  ;;  %v4045_v33 = vld [vmem:[#allocation9 + $0x988] sm:$0xff] }
 0x43d   :  { %13417 = vst [vmem:[#allocation45_spill] sm:$0xff] %v11390_v40  ;;  %v8836_v17 = vpack.c.bf16 %v4038_v8, %v4036_v13  ;;  %v9846_v13 = vld [vmem:[#allocation2 + $0x1c8] sm:$0xff]  ;;  %v3661_v8 = vrot.slane %v2715_v57, 1  ;;  %v8840_v62 = vpack.c.bf16 %v4042_v24, %v4040_v4  ;;  %v3658_v57 = vrot.slane %v2714_v53, 1  ;;  %v4050_v53 = vld [vmem:[#allocation9 + $0x9b0] sm:$0xff]  ;;  %v4055_v40 = vld [vmem:[#allocation9 + $0x9d8] sm:$0xff] }
 0x43e   :  { %3891 = vmatmul.mubr.f32.gmra.mrb[16].mxu1 %v3635_v10  ;;  %v9844_v10 = vld [vmem:[#allocation2 + $0x1a8] sm:$0xff]  ;;  %v3667_v24 = vrot.slane %v2719_v42, 1 }
 0x43f   :  { %3896 = vmatprep.mubr.f32.mxu1 %v11393_v34  ;;  %8829 = vmatpush1.bf16.msra.mxu1 %v8828_v44  ;;  %v3654_v44 = vrot.slane %v9844_v10, 1  ;;  %v8842_v10 = vpack.c.bf16 %v4047_v21, %v4045_v33  ;;  %v9848_v4 = vld [vmem:[#allocation2 + $0x1e8] sm:$0xff]  ;;  %v2718_v33 = vld [vmem:[#allocation2 + $0x1f0] sm:$0x3] }
 0x440   :  { %v11396_v49 = vpop.f32.mrb[34].mxu0  ;;  %8831 = vmatprep.subr.bf16.mxu1 %v8830_v0  ;;  %v2710_v0 = vld [vmem:[#allocation2 + $0x1b0] sm:$0x3] }
 0x441   :  { %13418 = vst [vmem:[#allocation46_spill] sm:$0xff] %v11396_v49  ;;  %v11398_v59 = vpop.f32.mrb[35].mxu0  ;;  %v3652_v26 = vrot.slane %v2710_v0, 1  ;;  %v4044_v0 = vld [vmem:[#allocation9 + $0x980] sm:$0xff] }
 0x442   :  { %13419 = vst [vmem:[#allocation47_spill] sm:$0xff] %v11398_v59  ;;  %3897 = vmatmul.mubr.f32.gmra.mrb[18].mxu1 %v11401_v28  ;;  %v4051_v59 = vld [vmem:[#allocation9 + $0x9b8] sm:$0xff]  ;;  %v8844_v21 = vpack.c.bf16 %v4046_v47, %v4044_v0 }
 0x443   :  { %3902 = vmatprep.mubr.f32.mxu1 %v11405_v38  ;;  %8833 = vmatpush1.bf16.msra.mxu1 %v8832_v1  ;;  %v11417_v1 = vsel %vm937_vm0, %v3654_v44, %v3655_v19  ;;  %v11425_v44 = vsel %vm937_vm0, %v3651_v41, %v3652_v26  ;;  %v9847_v19 = vld [vmem:[#allocation2 + $0x1c0] sm:$0xff]  ;;  %v2723_v41 = vld [vmem:[#allocation2 + $0x218] sm:$0x3] }
 0x444   :  { %v11408_v11 = vpop.f32.mrb[36].mxu0  ;;  %8835 = vmatprep.subr.bf16.mxu1 %v8834_v25  ;;  %v3660_v25 = vrot.slane %v9846_v13, 1  ;;  %v3657_v13 = vrot.slane %v9847_v19, 1  ;;  %v4048_v19 = vld [vmem:[#allocation9 + $0x9a0] sm:$0xff]  ;;  %v3673_v47 = vrot.slane %v2723_v41, 1 }
 0x445   :  { %13420 = vst [vmem:[#allocation48_spill] sm:$0xff] %v11408_v11  ;;  %v11410_v39 = vpop.f32.mrb[37].mxu0  ;;  %v4049_v11 = vld [vmem:[#allocation9 + $0x9a8] sm:$0xff] }
 0x446   :  { %13421 = vst [vmem:[#allocation49_spill] sm:$0xff] %v11410_v39  ;;  %3903 = vmatmul.mubr.f32.gmra.mrb[20].mxu1 %v11413_v58  ;;  %v8846_v26 = vpack.c.bf16 %v4051_v59, %v4049_v11  ;;  %v8848_v59 = vpack.c.bf16 %v4050_v53, %v4048_v19  ;;  %v2727_v11 = vld [vmem:[#allocation2 + $0x238] sm:$0x3] }
 0x447   :  { %3908 = vmatprep.mubr.f32.mxu1 %v11417_v1  ;;  %8837 = vmatpush1.bf16.msra.mxu1 %v8836_v17  ;;  %v11429_v17 = vsel %vm937_vm0, %v3660_v25, %v3661_v8  ;;  %v3664_v25 = vrot.slane %v2718_v33, 1  ;;  %v4053_v8 = vld [vmem:[#allocation9 + $0x9c8] sm:$0xff]  ;;  %v9851_v33 = vld [vmem:[#allocation2 + $0x200] sm:$0xff]  ;;  %v3679_v53 = vrot.slane %v2727_v11, 1 }
 0x448   :  { %8839 = vmatprep.subr.bf16.mxu1 %v8838_v22  ;;  %v3666_v22 = vrot.slane %v9848_v4, 1  ;;  %v3669_v46 = vrot.slane %v9851_v33, 1 }
 0x449   :  { %v11420_v51 = vpop.f32.mrb[38].mxu0 }
 0x44a   :  { %13422 = vst [vmem:[#allocation50_spill] sm:$0xff] %v11420_v51  ;;  %v11422_v39 = vpop.f32.mrb[39].mxu0  ;;  %3909 = vmatmul.mubr.f32.gmra.mrb[22].mxu1 %v11425_v44  ;;  %v9849_v51 = vld [vmem:[#allocation2 + $0x1e0] sm:$0xff]  ;;  %v11437_v42 = vsel %vm937_vm0, %v3666_v22, %v3667_v24  ;;  %v4057_v24 = vld [vmem:[#allocation9 + $0x9e8] sm:$0xff] }
 0x44b   :  { %13423 = vst [vmem:[#allocation51_spill] sm:$0xff] %v11422_v39  ;;  %3914 = vmatprep.mubr.f32.mxu1 %v11429_v17  ;;  %8841 = vmatpush1.bf16.msra.mxu1 %v8840_v62  ;;  %v11433_v39 = vsel %vm937_vm0, %v3657_v13, %v3658_v57  ;;  %v3663_v49 = vrot.slane %v9849_v51, 1  ;;  %v9850_v62 = vld [vmem:[#allocation2 + $0x208] sm:$0xff]  ;;  %v8850_v13 = vpack.c.bf16 %v4055_v40, %v4053_v8  ;;  %v4054_v57 = vld [vmem:[#allocation9 + $0x9d0] sm:$0xff] }
 0x44c   :  { %8843 = vmatprep.subr.bf16.mxu1 %v8842_v10  ;;  %v3672_v0 = vrot.slane %v9850_v62, 1  ;;  %v2722_v10 = vld [vmem:[#allocation2 + $0x210] sm:$0x3]  ;;  %v4052_v51 = vld [vmem:[#allocation9 + $0x9c0] sm:$0xff]  ;;  %v4058_v8 = vld [vmem:[#allocation9 + $0x9f0] sm:$0xff] }
 0x44d   :  { %v11441_v4 = vsel %vm937_vm0, %v3663_v49, %v3664_v25  ;;  %v3670_v22 = vrot.slane %v2722_v10, 1  ;;  %v8852_v40 = vpack.c.bf16 %v4054_v57, %v4052_v51  ;;  %v8854_v49 = vpack.c.bf16 %v4059_v63, %v4057_v24  ;;  %v4056_v25 = vld [vmem:[#allocation9 + $0x9e0] sm:$0xff]  ;;  %v4280_v51 = vld [vmem:[#allocation9 + $0xe10] sm:$0xff]  ;;  %v4283_v57 = vld [vmem:[#allocation9 + $0xe28] sm:$0xff] }
 0x44e   :  { %3915 = vmatmul.mubr.f32.gmra.mrb[24].mxu1 %v11433_v39  ;;  %v11445_v41 = vsel %vm937_vm0, %v3672_v0, %v3673_v47  ;;  %v9853_v10 = vld [vmem:[#allocation2 + $0x220] sm:$0xff]  ;;  %v4279_v0 = vld [vmem:[#allocation9 + $0xe08] sm:$0xff] }
 0x44f   :  { %3920 = vmatprep.mubr.f32.mxu1 %v11437_v42  ;;  %8845 = vmatpush1.bf16.msra.mxu1 %v8844_v21  ;;  %v9852_v21 = vld [vmem:[#allocation2 + $0x228] sm:$0xff]  ;;  %v11449_v62 = vsel %vm937_vm0, %v3669_v46, %v3670_v22  ;;  %v3675_v33 = vrot.slane %v9853_v10, 1  ;;  %v4281_v47 = vld [vmem:[#allocation9 + $0xe18] sm:$0xff] }
 0x450   :  { %8847 = vmatprep.subr.bf16.mxu1 %v8846_v26  ;;  %v3678_v19 = vrot.slane %v9852_v21, 1  ;;  %v2726_v26 = vld [vmem:[#allocation2 + $0x230] sm:$0x3]  ;;  %v8858_v63 = vpack.c.bf16 %v4281_v47, %v4279_v0  ;;  %v4285_v22 = vld [vmem:[#allocation9 + $0xe38] sm:$0xff]  ;;  %v4290_v47 = vld [vmem:[#allocation9 + $0xe60] sm:$0xff] }
 0x451   :  { %v3676_v16 = vrot.slane %v2726_v26, 1  ;;  %v8862_v21 = vpack.c.bf16 %v4285_v22, %v4283_v57  ;;  %v4287_v26 = vld [vmem:[#allocation9 + $0xe48] sm:$0xff]  ;;  %v4294_v57 = vld [vmem:[#allocation9 + $0xe80] sm:$0xff]  ;;  %v4296_v22 = vld [vmem:[#allocation9 + $0xe90] sm:$0xff] }
 0x452   :  { %3921 = vmatmul.mubr.f32.gmra.mrb[26].mxu1 %v11441_v4  ;;  %v11453_v11 = vsel %vm937_vm0, %v3678_v19, %v3679_v53  ;;  %v4282_v19 = vld [vmem:[#allocation9 + $0xe20] sm:$0xff]  ;;  %v4284_v53 = vld [vmem:[#allocation9 + $0xe30] sm:$0xff]  ;;  %v4291_v10 = vld [vmem:[#allocation9 + $0xe68] sm:$0xff] }
 0x453   :  { %3926 = vmatprep.mubr.f32.mxu1 %v11445_v41  ;;  %8849 = vmatpush1.bf16.msra.mxu1 %v8848_v59  ;;  %v8856_v59 = vpack.c.bf16 %v4058_v8, %v4056_v25  ;;  %v11457_v46 = vsel %vm937_vm0, %v3675_v33, %v3676_v16  ;;  %v8864_v16 = vpack.c.bf16 %v4284_v53, %v4282_v19  ;;  %v4286_v25 = vld [vmem:[#allocation9 + $0xe40] sm:$0xff]  ;;  %v4288_v8 = vld [vmem:[#allocation9 + $0xe50] sm:$0xff]  ;;  %v4293_v33 = vld [vmem:[#allocation9 + $0xe78] sm:$0xff] }
 0x454   :  { %8851 = vmatprep.subr.bf16.mxu1 %v8850_v13  ;;  %v4278_v13 = vld [vmem:[#allocation9 + $0xe00] sm:$0xff]  ;;  %v8870_v0 = vpack.c.bf16 %v4293_v33, %v4291_v10  ;;  %v8876_v19 = vpack.c.bf16 %v4296_v22, %v4294_v57 }
 0x455   :  { %v8860_v24 = vpack.c.bf16 %v4280_v51, %v4278_v13  ;;  %v4302_v33 = vld [vmem:[#allocation9 + $0xec0] sm:$0xff] }
 0x456   :  { %3927 = vmatmul.mubr.f32.gmra.mrb[28].mxu1 %v11449_v62  ;;  %v4306_v22 = vld [vmem:[#allocation9 + $0xee0] sm:$0xff] }
 0x457   :  { %3932 = vmatprep.mubr.f32.mxu1 %v11453_v11  ;;  %8853 = vmatpush1.bf16.msra.mxu1 %v8852_v40  ;;  %v4289_v40 = vld [vmem:[#allocation9 + $0xe58] sm:$0xff] }
 0x458   :  { %8855 = vmatprep.subr.bf16.mxu1 %v8854_v49  ;;  %v8866_v49 = vpack.c.bf16 %v4289_v40, %v4287_v26  ;;  %v4298_v26 = vld [vmem:[#allocation9 + $0xea0] sm:$0xff]  ;;  %v4300_v40 = vld [vmem:[#allocation9 + $0xeb0] sm:$0xff] }
 0x45a   :  { %3933 = vmatmul.mubr.f32.gmra.mrb[30].mxu1 %v11457_v46 }
 0x45b   :  { %8857 = vmatpush1.bf16.msra.mxu1 %v8856_v59  ;;  %4124 = vmatprep.mubr.f32.mxu1 %v11329_v3  ;;  %v8868_v3 = vpack.c.bf16 %v4288_v8, %v4286_v25  ;;  %v4295_v59 = vld [vmem:[#allocation9 + $0xe88] sm:$0xff]  ;;  %v8880_v25 = vpack.c.bf16 %v4300_v40, %v4298_v26  ;;  %v2691_v8 = vld [vmem:[#allocation2 + $0x118] sm:$0x3]  ;;  %v4313_v40 = vld [vmem:[#allocation9 + $0xf18] sm:$0xff] }
 0x45c   :  { %8859 = vmatprep.subr.bf16.mxu1 %v8858_v63  ;;  %v4297_v63 = vld [vmem:[#allocation9 + $0xe98] sm:$0xff]  ;;  %v4311_v26 = vld [vmem:[#allocation9 + $0xf08] sm:$0xff] }
 0x45d   :  { %v8874_v51 = vpack.c.bf16 %v4297_v63, %v4295_v59  ;;  %v3983_v63 = vrot.slane %v2691_v8, 1  ;;  %v4310_v8 = vld [vmem:[#allocation9 + $0xf00] sm:$0xff] }
 0x45e   :  { %4125 = vmatmul.mubr.f32.vlgmr.msra.gmra.mrb[0].mxu1 %v11333_v9  ;;  %v4292_v9 = vld [vmem:[#allocation9 + $0xe70] sm:$0xff] }
 0x45f   :  { %4130 = vmatprep.mubr.f32.mxu1 %v11337_v14  ;;  %8861 = vmatpush1.bf16.msra.mxu1 %v8860_v24  ;;  %v8872_v13 = vpack.c.bf16 %v4292_v9, %v4290_v47  ;;  %v4299_v24 = vld [vmem:[#allocation9 + $0xea8] sm:$0xff]  ;;  %v4309_v47 = vld [vmem:[#allocation9 + $0xef8] sm:$0xff] }
 0x460   :  { %8863 = vmatprep.subr.bf16.mxu1 %v8862_v21  ;;  %v4301_v21 = vld [vmem:[#allocation9 + $0xeb8] sm:$0xff]  ;;  %v9854_v9 = vld [vmem:[#allocation2 + $0x108] sm:$0xff] }
 0x461   :  { %v8878_v53 = vpack.c.bf16 %v4301_v21, %v4299_v24  ;;  %v3982_v59 = vrot.slane %v9854_v9, 1  ;;  %v4308_v24 = vld [vmem:[#allocation9 + $0xef0] sm:$0xff]  ;;  %v9855_v21 = vld [vmem:[#allocation2 + $0x100] sm:$0xff] }
 0x462   :  { %4131 = vmatmul.mubr.f32.gmra.mrb[2].mxu1 %v11341_v36 }
 0x463   :  { %4136 = vmatprep.mubr.f32.mxu1 %v11345_v23  ;;  %8865 = vmatpush1.bf16.msra.mxu1 %v8864_v16  ;;  %v4303_v16 = vld [vmem:[#allocation9 + $0xec8] sm:$0xff] }
 0x464   :  { %8867 = vmatprep.subr.bf16.mxu1 %v8866_v49  ;;  %v4305_v49 = vld [vmem:[#allocation9 + $0xed8] sm:$0xff] }
 0x465   :  { %v8882_v10 = vpack.c.bf16 %v4305_v49, %v4303_v16  ;;  %v11475_v16 = vsel %vm937_vm0, %v3982_v59, %v3983_v63  ;;  %v8888_v49 = vpack.c.bf16 %v4308_v24, %v4306_v22  ;;  %v4314_v59 = vld [vmem:[#allocation9 + $0xf20] sm:$0xff]  ;;  %v4316_v63 = vld [vmem:[#allocation9 + $0xf30] sm:$0xff] }
 0x466   :  { %4137 = vmatmul.mubr.f32.gmra.mrb[4].mxu1 %v11349_v2  ;;  %v4318_v24 = vld [vmem:[#allocation9 + $0xf40] sm:$0xff] }
 0x467   :  { %4142 = vmatprep.mubr.f32.mxu1 %v11353_v55  ;;  %8869 = vmatpush1.bf16.msra.mxu1 %v8868_v3  ;;  %v4304_v3 = vld [vmem:[#allocation9 + $0xed0] sm:$0xff] }
 0x468   :  { %8871 = vmatprep.subr.bf16.mxu1 %v8870_v0  ;;  %v4307_v0 = vld [vmem:[#allocation9 + $0xee8] sm:$0xff] }
 0x469   :  { %v8886_v57 = vpack.c.bf16 %v4309_v47, %v4307_v0  ;;  %v4317_v0 = vld [vmem:[#allocation9 + $0xf38] sm:$0xff] }
 0x46a   :  { %4143 = vmatmul.mubr.f32.gmra.mrb[6].mxu1 %v11357_v43 }
 0x46b   :  { %4148 = vmatprep.mubr.f32.mxu1 %v11361_v31  ;;  %8873 = vmatpush1.bf16.msra.mxu1 %v8872_v13  ;;  %v2690_v13 = vld [vmem:[#allocation2 + $0x110] sm:$0x3] }
 0x46c   :  { %8875 = vmatprep.subr.bf16.mxu1 %v8874_v51  ;;  %v8884_v51 = vpack.c.bf16 %v4304_v3, %v4302_v33  ;;  %v4315_v3 = vld [vmem:[#allocation9 + $0xf28] sm:$0xff] }
 0x46d   :  { %v8894_v9 = vpack.c.bf16 %v4317_v0, %v4315_v3  ;;  %v4326_v3 = vld [vmem:[#allocation9 + $0xf80] sm:$0xff]  ;;  %v4328_v0 = vld [vmem:[#allocation9 + $0xf90] sm:$0xff] }
 0x46e   :  { %4149 = vmatmul.mubr.f32.gmra.mrb[8].mxu1 %v11365_v27 }
 0x46f   :  { %4154 = vmatprep.mubr.f32.mxu1 %v11369_v29  ;;  %8877 = vmatpush1.bf16.msra.mxu1 %v8876_v19  ;;  %v3979_v19 = vrot.slane %v9855_v21, 1  ;;  %v4320_v21 = vld [vmem:[#allocation9 + $0xf50] sm:$0xff] }
 0x470   :  { %8879 = vmatprep.subr.bf16.mxu1 %v8878_v53  ;;  %v3980_v53 = vrot.slane %v2690_v13, 1  ;;  %v4319_v13 = vld [vmem:[#allocation9 + $0xf48] sm:$0xff] }
 0x472   :  { %4155 = vmatmul.mubr.f32.gmra.mrb[10].mxu1 %v11373_v54  ;;  %v11479_v33 = vsel %vm937_vm0, %v3979_v19, %v3980_v53  ;;  %v4323_v19 = vld [vmem:[#allocation9 + $0xf68] sm:$0xff]  ;;  %v8900_v53 = vpack.c.bf16 %v4320_v21, %v4318_v24  ;;  %v11493_v21 = vld [vmem:[#allocation2 + $0x258] sm:$0x3] }
 0x473   :  { %4160 = vmatprep.mubr.f32.mxu1 %v11377_v30  ;;  %8881 = vmatpush1.bf16.msra.mxu1 %v8880_v25  ;;  %v8890_v25 = vpack.c.bf16 %v4313_v40, %v4311_v26  ;;  %v4322_v40 = vld [vmem:[#allocation9 + $0xf60] sm:$0xff] }
 0x474   :  { %8883 = vmatprep.subr.bf16.mxu1 %v8882_v10  ;;  %v4312_v10 = vld [vmem:[#allocation9 + $0xf10] sm:$0xff] }
 0x475   :  { %v8892_v47 = vpack.c.bf16 %v4312_v10, %v4310_v8 }
 0x476   :  { %4161 = vmatmul.mubr.f32.gmra.mrb[12].mxu1 %v11383_v5 }
 0x477   :  { %4166 = vmatprep.mubr.f32.mxu1 %v11475_v16  ;;  %8885 = vmatpush1.bf16.msra.mxu1 %v8884_v51  ;;  %v4321_v51 = vld [vmem:[#allocation9 + $0xf58] sm:$0xff] }
 0x478   :  { %8887 = vmatprep.subr.bf16.mxu1 %v8886_v57  ;;  %v8896_v57 = vpack.c.bf16 %v4316_v63, %v4314_v59  ;;  %v8898_v22 = vpack.c.bf16 %v4321_v51, %v4319_v13  ;;  %v8908_v59 = vpack.c.bf16 %v4328_v0, %v4326_v3  ;;  %v4330_v13 = vld [vmem:[#allocation9 + $0xfa0] sm:$0xff]  ;;  %v4332_v51 = vld [vmem:[#allocation9 + $0xfb0] sm:$0xff] }
 0x479   :  { %v8912_v24 = vpack.c.bf16 %v4332_v51, %v4330_v13  ;;  %v4338_v0 = vld [vmem:[#allocation9 + $0xfe0] sm:$0xff]  ;;  %v4665_v13 = vld [vmem:[#allocation9 + $0x408] sm:$0xff]  ;;  %v4667_v51 = vld [vmem:[#allocation9 + $0x418] sm:$0xff] }
 0x47a   :  { %4167 = vmatmul.mubr.f32.gmra.mrb[14].mxu1 %v11479_v33 }
 0x47b   :  { %4172 = vmatprep.mubr.f32.mxu1 %v11393_v34  ;;  %8889 = vmatpush1.bf16.msra.mxu1 %v8888_v49  ;;  %v4325_v34 = vld [vmem:[#allocation9 + $0xf78] sm:$0xff]  ;;  %v4327_v49 = vld [vmem:[#allocation9 + $0xf88] sm:$0xff] }
 0x47c   :  { %8891 = vmatprep.subr.bf16.mxu1 %v8890_v25  ;;  %v8902_v26 = vpack.c.bf16 %v4325_v34, %v4323_v19  ;;  %v4329_v25 = vld [vmem:[#allocation9 + $0xf98] sm:$0xff]  ;;  %v4334_v34 = vld [vmem:[#allocation9 + $0xfc0] sm:$0xff] }
 0x47d   :  { %v8906_v10 = vpack.c.bf16 %v4329_v25, %v4327_v49  ;;  %v3989_v25 = vrot.slane %v11493_v21, 1 }
 0x47e   :  { %4173 = vmatmul.mubr.f32.gmra.mrb[16].mxu1 %v11401_v28  ;;  %v4324_v28 = vld [vmem:[#allocation9 + $0xf70] sm:$0xff] }
 0x47f   :  { %4178 = vmatprep.mubr.f32.mxu1 %v11405_v38  ;;  %8893 = vmatpush1.bf16.msra.mxu1 %v8892_v47  ;;  %v8904_v8 = vpack.c.bf16 %v4324_v28, %v4322_v40  ;;  %v4331_v47 = vld [vmem:[#allocation9 + $0xfa8] sm:$0xff]  ;;  %v4341_v40 = vld [vmem:[#allocation9 + $0xff8] sm:$0xff] }
 0x480   :  { %8895 = vmatprep.subr.bf16.mxu1 %v8894_v9  ;;  %v4333_v9 = vld [vmem:[#allocation9 + $0xfb8] sm:$0xff]  ;;  %v11496_v28 = vld [vmem:[#allocation2 + $0x248] sm:$0xff] }
 0x481   :  { %v8910_v63 = vpack.c.bf16 %v4333_v9, %v4331_v47  ;;  %v3988_v49 = vrot.slane %v11496_v28, 1  ;;  %v4340_v47 = vld [vmem:[#allocation9 + $0xff0] sm:$0xff]  ;;  %v11503_v9 = vld [vmem:[#allocation2 + $0x240] sm:$0xff] }
 0x482   :  { %4179 = vmatmul.mubr.f32.gmra.mrb[18].mxu1 %v11413_v58 }
 0x483   :  { %4184 = vmatprep.mubr.f32.mxu1 %v11417_v1  ;;  %8897 = vmatpush1.bf16.msra.mxu1 %v8896_v57  ;;  %v4335_v57 = vld [vmem:[#allocation9 + $0xfc8] sm:$0xff] }
 0x484   :  { %8899 = vmatprep.subr.bf16.mxu1 %v8898_v22  ;;  %v4337_v22 = vld [vmem:[#allocation9 + $0xfd8] sm:$0xff] }
 0x485   :  { %v8914_v19 = vpack.c.bf16 %v4337_v22, %v4335_v57  ;;  %v11509_v57 = vsel %vm937_vm0, %v3988_v49, %v3989_v25  ;;  %v8920_v22 = vpack.c.bf16 %v4340_v47, %v4338_v0  ;;  %v4673_v0 = vld [vmem:[#allocation9 + $0x448] sm:$0xff] }
 0x486   :  { %4185 = vmatmul.mubr.f32.gmra.mrb[20].mxu1 %v11425_v44 }
 0x487   :  { %4190 = vmatprep.mubr.f32.mxu1 %v11429_v17  ;;  %8901 = vmatpush1.bf16.msra.mxu1 %v8900_v53  ;;  %v4336_v53 = vld [vmem:[#allocation9 + $0xfd0] sm:$0xff] }
 0x488   :  { %8903 = vmatprep.subr.bf16.mxu1 %v8902_v26  ;;  %v4339_v26 = vld [vmem:[#allocation9 + $0xfe8] sm:$0xff] }
 0x489   :  { %v8918_v3 = vpack.c.bf16 %v4341_v40, %v4339_v26  ;;  %v4669_v26 = vld [vmem:[#allocation9 + $0x428] sm:$0xff]  ;;  %v4671_v40 = vld [vmem:[#allocation9 + $0x438] sm:$0xff] }
 0x48a   :  { %4191 = vmatmul.mubr.f32.gmra.mrb[22].mxu1 %v11433_v39  ;;  %v8926_v25 = vpack.c.bf16 %v4671_v40, %v4669_v26  ;;  %v4680_v40 = vld [vmem:[#allocation9 + $0x480] sm:$0xff] }
 0x48b   :  { %4196 = vmatprep.mubr.f32.mxu1 %v11437_v42  ;;  %8905 = vmatpush1.bf16.msra.mxu1 %v8904_v8  ;;  %v11500_v8 = vld [vmem:[#allocation2 + $0x250] sm:$0x3] }
 0x48c   :  { %8907 = vmatprep.subr.bf16.mxu1 %v8906_v10  ;;  %13424 = vst [vmem:[#allocation52_spill] sm:$0xff] %v11500_v8  ;;  %v8916_v10 = vpack.c.bf16 %v4336_v53, %v4334_v34  ;;  %v4666_v34 = vld [vmem:[#allocation9 + $0x410] sm:$0xff] }
 0x48e   :  { %4197 = vmatmul.mubr.f32.gmra.mrb[24].mxu1 %v11441_v4 }
 0x48f   :  { %4202 = vmatprep.mubr.f32.mxu1 %v11445_v41  ;;  %8909 = vmatpush1.bf16.msra.mxu1 %v8908_v59  ;;  %v3985_v59 = vrot.slane %v11503_v9, 1 }
 0x490   :  { %8911 = vmatprep.subr.bf16.mxu1 %v8910_v63  ;;  %v3986_v63 = vrot.slane %v11500_v8, 1  ;;  %v4668_v8 = vld [vmem:[#allocation9 + $0x420] sm:$0xff] }
 0x492   :  { %4203 = vmatmul.mubr.f32.gmra.mrb[26].mxu1 %v11449_v62  ;;  %v11513_v53 = vsel %vm937_vm0, %v3985_v59, %v3986_v63  ;;  %v4672_v63 = vld [vmem:[#allocation9 + $0x440] sm:$0xff] }
 0x493   :  { %4208 = vmatprep.mubr.f32.mxu1 %v11453_v11  ;;  %8913 = vmatpush1.bf16.msra.mxu1 %v8912_v24  ;;  %v8922_v24 = vpack.c.bf16 %v4667_v51, %v4665_v13  ;;  %v4674_v13 = vld [vmem:[#allocation9 + $0x450] sm:$0xff]  ;;  %v4677_v51 = vld [vmem:[#allocation9 + $0x468] sm:$0xff] }
 0x494   :  { %8915 = vmatprep.subr.bf16.mxu1 %v8914_v19  ;;  %v4664_v19 = vld [vmem:[#allocation9 + $0x400] sm:$0xff] }
 0x495   :  { %v8924_v49 = vpack.c.bf16 %v4666_v34, %v4664_v19  ;;  %v4676_v19 = vld [vmem:[#allocation9 + $0x460] sm:$0xff]  ;;  %v4681_v34 = vld [vmem:[#allocation9 + $0x488] sm:$0xff] }
 0x496   :  { %4209 = vmatmul.mubr.f32.gmra.mrb[28].mxu1 %v11457_v46 }
 0x497   :  { %4214 = vmatprep.mubr.f32.mxu1 %v11509_v57  ;;  %8917 = vmatpush1.bf16.msra.mxu1 %v8916_v10  ;;  %v4670_v10 = vld [vmem:[#allocation9 + $0x430] sm:$0xff] }
 0x498   :  { %8919 = vmatprep.subr.bf16.mxu1 %v8918_v3  ;;  %v4675_v3 = vld [vmem:[#allocation9 + $0x458] sm:$0xff]  ;;  %v8928_v47 = vpack.c.bf16 %v4670_v10, %v4668_v8 }
 0x499   :  { %v8930_v59 = vpack.c.bf16 %v4675_v3, %v4673_v0  ;;  %v4684_v0 = vld [vmem:[#allocation9 + $0x4a0] sm:$0xff]  ;;  %v4689_v3 = vld [vmem:[#allocation9 + $0x4c8] sm:$0xff] }
 0x49a   :  { %4215 = vmatmul.mubr.f32.gmra.mrb[30].mxu1 %v11513_v53 }
 0x49b   :  { %8921 = vmatpush1.bf16.msra.mxu1 %v8920_v22  ;;  %4406 = vmatprep.mubr.f32.mxu1 %v11337_v14  ;;  %v4679_v22 = vld [vmem:[#allocation9 + $0x478] sm:$0xff]  ;;  %v8932_v14 = vpack.c.bf16 %v4674_v13, %v4672_v63  ;;  %v4688_v13 = vld [vmem:[#allocation9 + $0x4c0] sm:$0xff] }
 0x49c   :  { %8923 = vmatprep.subr.bf16.mxu1 %v8922_v24  ;;  %v8934_v24 = vpack.c.bf16 %v4679_v22, %v4677_v51  ;;  %v11529_v63 = vld [vmem:[#allocation2] sm:$0xff]  ;;  %v4690_v51 = vld [vmem:[#allocation9 + $0x4d0] sm:$0xff] }
 0x49e   :  { %4407 = vmatmul.mubr.f32.vlgmr.msra.gmra.mrb[0].mxu1 %v11341_v36  ;;  %v4678_v36 = vld [vmem:[#allocation9 + $0x470] sm:$0xff] }
 0x49f   :  { %4412 = vmatprep.mubr.f32.mxu1 %v11345_v23  ;;  %8925 = vmatpush1.bf16.msra.mxu1 %v8924_v49  ;;  %v4683_v23 = vld [vmem:[#allocation9 + $0x498] sm:$0xff]  ;;  %v8936_v8 = vpack.c.bf16 %v4678_v36, %v4676_v19  ;;  %v4685_v49 = vld [vmem:[#allocation9 + $0x4a8] sm:$0xff] }
 0x4a0   :  { %8927 = vmatprep.subr.bf16.mxu1 %v8926_v25  ;;  %v8938_v26 = vpack.c.bf16 %v4683_v23, %v4681_v34  ;;  %v4695_v19 = vld [vmem:[#allocation9 + $0x4f8] sm:$0xff]  ;;  %v4692_v23 = vld [vmem:[#allocation9 + $0x4e0] sm:$0xff] }
 0x4a2   :  { %4413 = vmatmul.mubr.f32.gmra.mrb[2].mxu1 %v11349_v2  ;;  %v4682_v2 = vld [vmem:[#allocation9 + $0x490] sm:$0xff] }
 0x4a3   :  { %4418 = vmatprep.mubr.f32.mxu1 %v11353_v55  ;;  %8929 = vmatpush1.bf16.msra.mxu1 %v8928_v47  ;;  %v4687_v55 = vld [vmem:[#allocation9 + $0x4b8] sm:$0xff]  ;;  %v8940_v25 = vpack.c.bf16 %v4682_v2, %v4680_v40  ;;  %v11525_v47 = vld [vmem:[#allocation2 + $0x138] sm:$0x3] }
 0x4a4   :  { %8931 = vmatprep.subr.bf16.mxu1 %v8930_v59  ;;  %v8942_v10 = vpack.c.bf16 %v4687_v55, %v4685_v49  ;;  %v4265_v22 = vrot.slane %v11525_v47, 1  ;;  %v4699_v40 = vld [vmem:[#allocation9 + $0x518] sm:$0xff]  ;;  %v4696_v49 = vld [vmem:[#allocation9 + $0x500] sm:$0xff]  ;;  %v4698_v55 = vld [vmem:[#allocation9 + $0x510] sm:$0xff] }
 0x4a6   :  { %4419 = vmatmul.mubr.f32.gmra.mrb[4].mxu1 %v11357_v43  ;;  %v4686_v43 = vld [vmem:[#allocation9 + $0x4b0] sm:$0xff] }
 0x4a7   :  { %4424 = vmatprep.mubr.f32.mxu1 %v11361_v31  ;;  %8933 = vmatpush1.bf16.msra.mxu1 %v8932_v14  ;;  %v4691_v31 = vld [vmem:[#allocation9 + $0x4d8] sm:$0xff]  ;;  %v8944_v59 = vpack.c.bf16 %v4686_v43, %v4684_v0  ;;  %v11535_v14 = vld [vmem:[#allocation2 + $0x130] sm:$0x3]  ;;  %v8956_v0 = vpack.c.bf16 %v4698_v55, %v4696_v49  ;;  %v11554_v49 = vld [vmem:[#allocation2 + $0x278] sm:$0x3] }
 0x4a8   :  { %8935 = vmatprep.subr.bf16.mxu1 %v8934_v24  ;;  %v4693_v24 = vld [vmem:[#allocation9 + $0x4e8] sm:$0xff] }
 0x4a9   :  { %v8950_v34 = vpack.c.bf16 %v4695_v19, %v4693_v24  ;;  %v4709_v24 = vld [vmem:[#allocation9 + $0x568] sm:$0xff] }
 0x4aa   :  { %4425 = vmatmul.mubr.f32.gmra.mrb[6].mxu1 %v11365_v27  ;;  %v11532_v27 = vrot.slane %v11529_v63, 1 }
 0x4ab   :  { %4430 = vmatprep.mubr.f32.mxu1 %v11369_v29  ;;  %8937 = vmatpush1.bf16.msra.mxu1 %v8936_v8  ;;  %v8946_v29 = vpack.c.bf16 %v4691_v31, %v4689_v3  ;;  %v4694_v8 = vld [vmem:[#allocation9 + $0x4f0] sm:$0xff]  ;;  %v4705_v31 = vld [vmem:[#allocation9 + $0x548] sm:$0xff] }
 0x4ac   :  { %8939 = vmatprep.subr.bf16.mxu1 %v8938_v26  ;;  %v4266_v36 = vsel %vm937_vm0, %v11532_v27, %v4265_v22  ;;  %v4697_v26 = vld [vmem:[#allocation9 + $0x508] sm:$0xff]  ;;  %v4702_v3 = vld [vmem:[#allocation9 + $0x530] sm:$0xff] }
 0x4ad   :  { %v8954_v2 = vpack.c.bf16 %v4699_v40, %v4697_v26  ;;  %v4706_v22 = vld [vmem:[#allocation9 + $0x550] sm:$0xff]  ;;  %v4717_v26 = vld [vmem:[#allocation9 + $0x5a8] sm:$0xff] }
 0x4ae   :  { %4431 = vmatmul.mubr.f32.gmra.mrb[8].mxu1 %v11373_v54  ;;  %v8948_v54 = vpack.c.bf16 %v4690_v51, %v4688_v13  ;;  %v4704_v51 = vld [vmem:[#allocation9 + $0x540] sm:$0xff] }
 0x4af   :  { %4436 = vmatprep.mubr.f32.mxu1 %v11377_v30  ;;  %8941 = vmatpush1.bf16.msra.mxu1 %v8940_v25  ;;  %v4262_v30 = vrot.slane %v11535_v14, 1  ;;  %v4701_v25 = vld [vmem:[#allocation9 + $0x528] sm:$0xff]  ;;  %v8964_v19 = vpack.c.bf16 %v4706_v22, %v4704_v51  ;;  %v9859_v51 = vld [vmem:[#allocation2 + $0x18] sm:$0x3] }
 0x4b0   :  { %8943 = vmatprep.subr.bf16.mxu1 %v8942_v10  ;;  %v4703_v10 = vld [vmem:[#allocation9 + $0x538] sm:$0xff]  ;;  %v4539_v22 = vrot.slane %v9859_v51, 2  ;;  %v4950_v51 = vld [vmem:[#allocation9 + $0xa60] sm:$0xff] }
 0x4b1   :  { %v8958_v43 = vpack.c.bf16 %v4703_v10, %v4701_v25  ;;  %v4720_v25 = vld [vmem:[#allocation9 + $0x5c0] sm:$0xff]  ;;  %v4271_v10 = vrot.slane %v11554_v49, 1 }
 0x4b2   :  { %4437 = vmatmul.mubr.f32.gmra.mrb[10].mxu1 %v11383_v5  ;;  %v4263_v5 = vsel %vm937_vm0, %v11532_v27, %v4262_v30  ;;  %v4708_v30 = vld [vmem:[#allocation9 + $0x560] sm:$0xff] }
 0x4b3   :  { %4442 = vmatprep.mubr.f32.mxu1 %v11475_v16  ;;  %8945 = vmatpush1.bf16.msra.mxu1 %v8944_v59  ;;  %v8952_v16 = vpack.c.bf16 %v4694_v8, %v4692_v23  ;;  %v4707_v59 = vld [vmem:[#allocation9 + $0x558] sm:$0xff]  ;;  %v4712_v8 = vld [vmem:[#allocation9 + $0x580] sm:$0xff] }
 0x4b4   :  { %8947 = vmatprep.subr.bf16.mxu1 %v8946_v29  ;;  %v8962_v13 = vpack.c.bf16 %v4707_v59, %v4705_v31  ;;  %v4272_v31 = vsel %vm937_vm0, %v11532_v27, %v4271_v10 }
 0x4b6   :  { %4443 = vmatmul.mubr.f32.gmra.mrb[12].mxu1 %v11479_v33  ;;  %v4700_v33 = vld [vmem:[#allocation9 + $0x520] sm:$0xff] }
 0x4b7   :  { %8949 = vmatpush1.bf16.msra.mxu1 %v8948_v54  ;;  %4448 = vmatprep.mubr.f32.mxu1 %v4266_v36  ;;  %v8960_v29 = vpack.c.bf16 %v4702_v3, %v4700_v33  ;;  %v4713_v36 = vld [vmem:[#allocation9 + $0x588] sm:$0xff]  ;;  %v4727_v33 = vld [vmem:[#allocation9 + $0x5f8] sm:$0xff]  ;;  %v11565_v3 = vrot.slane %v11529_v63, 2 }
 0x4b8   :  { %8951 = vmatprep.subr.bf16.mxu1 %v8950_v34 }
 0x4ba   :  { %4449 = vmatmul.mubr.f32.gmra.mrb[14].mxu1 %v4263_v5 }
 0x4bb   :  { %4454 = vmatprep.mubr.f32.mxu1 %v11405_v38  ;;  %8953 = vmatpush1.bf16.msra.mxu1 %v8952_v16  ;;  %v4711_v38 = vld [vmem:[#allocation9 + $0x578] sm:$0xff]  ;;  %v4716_v16 = vld [vmem:[#allocation9 + $0x5a0] sm:$0xff] }
 0x4bc   :  { %8955 = vmatprep.subr.bf16.mxu1 %v8954_v2  ;;  %v8966_v54 = vpack.c.bf16 %v4711_v38, %v4709_v24  ;;  %v4721_v2 = vld [vmem:[#allocation9 + $0x5c8] sm:$0xff] }
 0x4bd   :  { %v4939_v24 = vld [vmem:[#allocation9 + $0xa08] sm:$0xff] }
 0x4be   :  { %4455 = vmatmul.mubr.f32.gmra.mrb[16].mxu1 %v11413_v58  ;;  %v4710_v58 = vld [vmem:[#allocation9 + $0x570] sm:$0xff] }
 0x4bf   :  { %4460 = vmatprep.mubr.f32.mxu1 %v11417_v1  ;;  %8957 = vmatpush1.bf16.msra.mxu1 %v8956_v0  ;;  %v4715_v1 = vld [vmem:[#allocation9 + $0x598] sm:$0xff]  ;;  %v8968_v34 = vpack.c.bf16 %v4710_v58, %v4708_v30  ;;  %v11559_v0 = vld [vmem:[#allocation2 + $0x270] sm:$0x3]  ;;  %v4540_v30 = vsel %vm1704_vm1, %v11565_v3, %v4539_v22  ;;  %v4952_v22 = vld [vmem:[#allocation9 + $0xa70] sm:$0xff] }
 0x4c0   :  { %8959 = vmatprep.subr.bf16.mxu1 %v8958_v43  ;;  %v8970_v23 = vpack.c.bf16 %v4715_v1, %v4713_v36  ;;  %v4725_v43 = vld [vmem:[#allocation9 + $0x5e8] sm:$0xff]  ;;  %v4938_v36 = vld [vmem:[#allocation9 + $0xa00] sm:$0xff]  ;;  %v4940_v1 = vld [vmem:[#allocation9 + $0xa10] sm:$0xff] }
 0x4c1   :  { %v8982_v59 = vpack.c.bf16 %v4727_v33, %v4725_v43  ;;  %v4946_v33 = vld [vmem:[#allocation9 + $0xa40] sm:$0xff] }
 0x4c2   :  { %4461 = vmatmul.mubr.f32.gmra.mrb[18].mxu1 %v11425_v44  ;;  %v4714_v44 = vld [vmem:[#allocation9 + $0x590] sm:$0xff] }
 0x4c3   :  { %4466 = vmatprep.mubr.f32.mxu1 %v11429_v17  ;;  %8961 = vmatpush1.bf16.msra.mxu1 %v8960_v29  ;;  %v4719_v17 = vld [vmem:[#allocation9 + $0x5b8] sm:$0xff]  ;;  %v8972_v40 = vpack.c.bf16 %v4714_v44, %v4712_v8  ;;  %v4724_v29 = vld [vmem:[#allocation9 + $0x5e0] sm:$0xff]  ;;  %v9862_v44 = vld [vmem:[#allocation2 + $0x38] sm:$0x3] }
 0x4c4   :  { %8963 = vmatprep.subr.bf16.mxu1 %v8962_v13  ;;  %v8974_v5 = vpack.c.bf16 %v4719_v17, %v4717_v26  ;;  %v4726_v13 = vld [vmem:[#allocation9 + $0x5f0] sm:$0xff]  ;;  %v9861_v8 = vld [vmem:[#allocation2 + $0x28] sm:$0xff]  ;;  %v4545_v26 = vrot.slane %v9862_v44, 2  ;;  %v8988_v17 = vpack.c.bf16 %v4940_v1, %v4938_v36 }
 0x4c5   :  { %v8984_v38 = vpack.c.bf16 %v4726_v13, %v4724_v29  ;;  %v9865_v44 = vld [vmem:[#allocation2 + $0xc8] sm:$0xff] }
 0x4c6   :  { %4467 = vmatmul.mubr.f32.gmra.mrb[20].mxu1 %v11433_v39  ;;  %v4718_v39 = vld [vmem:[#allocation9 + $0x5b0] sm:$0xff] }
 0x4c7   :  { %4472 = vmatprep.mubr.f32.mxu1 %v11437_v42  ;;  %8965 = vmatpush1.bf16.msra.mxu1 %v8964_v19  ;;  %v4723_v42 = vld [vmem:[#allocation9 + $0x5d8] sm:$0xff]  ;;  %v8976_v55 = vpack.c.bf16 %v4718_v39, %v4716_v16  ;;  %v9860_v19 = vld [vmem:[#allocation2 + $0x10] sm:$0x3]  ;;  %v4944_v16 = vld [vmem:[#allocation9 + $0xa30] sm:$0xff] }
 0x4c8   :  { %8967 = vmatprep.subr.bf16.mxu1 %v8966_v54  ;;  %v4536_v54 = vrot.slane %v9860_v19, 2  ;;  %v9863_v39 = vld [vmem:[#allocation2 + $0x20] sm:$0xff] }
 0x4c9   :  { %v4954_v19 = vld [vmem:[#allocation9 + $0xa80] sm:$0xff] }
 0x4ca   :  { %4473 = vmatmul.mubr.f32.gmra.mrb[22].mxu1 %v11441_v4  ;;  %v8978_v4 = vpack.c.bf16 %v4723_v42, %v4721_v2  ;;  %v4541_v2 = vrot.slane %v9863_v39, 2  ;;  %v9864_v42 = vld [vmem:[#allocation2 + $0x30] sm:$0x3]  ;;  %v4964_v39 = vld [vmem:[#allocation9 + $0xad0] sm:$0xff] }
 0x4cb   :  { %4478 = vmatprep.mubr.f32.mxu1 %v11445_v41  ;;  %8969 = vmatpush1.bf16.msra.mxu1 %v8968_v34  ;;  %v4722_v41 = vld [vmem:[#allocation9 + $0x5d0] sm:$0xff]  ;;  %v4943_v34 = vld [vmem:[#allocation9 + $0xa28] sm:$0xff] }
 0x4cc   :  { %8971 = vmatprep.subr.bf16.mxu1 %v8970_v23  ;;  %v4945_v23 = vld [vmem:[#allocation9 + $0xa38] sm:$0xff] }
 0x4ce   :  { %4479 = vmatmul.mubr.f32.gmra.mrb[24].mxu1 %v11449_v62  ;;  %v8980_v62 = vpack.c.bf16 %v4722_v41, %v4720_v25  ;;  %v4949_v25 = vld [vmem:[#allocation9 + $0xa58] sm:$0xff] }
 0x4cf   :  { %4484 = vmatprep.mubr.f32.mxu1 %v11453_v11  ;;  %8973 = vmatpush1.bf16.msra.mxu1 %v8972_v40  ;;  %v4268_v11 = vrot.slane %v11559_v0, 1  ;;  %v8990_v40 = vpack.c.bf16 %v4945_v23, %v4943_v34  ;;  %v4958_v34 = vld [vmem:[#allocation9 + $0xaa0] sm:$0xff]  ;;  %v4960_v23 = vld [vmem:[#allocation9 + $0xab0] sm:$0xff] }
 0x4d0   :  { %8975 = vmatprep.subr.bf16.mxu1 %v8974_v5  ;;  %v4942_v5 = vld [vmem:[#allocation9 + $0xa20] sm:$0xff] }
 0x4d1   :  { %v8992_v10 = vpack.c.bf16 %v4944_v16, %v4942_v5  ;;  %v4962_v16 = vld [vmem:[#allocation9 + $0xac0] sm:$0xff] }
 0x4d2   :  { %4485 = vmatmul.mubr.f32.gmra.mrb[26].mxu1 %v11457_v46  ;;  %v4941_v46 = vld [vmem:[#allocation9 + $0xa18] sm:$0xff] }
 0x4d3   :  { %4490 = vmatprep.mubr.f32.mxu1 %v11509_v57  ;;  %8977 = vmatpush1.bf16.msra.mxu1 %v8976_v55  ;;  %v4269_v57 = vsel %vm937_vm0, %v11532_v27, %v4268_v11  ;;  %v8986_v58 = vpack.c.bf16 %v4941_v46, %v4939_v24  ;;  %v4537_v27 = vsel %vm1704_vm1, %v11565_v3, %v4536_v54  ;;  %v4542_v55 = vrot.slane %v9864_v42, 2  ;;  %v4955_v24 = vld [vmem:[#allocation9 + $0xa88] sm:$0xff]  ;;  %v4957_v46 = vld [vmem:[#allocation9 + $0xa98] sm:$0xff]  ;;  %v4956_v54 = vld [vmem:[#allocation9 + $0xa90] sm:$0xff] }
 0x4d4   :  { %8979 = vmatprep.subr.bf16.mxu1 %v8978_v4  ;;  %v4947_v4 = vld [vmem:[#allocation9 + $0xa48] sm:$0xff]  ;;  %v9004_v36 = vpack.c.bf16 %v4956_v54, %v4954_v19 }
 0x4d5   :  { %v8994_v43 = vpack.c.bf16 %v4949_v25, %v4947_v4  ;;  %v11581_v11 = vsel %vm1704_vm1, %v4541_v2, %v4542_v55  ;;  %v9867_v2 = vld [vmem:[#allocation2 + $0xc0] sm:$0xff]  ;;  %v9868_v55 = vld [vmem:[#allocation2 + $0xd0] sm:$0x3] }
 0x4d6   :  { %4491 = vmatmul.mubr.f32.gmra.mrb[28].mxu1 %v11513_v53  ;;  %v4544_v53 = vrot.slane %v9861_v8, 2  ;;  %v4963_v8 = vld [vmem:[#allocation9 + $0xac8] sm:$0xff]  ;;  %v4571_v42 = vrot.slane %v9867_v2, 2  ;;  %v4572_v4 = vrot.slane %v9868_v55, 2  ;;  %v9876_v2 = vld [vmem:[#allocation2 + $0x178] sm:$0x3] }
 0x4d7   :  { %8981 = vmatpush1.bf16.msra.mxu1 %v8980_v62  ;;  %4496 = vmatprep.mubr.f32.mxu1 %v4272_v31  ;;  %v4948_v62 = vld [vmem:[#allocation9 + $0xa50] sm:$0xff]  ;;  %v4951_v31 = vld [vmem:[#allocation9 + $0xa68] sm:$0xff] }
 0x4d8   :  { %8983 = vmatprep.subr.bf16.mxu1 %v8982_v59  ;;  %v11577_v41 = vsel %vm1704_vm1, %v4544_v53, %v4545_v26  ;;  %v4953_v59 = vld [vmem:[#allocation9 + $0xa78] sm:$0xff]  ;;  %v8996_v29 = vpack.c.bf16 %v4948_v62, %v4946_v33  ;;  %v4574_v26 = vrot.slane %v9865_v44, 2  ;;  %v4967_v25 = vld [vmem:[#allocation9 + $0xae8] sm:$0xff] }
 0x4d9   :  { %v8998_v13 = vpack.c.bf16 %v4953_v59, %v4951_v31  ;;  %v4965_v53 = vld [vmem:[#allocation9 + $0xad8] sm:$0xff]  ;;  %v9869_v33 = vld [vmem:[#allocation2 + $0xe8] sm:$0xff]  ;;  %v9870_v31 = vld [vmem:[#allocation2 + $0xf8] sm:$0x3] }
 0x4da   :  { %4497 = vmatmul.mubr.f32.gmra.mrb[30].mxu1 %v4269_v57  ;;  %v9000_v57 = vpack.c.bf16 %v4952_v22, %v4950_v51  ;;  %v9010_v5 = vpack.c.bf16 %v4965_v53, %v4963_v8  ;;  %v4580_v62 = vrot.slane %v9869_v33, 2  ;;  %v4581_v59 = vrot.slane %v9870_v31, 2  ;;  %v4966_v51 = vld [vmem:[#allocation9 + $0xae0] sm:$0xff]  ;;  %v4968_v22 = vld [vmem:[#allocation9 + $0xaf0] sm:$0xff]  ;;  %v9873_v54 = vld [vmem:[#allocation2 + $0xf0] sm:$0x3] }
 0x4db   :  { %8985 = vmatpush1.bf16.msra.mxu1 %v8984_v38  ;;  %4792 = vmatprep.mubr.f32.mxu1 %v4540_v30  ;;  %v9002_v38 = vpack.c.bf16 %v4957_v46, %v4955_v24  ;;  %v4959_v30 = vld [vmem:[#allocation9 + $0xaa8] sm:$0xff]  ;;  %v9871_v24 = vld [vmem:[#allocation2 + $0x158] sm:$0x3] }
 0x4dc   :  { %8987 = vmatprep.subr.bf16.mxu1 %v8986_v58  ;;  %v4961_v58 = vld [vmem:[#allocation9 + $0xab8] sm:$0xff]  ;;  %v4587_v46 = vrot.slane %v9871_v24, 2  ;;  %v4976_v33 = vld [vmem:[#allocation9 + $0xb30] sm:$0xff]  ;;  %v9879_v24 = vld [vmem:[#allocation2 + $0x188] sm:$0xff] }
 0x4dd   :  { %v9006_v1 = vpack.c.bf16 %v4961_v58, %v4959_v30  ;;  %v4578_v30 = vrot.slane %v9873_v54, 2  ;;  %v4971_v58 = vld [vmem:[#allocation9 + $0xb08] sm:$0xff] }
 0x4de   :  { %4793 = vmatmul.mubr.f32.vlgmr.msra.gmra.mrb[0].mxu1 %v4537_v27  ;;  %v9866_v27 = vld [vmem:[#allocation2 + $0xd8] sm:$0x3]  ;;  %v4588_v53 = vsel %vm1704_vm1, %v11565_v3, %v4587_v46  ;;  %v4598_v46 = vrot.slane %v9879_v24, 2  ;;  %v9887_v24 = vld [vmem:[#allocation2 + $0x1c8] sm:$0xff] }
 0x4df   :  { %4798 = vmatprep.mubr.f32.mxu1 %v11577_v41  ;;  %8989 = vmatpush1.bf16.msra.mxu1 %v8988_v17  ;;  %v4575_v17 = vrot.slane %v9866_v27, 2  ;;  %v4972_v27 = vld [vmem:[#allocation9 + $0xb10] sm:$0xff] }
 0x4e0   :  { %8991 = vmatprep.subr.bf16.mxu1 %v8990_v40  ;;  %v9008_v40 = vpack.c.bf16 %v4960_v23, %v4958_v34  ;;  %v9016_v34 = vpack.c.bf16 %v4968_v22, %v4966_v51  ;;  %v9874_v23 = vld [vmem:[#allocation2 + $0x150] sm:$0x3]  ;;  %v4981_v51 = vld [vmem:[#allocation9 + $0xb58] sm:$0xff] }
 0x4e1   :  { %v4584_v8 = vrot.slane %v9874_v23, 2  ;;  %v9881_v23 = vld [vmem:[#allocation2 + $0x180] sm:$0xff] }
 0x4e2   :  { %4799 = vmatmul.mubr.f32.gmra.mrb[2].mxu1 %v11581_v11 }
 0x4e3   :  { %4804 = vmatprep.mubr.f32.mxu1 %v11116_v12  ;;  %8993 = vmatpush1.bf16.msra.mxu1 %v8992_v10  ;;  %v4969_v10 = vld [vmem:[#allocation9 + $0xaf8] sm:$0xff]  ;;  %v4585_v55 = vsel %vm1704_vm1, %v11565_v3, %v4584_v8  ;;  %v4595_v8 = vrot.slane %v9881_v23, 2 }
 0x4e4   :  { %8995 = vmatprep.subr.bf16.mxu1 %v8994_v43  ;;  %v11593_v43 = vsel %vm1704_vm1, %v4574_v26, %v4575_v17  ;;  %v4970_v26 = vld [vmem:[#allocation9 + $0xb00] sm:$0xff] }
 0x4e6   :  { %4805 = vmatmul.mubr.f32.gmra.mrb[4].mxu1 %v11124_v15 }
 0x4e7   :  { %4810 = vmatprep.mubr.f32.mxu1 %v11134_v56  ;;  %8997 = vmatpush1.bf16.msra.mxu1 %v8996_v29  ;;  %v9012_v29 = vpack.c.bf16 %v4964_v39, %v4962_v16  ;;  %v9875_v16 = vld [vmem:[#allocation2 + $0x168] sm:$0xff] }
 0x4e8   :  { %8999 = vmatprep.subr.bf16.mxu1 %v8998_v13  ;;  %v9014_v13 = vpack.c.bf16 %v4969_v10, %v4967_v25  ;;  %v4592_v39 = vrot.slane %v9875_v16, 2  ;;  %v4974_v10 = vld [vmem:[#allocation9 + $0xb20] sm:$0xff] }
 0x4e9   :  { %v9024_v54 = vpack.c.bf16 %v4976_v33, %v4974_v10  ;;  %v9885_v33 = vld [vmem:[#allocation2 + $0x1a0] sm:$0xff] }
 0x4ea   :  { %4811 = vmatmul.mubr.f32.gmra.mrb[6].mxu1 %v11142_v18 }
 0x4eb   :  { %4816 = vmatprep.mubr.f32.mxu1 %v11152_v48  ;;  %9001 = vmatpush1.bf16.msra.mxu1 %v9000_v57  ;;  %v11597_v57 = vsel %vm1704_vm1, %v4571_v42, %v4572_v4  ;;  %v4593_v42 = vrot.slane %v9876_v2, 2  ;;  %v9020_v4 = vpack.c.bf16 %v4972_v27, %v4970_v26  ;;  %v4983_v26 = vld [vmem:[#allocation9 + $0xb68] sm:$0xff]  ;;  %v4985_v27 = vld [vmem:[#allocation9 + $0xb78] sm:$0xff] }
 0x4ec   :  { %9003 = vmatprep.subr.bf16.mxu1 %v9002_v38  ;;  %v9872_v38 = vld [vmem:[#allocation2 + $0xe0] sm:$0xff] }
 0x4ed   :  { %v4577_v19 = vrot.slane %v9872_v38, 2  ;;  %v11613_v22 = vsel %vm1704_vm1, %v4592_v39, %v4593_v42  ;;  %v9880_v38 = vld [vmem:[#allocation2 + $0x198] sm:$0x3] }
 0x4ee   :  { %4817 = vmatmul.mubr.f32.gmra.mrb[8].mxu1 %v11160_v32  ;;  %v9884_v39 = vld [vmem:[#allocation2 + $0x1b8] sm:$0x3] }
 0x4ef   :  { %4822 = vmatprep.mubr.f32.mxu1 %v11170_v37  ;;  %9005 = vmatpush1.bf16.msra.mxu1 %v9004_v36  ;;  %v4973_v36 = vld [vmem:[#allocation9 + $0xb18] sm:$0xff]  ;;  %v11607_v17 = vsel %vm1704_vm1, %v4577_v19, %v4578_v30  ;;  %v4599_v19 = vrot.slane %v9880_v38, 2  ;;  %v4605_v2 = vrot.slane %v9884_v39, 2  ;;  %v9888_v38 = vld [vmem:[#allocation2 + $0x1d8] sm:$0x3]  ;;  %v9891_v39 = vld [vmem:[#allocation2 + $0x1e8] sm:$0xff] }
 0x4f0   :  { %9007 = vmatprep.subr.bf16.mxu1 %v9006_v1  ;;  %v11601_v1 = vsel %vm1704_vm1, %v4580_v62, %v4581_v59  ;;  %v9018_v44 = vpack.c.bf16 %v4973_v36, %v4971_v58  ;;  %v9877_v62 = vld [vmem:[#allocation2 + $0x160] sm:$0xff]  ;;  %v9878_v59 = vld [vmem:[#allocation2 + $0x170] sm:$0x3]  ;;  %v4980_v36 = vld [vmem:[#allocation9 + $0xb50] sm:$0xff] }
 0x4f1   :  { %v4589_v31 = vrot.slane %v9877_v62, 2  ;;  %v4978_v58 = vld [vmem:[#allocation9 + $0xb40] sm:$0xff]  ;;  %v4601_v62 = vrot.slane %v9885_v33, 2 }
 0x4f2   :  { %4823 = vmatmul.mubr.f32.gmra.mrb[10].mxu1 %v11176_v35  ;;  %v9028_v42 = vpack.c.bf16 %v4980_v36, %v4978_v58  ;;  %v4986_v58 = vld [vmem:[#allocation9 + $0xb80] sm:$0xff]  ;;  %v4988_v36 = vld [vmem:[#allocation9 + $0xb90] sm:$0xff] }
 0x4f3   :  { %4828 = vmatprep.mubr.f32.mxu1 %v11593_v43  ;;  %9009 = vmatpush1.bf16.msra.mxu1 %v9008_v40  ;;  %v4975_v40 = vld [vmem:[#allocation9 + $0xb28] sm:$0xff]  ;;  %v4990_v33 = vld [vmem:[#allocation9 + $0xba0] sm:$0xff] }
 0x4f4   :  { %9011 = vmatprep.subr.bf16.mxu1 %v9010_v5  ;;  %v4977_v5 = vld [vmem:[#allocation9 + $0xb38] sm:$0xff] }
 0x4f5   :  { %v9022_v25 = vpack.c.bf16 %v4977_v5, %v4975_v40  ;;  %v11621_v40 = vsel %vm1704_vm1, %v4598_v46, %v4599_v19  ;;  %v9883_v5 = vld [vmem:[#allocation2 + $0x1a8] sm:$0xff]  ;;  %v4610_v46 = vrot.slane %v9887_v24, 2  ;;  %v4611_v19 = vrot.slane %v9888_v38, 2  ;;  %v4997_v38 = vld [vmem:[#allocation9 + $0xbd8] sm:$0xff] }
 0x4f6   :  { %4829 = vmatmul.mubr.f32.gmra.mrb[12].mxu1 %v11597_v57  ;;  %v4604_v16 = vrot.slane %v9883_v5, 2  ;;  %v4993_v5 = vld [vmem:[#allocation9 + $0xbb8] sm:$0xff] }
 0x4f7   :  { %4834 = vmatprep.mubr.f32.mxu1 %v11601_v1  ;;  %9013 = vmatpush1.bf16.msra.mxu1 %v9012_v29  ;;  %v4590_v29 = vrot.slane %v9878_v59, 2 }
 0x4f8   :  { %9015 = vmatprep.subr.bf16.mxu1 %v9014_v13  ;;  %v4979_v13 = vld [vmem:[#allocation9 + $0xb48] sm:$0xff] }
 0x4f9   :  { %v9026_v30 = vpack.c.bf16 %v4981_v51, %v4979_v13  ;;  %v4989_v13 = vld [vmem:[#allocation9 + $0xb98] sm:$0xff]  ;;  %v11629_v51 = vsel %vm1704_vm1, %v4604_v16, %v4605_v2  ;;  %v11637_v16 = vsel %vm1704_vm1, %v4610_v46, %v4611_v19  ;;  %v4616_v2 = vrot.slane %v9891_v39, 2  ;;  %v4995_v46 = vld [vmem:[#allocation9 + $0xbc8] sm:$0xff] }
 0x4fa   :  { %4835 = vmatmul.mubr.f32.gmra.mrb[14].mxu1 %v11607_v17 }
 0x4fb   :  { %9017 = vmatpush1.bf16.msra.mxu1 %v9016_v34  ;;  %4840 = vmatprep.mubr.f32.mxu1 %v4588_v53  ;;  %v11617_v34 = vsel %vm1704_vm1, %v4589_v31, %v4590_v29  ;;  %v9882_v53 = vld [vmem:[#allocation2 + $0x190] sm:$0x3] }
 0x4fc   :  { %9019 = vmatprep.subr.bf16.mxu1 %v9018_v44  ;;  %v4596_v44 = vrot.slane %v9882_v53, 2  ;;  %v9886_v31 = vld [vmem:[#allocation2 + $0x1b0] sm:$0x3] }
 0x4fd   :  { %v4602_v59 = vrot.slane %v9886_v31, 2  ;;  %v4987_v29 = vld [vmem:[#allocation9 + $0xb88] sm:$0xff] }
 0x4fe   :  { %4841 = vmatmul.mubr.f32.gmra.mrb[16].mxu1 %v4585_v55  ;;  %v9030_v55 = vpack.c.bf16 %v4985_v27, %v4983_v26  ;;  %v11625_v10 = vsel %vm1704_vm1, %v4595_v8, %v4596_v44  ;;  %v9889_v8 = vld [vmem:[#allocation2 + $0x1c0] sm:$0xff]  ;;  %v9890_v44 = vld [vmem:[#allocation2 + $0x1d0] sm:$0x3] }
 0x4ff   :  { %4846 = vmatprep.mubr.f32.mxu1 %v11613_v22  ;;  %9021 = vmatpush1.bf16.msra.mxu1 %v9020_v4  ;;  %v4982_v4 = vld [vmem:[#allocation9 + $0xb60] sm:$0xff]  ;;  %v11633_v23 = vsel %vm1704_vm1, %v4601_v62, %v4602_v59  ;;  %v4607_v53 = vrot.slane %v9889_v8, 2  ;;  %v4608_v26 = vrot.slane %v9890_v44, 2  ;;  %v4991_v27 = vld [vmem:[#allocation9 + $0xba8] sm:$0xff]  ;;  %v4992_v62 = vld [vmem:[#allocation9 + $0xbb0] sm:$0xff] }
 0x500   :  { %9023 = vmatprep.subr.bf16.mxu1 %v9022_v25  ;;  %v4984_v25 = vld [vmem:[#allocation9 + $0xb70] sm:$0xff]  ;;  %v9893_v59 = vld [vmem:[#allocation2 + $0x1e0] sm:$0xff]  ;;  %v9040_v8 = vpack.c.bf16 %v4992_v62, %v4990_v33 }
 0x501   :  { %v11641_v31 = vsel %vm1704_vm1, %v4607_v53, %v4608_v26  ;;  %v9042_v53 = vpack.c.bf16 %v4997_v38, %v4995_v46  ;;  %v4994_v44 = vld [vmem:[#allocation9 + $0xbc0] sm:$0xff]  ;;  %v4996_v26 = vld [vmem:[#allocation9 + $0xbd0] sm:$0xff] }
 0x502   :  { %4847 = vmatmul.mubr.f32.gmra.mrb[18].mxu1 %v11617_v34  ;;  %v4998_v46 = vld [vmem:[#allocation9 + $0xbe0] sm:$0xff]  ;;  %v5000_v38 = vld [vmem:[#allocation9 + $0xbf0] sm:$0xff] }
 0x503   :  { %4852 = vmatprep.mubr.f32.mxu1 %v11621_v40  ;;  %9025 = vmatpush1.bf16.msra.mxu1 %v9024_v54  ;;  %v9032_v54 = vpack.c.bf16 %v4984_v25, %v4982_v4  ;;  %v9036_v4 = vpack.c.bf16 %v4988_v36, %v4986_v58  ;;  %v9038_v25 = vpack.c.bf16 %v4993_v5, %v4991_v27  ;;  %v9897_v5 = vld [vmem:[#allocation2 + $0x200] sm:$0xff] }
 0x504   :  { %9027 = vmatprep.subr.bf16.mxu1 %v9026_v30  ;;  %v9034_v30 = vpack.c.bf16 %v4989_v13, %v4987_v29  ;;  %v4613_v29 = vrot.slane %v9893_v59, 2  ;;  %v9894_v13 = vld [vmem:[#allocation2 + $0x1f0] sm:$0x3]  ;;  %v4619_v39 = vrot.slane %v9897_v5, 2  ;;  %v5001_v59 = vld [vmem:[#allocation9 + $0xbf8] sm:$0xff] }
 0x505   :  { %v4614_v24 = vrot.slane %v9894_v13, 2 }
 0x506   :  { %4853 = vmatmul.mubr.f32.gmra.mrb[20].mxu1 %v11625_v10 }
 0x507   :  { %4858 = vmatprep.mubr.f32.mxu1 %v11629_v51  ;;  %9029 = vmatpush1.bf16.msra.mxu1 %v9028_v42  ;;  %v9892_v42 = vld [vmem:[#allocation2 + $0x1f8] sm:$0x3]  ;;  %v11649_v27 = vsel %vm1704_vm1, %v4613_v29, %v4614_v24  ;;  %v9044_v29 = vpack.c.bf16 %v4996_v26, %v4994_v44  ;;  %v13433_v44 = vld [vmem:[#allocation26_spill] sm:$0xff]  ;;  %v13434_v26 = vld [vmem:[#allocation27_spill] sm:$0xff] }
 0x508   :  { %9031 = vmatprep.subr.bf16.mxu1 %v9030_v55  ;;  %v4617_v55 = vrot.slane %v9892_v42, 2  ;;  %v9898_v42 = vld [vmem:[#allocation2 + $0x210] sm:$0x3] }
 0x50a   :  { %4859 = vmatmul.mubr.f32.gmra.mrb[22].mxu1 %v11633_v23  ;;  %v11645_v19 = vsel %vm1704_vm1, %v4616_v2, %v4617_v55  ;;  %v4620_v2 = vrot.slane %v9898_v42, 2  ;;  %v4999_v55 = vld [vmem:[#allocation9 + $0xbe8] sm:$0xff] }
 0x50b   :  { %4864 = vmatprep.mubr.f32.mxu1 %v11637_v16  ;;  %9033 = vmatpush1.bf16.msra.mxu1 %v9032_v54  ;;  %v9895_v54 = vld [vmem:[#allocation2 + $0x208] sm:$0xff]  ;;  %v9046_v24 = vpack.c.bf16 %v5001_v59, %v4999_v55  ;;  %v9902_v42 = vld [vmem:[#allocation2 + $0x230] sm:$0x3]  ;;  %v13440_v59 = vld [vmem:[#allocation33_spill] sm:$0xff] }
 0x50c   :  { %9035 = vmatprep.subr.bf16.mxu1 %v9034_v30  ;;  %v4622_v58 = vrot.slane %v9895_v54, 2  ;;  %v9896_v30 = vld [vmem:[#allocation2 + $0x218] sm:$0x3]  ;;  %v11657_v54 = vsel %vm1704_vm1, %v4619_v39, %v4620_v2  ;;  %v13436_v2 = vld [vmem:[#allocation29_spill] sm:$0xff]  ;;  %v13437_v55 = vld [vmem:[#allocation30_spill] sm:$0xff] }
 0x50d   :  { %v4623_v36 = vrot.slane %v9896_v30, 2  ;;  %v9901_v30 = vld [vmem:[#allocation2 + $0x220] sm:$0xff]  ;;  %v13435_v39 = vld [vmem:[#allocation28_spill] sm:$0xff] }
 0x50e   :  { %4865 = vmatmul.mubr.f32.gmra.mrb[24].mxu1 %v11641_v31  ;;  %v4625_v5 = vrot.slane %v9901_v30, 2  ;;  %v13446_v30 = vld [vmem:[#allocation52_spill] sm:$0xff] }
 0x50f   :  { %4870 = vmatprep.mubr.f32.mxu1 %v11645_v19  ;;  %9037 = vmatpush1.bf16.msra.mxu1 %v9036_v4  ;;  %v11653_v13 = vsel %vm1704_vm1, %v4622_v58, %v4623_v36  ;;  %v9899_v4 = vld [vmem:[#allocation2 + $0x228] sm:$0xff]  ;;  %v4626_v58 = vrot.slane %v9902_v42, 2 }
 0x510   :  { %9039 = vmatprep.subr.bf16.mxu1 %v9038_v25  ;;  %v4628_v33 = vrot.slane %v9899_v4, 2  ;;  %v9900_v25 = vld [vmem:[#allocation2 + $0x238] sm:$0x3]  ;;  %v13441_v4 = vld [vmem:[#allocation34_spill] sm:$0xff] }
 0x511   :  { %v4629_v62 = vrot.slane %v9900_v25, 2  ;;  %v13443_v25 = vld [vmem:[#allocation36_spill] sm:$0xff] }
 0x512   :  { %4871 = vmatmul.mubr.f32.gmra.mrb[26].mxu1 %v11649_v27 }
 0x513   :  { %4876 = vmatprep.mubr.f32.mxu1 %v11653_v13  ;;  %9041 = vmatpush1.bf16.msra.mxu1 %v9040_v8  ;;  %v11661_v36 = vsel %vm1704_vm1, %v4628_v33, %v4629_v62  ;;  %v9048_v8 = vpack.c.bf16 %v5000_v38, %v4998_v46  ;;  %v13442_v33 = vld [vmem:[#allocation35_spill] sm:$0xff]  ;;  %v4930_v62 = vrot.slane %v11496_v28, 2  ;;  %v13445_v46 = vld [vmem:[#allocation38_spill] sm:$0xff]  ;;  %v4927_v38 = vrot.slane %v11503_v9, 2  ;;  %v13448_v28 = vld [vmem:[#allocation40_spill] sm:$0xff] }
 0x514   :  { %9043 = vmatprep.subr.bf16.mxu1 %v9042_v53  ;;  %v11665_v53 = vsel %vm1704_vm1, %v4625_v5, %v4626_v58  ;;  %v4928_v5 = vrot.slane %v13446_v30, 2  ;;  %v13447_v58 = vld [vmem:[#allocation39_spill] sm:$0xff]  ;;  %v5199_v9 = vrot.slane %v11525_v47, 2  ;;  %v5205_v47 = vrot.slane %v11554_v49, 2 }
 0x515   :  { %v6574_v49 = vld [vmem:[#allocation12 + $0x7] ss:$8 sm:$0x3] }
 0x516   :  { %4877 = vmatmul.mubr.f32.gmra.mrb[28].mxu1 %v11657_v54 }
 0x517   :  { %4882 = vmatprep.mubr.f32.mxu1 %v11661_v36  ;;  %9045 = vmatpush1.bf16.msra.mxu1 %v9044_v29  ;;  %v4931_v29 = vrot.slane %v11493_v21, 2  ;;  %v4929_v21 = vsel %vm1704_vm1, %v4927_v38, %v4928_v5 }
 0x518   :  { %9047 = vmatprep.subr.bf16.mxu1 %v9046_v24  ;;  %v13444_v24 = vld [vmem:[#allocation37_spill] sm:$0xff] }
 0x519   :  { %v4932_v42 = vsel %vm1704_vm1, %v4930_v62, %v4931_v29 }
 0x51a   :  { %4883 = vmatmul.mubr.f32.gmra.mrb[30].mxu1 %v11665_v53 }
 0x51b   :  { %9049 = vmatpush1.bf16.msra.mxu1 %v9048_v8  ;;  %5066 = vmatprep.mubr.f32.mxu1 %v11577_v41  ;;  %v13449_v8 = vld [vmem:[#allocation41_spill] sm:$0xff] }
 0x51c   :  { %9114 = vmatprep.subr.bf16.mxu1 %v10918_v6  ;;  %v13425_v6 = vld [vmem:[#allocation18_spill] sm:$0xff] }
 0x51e   :  { %5067 = vmatmul.mubr.f32.vlgmr.msra.gmra.mrb[0].mxu1 %v11581_v11  ;;  %v13432_v11 = vld [vmem:[#allocation25_spill] sm:$0xff] }
 0x51f   :  { %5072 = vmatprep.mubr.f32.mxu1 %v11116_v12  ;;  %9130 = vmatpush1.bf16.msra.mxu1 %v10946_v7  ;;  %v13426_v7 = vld [vmem:[#allocation19_spill] sm:$0xff]  ;;  %v13428_v12 = vld [vmem:[#allocation21_spill] sm:$0xff] }
 0x520   :  { %9115 = vmatprep.subr.bf16.mxu1 %v10948_v45  ;;  %v13427_v45 = vld [vmem:[#allocation20_spill] sm:$0xff] }
 0x522   :  { %5073 = vmatmul.mubr.f32.gmra.mrb[2].mxu1 %v11124_v15  ;;  %v9905_v15 = vld [vmem:[#allocation2 + $0x100] sm:$0xff] }
 0x523   :  { %5078 = vmatprep.mubr.f32.mxu1 %v11134_v56  ;;  %9131 = vmatpush1.bf16.msra.mxu1 %v10953_v61  ;;  %v9903_v61 = vld [vmem:[#allocation2 + $0x108] sm:$0xff]  ;;  %v4921_v56 = vrot.slane %v9905_v15, 2 }
 0x524   :  { %9116 = vmatprep.subr.bf16.mxu1 %v10956_v60  ;;  %v4924_v60 = vrot.slane %v9903_v61, 2 }
 0x526   :  { %5079 = vmatmul.mubr.f32.gmra.mrb[4].mxu1 %v11142_v18  ;;  %v9906_v18 = vld [vmem:[#allocation2 + $0x110] sm:$0x3] }
 0x527   :  { %5084 = vmatprep.mubr.f32.mxu1 %v11152_v48  ;;  %9132 = vmatpush1.bf16.msra.mxu1 %v10961_v20  ;;  %v9904_v20 = vld [vmem:[#allocation2 + $0x118] sm:$0x3]  ;;  %v4922_v48 = vrot.slane %v9906_v18, 2 }
 0x528   :  { %9117 = vmatprep.subr.bf16.mxu1 %v10964_v50  ;;  %v4925_v50 = vrot.slane %v9904_v20, 2 }
 0x529   :  { %v4923_v41 = vsel %vm1704_vm1, %v4921_v56, %v4922_v48 }
 0x52a   :  { %5085 = vmatmul.mubr.f32.gmra.mrb[6].mxu1 %v11160_v32  ;;  %v4926_v32 = vsel %vm1704_vm1, %v4924_v60, %v4925_v50 }
 0x52b   :  { %5090 = vmatprep.mubr.f32.mxu1 %v11170_v37  ;;  %9133 = vmatpush1.bf16.msra.mxu1 %v10969_v52  ;;  %v13429_v52 = vld [vmem:[#allocation22_spill] sm:$0xff]  ;;  %v13430_v37 = vld [vmem:[#allocation23_spill] sm:$0xff] }
 0x52c   :  { %9118 = vmatprep.subr.bf16.mxu1 %v13425_v6  ;;  %v5196_v6 = vrot.slane %v11535_v14, 2  ;;  %v5202_v14 = vrot.slane %v11559_v0, 2  ;;  %v7176_v0 = vld [vmem:[#allocation12 + $0x5] ss:$8 sm:$0x3] }
 0x52e   :  { %5091 = vmatmul.mubr.f32.gmra.mrb[8].mxu1 %v11176_v35  ;;  %v13431_v35 = vld [vmem:[#allocation24_spill] sm:$0xff] }
 0x52f   :  { %5096 = vmatprep.mubr.f32.mxu1 %v11593_v43  ;;  %9134 = vmatpush1.bf16.msra.mxu1 %v13426_v7  ;;  %v5200_v7 = vsel %vm1704_vm1, %v11565_v3, %v5199_v9  ;;  %v13455_v9 = vld [vmem:[#allocation47_spill] sm:$0xff] }
 0x530   :  { %9119 = vmatprep.subr.bf16.mxu1 %v13427_v45  ;;  %v5197_v45 = vsel %vm1704_vm1, %v11565_v3, %v5196_v6 }
 0x532   :  { %5097 = vmatmul.mubr.f32.gmra.mrb[10].mxu1 %v11597_v57 }
 0x533   :  { %5102 = vmatprep.mubr.f32.mxu1 %v11601_v1  ;;  %9135 = vmatpush1.bf16.msra.mxu1 %v13428_v12 }
 0x534   :  { %9120 = vmatprep.subr.bf16.mxu1 %v13429_v52  ;;  %v5818_v52 = vld [vmem:[#allocation12 + $0x3] ss:$8 sm:$0x3] }
 0x536   :  { %5103 = vmatmul.mubr.f32.gmra.mrb[12].mxu1 %v11607_v17 }
 0x537   :  { %5108 = vmatprep.mubr.f32.mxu1 %v4926_v32  ;;  %9136 = vmatpush1.bf16.msra.mxu1 %v13430_v37 }
 0x538   :  { %9121 = vmatprep.subr.bf16.mxu1 %v13431_v35  ;;  %v13452_v35 = vld [vmem:[#allocation44_spill] sm:$0xff] }
 0x53a   :  { %5109 = vmatmul.mubr.f32.gmra.mrb[14].mxu1 %v4923_v41 }
 0x53b   :  { %5114 = vmatprep.mubr.f32.mxu1 %v11613_v22  ;;  %9137 = vmatpush1.bf16.msra.mxu1 %v13432_v11  ;;  %v13438_v22 = vld [vmem:[#allocation31_spill] sm:$0xff] }
 0x53c   :  { %9122 = vmatprep.subr.bf16.mxu1 %v13433_v44  ;;  %v5663_v11 = vld [vmem:[#allocation2 + $0x10] sm:$0x3]  ;;  %v5664_v44 = vld [vmem:[#allocation2 + $0x18] sm:$0x3] }
 0x53e   :  { %5115 = vmatmul.mubr.f32.gmra.mrb[16].mxu1 %v11617_v34  ;;  %v13439_v34 = vld [vmem:[#allocation32_spill] sm:$0xff] }
 0x53f   :  { %5120 = vmatprep.mubr.f32.mxu1 %v11621_v40  ;;  %9138 = vmatpush1.bf16.msra.mxu1 %v13434_v26 }
 0x540   :  { %9123 = vmatprep.subr.bf16.mxu1 %v13435_v39  ;;  %v13453_v39 = vld [vmem:[#allocation45_spill] sm:$0xff] }
 0x542   :  { %5121 = vmatmul.mubr.f32.gmra.mrb[18].mxu1 %v11625_v10 }
 0x543   :  { %5126 = vmatprep.mubr.f32.mxu1 %v11629_v51  ;;  %9139 = vmatpush1.bf16.msra.mxu1 %v13436_v2 }
 0x544   :  { %9124 = vmatprep.subr.bf16.mxu1 %v13437_v55 }
 0x546   :  { %5127 = vmatmul.mubr.f32.gmra.mrb[20].mxu1 %v11633_v23 }
 0x547   :  { %5132 = vmatprep.mubr.f32.mxu1 %v11637_v16  ;;  %9140 = vmatpush1.bf16.msra.mxu1 %v13438_v22 }
 0x548   :  { %9125 = vmatprep.subr.bf16.mxu1 %v13439_v34 }
 0x54a   :  { %5133 = vmatmul.mubr.f32.gmra.mrb[22].mxu1 %v11641_v31 }
 0x54b   :  { %5138 = vmatprep.mubr.f32.mxu1 %v11645_v19  ;;  %9141 = vmatpush1.bf16.msra.mxu1 %v13440_v59 }
 0x54c   :  { %9126 = vmatprep.subr.bf16.mxu1 %v13441_v4 }
 0x54e   :  { %5139 = vmatmul.mubr.f32.gmra.mrb[24].mxu1 %v11649_v27 }
 0x54f   :  { %5144 = vmatprep.mubr.f32.mxu1 %v11653_v13  ;;  %9142 = vmatpush1.bf16.msra.mxu1 %v13442_v33 }
 0x550   :  { %9127 = vmatprep.subr.bf16.mxu1 %v13443_v25 }
 0x552   :  { %5145 = vmatmul.mubr.f32.gmra.mrb[26].mxu1 %v11657_v54 }
 0x553   :  { %5150 = vmatprep.mubr.f32.mxu1 %v11661_v36  ;;  %9143 = vmatpush1.bf16.msra.mxu1 %v13444_v24 }
 0x554   :  { %9128 = vmatprep.subr.bf16.mxu1 %v13445_v46 }
 0x556   :  { %5151 = vmatmul.mubr.f32.gmra.mrb[28].mxu1 %v11665_v53 }
 0x557   :  { %5156 = vmatprep.mubr.f32.mxu1 %v4932_v42  ;;  %9144 = vmatpush1.bf16.msra.mxu1 %v13447_v58 }
 0x558   :  { %9129 = vmatprep.subr.bf16.mxu1 %v13448_v28 }
 0x55a   :  { %5157 = vmatmul.mubr.f32.gmra.mrb[30].mxu1 %v4929_v21 }
 0x55b   :  { %9145 = vmatpush1.bf16.msra.mxu1 %v13449_v8  ;;  %5364 = vmatprep.mubr.f32.mxu1 %v11593_v43  ;;  %v5206_v43 = vsel %vm1704_vm1, %v11565_v3, %v5205_v47 }
 0x55e   :  { %5365 = vmatmul.mubr.f32.vlgmr.msra.gmra.mrb[8].mxu1 %v11597_v57  ;;  %v5203_v57 = vsel %vm1704_vm1, %v11565_v3, %v5202_v14 }
 0x55f   :  { %5370 = vmatprep.mubr.f32.mxu1 %v11601_v1  ;;  %v2736_v1 = vld [vmem:[#allocation10] sm:$0x3] }
 0x562   :  { %5371 = vmatmul.mubr.f32.gmra.mrb[10].mxu1 %v11607_v17  ;;  %v5972_v17 = vld [vmem:[#allocation12 + $0x1] ss:$8 sm:$0x3] }
 0x563   :  { %5376 = vmatprep.mubr.f32.mxu1 %v4926_v32 }
 0x566   :  { %5377 = vmatmul.mubr.f32.gmra.mrb[12].mxu1 %v4923_v41 }
 0x567   :  { %5382 = vmatprep.mubr.f32.mxu1 %v5200_v7 }
 0x56a   :  { %5383 = vmatmul.mubr.f32.gmra.mrb[14].mxu1 %v5197_v45 }
 0x56b   :  { %5388 = vmatprep.mubr.f32.mxu1 %v11621_v40  ;;  %v6273_v40 = vld [vmem:[#allocation12 + $0x4] ss:$8 sm:$0x3] }
 0x56e   :  { %5389 = vmatmul.mubr.f32.gmra.mrb[16].mxu1 %v11625_v10  ;;  %v13450_v10 = vld [vmem:[#allocation42_spill] sm:$0xff] }
 0x56f   :  { %5394 = vmatprep.mubr.f32.mxu1 %v11629_v51  ;;  %v11765_v51 = vrot.slane %v2736_v1, %v13450_v10  ;;  %v11783_v61 = vrot.slane %v6574_v49, %v13450_v10  ;;  %v11793_v15 = vrot.slane %v7176_v0, %v13450_v10  ;;  %v11817_v34 = vrot.slane %v5818_v52, %v13450_v10 }
 0x572   :  { %5395 = vmatmul.mubr.f32.gmra.mrb[18].mxu1 %v11633_v23  ;;  %v6875_v23 = vld [vmem:[#allocation12 + $0x2] ss:$8 sm:$0x3] }
 0x573   :  { %5400 = vmatprep.mubr.f32.mxu1 %v11637_v16  ;;  %v13451_v16 = vld [vmem:[#allocation43_spill] sm:$0xff]  ;;  %v11786_v60 = vrot.slane %v6875_v23, %v13450_v10 }
 0x574   :  { %v11777_v3 = vrot.slane %v5972_v17, %v13451_v16  ;;  %v11789_v20 = vrot.slane %v6574_v49, %v13451_v16  ;;  %v11799_v18 = vrot.slane %v6875_v23, %v13451_v16  ;;  %v11803_v32 = vrot.slane %v7176_v0, %v13451_v16  ;;  %v5895_v49 = vld [vmem:[#allocation12 + $0x6] ss:$8 sm:$0x3] }
 0x575   :  { %v11820_v59 = vrot.slane %v5818_v52, %v13451_v16  ;;  %v6887_v28 = vmul.f32 %v11529_v63, %v11786_v60  ;;  %v6889_v45 = vmul.f32 %v11786_v60, %v5663_v11 }
 0x576   :  { %5401 = vmatmul.mubr.f32.gmra.mrb[20].mxu1 %v11641_v31  ;;  %v11768_v31 = vrot.slane %v2736_v1, %v13451_v16  ;;  %v5985_v29 = vmul.f32 %v11529_v63, %v11777_v3  ;;  %v5987_v30 = vmul.f32 %v11777_v3, %v5664_v44  ;;  %v6890_v47 = vmul.f32 %v11799_v18, %v5664_v44 }
 0x577   :  { %5406 = vmatprep.mubr.f32.mxu1 %v11645_v19  ;;  %v7477_v19 = vld [vmem:[#allocation12 + $0x10] ss:$8 sm:$0x3] }
 0x578   :  { %v11796_v56 = vrot.slane %v7477_v19, %v13450_v10  ;;  %v11806_v37 = vrot.slane %v7477_v19, %v13451_v16  ;;  %v6116_v0 = vrot.slane %v5987_v30, 1  ;;  %v7019_v44 = vrot.slane %v6890_v47, 2  ;;  %v13458_v30 = vld [vmem:[#allocation50_spill] sm:$0xff] }
 0x57a   :  { %5407 = vmatmul.mubr.f32.gmra.mrb[22].mxu1 %v11649_v27  ;;  %v11771_v27 = vrot.slane %v5972_v17, %v13450_v10  ;;  %v6115_v17 = vrot.slane %v5985_v29, 1  ;;  %v9907_v29 = vld [vmem:[#allocation2] sm:$0xff] }
 0x57b   :  { %5412 = vmatprep.mubr.f32.mxu1 %v11653_v13  ;;  %v11774_v13 = vrot.slane %v6273_v40, %v13450_v10 }
 0x57c   :  { %v5984_v62 = vmul.f32 %v11529_v63, %v11771_v27  ;;  %v5986_v38 = vmul.f32 %v11771_v27, %v5663_v11  ;;  %v7016_v11 = vrot.slane %v6889_v45, 2 }
 0x57e   :  { %5413 = vmatmul.mubr.f32.gmra.mrb[24].mxu1 %v11657_v54  ;;  %v11780_v54 = vrot.slane %v6273_v40, %v13451_v16  ;;  %v6112_v1 = vrot.slane %v5984_v62, 1  ;;  %v6113_v23 = vrot.slane %v5986_v38, 1 }
 0x57f   :  { %5418 = vmatprep.mubr.f32.mxu1 %v11661_v36 }
 0x582   :  { %5419 = vmatmul.mubr.f32.gmra.mrb[26].mxu1 %v11665_v53  ;;  %v5741_v53 = vld [vmem:[#allocation12] ss:$8 sm:$0x3] }
 0x583   :  { %5424 = vmatprep.mubr.f32.mxu1 %v4932_v42  ;;  %v11810_v26 = vrot.slane %v5741_v53, %v13450_v10  ;;  %v11814_v22 = vrot.slane %v5741_v53, %v13451_v16  ;;  %v13454_v42 = vld [vmem:[#allocation46_spill] sm:$0xff] }
 0x586   :  { %5425 = vmatmul.mubr.f32.gmra.mrb[28].mxu1 %v4929_v21  ;;  %v6888_v21 = vmul.f32 %v11529_v63, %v11799_v18 }
 0x587   :  { %5430 = vmatprep.mubr.f32.mxu1 %v5206_v43 }
 0x58a   :  { %5431 = vmatmul.mubr.f32.gmra.mrb[30].mxu1 %v5203_v57 }
 0x5f1   :  { %v5068_v36 = vpop.f32.mrb[0].mxu1 }
 0x5f2   :  { %v9178_v50 = vadd.f32 %v5068_v36, %v11765_v51  ;;  %v5070_v12 = vpop.f32.mrb[1].mxu1  ;;  %v13456_v36 = vld [vmem:[#allocation48_spill] sm:$0xff] }
 0x5f3   :  { %v9180_v48 = vadd.f32 %v5070_v12, %v11768_v31  ;;  %v7018_v12 = vrot.slane %v6888_v21, 2 }
 0x5f4   :  { %v9179_v41 = vadd.f32 %v9178_v50, %v13452_v35  ;;  %v7015_v50 = vrot.slane %v6887_v28, 2 }
 0x5f5   :  { %v9181_v2 = vadd.f32 %v9180_v48, %v13453_v39  ;;  %v5074_v55 = vpop.f32.mrb[2].mxu1  ;;  %v13457_v48 = vld [vmem:[#allocation49_spill] sm:$0xff] }
 0x5f6   :  { %v5469_v4 = vmax.f32 %v9179_v41, 0.0  ;;  %v9182_v33 = vadd.f32 %v5074_v55, %v11765_v51  ;;  %v5076_v25 = vpop.f32.mrb[3].mxu1 }
 0x5f7   :  { %v5470_v24 = vmax.f32 %v9181_v2, 0.0  ;;  %v9184_v46 = vadd.f32 %v5076_v25, %v11768_v31 }
 0x5f8   :  { %v5533_v5 = vrot.slane %v5469_v4, 7  ;;  %v9183_v58 = vadd.f32 %v9182_v33, %v13454_v42  ;;  %v11844_v4 = vrot.slane %v5895_v49, %v13450_v10  ;;  %v11847_v33 = vrot.slane %v5895_v49, %v13451_v16  ;;  %v13459_v16 = vld [vmem:[#allocation51_spill] sm:$0xff] }
 0x5f9   :  { %v5534_v8 = vrot.slane %v5470_v24, 7  ;;  %v9185_v6 = vadd.f32 %v9184_v46, %v13455_v9  ;;  %v5080_v7 = vpop.f32.mrb[4].mxu1  ;;  %v5753_v24 = vmul.f32 %v9907_v29, %v11810_v26  ;;  %v5754_v46 = vmul.f32 %v9907_v29, %v11814_v22 }
 0x5fa   :  { %5597 = vst [vmem:[#allocation2 + $0x20] sm:$0xfe] %v5533_v5  ;;  %5599 = vst [vmem:[#allocation2 + $0x30] sm:$0x1] %v5533_v5  ;;  %v5471_v14 = vmax.f32 %v9183_v58, 0.0  ;;  %v9186_v43 = vadd.f32 %v5080_v7, %v11765_v51  ;;  %v5082_v57 = vpop.f32.mrb[5].mxu1  ;;  %v6114_v42 = vsel %vm937_vm0, %v6112_v1, %v6113_v23  ;;  %v6117_v10 = vsel %vm937_vm0, %v6115_v17, %v6116_v0 }
 0x5fb   :  { %5598 = vst [vmem:[#allocation2 + $0x28] sm:$0xfe] %v5534_v8  ;;  %5600 = vst [vmem:[#allocation2 + $0x38] sm:$0x1] %v5534_v8  ;;  %v5472_v40 = vmax.f32 %v9185_v6, 0.0  ;;  %v9188_v63 = vadd.f32 %v5082_v57, %v11768_v31  ;;  %v11861_v9 = vsel %vm1704_vm1, %v7015_v50, %v7016_v11  ;;  %v11864_v6 = vsel %vm1704_vm1, %v7018_v12, %v7019_v44 }
 0x5fc   :  { %v5535_v19 = vrot.slane %v5471_v14, 7  ;;  %v9187_v53 = vadd.f32 %v9186_v43, %v13456_v36 }
 0x5fd   :  { %v5536_v52 = vrot.slane %v5472_v40, 7  ;;  %v9189_v35 = vadd.f32 %v9188_v63, %v13457_v48  ;;  %v5086_v41 = vpop.f32.mrb[6].mxu1 }
 0x5fe   :  { %5601 = vst [vmem:[#allocation2 + $0x40] sm:$0xfe] %v5535_v19  ;;  %5603 = vst [vmem:[#allocation2 + $0x50] sm:$0x1] %v5535_v19  ;;  %v5473_v39 = vmax.f32 %v9187_v53, 0.0  ;;  %v9190_v2 = vadd.f32 %v5086_v41, %v11765_v51  ;;  %v5088_v55 = vpop.f32.mrb[7].mxu1 }
 0x5ff   :  { %5602 = vst [vmem:[#allocation2 + $0x48] sm:$0xfe] %v5536_v52  ;;  %5604 = vst [vmem:[#allocation2 + $0x58] sm:$0x1] %v5536_v52  ;;  %v5474_v25 = vmax.f32 %v9189_v35, 0.0  ;;  %v9192_v62 = vadd.f32 %v5088_v55, %v11768_v31 }
 0x600   :  { %v5537_v38 = vrot.slane %v5473_v39, 7  ;;  %v9191_v5 = vadd.f32 %v9190_v2, %v13458_v30 }
 0x601   :  { %v5538_v58 = vrot.slane %v5474_v25, 7  ;;  %v9193_v28 = vadd.f32 %v9192_v62, %v13459_v16  ;;  %v11856_v21 = vld [vmem:[#allocation2 + $0x20] sm:$0xff]  ;;  %v11858_v8 = vld [vmem:[#allocation2 + $0x30] sm:$0x3] }
 0x602   :  { %5605 = vst [vmem:[#allocation2 + $0x60] sm:$0xfe] %v5537_v38  ;;  %5607 = vst [vmem:[#allocation2 + $0x70] sm:$0x1] %v5537_v38  ;;  %v5475_v7 = vmax.f32 %v9191_v5, 0.0  ;;  %v11866_v45 = vld [vmem:[#allocation2 + $0x28] sm:$0xff]  ;;  %v5830_v14 = vmul.f32 %v11817_v34, %v11856_v21  ;;  %v11874_v43 = vmul.f32 %v11771_v27, %v11858_v8  ;;  %v6285_v57 = vmul.f32 %v11774_v13, %v11856_v21 }
 0x603   :  { %v11868_v47 = vld [vmem:[#allocation2 + $0x38] sm:$0x3]  ;;  %5606 = vst [vmem:[#allocation2 + $0x68] sm:$0xfe] %v5538_v58  ;;  %5608 = vst [vmem:[#allocation2 + $0x78] sm:$0x1] %v5538_v58  ;;  %v5831_v17 = vmul.f32 %v11820_v59, %v11866_v45  ;;  %v6286_v63 = vmul.f32 %v11780_v54, %v11866_v45  ;;  %v6287_v19 = vmul.f32 %v11774_v13, %v11858_v8 }
 0x604   :  { %v5476_v1 = vmax.f32 %v9193_v28, 0.0  ;;  %v11882_v40 = vmul.f32 %v11777_v3, %v11868_v47  ;;  %v5539_v49 = vrot.slane %v5475_v7, 7  ;;  %v5862_v23 = vadd.f32 %v5830_v14, %v5753_v24 }
 0x605   :  { %v6119_v0 = vrot.slane %v11874_v43, 1  ;;  %v11889_v53 = vld [vmem:[#allocation2 + $0x40] sm:$0xff]  ;;  %v11891_v50 = vld [vmem:[#allocation2 + $0x50] sm:$0x3]  ;;  %v5863_v12 = vadd.f32 %v5831_v17, %v5754_v46  ;;  %v6288_v48 = vmul.f32 %v11780_v54, %v11868_v47  ;;  %v6413_v44 = vrot.slane %v6285_v57, 1 }
 0x606   :  { %v5540_v36 = vrot.slane %v5476_v1, 7  ;;  %v6122_v52 = vrot.slane %v11882_v40, 1  ;;  %5609 = vst [vmem:[#allocation2 + $0x80] sm:$0xfe] %v5539_v49  ;;  %5611 = vst [vmem:[#allocation2 + $0x90] sm:$0x1] %v5539_v49  ;;  %v5907_v11 = vmul.f32 %v11844_v4, %v11889_v53  ;;  %v6586_v62 = vmul.f32 %v11783_v61, %v11889_v53 }
 0x607   :  { %v11896_v35 = vld [vmem:[#allocation2 + $0x48] sm:$0xff]  ;;  %v11898_v41 = vld [vmem:[#allocation2 + $0x58] sm:$0x3]  ;;  %v6414_v39 = vrot.slane %v6287_v19, 1  ;;  %v6416_v2 = vrot.slane %v6286_v63, 1  ;;  %v6417_v25 = vrot.slane %v6288_v48, 1  ;;  %v6588_v38 = vmul.f32 %v11783_v61, %v11891_v50 }
 0x608   :  { %5610 = vst [vmem:[#allocation2 + $0x88] sm:$0xfe] %v5540_v36  ;;  %5612 = vst [vmem:[#allocation2 + $0x98] sm:$0x1] %v5540_v36  ;;  %v5908_v55 = vmul.f32 %v11847_v33, %v11896_v35  ;;  %v6587_v29 = vmul.f32 %v11789_v20, %v11896_v35  ;;  %v5939_v24 = vadd.f32 %v5907_v11, %v5862_v23  ;;  %v6714_v16 = vrot.slane %v6586_v62, 1 }
 0x609   :  { %v6415_v46 = vsel %vm937_vm0, %v6413_v44, %v6414_v39  ;;  %v6589_v30 = vmul.f32 %v11789_v20, %v11898_v41  ;;  %v6418_v58 = vsel %vm937_vm0, %v6416_v2, %v6417_v25  ;;  %v6715_v14 = vrot.slane %v6588_v38, 1 }
 0x60a   :  { %v5940_v5 = vadd.f32 %v5908_v55, %v5863_v12  ;;  %v6717_v28 = vrot.slane %v6587_v29, 1  ;;  %v6240_v7 = vadd.f32 %v6114_v42, %v5939_v24  ;;  %v7188_v1 = vmul.f32 %v11793_v15, %v11856_v21 }
 0x60b   :  { %v6718_v57 = vrot.slane %v6589_v30, 1  ;;  %v7189_v63 = vmul.f32 %v11803_v32, %v11866_v45  ;;  %v7190_v49 = vmul.f32 %v11793_v15, %v11858_v8  ;;  %v7191_v23 = vmul.f32 %v11803_v32, %v11868_v47 }
 0x60c   :  { %v6241_v17 = vadd.f32 %v6117_v10, %v5940_v5  ;;  %v6541_v19 = vadd.f32 %v6415_v46, %v6240_v7  ;;  %v6716_v36 = vsel %vm937_vm0, %v6714_v16, %v6715_v14  ;;  %v7316_v12 = vrot.slane %v7188_v1, 2  ;;  %v11935_v16 = vld [vmem:[#allocation2 + $0x60] sm:$0xff] }
 0x60d   :  { %v6719_v42 = vsel %vm937_vm0, %v6717_v28, %v6718_v57  ;;  %v7317_v11 = vrot.slane %v7190_v49, 2  ;;  %v7319_v44 = vrot.slane %v7189_v63, 2  ;;  %v7320_v39 = vrot.slane %v7191_v23, 2  ;;  %v11937_v28 = vld [vmem:[#allocation2 + $0x68] sm:$0xff] }
 0x60e   :  { %v6542_v48 = vadd.f32 %v6418_v58, %v6241_v17  ;;  %v6842_v10 = vadd.f32 %v6716_v36, %v6541_v19  ;;  %v7489_v2 = vmul.f32 %v11796_v56, %v11889_v53  ;;  %v7490_v55 = vmul.f32 %v11806_v37, %v11896_v35 }
 0x60f   :  { %v7491_v25 = vmul.f32 %v11796_v56, %v11891_v50  ;;  %v7318_v29 = vsel %vm1704_vm1, %v7316_v12, %v7317_v11  ;;  %v7321_v24 = vsel %vm1704_vm1, %v7319_v44, %v7320_v39  ;;  %v7492_v46 = vmul.f32 %v11806_v37, %v11898_v41 }
 0x610   :  { %v6843_v62 = vadd.f32 %v6719_v42, %v6542_v48  ;;  %v7143_v38 = vadd.f32 %v11861_v9, %v6842_v10  ;;  %v7617_v30 = vrot.slane %v7489_v2, 2  ;;  %v7620_v58 = vrot.slane %v7490_v55, 2 }
 0x611   :  { %v7618_v5 = vrot.slane %v7491_v25, 2  ;;  %v7621_v14 = vrot.slane %v7492_v46, 2  ;;  %v5755_v57 = vmul.f32 %v11810_v26, %v11856_v21  ;;  %v5756_v1 = vmul.f32 %v11814_v22, %v11866_v45  ;;  %v11964_v46 = vld [vmem:[#allocation2 + $0x70] sm:$0x3] }
 0x612   :  { %v7144_v7 = vadd.f32 %v11864_v6, %v6843_v62  ;;  %v7444_v17 = vadd.f32 %v7318_v29, %v7143_v38  ;;  %v5832_v9 = vmul.f32 %v11817_v34, %v11889_v53  ;;  %v5833_v49 = vmul.f32 %v11820_v59, %v11896_v35  ;;  %v11966_v38 = vld [vmem:[#allocation2 + $0x78] sm:$0x3] }
 0x613   :  { %v7619_v63 = vsel %vm1704_vm1, %v7617_v30, %v7618_v5  ;;  %v7622_v19 = vsel %vm1704_vm1, %v7620_v58, %v7621_v14  ;;  %v5909_v6 = vmul.f32 %v11844_v4, %v11935_v16  ;;  %v5910_v36 = vmul.f32 %v11847_v33, %v11937_v28 }
 0x614   :  { %v7445_v23 = vadd.f32 %v7321_v24, %v7144_v7  ;;  %v7745_v42 = vadd.f32 %v7619_v63, %v7444_v17  ;;  %v5864_v12 = vadd.f32 %v5832_v9, %v5755_v57  ;;  %v5865_v48 = vadd.f32 %v5833_v49, %v5756_v1 }
 0x615   :  { %v5988_v11 = vmul.f32 %v11771_v27, %v11856_v21  ;;  %v5989_v39 = vmul.f32 %v11777_v3, %v11866_v45  ;;  %v6289_v10 = vmul.f32 %v11774_v13, %v11889_v53  ;;  %v6290_v2 = vmul.f32 %v11780_v54, %v11896_v35 }
 0x616   :  { %v7746_v44 = vadd.f32 %v7622_v19, %v7445_v23  ;;  %v5941_v55 = vadd.f32 %v5909_v6, %v5864_v12  ;;  %v5942_v25 = vadd.f32 %v5910_v36, %v5865_v48  ;;  %v6291_v29 = vmul.f32 %v11774_v13, %v11891_v50 }
 0x617   :  { %v6118_v62 = vrot.slane %v5988_v11, 1  ;;  %v6121_v30 = vrot.slane %v5989_v39, 1  ;;  %v6292_v5 = vmul.f32 %v11780_v54, %v11898_v41  ;;  %v6419_v58 = vrot.slane %v6289_v10, 1 }
 0x618   :  { %v7777_v24 = vadd.f32 %v7746_v44, %v7745_v42  ;;  %v6420_v14 = vrot.slane %v6291_v29, 1  ;;  %v6422_v57 = vrot.slane %v6290_v2, 1  ;;  %v6590_v1 = vmul.f32 %v11783_v61, %v11935_v16 }
 0x619   :  { %v6120_v7 = vsel %vm937_vm0, %v6118_v62, %v6119_v0  ;;  %v6123_v17 = vsel %vm937_vm0, %v6121_v30, %v6122_v52  ;;  %v6423_v9 = vrot.slane %v6292_v5, 1  ;;  %v6591_v49 = vmul.f32 %v11789_v20, %v11937_v28 }
 0x61a   :  { %7778 = vadd.xlane.f32.xlu0 %v7777_v24  ;;  %v6242_v63 = vadd.f32 %v6120_v7, %v5941_v55  ;;  %v6243_v23 = vadd.f32 %v6123_v17, %v5942_v25  ;;  %v6421_v43 = vsel %vm937_vm0, %v6419_v58, %v6420_v14  ;;  %v6592_v0 = vmul.f32 %v11783_v61, %v11964_v46 }
 0x61b   :  { %v6593_v19 = vmul.f32 %v11789_v20, %v11966_v38  ;;  %v6424_v6 = vsel %vm937_vm0, %v6422_v57, %v6423_v9  ;;  %v6720_v40 = vrot.slane %v6590_v1, 1  ;;  %v6723_v42 = vrot.slane %v6591_v49, 1 }
 0x61c   :  { %v6543_v36 = vadd.f32 %v6421_v43, %v6242_v63  ;;  %v6544_v52 = vadd.f32 %v6424_v6, %v6243_v23  ;;  %v6721_v12 = vrot.slane %v6592_v0, 1  ;;  %v6891_v11 = vmul.f32 %v11786_v60, %v11856_v21  ;;  %v12014_v6 = vld [vmem:[#allocation2 + $0x80] sm:$0xff] }
 0x61d   :  { %v6724_v48 = vrot.slane %v6593_v19, 1  ;;  %v6892_v44 = vmul.f32 %v11799_v18, %v11866_v45  ;;  %v6893_v39 = vmul.f32 %v11786_v60, %v11858_v8  ;;  %v6894_v10 = vmul.f32 %v11799_v18, %v11868_v47 }
 0x61e   :  { %v7192_v2 = vmul.f32 %v11793_v15, %v11889_v53  ;;  %v6722_v55 = vsel %vm937_vm0, %v6720_v40, %v6721_v12  ;;  %v7021_v62 = vrot.slane %v6891_v11, 2  ;;  %v7193_v21 = vmul.f32 %v11803_v32, %v11896_v35 }
 0x61f   :  { %v6725_v25 = vsel %vm937_vm0, %v6723_v42, %v6724_v48  ;;  %v6844_v29 = vadd.f32 %v6722_v55, %v6543_v36  ;;  %v7022_v45 = vrot.slane %v6893_v39, 2  ;;  %v7024_v30 = vrot.slane %v6892_v44, 2 }
 0x620   :  { %v6845_v24 = vadd.f32 %v6725_v25, %v6544_v52  ;;  %v7025_v5 = vrot.slane %v6894_v10, 2  ;;  %v7194_v8 = vmul.f32 %v11793_v15, %v11891_v50  ;;  %v7195_v47 = vmul.f32 %v11803_v32, %v11898_v41  ;;  %v12018_v52 = vld [vmem:[#allocation2 + $0x88] sm:$0xff] }
 0x621   :  { %v7322_v58 = vrot.slane %v7192_v2, 2  ;;  %v7023_v7 = vsel %vm1704_vm1, %v7021_v62, %v7022_v45  ;;  %v7325_v14 = vrot.slane %v7193_v21, 2  ;;  %v7493_v57 = vmul.f32 %v11796_v56, %v11935_v16 }
 0x622   :  { %v7494_v1 = vmul.f32 %v11806_v37, %v11937_v28  ;;  %v7026_v17 = vsel %vm1704_vm1, %v7024_v30, %v7025_v5  ;;  %v7145_v63 = vadd.f32 %v7023_v7, %v6844_v29  ;;  %v7323_v9 = vrot.slane %v7194_v8, 2 }
 0x623   :  { %v7326_v49 = vrot.slane %v7195_v47, 2  ;;  %v7146_v23 = vadd.f32 %v7026_v17, %v6845_v24  ;;  %v7495_v43 = vmul.f32 %v11796_v56, %v11964_v46  ;;  %v7496_v0 = vmul.f32 %v11806_v37, %v11966_v38 }
 0x624   :  { %v7623_v19 = vrot.slane %v7493_v57, 2  ;;  %v7324_v36 = vsel %vm1704_vm1, %v7322_v58, %v7323_v9  ;;  %v7626_v42 = vrot.slane %v7494_v1, 2  ;;  %v5757_v12 = vmul.f32 %v11810_v26, %v11889_v53 }
 0x625   :  { %v7327_v40 = vsel %vm1704_vm1, %v7325_v14, %v7326_v49  ;;  %v7446_v48 = vadd.f32 %v7324_v36, %v7145_v63  ;;  %v7624_v44 = vrot.slane %v7495_v43, 2  ;;  %v7627_v39 = vrot.slane %v7496_v0, 2  ;;  %v12046_v0 = vld [vmem:[#allocation2 + $0x90] sm:$0x3] }
 0x626   :  { %v7447_v11 = vadd.f32 %v7327_v40, %v7146_v23  ;;  %v5758_v10 = vmul.f32 %v11814_v22, %v11896_v35  ;;  %v5834_v2 = vmul.f32 %v11817_v34, %v11935_v16  ;;  %v5835_v55 = vmul.f32 %v11820_v59, %v11937_v28 }
 0x627   :  { %v5911_v25 = vmul.f32 %v11844_v4, %v12014_v6  ;;  %v7625_v62 = vsel %vm1704_vm1, %v7623_v19, %v7624_v44  ;;  %v7628_v21 = vsel %vm1704_vm1, %v7626_v42, %v7627_v39  ;;  %v5912_v29 = vmul.f32 %v11847_v33, %v12018_v52  ;;  %v12048_v19 = vld [vmem:[#allocation2 + $0x98] sm:$0x3] }
 0x628   :  { %v5992_v24 = vmul.f32 %v11771_v27, %v11889_v53  ;;  %v7747_v45 = vadd.f32 %v7625_v62, %v7446_v48  ;;  %v7748_v30 = vadd.f32 %v7628_v21, %v7447_v11  ;;  %v5866_v5 = vadd.f32 %v5834_v2, %v5757_v12 }
 0x629   :  { %v5867_v8 = vadd.f32 %v5835_v55, %v5758_v10  ;;  %v5993_v47 = vmul.f32 %v11777_v3, %v11896_v35  ;;  %v5994_v58 = vmul.f32 %v11771_v27, %v11891_v50  ;;  %v5995_v7 = vmul.f32 %v11777_v3, %v11898_v41 }
 0x62a   :  { %v6124_v14 = vrot.slane %v5992_v24, 1  ;;  %v7780_v57 = vadd.f32 %v7748_v30, %v7747_v45  ;;  %v5943_v1 = vadd.f32 %v5911_v25, %v5866_v5  ;;  %v6293_v63 = vmul.f32 %v11774_v13, %v11935_v16 }
 0x62b   :  { %v5944_v17 = vadd.f32 %v5912_v29, %v5867_v8  ;;  %v6125_v9 = vrot.slane %v5994_v58, 1  ;;  %v6127_v49 = vrot.slane %v5993_v47, 1  ;;  %v6128_v23 = vrot.slane %v5995_v7, 1 }
 0x62c   :  { %v6294_v43 = vmul.f32 %v11780_v54, %v11937_v28  ;;  %7781 = vadd.xlane.f32.xlu0 %v7780_v57  ;;  %v6295_v36 = vmul.f32 %v11774_v13, %v11964_v46  ;;  %v6296_v40 = vmul.f32 %v11780_v54, %v11966_v38  ;;  %v6425_v42 = vrot.slane %v6293_v63, 1 }
 0x62d   :  { %v6594_v12 = vmul.f32 %v11783_v61, %v12014_v6  ;;  %v6126_v48 = vsel %vm937_vm0, %v6124_v14, %v6125_v9  ;;  %v6129_v11 = vsel %vm937_vm0, %v6127_v49, %v6128_v23  ;;  %v6595_v39 = vmul.f32 %v11789_v20, %v12018_v52 }
 0x62e   :  { %v6428_v44 = vrot.slane %v6294_v43, 1  ;;  %v6244_v10 = vadd.f32 %v6126_v48, %v5943_v1  ;;  %v6245_v2 = vadd.f32 %v6129_v11, %v5944_v17  ;;  %v6426_v55 = vrot.slane %v6295_v36, 1 }
 0x62f   :  { %v6429_v25 = vrot.slane %v6296_v40, 1  ;;  %v6596_v62 = vmul.f32 %v11783_v61, %v12046_v0  ;;  %v6597_v21 = vmul.f32 %v11789_v20, %v12048_v19  ;;  %v6726_v29 = vrot.slane %v6594_v12, 1 }
 0x630   :  { %v6729_v24 = vrot.slane %v6595_v39, 1  ;;  %v6427_v45 = vsel %vm937_vm0, %v6425_v42, %v6426_v55  ;;  %v6895_v5 = vmul.f32 %v11786_v60, %v11889_v53  ;;  %v6896_v8 = vmul.f32 %v11799_v18, %v11896_v35 }
 0x631   :  { %v6430_v30 = vsel %vm937_vm0, %v6428_v44, %v6429_v25  ;;  %v6545_v47 = vadd.f32 %v6427_v45, %v6244_v10  ;;  %v6727_v7 = vrot.slane %v6596_v62, 1  ;;  %v6730_v14 = vrot.slane %v6597_v21, 1  ;;  %v5366_v57 = vpop.f32.mrb[8].mxu1 }
 0x632   :  { %v6546_v58 = vadd.f32 %v6430_v30, %v6245_v2  ;;  %v6897_v1 = vmul.f32 %v11786_v60, %v11891_v50  ;;  %v6898_v17 = vmul.f32 %v11799_v18, %v11898_v41  ;;  %v7027_v63 = vrot.slane %v6895_v5, 2  ;;  %v5368_v49 = vpop.f32.mrb[9].mxu1 }
 0x633   :  { %v7030_v9 = vrot.slane %v6896_v8, 2  ;;  %v6728_v23 = vsel %vm937_vm0, %v6726_v29, %v6727_v7  ;;  %v6731_v53 = vsel %vm937_vm0, %v6729_v24, %v6730_v14  ;;  %v7196_v35 = vmul.f32 %v11793_v15, %v11935_v16 }
 0x634   :  { %v7197_v43 = vmul.f32 %v11803_v32, %v11937_v28  ;;  %v6846_v36 = vadd.f32 %v6728_v23, %v6545_v47  ;;  %v6847_v40 = vadd.f32 %v6731_v53, %v6546_v58  ;;  %v7028_v42 = vrot.slane %v6897_v1, 2 }
 0x635   :  { %v7031_v50 = vrot.slane %v6898_v17, 2  ;;  %v7198_v41 = vmul.f32 %v11793_v15, %v11964_v46  ;;  %v7199_v12 = vmul.f32 %v11803_v32, %v11966_v38  ;;  %v7328_v48 = vrot.slane %v7196_v35, 2  ;;  %v5372_v44 = vpop.f32.mrb[10].mxu1 }
 0x636   :  { %v7331_v11 = vrot.slane %v7197_v43, 2  ;;  %v7029_v39 = vsel %vm1704_vm1, %v7027_v63, %v7028_v42  ;;  %v7497_v2 = vmul.f32 %v11796_v56, %v12014_v6  ;;  %v7498_v55 = vmul.f32 %v11806_v37, %v12018_v52  ;;  %v5374_v25 = vpop.f32.mrb[11].mxu1 }
 0x637   :  { %v7032_v10 = vsel %vm1704_vm1, %v7030_v9, %v7031_v50  ;;  %v7147_v62 = vadd.f32 %v7029_v39, %v6846_v36  ;;  %v7329_v29 = vrot.slane %v7198_v41, 2  ;;  %v7332_v24 = vrot.slane %v7199_v12, 2 }
 0x638   :  { %v7148_v21 = vadd.f32 %v7032_v10, %v6847_v40  ;;  %v7499_v45 = vmul.f32 %v11796_v56, %v12046_v0  ;;  %v7500_v30 = vmul.f32 %v11806_v37, %v12048_v19  ;;  %v7629_v5 = vrot.slane %v7497_v2, 2 }
 0x639   :  { %v7632_v8 = vrot.slane %v7498_v55, 2  ;;  %v7330_v47 = vsel %vm1704_vm1, %v7328_v48, %v7329_v29  ;;  %v7333_v58 = vsel %vm1704_vm1, %v7331_v11, %v7332_v24  ;;  %v9194_v7 = vadd.f32 %v5366_v57, %v11765_v51  ;;  %v5378_v1 = vpop.f32.mrb[12].mxu1 }
 0x63a   :  { %v9195_v14 = vadd.f32 %v5368_v49, %v11768_v31  ;;  %v7448_v17 = vadd.f32 %v7330_v47, %v7147_v62  ;;  %v7449_v63 = vadd.f32 %v7333_v58, %v7148_v21  ;;  %v7630_v9 = vrot.slane %v7499_v45, 2  ;;  %v5380_v53 = vpop.f32.mrb[13].mxu1 }
 0x63b   :  { %v7633_v23 = vrot.slane %v7500_v30, 2  ;;  %v5477_v35 = vmax.f32 %v9194_v7, 0.0  ;;  %v9196_v36 = vadd.f32 %v5372_v44, %v11765_v51  ;;  %v9197_v40 = vadd.f32 %v5374_v25, %v11768_v31 }
 0x63c   :  { %v5478_v43 = vmax.f32 %v9195_v14, 0.0  ;;  %v7631_v42 = vsel %vm1704_vm1, %v7629_v5, %v7630_v9  ;;  %v9198_v57 = vadd.f32 %v5378_v1, %v11765_v51  ;;  %v9199_v49 = vadd.f32 %v5380_v53, %v11768_v31 }
 0x63d   :  { %v7634_v50 = vsel %vm1704_vm1, %v7632_v8, %v7633_v23  ;;  %v7749_v41 = vadd.f32 %v7631_v42, %v7448_v17  ;;  %v5541_v48 = vrot.slane %v5477_v35, 7  ;;  %v5384_v39 = vpop.f32.mrb[14].mxu1  ;;  %v5479_v10 = vmax.f32 %v9196_v36, 0.0 }
 0x63e   :  { %v7750_v12 = vadd.f32 %v7634_v50, %v7449_v63  ;;  %v5542_v11 = vrot.slane %v5478_v43, 7  ;;  %v5480_v2 = vmax.f32 %v9197_v40, 0.0  ;;  %v5481_v55 = vmax.f32 %v9198_v57, 0.0  ;;  %v5386_v44 = vpop.f32.mrb[15].mxu1 }
 0x63f   :  { %v5482_v62 = vmax.f32 %v9199_v49, 0.0  ;;  %5613 = vst [vmem:[#allocation2 + $0xa0] sm:$0xfe] %v5541_v48  ;;  %5615 = vst [vmem:[#allocation2 + $0xb0] sm:$0x1] %v5541_v48  ;;  %v9200_v25 = vadd.f32 %v5384_v39, %v11765_v51  ;;  %v9201_v29 = vadd.f32 %v5386_v44, %v11768_v31  ;;  %v5759_v24 = vmul.f32 %v11810_v26, %v11935_v16 }
 0x640   :  { %v7783_v21 = vadd.f32 %v7750_v12, %v7749_v41  ;;  %5614 = vst [vmem:[#allocation2 + $0xa8] sm:$0xfe] %v5542_v11  ;;  %5616 = vst [vmem:[#allocation2 + $0xb8] sm:$0x1] %v5542_v11  ;;  %v5543_v45 = vrot.slane %v5479_v10, 7  ;;  %v5544_v30 = vrot.slane %v5480_v2, 7  ;;  %v5760_v14 = vmul.f32 %v11814_v22, %v11937_v28 }
 0x641   :  { %v5545_v5 = vrot.slane %v5481_v55, 7  ;;  %v5546_v8 = vrot.slane %v5482_v62, 7  ;;  %v5483_v47 = vmax.f32 %v9200_v25, 0.0  ;;  %v5484_v58 = vmax.f32 %v9201_v29, 0.0  ;;  %v5390_v7 = vpop.f32.mrb[16].mxu1 }
 0x642   :  { %7784 = vadd.xlane.f32.xlu1 %v7783_v21  ;;  %v5836_v1 = vmul.f32 %v11817_v34, %v12014_v6  ;;  %5617 = vst [vmem:[#allocation2 + $0xc0] sm:$0xfe] %v5543_v45  ;;  %5619 = vst [vmem:[#allocation2 + $0xd0] sm:$0x1] %v5543_v45  ;;  %v9202_v17 = vadd.f32 %v5390_v7, %v11765_v51  ;;  %v5392_v63 = vpop.f32.mrb[17].mxu1  ;;  %v5837_v9 = vmul.f32 %v11820_v59, %v12018_v52 }
 0x643   :  { %5618 = vst [vmem:[#allocation2 + $0xc8] sm:$0xfe] %v5544_v30  ;;  %5620 = vst [vmem:[#allocation2 + $0xd8] sm:$0x1] %v5544_v30  ;;  %v5996_v23 = vmul.f32 %v11771_v27, %v11935_v16  ;;  %v5997_v53 = vmul.f32 %v11777_v3, %v11937_v28  ;;  %v5547_v35 = vrot.slane %v5483_v47, 7  ;;  %v5548_v43 = vrot.slane %v5484_v58, 7 }
 0x644   :  { %5621 = vst [vmem:[#allocation2 + $0xe0] sm:$0xfe] %v5545_v5  ;;  %5623 = vst [vmem:[#allocation2 + $0xf0] sm:$0x1] %v5545_v5  ;;  %v9203_v36 = vadd.f32 %v5392_v63, %v11768_v31  ;;  %v5868_v40 = vadd.f32 %v5836_v1, %v5759_v24  ;;  %v5485_v42 = vmax.f32 %v9202_v17, 0.0  ;;  %v5869_v50 = vadd.f32 %v5837_v9, %v5760_v14 }
 0x645   :  { %5622 = vst [vmem:[#allocation2 + $0xe8] sm:$0xfe] %v5546_v8  ;;  %5624 = vst [vmem:[#allocation2 + $0xf8] sm:$0x1] %v5546_v8  ;;  %v5998_v57 = vmul.f32 %v11771_v27, %v11964_v46  ;;  %v5999_v49 = vmul.f32 %v11777_v3, %v11966_v38  ;;  %v5396_v12 = vpop.f32.mrb[18].mxu1  ;;  %v6130_v48 = vrot.slane %v5996_v23, 1  ;;  %v6297_v39 = vmul.f32 %v11774_v13, %v12014_v6 }
 0x646   :  { %5625 = vst [vmem:[#allocation2 + $0x100] sm:$0xfe] %v5547_v35  ;;  %5627 = vst [vmem:[#allocation2 + $0x110] sm:$0x1] %v5547_v35  ;;  %v5486_v41 = vmax.f32 %v9203_v36, 0.0  ;;  %v6133_v11 = vrot.slane %v5997_v53, 1  ;;  %v9204_v2 = vadd.f32 %v5396_v12, %v11765_v51  ;;  %v6298_v21 = vmul.f32 %v11780_v54, %v12018_v52 }
 0x647   :  { %5626 = vst [vmem:[#allocation2 + $0x108] sm:$0xfe] %v5548_v43  ;;  %5628 = vst [vmem:[#allocation2 + $0x118] sm:$0x1] %v5548_v43  ;;  %v5549_v10 = vrot.slane %v5485_v42, 7  ;;  %v5398_v55 = vpop.f32.mrb[19].mxu1  ;;  %v6299_v25 = vmul.f32 %v11774_v13, %v12046_v0  ;;  %v6300_v58 = vmul.f32 %v11780_v54, %v12048_v19 }
 0x648   :  { %v12127_v62 = vld [vmem:[#allocation2 + $0xa0] sm:$0xff]  ;;  %v12129_v44 = vld [vmem:[#allocation2 + $0xa8] sm:$0xff]  ;;  %v5550_v29 = vrot.slane %v5486_v41, 7  ;;  %v9205_v24 = vadd.f32 %v5398_v55, %v11768_v31  ;;  %v5487_v5 = vmax.f32 %v9204_v2, 0.0  ;;  %v6131_v8 = vrot.slane %v5998_v57, 1 }
 0x649   :  { %v5913_v45 = vmul.f32 %v11844_v4, %v12127_v62  ;;  %v5914_v30 = vmul.f32 %v11847_v33, %v12129_v44  ;;  %5629 = vst [vmem:[#allocation2 + $0x160] sm:$0xfe] %v5549_v10  ;;  %5631 = vst [vmem:[#allocation2 + $0x170] sm:$0x1] %v5549_v10  ;;  %v6134_v47 = vrot.slane %v5999_v49, 1  ;;  %v5402_v14 = vpop.f32.mrb[20].mxu1 }
 0x64a   :  { %5630 = vst [vmem:[#allocation2 + $0x168] sm:$0xfe] %v5550_v29  ;;  %5632 = vst [vmem:[#allocation2 + $0x178] sm:$0x1] %v5550_v29  ;;  %v5488_v7 = vmax.f32 %v9205_v24, 0.0  ;;  %v6431_v63 = vrot.slane %v6297_v39, 1  ;;  %v9206_v23 = vadd.f32 %v5402_v14, %v11765_v51  ;;  %v6132_v43 = vsel %vm937_vm0, %v6130_v48, %v6131_v8 }
 0x64b   :  { %v5945_v1 = vadd.f32 %v5913_v45, %v5868_v40  ;;  %v5946_v17 = vadd.f32 %v5914_v30, %v5869_v50  ;;  %v5551_v9 = vrot.slane %v5487_v5, 7  ;;  %v5404_v53 = vpop.f32.mrb[21].mxu1  ;;  %v12143_v35 = vld [vmem:[#allocation2 + $0xb0] sm:$0x3]  ;;  %v6135_v36 = vsel %vm937_vm0, %v6133_v11, %v6134_v47  ;;  %v12148_v55 = vld [vmem:[#allocation2 + $0xb8] sm:$0x3] }
 0x64c   :  { %v5552_v42 = vrot.slane %v5488_v7, 7  ;;  %v9207_v57 = vadd.f32 %v5404_v53, %v11768_v31  ;;  %v5489_v40 = vmax.f32 %v9206_v23, 0.0  ;;  %v6432_v50 = vrot.slane %v6299_v25, 1 }
 0x64d   :  { %v6246_v49 = vadd.f32 %v6132_v43, %v5945_v1  ;;  %v6247_v41 = vadd.f32 %v6135_v36, %v5946_v17  ;;  %5633 = vst [vmem:[#allocation2 + $0x180] sm:$0xfe] %v5551_v9  ;;  %5635 = vst [vmem:[#allocation2 + $0x190] sm:$0x1] %v5551_v9  ;;  %v6434_v12 = vrot.slane %v6298_v21, 1  ;;  %v6435_v39 = vrot.slane %v6300_v58, 1 }
 0x64e   :  { %5634 = vst [vmem:[#allocation2 + $0x188] sm:$0xfe] %v5552_v42  ;;  %5636 = vst [vmem:[#allocation2 + $0x198] sm:$0x1] %v5552_v42  ;;  %v5490_v10 = vmax.f32 %v9207_v57, 0.0  ;;  %v5408_v2 = vpop.f32.mrb[22].mxu1  ;;  %v6598_v48 = vmul.f32 %v11783_v61, %v12127_v62  ;;  %v6599_v11 = vmul.f32 %v11789_v20, %v12129_v44  ;;  %v6600_v29 = vmul.f32 %v11783_v61, %v12143_v35 }
 0x64f   :  { %v5553_v24 = vrot.slane %v5489_v40, 7  ;;  %v9208_v25 = vadd.f32 %v5408_v2, %v11765_v51  ;;  %v5410_v21 = vpop.f32.mrb[23].mxu1  ;;  %v6433_v45 = vsel %vm937_vm0, %v6431_v63, %v6432_v50  ;;  %v6436_v30 = vsel %vm937_vm0, %v6434_v12, %v6435_v39 }
 0x650   :  { %v5554_v5 = vrot.slane %v5490_v10, 7  ;;  %v9209_v8 = vadd.f32 %v5410_v21, %v11768_v31  ;;  %v6547_v47 = vadd.f32 %v6433_v45, %v6246_v49  ;;  %v6548_v58 = vadd.f32 %v6436_v30, %v6247_v41 }
 0x651   :  { %5637 = vst [vmem:[#allocation2 + $0x1a0] sm:$0xfe] %v5553_v24  ;;  %5639 = vst [vmem:[#allocation2 + $0x1b0] sm:$0x1] %v5553_v24  ;;  %v5491_v7 = vmax.f32 %v9208_v25, 0.0  ;;  %v6601_v14 = vmul.f32 %v11789_v20, %v12148_v55  ;;  %v6732_v1 = vrot.slane %v6598_v48, 1  ;;  %v6899_v53 = vmul.f32 %v11786_v60, %v11935_v16 }
 0x652   :  { %v6733_v17 = vrot.slane %v6600_v29, 1  ;;  %5638 = vst [vmem:[#allocation2 + $0x1a8] sm:$0xfe] %v5554_v5  ;;  %5640 = vst [vmem:[#allocation2 + $0x1b8] sm:$0x1] %v5554_v5  ;;  %v5492_v9 = vmax.f32 %v9209_v8, 0.0  ;;  %v6900_v43 = vmul.f32 %v11799_v18, %v11937_v28  ;;  %v6901_v39 = vmul.f32 %v11786_v60, %v11964_v46 }
 0x653   :  { %v5414_v23 = vpop.f32.mrb[24].mxu1  ;;  %v6735_v63 = vrot.slane %v6599_v11, 1  ;;  %v5555_v36 = vrot.slane %v5491_v7, 7  ;;  %v6736_v41 = vrot.slane %v6601_v14, 1  ;;  %v6902_v28 = vmul.f32 %v11799_v18, %v11966_v38 }
 0x654   :  { %v9210_v42 = vadd.f32 %v5414_v23, %v11765_v51  ;;  %v5416_v57 = vpop.f32.mrb[25].mxu1  ;;  %v6734_v49 = vsel %vm937_vm0, %v6732_v1, %v6733_v17  ;;  %v5556_v40 = vrot.slane %v5492_v9, 7  ;;  %v7033_v2 = vrot.slane %v6899_v53, 2 }
 0x655   :  { %v9211_v50 = vadd.f32 %v5416_v57, %v11768_v31  ;;  %v6848_v12 = vadd.f32 %v6734_v49, %v6547_v47  ;;  %5641 = vst [vmem:[#allocation2 + $0x1c0] sm:$0xfe] %v5555_v36  ;;  %5643 = vst [vmem:[#allocation2 + $0x1d0] sm:$0x1] %v5555_v36  ;;  %v6737_v10 = vsel %vm937_vm0, %v6735_v63, %v6736_v41  ;;  %v7034_v29 = vrot.slane %v6901_v39, 2  ;;  %v5420_v25 = vpop.f32.mrb[26].mxu1 }
 0x656   :  { %v5493_v16 = vmax.f32 %v9210_v42, 0.0  ;;  %5642 = vst [vmem:[#allocation2 + $0x1c8] sm:$0xfe] %v5556_v40  ;;  %5644 = vst [vmem:[#allocation2 + $0x1d8] sm:$0x1] %v5556_v40  ;;  %v6849_v11 = vadd.f32 %v6737_v10, %v6548_v58  ;;  %v7036_v24 = vrot.slane %v6900_v43, 2  ;;  %v7200_v46 = vmul.f32 %v11793_v15, %v12014_v6 }
 0x657   :  { %v5494_v48 = vmax.f32 %v9211_v50, 0.0  ;;  %v7037_v45 = vrot.slane %v6902_v28, 2  ;;  %v7201_v30 = vmul.f32 %v11803_v32, %v12018_v52  ;;  %v5422_v5 = vpop.f32.mrb[27].mxu1  ;;  %v7035_v38 = vsel %vm1704_vm1, %v7033_v2, %v7034_v29 }
 0x658   :  { %v5557_v21 = vrot.slane %v5493_v16, 7  ;;  %v7202_v47 = vmul.f32 %v11793_v15, %v12046_v0  ;;  %v7203_v58 = vmul.f32 %v11803_v32, %v12048_v19  ;;  %v7149_v14 = vadd.f32 %v7035_v38, %v6848_v12 }
 0x659   :  { %v5558_v8 = vrot.slane %v5494_v48, 7  ;;  %v7038_v7 = vsel %vm1704_vm1, %v7036_v24, %v7037_v45  ;;  %v7334_v1 = vrot.slane %v7200_v46, 2  ;;  %v7337_v17 = vrot.slane %v7201_v30, 2  ;;  %v12186_v43 = vpop.f32.mrb[28].mxu1  ;;  %v12200_v24 = vld [vmem:[#allocation2 + $0xc0] sm:$0xff]  ;;  %v12207_v46 = vld [vmem:[#allocation2 + $0xc8] sm:$0xff] }
 0x65a   :  { %5645 = vst [vmem:[#allocation2 + $0x1e0] sm:$0xfe] %v5557_v21  ;;  %5647 = vst [vmem:[#allocation2 + $0x1f0] sm:$0x1] %v5557_v21  ;;  %v7150_v9 = vadd.f32 %v7038_v7, %v6849_v11  ;;  %v7335_v23 = vrot.slane %v7202_v47, 2  ;;  %v7338_v63 = vrot.slane %v7203_v58, 2  ;;  %v7501_v53 = vmul.f32 %v11796_v56, %v12127_v62 }
 0x65b   :  { %5646 = vst [vmem:[#allocation2 + $0x1e8] sm:$0xfe] %v5558_v8  ;;  %5648 = vst [vmem:[#allocation2 + $0x1f8] sm:$0x1] %v5558_v8  ;;  %v7502_v36 = vmul.f32 %v11806_v37, %v12129_v44  ;;  %v7503_v42 = vmul.f32 %v11796_v56, %v12143_v35  ;;  %v7504_v57 = vmul.f32 %v11806_v37, %v12148_v55  ;;  %v12195_v41 = vpop.f32.mrb[29].mxu1 }
 0x65c   :  { %v9212_v49 = vadd.f32 %v5420_v25, %v11765_v51  ;;  %v7336_v40 = vsel %vm1704_vm1, %v7334_v1, %v7335_v23  ;;  %v7339_v50 = vsel %vm1704_vm1, %v7337_v17, %v7338_v63  ;;  %v7635_v12 = vrot.slane %v7501_v53, 2 }
 0x65d   :  { %v9213_v39 = vadd.f32 %v5422_v5, %v11768_v31  ;;  %v7450_v16 = vadd.f32 %v7336_v40, %v7149_v14  ;;  %v7451_v10 = vadd.f32 %v7339_v50, %v7150_v9  ;;  %v7636_v28 = vrot.slane %v7503_v42, 2  ;;  %v12204_v21 = vpop.f32.mrb[30].mxu1 }
 0x65e   :  { %v7638_v2 = vrot.slane %v7502_v36, 2  ;;  %v7639_v48 = vrot.slane %v7504_v57, 2  ;;  %v5495_v11 = vmax.f32 %v9212_v49, 0.0  ;;  %v5761_v25 = vmul.f32 %v11810_v26, %v12014_v6  ;;  %v12215_v38 = vpop.f32.mrb[31].mxu1 }
 0x65f   :  { %v5496_v29 = vmax.f32 %v9213_v39, 0.0  ;;  %v7637_v45 = vsel %vm1704_vm1, %v7635_v12, %v7636_v28  ;;  %v5762_v30 = vmul.f32 %v11814_v22, %v12018_v52  ;;  %v5838_v5 = vmul.f32 %v11817_v34, %v12127_v62  ;;  %v12232_v28 = vld [vmem:[#allocation2 + $0xd0] sm:$0x3] }
 0x660   :  { %v5839_v8 = vmul.f32 %v11820_v59, %v12129_v44  ;;  %v7640_v47 = vsel %vm1704_vm1, %v7638_v2, %v7639_v48  ;;  %v7751_v58 = vadd.f32 %v7637_v45, %v7450_v16  ;;  %v5559_v7 = vrot.slane %v5495_v11, 7  ;;  %v12234_v2 = vld [vmem:[#allocation2 + $0xd8] sm:$0x3] }
 0x661   :  { %v5560_v14 = vrot.slane %v5496_v29, 7  ;;  %v7752_v1 = vadd.f32 %v7640_v47, %v7451_v10  ;;  %v5870_v17 = vadd.f32 %v5838_v5, %v5761_v25  ;;  %v5915_v23 = vmul.f32 %v11844_v4, %v12200_v24 }
 0x662   :  { %v5871_v9 = vadd.f32 %v5839_v8, %v5762_v30  ;;  %5649 = vst [vmem:[#allocation2 + $0x200] sm:$0xfe] %v5559_v7  ;;  %5651 = vst [vmem:[#allocation2 + $0x210] sm:$0x1] %v5559_v7  ;;  %v5916_v63 = vmul.f32 %v11847_v33, %v12207_v46  ;;  %v6000_v53 = vmul.f32 %v11771_v27, %v12014_v6 }
 0x663   :  { %5650 = vst [vmem:[#allocation2 + $0x208] sm:$0xfe] %v5560_v14  ;;  %5652 = vst [vmem:[#allocation2 + $0x218] sm:$0x1] %v5560_v14  ;;  %v6001_v36 = vmul.f32 %v11777_v3, %v12018_v52  ;;  %v6002_v42 = vmul.f32 %v11771_v27, %v12046_v0  ;;  %v7786_v57 = vadd.f32 %v7752_v1, %v7751_v58 }
 0x664   :  { %v5947_v49 = vadd.f32 %v5915_v23, %v5870_v17  ;;  %v6003_v40 = vmul.f32 %v11777_v3, %v12048_v19  ;;  %v6301_v50 = vmul.f32 %v11774_v13, %v12127_v62  ;;  %v5948_v12 = vadd.f32 %v5916_v63, %v5871_v9 }
 0x665   :  { %v6136_v39 = vrot.slane %v6000_v53, 1  ;;  %v6137_v16 = vrot.slane %v6002_v42, 1  ;;  %v6139_v10 = vrot.slane %v6001_v36, 1  ;;  %7787 = vadd.xlane.f32.xlu1 %v7786_v57  ;;  %v6302_v11 = vmul.f32 %v11780_v54, %v12129_v44 }
 0x666   :  { %v6140_v48 = vrot.slane %v6003_v40, 1  ;;  %v6303_v29 = vmul.f32 %v11774_v13, %v12143_v35  ;;  %v6304_v25 = vmul.f32 %v11780_v54, %v12148_v55  ;;  %v6437_v30 = vrot.slane %v6301_v50, 1 }
 0x667   :  { %v6138_v45 = vsel %vm937_vm0, %v6136_v39, %v6137_v16  ;;  %v6602_v5 = vmul.f32 %v11783_v61, %v12200_v24  ;;  %v6603_v8 = vmul.f32 %v11789_v20, %v12207_v46  ;;  %v6440_v14 = vrot.slane %v6302_v11, 1 }
 0x668   :  { %v6141_v47 = vsel %vm937_vm0, %v6139_v10, %v6140_v48  ;;  %v6248_v58 = vadd.f32 %v6138_v45, %v5947_v49  ;;  %v6438_v7 = vrot.slane %v6303_v29, 1  ;;  %v6441_v17 = vrot.slane %v6304_v25, 1 }
 0x669   :  { %v6249_v1 = vadd.f32 %v6141_v47, %v5948_v12  ;;  %v6604_v9 = vmul.f32 %v11783_v61, %v12232_v28  ;;  %v6605_v23 = vmul.f32 %v11789_v20, %v12234_v2  ;;  %v6738_v53 = vrot.slane %v6602_v5, 1 }
 0x66a   :  { %v6439_v63 = vsel %vm937_vm0, %v6437_v30, %v6438_v7  ;;  %v6741_v36 = vrot.slane %v6603_v8, 1  ;;  %v6903_v42 = vmul.f32 %v11786_v60, %v12014_v6  ;;  %v6442_v57 = vsel %vm937_vm0, %v6440_v14, %v6441_v17 }
 0x66b   :  { %v6549_v49 = vadd.f32 %v6439_v63, %v6248_v58  ;;  %v6739_v40 = vrot.slane %v6604_v9, 1  ;;  %v6742_v50 = vrot.slane %v6605_v23, 1  ;;  %v6550_v12 = vadd.f32 %v6442_v57, %v6249_v1 }
 0x66c   :  { %v6904_v39 = vmul.f32 %v11799_v18, %v12018_v52  ;;  %v6905_v16 = vmul.f32 %v11786_v60, %v12046_v0  ;;  %v6906_v10 = vmul.f32 %v11799_v18, %v12048_v19  ;;  %v7039_v6 = vrot.slane %v6903_v42, 2 }
 0x66d   :  { %v6740_v48 = vsel %vm937_vm0, %v6738_v53, %v6739_v40  ;;  %v6743_v11 = vsel %vm937_vm0, %v6741_v36, %v6742_v50  ;;  %v7204_v29 = vmul.f32 %v11793_v15, %v12127_v62  ;;  %v7205_v52 = vmul.f32 %v11803_v32, %v12129_v44 }
 0x66e   :  { %v6850_v25 = vadd.f32 %v6740_v48, %v6549_v49  ;;  %v6851_v45 = vadd.f32 %v6743_v11, %v6550_v12  ;;  %v7040_v30 = vrot.slane %v6905_v16, 2  ;;  %v7042_v5 = vrot.slane %v6904_v39, 2 }
 0x66f   :  { %v7043_v8 = vrot.slane %v6906_v10, 2  ;;  %v7206_v0 = vmul.f32 %v11793_v15, %v12143_v35  ;;  %v7207_v19 = vmul.f32 %v11803_v32, %v12148_v55  ;;  %v7340_v58 = vrot.slane %v7204_v29, 2  ;;  %v12288_v29 = vld [vmem:[#allocation2 + $0xe0] sm:$0xff] }
 0x670   :  { %v7041_v47 = vsel %vm1704_vm1, %v7039_v6, %v7040_v30  ;;  %v7505_v7 = vmul.f32 %v11796_v56, %v12200_v24  ;;  %v7506_v14 = vmul.f32 %v11806_v37, %v12207_v46  ;;  %v7343_v23 = vrot.slane %v7205_v52, 2 }
 0x671   :  { %v7044_v1 = vsel %vm1704_vm1, %v7042_v5, %v7043_v8  ;;  %v7151_v17 = vadd.f32 %v7041_v47, %v6850_v25  ;;  %v7341_v9 = vrot.slane %v7206_v0, 2  ;;  %v7344_v53 = vrot.slane %v7207_v19, 2  ;;  %v12290_v25 = vld [vmem:[#allocation2 + $0xe8] sm:$0xff] }
 0x672   :  { %v7152_v63 = vadd.f32 %v7044_v1, %v6851_v45  ;;  %v7507_v36 = vmul.f32 %v11796_v56, %v12232_v28  ;;  %v7508_v42 = vmul.f32 %v11806_v37, %v12234_v2  ;;  %v7641_v49 = vrot.slane %v7505_v7, 2 }
 0x673   :  { %v7342_v57 = vsel %vm1704_vm1, %v7340_v58, %v7341_v9  ;;  %v7644_v40 = vrot.slane %v7506_v14, 2  ;;  %v9214_v50 = vadd.f32 %v12186_v43, %v11765_v51  ;;  %v7345_v12 = vsel %vm1704_vm1, %v7343_v23, %v7344_v53 }
 0x674   :  { %v7452_v39 = vadd.f32 %v7342_v57, %v7151_v17  ;;  %v7642_v16 = vrot.slane %v7507_v36, 2  ;;  %v7645_v10 = vrot.slane %v7508_v42, 2  ;;  %v7453_v48 = vadd.f32 %v7345_v12, %v7152_v63  ;;  %v12318_v12 = vld [vmem:[#allocation2 + $0xf0] sm:$0x3] }
 0x675   :  { %v5497_v11 = vmax.f32 %v9214_v50, 0.0  ;;  %v9215_v6 = vadd.f32 %v12195_v41, %v11768_v31  ;;  %v5763_v45 = vmul.f32 %v11810_v26, %v12127_v62  ;;  %v5764_v5 = vmul.f32 %v11814_v22, %v12129_v44 }
 0x676   :  { %v7643_v30 = vsel %vm1704_vm1, %v7641_v49, %v7642_v16  ;;  %v7646_v43 = vsel %vm1704_vm1, %v7644_v40, %v7645_v10  ;;  %v5840_v8 = vmul.f32 %v11817_v34, %v12200_v24  ;;  %v5841_v47 = vmul.f32 %v11820_v59, %v12207_v46 }
 0x677   :  { %v7753_v52 = vadd.f32 %v7643_v30, %v7452_v39  ;;  %v7754_v0 = vadd.f32 %v7646_v43, %v7453_v48  ;;  %v5561_v41 = vrot.slane %v5497_v11, 7  ;;  %v5498_v19 = vmax.f32 %v9215_v6, 0.0  ;;  %v12322_v11 = vld [vmem:[#allocation2 + $0xf8] sm:$0x3] }
 0x678   :  { %v5872_v58 = vadd.f32 %v5840_v8, %v5763_v45  ;;  %v5917_v7 = vmul.f32 %v11844_v4, %v12288_v29  ;;  %v5918_v14 = vmul.f32 %v11847_v33, %v12290_v25  ;;  %v6004_v9 = vmul.f32 %v11771_v27, %v12127_v62 }
 0x679   :  { %v7789_v1 = vadd.f32 %v7754_v0, %v7753_v52  ;;  %5653 = vst [vmem:[#allocation2 + $0x220] sm:$0xfe] %v5561_v41  ;;  %5655 = vst [vmem:[#allocation2 + $0x230] sm:$0x1] %v5561_v41  ;;  %v5562_v17 = vrot.slane %v5498_v19, 7  ;;  %v6005_v23 = vmul.f32 %v11777_v3, %v12129_v44  ;;  %v5873_v63 = vadd.f32 %v5841_v47, %v5764_v5 }
 0x67a   :  { %v5949_v53 = vadd.f32 %v5917_v7, %v5872_v58  ;;  %v6006_v36 = vmul.f32 %v11771_v27, %v12143_v35  ;;  %v6007_v42 = vmul.f32 %v11777_v3, %v12148_v55  ;;  %v6142_v57 = vrot.slane %v6004_v9, 1 }
 0x67b   :  { %7790 = vadd.xlane.f32.xlu0 %v7789_v1  ;;  %5654 = vst [vmem:[#allocation2 + $0x228] sm:$0xfe] %v5562_v17  ;;  %5656 = vst [vmem:[#allocation2 + $0x238] sm:$0x1] %v5562_v17  ;;  %v6145_v49 = vrot.slane %v6005_v23, 1  ;;  %v6305_v40 = vmul.f32 %v11774_v13, %v12200_v24  ;;  %v6306_v50 = vmul.f32 %v11780_v54, %v12207_v46 }
 0x67c   :  { %v5950_v39 = vadd.f32 %v5918_v14, %v5873_v63  ;;  %v6143_v16 = vrot.slane %v6006_v36, 1  ;;  %v6146_v10 = vrot.slane %v6007_v42, 1  ;;  %v6307_v48 = vmul.f32 %v11774_v13, %v12232_v28 }
 0x67d   :  { %v6308_v6 = vmul.f32 %v11780_v54, %v12234_v2  ;;  %v6443_v45 = vrot.slane %v6305_v40, 1  ;;  %v6446_v30 = vrot.slane %v6306_v50, 1  ;;  %v6606_v43 = vmul.f32 %v11783_v61, %v12288_v29 }
 0x67e   :  { %v6144_v5 = vsel %vm937_vm0, %v6142_v57, %v6143_v16  ;;  %v6147_v8 = vsel %vm937_vm0, %v6145_v49, %v6146_v10  ;;  %v6444_v52 = vrot.slane %v6307_v48, 1  ;;  %v6607_v0 = vmul.f32 %v11789_v20, %v12290_v25 }
 0x67f   :  { %v6250_v41 = vadd.f32 %v6144_v5, %v5949_v53  ;;  %v6251_v19 = vadd.f32 %v6147_v8, %v5950_v39  ;;  %v6447_v47 = vrot.slane %v6308_v6, 1  ;;  %v6608_v58 = vmul.f32 %v11783_v61, %v12318_v12 }
 0x680   :  { %v6445_v7 = vsel %vm937_vm0, %v6443_v45, %v6444_v52  ;;  %v6609_v14 = vmul.f32 %v11789_v20, %v12322_v11  ;;  %v6744_v1 = vrot.slane %v6606_v43, 1  ;;  %v6747_v17 = vrot.slane %v6607_v0, 1 }
 0x681   :  { %v6448_v9 = vsel %vm937_vm0, %v6446_v30, %v6447_v47  ;;  %v6551_v23 = vadd.f32 %v6445_v7, %v6250_v41  ;;  %v6745_v63 = vrot.slane %v6608_v58, 1  ;;  %v6907_v36 = vmul.f32 %v11786_v60, %v12127_v62 }
 0x682   :  { %v6552_v53 = vadd.f32 %v6448_v9, %v6251_v19  ;;  %v6748_v42 = vrot.slane %v6609_v14, 1  ;;  %v6908_v57 = vmul.f32 %v11799_v18, %v12129_v44  ;;  %v6909_v49 = vmul.f32 %v11786_v60, %v12143_v35 }
 0x683   :  { %v6746_v40 = vsel %vm937_vm0, %v6744_v1, %v6745_v63  ;;  %v6910_v50 = vmul.f32 %v11799_v18, %v12148_v55  ;;  %v7045_v39 = vrot.slane %v6907_v36, 2  ;;  %v7208_v16 = vmul.f32 %v11793_v15, %v12200_v24 }
 0x684   :  { %v6749_v10 = vsel %vm937_vm0, %v6747_v17, %v6748_v42  ;;  %v6852_v62 = vadd.f32 %v6746_v40, %v6551_v23  ;;  %v7046_v48 = vrot.slane %v6909_v49, 2  ;;  %v7048_v6 = vrot.slane %v6908_v57, 2 }
 0x685   :  { %v6853_v45 = vadd.f32 %v6749_v10, %v6552_v53  ;;  %v7049_v30 = vrot.slane %v6910_v50, 2  ;;  %v7209_v44 = vmul.f32 %v11803_v32, %v12207_v46  ;;  %v7210_v35 = vmul.f32 %v11793_v15, %v12232_v28  ;;  %v12375_v10 = vld [vmem:[#allocation2 + $0x108] sm:$0xff] }
 0x686   :  { %v7047_v43 = vsel %vm1704_vm1, %v7045_v39, %v7046_v48  ;;  %v7211_v55 = vmul.f32 %v11803_v32, %v12234_v2  ;;  %v7346_v5 = vrot.slane %v7208_v16, 2  ;;  %v7509_v8 = vmul.f32 %v11796_v56, %v12288_v29  ;;  %v12372_v39 = vld [vmem:[#allocation2 + $0x100] sm:$0xff] }
 0x687   :  { %v7050_v52 = vsel %vm1704_vm1, %v7048_v6, %v7049_v30  ;;  %v7153_v0 = vadd.f32 %v7047_v43, %v6852_v62  ;;  %v7347_v41 = vrot.slane %v7210_v35, 2  ;;  %v7349_v19 = vrot.slane %v7209_v44, 2 }
 0x688   :  { %v7154_v47 = vadd.f32 %v7050_v52, %v6853_v45  ;;  %v7350_v58 = vrot.slane %v7211_v55, 2  ;;  %v7510_v7 = vmul.f32 %v11806_v37, %v12290_v25  ;;  %v7511_v14 = vmul.f32 %v11796_v56, %v12318_v12 }
 0x689   :  { %v7348_v1 = vsel %vm1704_vm1, %v7346_v5, %v7347_v41  ;;  %v7512_v17 = vmul.f32 %v11806_v37, %v12322_v11  ;;  %v7647_v9 = vrot.slane %v7509_v8, 2  ;;  %v9216_v23 = vadd.f32 %v12204_v21, %v11765_v51 }
 0x68a   :  { %v7351_v63 = vsel %vm1704_vm1, %v7349_v19, %v7350_v58  ;;  %v7454_v36 = vadd.f32 %v7348_v1, %v7153_v0  ;;  %v7648_v53 = vrot.slane %v7511_v14, 2  ;;  %v7650_v42 = vrot.slane %v7510_v7, 2  ;;  %v12400_v1 = vld [vmem:[#allocation2 + $0x110] sm:$0x3] }
 0x68b   :  { %v7455_v57 = vadd.f32 %v7351_v63, %v7154_v47  ;;  %v7651_v49 = vrot.slane %v7512_v17, 2  ;;  %v5499_v40 = vmax.f32 %v9216_v23, 0.0  ;;  %v9217_v50 = vadd.f32 %v12215_v38, %v11768_v31 }
 0x68c   :  { %v7649_v16 = vsel %vm1704_vm1, %v7647_v9, %v7648_v53  ;;  %v5765_v51 = vmul.f32 %v11810_v26, %v12200_v24  ;;  %v5766_v21 = vmul.f32 %v11814_v22, %v12207_v46  ;;  %v5842_v62 = vmul.f32 %v11817_v34, %v12288_v29 }
 0x68d   :  { %v7652_v48 = vsel %vm1704_vm1, %v7650_v42, %v7651_v49  ;;  %v7755_v6 = vadd.f32 %v7649_v16, %v7454_v36  ;;  %v5563_v45 = vrot.slane %v5499_v40, 7  ;;  %v5500_v31 = vmax.f32 %v9217_v50, 0.0  ;;  %v12406_v36 = vld [vmem:[#allocation2 + $0x118] sm:$0x3] }
 0x68e   :  { %v7756_v38 = vadd.f32 %v7652_v48, %v7455_v57  ;;  %v5843_v30 = vmul.f32 %v11820_v59, %v12290_v25  ;;  %v5874_v44 = vadd.f32 %v5842_v62, %v5765_v51  ;;  %v5919_v35 = vmul.f32 %v11844_v4, %v12372_v39 }
 0x68f   :  { %5657 = vst [vmem:[#allocation2 + $0x240] sm:$0xfe] %v5563_v45  ;;  %5659 = vst [vmem:[#allocation2 + $0x250] sm:$0x1] %v5563_v45  ;;  %v5564_v43 = vrot.slane %v5500_v31, 7  ;;  %v5920_v55 = vmul.f32 %v11847_v33, %v12375_v10  ;;  %v6008_v5 = vmul.f32 %v11771_v27, %v12200_v24  ;;  %v6009_v8 = vmul.f32 %v11777_v3, %v12207_v46 }
 0x690   :  { %v7792_v52 = vadd.f32 %v7756_v38, %v7755_v6  ;;  %v5875_v0 = vadd.f32 %v5843_v30, %v5766_v21  ;;  %v5951_v41 = vadd.f32 %v5919_v35, %v5874_v44  ;;  %v6010_v19 = vmul.f32 %v11771_v27, %v12232_v28 }
 0x691   :  { %5658 = vst [vmem:[#allocation2 + $0x248] sm:$0xfe] %v5564_v43  ;;  %5660 = vst [vmem:[#allocation2 + $0x258] sm:$0x1] %v5564_v43  ;;  %v6011_v47 = vmul.f32 %v11777_v3, %v12234_v2  ;;  %v6148_v58 = vrot.slane %v6008_v5, 1  ;;  %v6151_v7 = vrot.slane %v6009_v8, 1  ;;  %v6309_v14 = vmul.f32 %v11774_v13, %v12288_v29 }
 0x692   :  { %7793 = vadd.xlane.f32.xlu1 %v7792_v52  ;;  %v5952_v17 = vadd.f32 %v5920_v55, %v5875_v0  ;;  %v6149_v9 = vrot.slane %v6010_v19, 1  ;;  %v6310_v23 = vmul.f32 %v11780_v54, %v12290_v25  ;;  %v6311_v63 = vmul.f32 %v11774_v13, %v12318_v12 }
 0x693   :  { %v6152_v53 = vrot.slane %v6011_v47, 1  ;;  %v6312_v42 = vmul.f32 %v11780_v54, %v12322_v11  ;;  %v6449_v57 = vrot.slane %v6309_v14, 1  ;;  %v6610_v49 = vmul.f32 %v11783_v61, %v12372_v39 }
 0x694   :  { %v6150_v40 = vsel %vm937_vm0, %v6148_v58, %v6149_v9  ;;  %v6450_v50 = vrot.slane %v6311_v63, 1  ;;  %v6452_v16 = vrot.slane %v6310_v23, 1  ;;  %v6611_v51 = vmul.f32 %v11789_v20, %v12375_v10 }
 0x695   :  { %v6153_v21 = vsel %vm937_vm0, %v6151_v7, %v6152_v53  ;;  %v6252_v62 = vadd.f32 %v6150_v40, %v5951_v41  ;;  %v6453_v48 = vrot.slane %v6312_v42, 1  ;;  %v6612_v6 = vmul.f32 %v11783_v61, %v12400_v1 }
 0x696   :  { %v6253_v45 = vadd.f32 %v6153_v21, %v5952_v17  ;;  %v6451_v31 = vsel %vm937_vm0, %v6449_v57, %v6450_v50  ;;  %v6613_v38 = vmul.f32 %v11789_v20, %v12406_v36  ;;  %v6750_v30 = vrot.slane %v6610_v49, 1 }
 0x697   :  { %v6454_v44 = vsel %vm937_vm0, %v6452_v16, %v6453_v48  ;;  %v6553_v35 = vadd.f32 %v6451_v31, %v6252_v62  ;;  %v6751_v43 = vrot.slane %v6612_v6, 1  ;;  %v6753_v55 = vrot.slane %v6611_v51, 1 }
 0x698   :  { %v6554_v5 = vadd.f32 %v6454_v44, %v6253_v45  ;;  %v6754_v8 = vrot.slane %v6613_v38, 1  ;;  %v6911_v52 = vmul.f32 %v11786_v60, %v12200_v24  ;;  %v6912_v0 = vmul.f32 %v11799_v18, %v12207_v46 }
 0x699   :  { %v6752_v41 = vsel %vm937_vm0, %v6750_v30, %v6751_v43  ;;  %v6913_v19 = vmul.f32 %v11786_v60, %v12232_v28  ;;  %v6914_v47 = vmul.f32 %v11799_v18, %v12234_v2  ;;  %v7212_v58 = vmul.f32 %v11793_v15, %v12288_v29 }
 0x69a   :  { %v6755_v7 = vsel %vm937_vm0, %v6753_v55, %v6754_v8  ;;  %v6854_v14 = vadd.f32 %v6752_v41, %v6553_v35  ;;  %v7051_v17 = vrot.slane %v6911_v52, 2  ;;  %v7054_v9 = vrot.slane %v6912_v0, 2  ;;  %v12460_v41 = vld [vmem:[#allocation2] sm:$0xff] }
 0x69b   :  { %v6855_v24 = vadd.f32 %v6755_v7, %v6554_v5  ;;  %v7052_v23 = vrot.slane %v6913_v19, 2  ;;  %v7055_v63 = vrot.slane %v6914_v47, 2  ;;  %v7213_v46 = vmul.f32 %v11803_v32, %v12290_v25 }
 0x69c   :  { %v7214_v28 = vmul.f32 %v11793_v15, %v12318_v12  ;;  %v7215_v2 = vmul.f32 %v11803_v32, %v12322_v11  ;;  %v7352_v53 = vrot.slane %v7212_v58, 2  ;;  %v7513_v42 = vmul.f32 %v11796_v56, %v12372_v39 }
 0x69d   :  { %v7053_v57 = vsel %vm1704_vm1, %v7051_v17, %v7052_v23  ;;  %v7056_v49 = vsel %vm1704_vm1, %v7054_v9, %v7055_v63  ;;  %v7355_v40 = vrot.slane %v7213_v46, 2  ;;  %v7514_v50 = vmul.f32 %v11806_v37, %v12375_v10 }
 0x69e   :  { %v7155_v16 = vadd.f32 %v7053_v57, %v6854_v14  ;;  %v7156_v51 = vadd.f32 %v7056_v49, %v6855_v24  ;;  %v7353_v21 = vrot.slane %v7214_v28, 2  ;;  %v7356_v62 = vrot.slane %v7215_v2, 2 }
 0x69f   :  { %v7515_v48 = vmul.f32 %v11796_v56, %v12400_v1  ;;  %v7516_v6 = vmul.f32 %v11806_v37, %v12406_v36  ;;  %v7653_v45 = vrot.slane %v7513_v42, 2  ;;  %v7656_v31 = vrot.slane %v7514_v50, 2  ;;  %v5699_v50 = vld [vmem:[#allocation2 + $0x130] sm:$0x3] }
 0x6a0   :  { %v7354_v38 = vsel %vm1704_vm1, %v7352_v53, %v7353_v21  ;;  %v7357_v30 = vsel %vm1704_vm1, %v7355_v40, %v7356_v62  ;;  %v5767_v44 = vmul.f32 %v11810_v26, %v12288_v29  ;;  %v5768_v35 = vmul.f32 %v11814_v22, %v12290_v25 }
 0x6a1   :  { %v7456_v43 = vadd.f32 %v7354_v38, %v7155_v16  ;;  %v7457_v55 = vadd.f32 %v7357_v30, %v7156_v51  ;;  %v7654_v5 = vrot.slane %v7515_v48, 2  ;;  %v7657_v8 = vrot.slane %v7516_v6, 2  ;;  %v5700_v48 = vld [vmem:[#allocation2 + $0x138] sm:$0x3] }
 0x6a2   :  { %v5844_v52 = vmul.f32 %v11817_v34, %v12372_v39  ;;  %v5845_v0 = vmul.f32 %v11820_v59, %v12375_v10  ;;  %v5921_v19 = vmul.f32 %v12460_v41, %v11844_v4  ;;  %v5922_v47 = vmul.f32 %v12460_v41, %v11847_v33 }
 0x6a3   :  { %v7655_v58 = vsel %vm1704_vm1, %v7653_v45, %v7654_v5  ;;  %v7658_v7 = vsel %vm1704_vm1, %v7656_v31, %v7657_v8  ;;  %v6012_v14 = vmul.f32 %v11771_v27, %v12288_v29  ;;  %v6013_v17 = vmul.f32 %v11777_v3, %v12290_v25 }
 0x6a4   :  { %v7757_v9 = vadd.f32 %v7655_v58, %v7456_v43  ;;  %v7758_v24 = vadd.f32 %v7658_v7, %v7457_v55  ;;  %v5876_v23 = vadd.f32 %v5844_v52, %v5767_v44  ;;  %v5877_v63 = vadd.f32 %v5845_v0, %v5768_v35 }
 0x6a5   :  { %v6014_v46 = vmul.f32 %v11771_v27, %v12318_v12  ;;  %v6015_v28 = vmul.f32 %v11777_v3, %v12322_v11  ;;  %v6154_v2 = vrot.slane %v6012_v14, 1  ;;  %v6157_v53 = vrot.slane %v6013_v17, 1 }
 0x6a6   :  { %v7795_v42 = vadd.f32 %v7758_v24, %v7757_v9  ;;  %v5953_v57 = vadd.f32 %v5921_v19, %v5876_v23  ;;  %v5954_v49 = vadd.f32 %v5922_v47, %v5877_v63  ;;  %v6313_v40 = vmul.f32 %v11774_v13, %v12372_v39 }
 0x6a7   :  { %v6155_v16 = vrot.slane %v6014_v46, 1  ;;  %v6158_v51 = vrot.slane %v6015_v28, 1  ;;  %v6314_v21 = vmul.f32 %v11780_v54, %v12375_v10  ;;  %v6315_v62 = vmul.f32 %v11774_v13, %v12400_v1 }
 0x6a8   :  { %7796 = vadd.xlane.f32.xlu0 %v7795_v42  ;;  %v6316_v6 = vmul.f32 %v11780_v54, %v12406_v36  ;;  %v6455_v45 = vrot.slane %v6313_v40, 1  ;;  %v6614_v31 = vmul.f32 %v12460_v41, %v11783_v61  ;;  %v6615_v38 = vmul.f32 %v12460_v41, %v11789_v20 }
 0x6a9   :  { %v6156_v30 = vsel %vm937_vm0, %v6154_v2, %v6155_v16  ;;  %v6159_v44 = vsel %vm937_vm0, %v6157_v53, %v6158_v51  ;;  %v6456_v35 = vrot.slane %v6315_v62, 1  ;;  %v6458_v43 = vrot.slane %v6314_v21, 1 }
 0x6aa   :  { %v6254_v55 = vadd.f32 %v6156_v30, %v5953_v57  ;;  %v6255_v5 = vadd.f32 %v6159_v44, %v5954_v49  ;;  %v6459_v8 = vrot.slane %v6316_v6, 1  ;;  %v6616_v52 = vmul.f32 %v11783_v61, %v5699_v50 }
 0x6ab   :  { %v6457_v0 = vsel %vm937_vm0, %v6455_v45, %v6456_v35  ;;  %v6617_v19 = vmul.f32 %v11789_v20, %v5700_v48  ;;  %v6756_v47 = vrot.slane %v6614_v31, 1  ;;  %v6759_v58 = vrot.slane %v6615_v38, 1  ;;  %v12519_v35 = vld [vmem:[#allocation2 + $0x160] sm:$0xff] }
 0x6ac   :  { %v6460_v7 = vsel %vm937_vm0, %v6458_v43, %v6459_v8  ;;  %v6555_v14 = vadd.f32 %v6457_v0, %v6254_v55  ;;  %v6757_v17 = vrot.slane %v6616_v52, 1  ;;  %v6915_v9 = vmul.f32 %v11786_v60, %v12288_v29  ;;  %v12525_v8 = vld [vmem:[#allocation2 + $0x180] sm:$0xff]  ;;  %v12527_v52 = vld [vmem:[#allocation2 + $0x188] sm:$0xff] }
 0x6ad   :  { %v6556_v24 = vadd.f32 %v6460_v7, %v6255_v5  ;;  %v6760_v23 = vrot.slane %v6617_v19, 1  ;;  %v6916_v63 = vmul.f32 %v11799_v18, %v12290_v25  ;;  %v6917_v46 = vmul.f32 %v11786_v60, %v12318_v12  ;;  %v12523_v5 = vld [vmem:[#allocation2 + $0x168] sm:$0xff] }
 0x6ae   :  { %v6758_v28 = vsel %vm937_vm0, %v6756_v47, %v6757_v17  ;;  %v6918_v2 = vmul.f32 %v11799_v18, %v12322_v11  ;;  %v7057_v53 = vrot.slane %v6915_v9, 2  ;;  %v7216_v42 = vmul.f32 %v11793_v15, %v12372_v39  ;;  %v5703_v17 = vld [vmem:[#allocation2 + $0x150] sm:$0x3] }
 0x6af   :  { %v6761_v57 = vsel %vm937_vm0, %v6759_v58, %v6760_v23  ;;  %v6856_v29 = vadd.f32 %v6758_v28, %v6555_v14  ;;  %v7058_v49 = vrot.slane %v6917_v46, 2  ;;  %v7060_v40 = vrot.slane %v6916_v63, 2  ;;  %v5704_v23 = vld [vmem:[#allocation2 + $0x158] sm:$0x3] }
 0x6b0   :  { %v6857_v16 = vadd.f32 %v6761_v57, %v6556_v24  ;;  %v7061_v51 = vrot.slane %v6918_v2, 2  ;;  %v7217_v25 = vmul.f32 %v11803_v32, %v12375_v10  ;;  %v7218_v12 = vmul.f32 %v11793_v15, %v12400_v1 }
 0x6b1   :  { %v7059_v21 = vsel %vm1704_vm1, %v7057_v53, %v7058_v49  ;;  %v7219_v11 = vmul.f32 %v11803_v32, %v12406_v36  ;;  %v7358_v62 = vrot.slane %v7216_v42, 2  ;;  %v7517_v39 = vmul.f32 %v12460_v41, %v11796_v56  ;;  %v12546_v49 = vld [vmem:[#allocation2 + $0x170] sm:$0x3] }
 0x6b2   :  { %v7062_v6 = vsel %vm1704_vm1, %v7060_v40, %v7061_v51  ;;  %v7157_v45 = vadd.f32 %v7059_v21, %v6856_v29  ;;  %v7359_v31 = vrot.slane %v7218_v12, 2  ;;  %v7361_v38 = vrot.slane %v7217_v25, 2  ;;  %v12548_v40 = vld [vmem:[#allocation2 + $0x178] sm:$0x3] }
 0x6b3   :  { %v7158_v30 = vadd.f32 %v7062_v6, %v6857_v16  ;;  %v7362_v44 = vrot.slane %v7219_v11, 2  ;;  %v7518_v10 = vmul.f32 %v12460_v41, %v11806_v37  ;;  %v7519_v1 = vmul.f32 %v11796_v56, %v5699_v50 }
 0x6b4   :  { %v7360_v36 = vsel %vm1704_vm1, %v7358_v62, %v7359_v31  ;;  %v7520_v43 = vmul.f32 %v11806_v37, %v5700_v48  ;;  %v7659_v55 = vrot.slane %v7517_v39, 2  ;;  %v5769_v0 = vmul.f32 %v12460_v41, %v11810_v26 }
 0x6b5   :  { %v7363_v19 = vsel %vm1704_vm1, %v7361_v38, %v7362_v44  ;;  %v7458_v47 = vadd.f32 %v7360_v36, %v7157_v45  ;;  %v7660_v50 = vrot.slane %v7519_v1, 2  ;;  %v7662_v58 = vrot.slane %v7518_v10, 2  ;;  %v12556_v38 = vld [vmem:[#allocation2 + $0x190] sm:$0x3] }
 0x6b6   :  { %v7459_v7 = vadd.f32 %v7363_v19, %v7158_v30  ;;  %v7663_v14 = vrot.slane %v7520_v43, 2  ;;  %v5770_v48 = vmul.f32 %v12460_v41, %v11814_v22  ;;  %v5846_v9 = vmul.f32 %v11817_v34, %v12519_v35  ;;  %v12558_v30 = vld [vmem:[#allocation2 + $0x198] sm:$0x3] }
 0x6b7   :  { %v7661_v24 = vsel %vm1704_vm1, %v7659_v55, %v7660_v50  ;;  %v5847_v63 = vmul.f32 %v11820_v59, %v12523_v5  ;;  %v5923_v46 = vmul.f32 %v11844_v4, %v12525_v8  ;;  %v5924_v28 = vmul.f32 %v11847_v33, %v12527_v52 }
 0x6b8   :  { %v7664_v2 = vsel %vm1704_vm1, %v7662_v58, %v7663_v14  ;;  %v7759_v53 = vadd.f32 %v7661_v24, %v7458_v47  ;;  %v5878_v42 = vadd.f32 %v5846_v9, %v5769_v0  ;;  %v6016_v57 = vmul.f32 %v12460_v41, %v11771_v27 }
 0x6b9   :  { %v7760_v29 = vadd.f32 %v7664_v2, %v7459_v7  ;;  %v5879_v16 = vadd.f32 %v5847_v63, %v5770_v48  ;;  %v6017_v51 = vmul.f32 %v12460_v41, %v11777_v3  ;;  %v6018_v25 = vmul.f32 %v11771_v27, %v5703_v17 }
 0x6ba   :  { %v5955_v12 = vadd.f32 %v5923_v46, %v5878_v42  ;;  %v6019_v21 = vmul.f32 %v11777_v3, %v5704_v23  ;;  %v6160_v11 = vrot.slane %v6016_v57, 1  ;;  %v6317_v62 = vmul.f32 %v11774_v13, %v12519_v35 }
 0x6bb   :  { %v7798_v39 = vadd.f32 %v7760_v29, %v7759_v53  ;;  %v5956_v6 = vadd.f32 %v5924_v28, %v5879_v16  ;;  %v6161_v45 = vrot.slane %v6018_v25, 1  ;;  %v6163_v31 = vrot.slane %v6017_v51, 1 }
 0x6bc   :  { %v6164_v44 = vrot.slane %v6019_v21, 1  ;;  %v6318_v10 = vmul.f32 %v11780_v54, %v12523_v5  ;;  %v6319_v1 = vmul.f32 %v11774_v13, %v12546_v49  ;;  %v6320_v36 = vmul.f32 %v11780_v54, %v12548_v40 }
 0x6bd   :  { %7799 = vadd.xlane.f32.xlu1 %v7798_v39  ;;  %v6162_v43 = vsel %vm937_vm0, %v6160_v11, %v6161_v45  ;;  %v6461_v55 = vrot.slane %v6317_v62, 1  ;;  %v6618_v0 = vmul.f32 %v11783_v61, %v12525_v8  ;;  %v6619_v19 = vmul.f32 %v11789_v20, %v12527_v52 }
 0x6be   :  { %v6165_v47 = vsel %vm937_vm0, %v6163_v31, %v6164_v44  ;;  %v6256_v50 = vadd.f32 %v6162_v43, %v5955_v12  ;;  %v6462_v58 = vrot.slane %v6319_v1, 1  ;;  %v6464_v7 = vrot.slane %v6318_v10, 1 }
 0x6bf   :  { %v6257_v14 = vadd.f32 %v6165_v47, %v5956_v6  ;;  %v6465_v48 = vrot.slane %v6320_v36, 1  ;;  %v6620_v9 = vmul.f32 %v11783_v61, %v12556_v38  ;;  %v6621_v24 = vmul.f32 %v11789_v20, %v12558_v30 }
 0x6c0   :  { %v6463_v63 = vsel %vm937_vm0, %v6461_v55, %v6462_v58  ;;  %v6762_v46 = vrot.slane %v6618_v0, 1  ;;  %v6765_v28 = vrot.slane %v6619_v19, 1  ;;  %v6919_v2 = vmul.f32 %v12460_v41, %v11786_v60 }
 0x6c1   :  { %v6466_v53 = vsel %vm937_vm0, %v6464_v7, %v6465_v48  ;;  %v6557_v42 = vadd.f32 %v6463_v63, %v6256_v50  ;;  %v6763_v57 = vrot.slane %v6620_v9, 1  ;;  %v6766_v29 = vrot.slane %v6621_v24, 1 }
 0x6c2   :  { %v6558_v16 = vadd.f32 %v6466_v53, %v6257_v14  ;;  %v6920_v51 = vmul.f32 %v12460_v41, %v11799_v18  ;;  %v6921_v25 = vmul.f32 %v11786_v60, %v5703_v17  ;;  %v6922_v12 = vmul.f32 %v11799_v18, %v5704_v23 }
 0x6c3   :  { %v6764_v21 = vsel %vm937_vm0, %v6762_v46, %v6763_v57  ;;  %v6767_v11 = vsel %vm937_vm0, %v6765_v28, %v6766_v29  ;;  %v7063_v62 = vrot.slane %v6919_v2, 2  ;;  %v7220_v39 = vmul.f32 %v11793_v15, %v12519_v35  ;;  %v12605_v46 = vld [vmem:[#allocation2 + $0x1a0] sm:$0xff]  ;;  %v12607_v28 = vld [vmem:[#allocation2 + $0x1a8] sm:$0xff] }
 0x6c4   :  { %v6858_v6 = vadd.f32 %v6764_v21, %v6557_v42  ;;  %v6859_v45 = vadd.f32 %v6767_v11, %v6558_v16  ;;  %v7064_v31 = vrot.slane %v6921_v25, 2  ;;  %v7066_v44 = vrot.slane %v6920_v51, 2 }
 0x6c5   :  { %v7067_v10 = vrot.slane %v6922_v12, 2  ;;  %v7221_v41 = vmul.f32 %v11803_v32, %v12523_v5  ;;  %v7222_v17 = vmul.f32 %v11793_v15, %v12546_v49  ;;  %v7223_v23 = vmul.f32 %v11803_v32, %v12548_v40 }
 0x6c6   :  { %v7065_v1 = vsel %vm1704_vm1, %v7063_v62, %v7064_v31  ;;  %v7364_v36 = vrot.slane %v7220_v39, 2  ;;  %v7521_v43 = vmul.f32 %v11796_v56, %v12525_v8  ;;  %v7522_v55 = vmul.f32 %v11806_v37, %v12527_v52 }
 0x6c7   :  { %v7068_v0 = vsel %vm1704_vm1, %v7066_v44, %v7067_v10  ;;  %v7159_v19 = vadd.f32 %v7065_v1, %v6858_v6  ;;  %v7365_v47 = vrot.slane %v7222_v17, 2  ;;  %v7367_v50 = vrot.slane %v7221_v41, 2 }
 0x6c8   :  { %v7160_v58 = vadd.f32 %v7068_v0, %v6859_v45  ;;  %v7368_v7 = vrot.slane %v7223_v23, 2  ;;  %v7523_v14 = vmul.f32 %v11796_v56, %v12556_v38  ;;  %v7524_v48 = vmul.f32 %v11806_v37, %v12558_v30 }
 0x6c9   :  { %v7366_v9 = vsel %vm1704_vm1, %v7364_v36, %v7365_v47  ;;  %v7665_v24 = vrot.slane %v7521_v43, 2  ;;  %v7668_v63 = vrot.slane %v7522_v55, 2  ;;  %v5771_v2 = vmul.f32 %v11810_v26, %v12519_v35 }
 0x6ca   :  { %v7369_v53 = vsel %vm1704_vm1, %v7367_v50, %v7368_v7  ;;  %v7460_v42 = vadd.f32 %v7366_v9, %v7159_v19  ;;  %v7666_v57 = vrot.slane %v7523_v14, 2  ;;  %v7669_v29 = vrot.slane %v7524_v48, 2  ;;  %v12636_v7 = vld [vmem:[#allocation2 + $0x1b8] sm:$0x3] }
 0x6cb   :  { %v7461_v16 = vadd.f32 %v7369_v53, %v7160_v58  ;;  %v5772_v51 = vmul.f32 %v11814_v22, %v12523_v5  ;;  %v5848_v25 = vmul.f32 %v11817_v34, %v12525_v8  ;;  %v5849_v12 = vmul.f32 %v11820_v59, %v12527_v52  ;;  %v12634_v58 = vld [vmem:[#allocation2 + $0x1b0] sm:$0x3] }
 0x6cc   :  { %v7667_v21 = vsel %vm1704_vm1, %v7665_v24, %v7666_v57  ;;  %v7670_v11 = vsel %vm1704_vm1, %v7668_v63, %v7669_v29  ;;  %v5925_v62 = vmul.f32 %v11844_v4, %v12605_v46  ;;  %v5926_v39 = vmul.f32 %v11847_v33, %v12607_v28 }
 0x6cd   :  { %v7761_v6 = vadd.f32 %v7667_v21, %v7460_v42  ;;  %v7762_v45 = vadd.f32 %v7670_v11, %v7461_v16  ;;  %v5880_v31 = vadd.f32 %v5848_v25, %v5771_v2  ;;  %v5881_v44 = vadd.f32 %v5849_v12, %v5772_v51 }
 0x6ce   :  { %v6020_v10 = vmul.f32 %v11771_v27, %v12519_v35  ;;  %v6021_v41 = vmul.f32 %v11777_v3, %v12523_v5  ;;  %v6022_v17 = vmul.f32 %v11771_v27, %v12546_v49  ;;  %v6023_v23 = vmul.f32 %v11777_v3, %v12548_v40 }
 0x6cf   :  { %v7801_v1 = vadd.f32 %v7762_v45, %v7761_v6  ;;  %v5957_v36 = vadd.f32 %v5925_v62, %v5880_v31  ;;  %v5958_v43 = vadd.f32 %v5926_v39, %v5881_v44  ;;  %v6321_v55 = vmul.f32 %v11774_v13, %v12525_v8 }
 0x6d0   :  { %v6166_v0 = vrot.slane %v6020_v10, 1  ;;  %v6167_v19 = vrot.slane %v6022_v17, 1  ;;  %v6169_v47 = vrot.slane %v6021_v41, 1  ;;  %v6170_v50 = vrot.slane %v6023_v23, 1 }
 0x6d1   :  { %7802 = vadd.xlane.f32.xlu0 %v7801_v1  ;;  %v6322_v14 = vmul.f32 %v11780_v54, %v12527_v52  ;;  %v6323_v48 = vmul.f32 %v11774_v13, %v12556_v38  ;;  %v6324_v9 = vmul.f32 %v11780_v54, %v12558_v30  ;;  %v6467_v24 = vrot.slane %v6321_v55, 1 }
 0x6d2   :  { %v6168_v63 = vsel %vm937_vm0, %v6166_v0, %v6167_v19  ;;  %v6171_v2 = vsel %vm937_vm0, %v6169_v47, %v6170_v50  ;;  %v6622_v53 = vmul.f32 %v11783_v61, %v12605_v46  ;;  %v6623_v42 = vmul.f32 %v11789_v20, %v12607_v28 }
 0x6d3   :  { %v6258_v57 = vadd.f32 %v6168_v63, %v5957_v36  ;;  %v6259_v29 = vadd.f32 %v6171_v2, %v5958_v43  ;;  %v6468_v16 = vrot.slane %v6323_v48, 1  ;;  %v6470_v51 = vrot.slane %v6322_v14, 1 }
 0x6d4   :  { %v6471_v25 = vrot.slane %v6324_v9, 1  ;;  %v6624_v12 = vmul.f32 %v11783_v61, %v12634_v58  ;;  %v6625_v21 = vmul.f32 %v11789_v20, %v12636_v7  ;;  %v6768_v11 = vrot.slane %v6622_v53, 1 }
 0x6d5   :  { %v6469_v62 = vsel %vm937_vm0, %v6467_v24, %v6468_v16  ;;  %v6771_v39 = vrot.slane %v6623_v42, 1  ;;  %v6923_v6 = vmul.f32 %v11786_v60, %v12519_v35  ;;  %v6924_v45 = vmul.f32 %v11799_v18, %v12523_v5 }
 0x6d6   :  { %v6472_v31 = vsel %vm937_vm0, %v6470_v51, %v6471_v25  ;;  %v6559_v44 = vadd.f32 %v6469_v62, %v6258_v57  ;;  %v6769_v10 = vrot.slane %v6624_v12, 1  ;;  %v6772_v41 = vrot.slane %v6625_v21, 1  ;;  %v12684_v21 = vld [vmem:[#allocation2 + $0x1c0] sm:$0xff] }
 0x6d7   :  { %v6560_v17 = vadd.f32 %v6472_v31, %v6259_v29  ;;  %v6925_v23 = vmul.f32 %v11786_v60, %v12546_v49  ;;  %v6926_v1 = vmul.f32 %v11799_v18, %v12548_v40  ;;  %v7069_v36 = vrot.slane %v6923_v6, 2 }
 0x6d8   :  { %v6770_v43 = vsel %vm937_vm0, %v6768_v11, %v6769_v10  ;;  %v6773_v35 = vsel %vm937_vm0, %v6771_v39, %v6772_v41  ;;  %v7072_v55 = vrot.slane %v6924_v45, 2  ;;  %v7224_v5 = vmul.f32 %v11793_v15, %v12525_v8  ;;  %v12687_v39 = vld [vmem:[#allocation2 + $0x1c8] sm:$0xff] }
 0x6d9   :  { %v6860_v0 = vadd.f32 %v6770_v43, %v6559_v44  ;;  %v6861_v19 = vadd.f32 %v6773_v35, %v6560_v17  ;;  %v7070_v47 = vrot.slane %v6925_v23, 2  ;;  %v7073_v50 = vrot.slane %v6926_v1, 2 }
 0x6da   :  { %v7225_v14 = vmul.f32 %v11803_v32, %v12527_v52  ;;  %v7226_v49 = vmul.f32 %v11793_v15, %v12556_v38  ;;  %v7227_v40 = vmul.f32 %v11803_v32, %v12558_v30  ;;  %v7370_v48 = vrot.slane %v7224_v5, 2 }
 0x6db   :  { %v7071_v9 = vsel %vm1704_vm1, %v7069_v36, %v7070_v47  ;;  %v7074_v24 = vsel %vm1704_vm1, %v7072_v55, %v7073_v50  ;;  %v7525_v63 = vmul.f32 %v11796_v56, %v12605_v46  ;;  %v7526_v2 = vmul.f32 %v11806_v37, %v12607_v28 }
 0x6dc   :  { %v7161_v53 = vadd.f32 %v7071_v9, %v6860_v0  ;;  %v7162_v42 = vadd.f32 %v7074_v24, %v6861_v19  ;;  %v7371_v57 = vrot.slane %v7226_v49, 2  ;;  %v7373_v29 = vrot.slane %v7225_v14, 2 }
 0x6dd   :  { %v7374_v16 = vrot.slane %v7227_v40, 2  ;;  %v7527_v51 = vmul.f32 %v11796_v56, %v12634_v58  ;;  %v7528_v25 = vmul.f32 %v11806_v37, %v12636_v7  ;;  %v7671_v12 = vrot.slane %v7525_v63, 2 }
 0x6de   :  { %v7372_v11 = vsel %vm1704_vm1, %v7370_v48, %v7371_v57  ;;  %v7674_v62 = vrot.slane %v7526_v2, 2  ;;  %v5773_v6 = vmul.f32 %v11810_v26, %v12525_v8  ;;  %v5774_v45 = vmul.f32 %v11814_v22, %v12527_v52 }
 0x6df   :  { %v7375_v31 = vsel %vm1704_vm1, %v7373_v29, %v7374_v16  ;;  %v7462_v44 = vadd.f32 %v7372_v11, %v7161_v53  ;;  %v7672_v10 = vrot.slane %v7527_v51, 2  ;;  %v7675_v41 = vrot.slane %v7528_v25, 2  ;;  %v12716_v16 = vld [vmem:[#allocation2 + $0x1d0] sm:$0x3]  ;;  %v12718_v51 = vld [vmem:[#allocation2 + $0x1d8] sm:$0x3] }
 0x6e0   :  { %v7463_v17 = vadd.f32 %v7375_v31, %v7162_v42  ;;  %v5850_v23 = vmul.f32 %v11817_v34, %v12605_v46  ;;  %v5851_v1 = vmul.f32 %v11820_v59, %v12607_v28  ;;  %v5927_v36 = vmul.f32 %v11844_v4, %v12684_v21 }
 0x6e1   :  { %v7673_v43 = vsel %vm1704_vm1, %v7671_v12, %v7672_v10  ;;  %v7676_v35 = vsel %vm1704_vm1, %v7674_v62, %v7675_v41  ;;  %v5928_v55 = vmul.f32 %v11847_v33, %v12687_v39  ;;  %v6024_v5 = vmul.f32 %v11771_v27, %v12525_v8 }
 0x6e2   :  { %v7763_v0 = vadd.f32 %v7673_v43, %v7462_v44  ;;  %v7764_v19 = vadd.f32 %v7676_v35, %v7463_v17  ;;  %v5882_v47 = vadd.f32 %v5850_v23, %v5773_v6  ;;  %v5883_v50 = vadd.f32 %v5851_v1, %v5774_v45 }
 0x6e3   :  { %v6025_v14 = vmul.f32 %v11777_v3, %v12527_v52  ;;  %v6026_v49 = vmul.f32 %v11771_v27, %v12556_v38  ;;  %v6027_v40 = vmul.f32 %v11777_v3, %v12558_v30  ;;  %v6172_v48 = vrot.slane %v6024_v5, 1 }
 0x6e4   :  { %v7804_v9 = vadd.f32 %v7764_v19, %v7763_v0  ;;  %v5959_v24 = vadd.f32 %v5927_v36, %v5882_v47  ;;  %v5960_v63 = vadd.f32 %v5928_v55, %v5883_v50  ;;  %v6325_v2 = vmul.f32 %v11774_v13, %v12605_v46 }
 0x6e5   :  { %v6173_v53 = vrot.slane %v6026_v49, 1  ;;  %v6175_v42 = vrot.slane %v6025_v14, 1  ;;  %v6176_v57 = vrot.slane %v6027_v40, 1  ;;  %v6326_v29 = vmul.f32 %v11780_v54, %v12607_v28 }
 0x6e6   :  { %7805 = vadd.xlane.f32.xlu1 %v7804_v9  ;;  %v6327_v25 = vmul.f32 %v11774_v13, %v12634_v58  ;;  %v6328_v12 = vmul.f32 %v11780_v54, %v12636_v7  ;;  %v6473_v11 = vrot.slane %v6325_v2, 1  ;;  %v6626_v62 = vmul.f32 %v11783_v61, %v12684_v21 }
 0x6e7   :  { %v6174_v6 = vsel %vm937_vm0, %v6172_v48, %v6173_v53  ;;  %v6177_v45 = vsel %vm937_vm0, %v6175_v42, %v6176_v57  ;;  %v6476_v31 = vrot.slane %v6326_v29, 1  ;;  %v6627_v44 = vmul.f32 %v11789_v20, %v12687_v39 }
 0x6e8   :  { %v6260_v10 = vadd.f32 %v6174_v6, %v5959_v24  ;;  %v6261_v41 = vadd.f32 %v6177_v45, %v5960_v63  ;;  %v6474_v17 = vrot.slane %v6327_v25, 1  ;;  %v6477_v23 = vrot.slane %v6328_v12, 1 }
 0x6e9   :  { %v6628_v1 = vmul.f32 %v11783_v61, %v12716_v16  ;;  %v6629_v36 = vmul.f32 %v11789_v20, %v12718_v51  ;;  %v6774_v43 = vrot.slane %v6626_v62, 1  ;;  %v6777_v35 = vrot.slane %v6627_v44, 1 }
 0x6ea   :  { %v6475_v55 = vsel %vm937_vm0, %v6473_v11, %v6474_v17  ;;  %v6478_v5 = vsel %vm937_vm0, %v6476_v31, %v6477_v23  ;;  %v6927_v0 = vmul.f32 %v11786_v60, %v12525_v8  ;;  %v6928_v19 = vmul.f32 %v11799_v18, %v12527_v52 }
 0x6eb   :  { %v6561_v47 = vadd.f32 %v6475_v55, %v6260_v10  ;;  %v6562_v50 = vadd.f32 %v6478_v5, %v6261_v41  ;;  %v6775_v14 = vrot.slane %v6628_v1, 1  ;;  %v6778_v49 = vrot.slane %v6629_v36, 1 }
 0x6ec   :  { %v6929_v40 = vmul.f32 %v11786_v60, %v12556_v38  ;;  %v6930_v48 = vmul.f32 %v11799_v18, %v12558_v30  ;;  %v7075_v9 = vrot.slane %v6927_v0, 2  ;;  %v7078_v24 = vrot.slane %v6928_v19, 2 }
 0x6ed   :  { %v6776_v63 = vsel %vm937_vm0, %v6774_v43, %v6775_v14  ;;  %v6779_v2 = vsel %vm937_vm0, %v6777_v35, %v6778_v49  ;;  %v7228_v8 = vmul.f32 %v11793_v15, %v12605_v46  ;;  %v7229_v52 = vmul.f32 %v11803_v32, %v12607_v28  ;;  %v12764_v43 = vld [vmem:[#allocation2 + $0x1e0] sm:$0xff]  ;;  %v12766_v35 = vld [vmem:[#allocation2 + $0x1e8] sm:$0xff] }
 0x6ee   :  { %v6862_v53 = vadd.f32 %v6776_v63, %v6561_v47  ;;  %v6863_v42 = vadd.f32 %v6779_v2, %v6562_v50  ;;  %v7076_v57 = vrot.slane %v6929_v40, 2  ;;  %v7079_v29 = vrot.slane %v6930_v48, 2 }
 0x6ef   :  { %v7230_v38 = vmul.f32 %v11793_v15, %v12634_v58  ;;  %v7231_v30 = vmul.f32 %v11803_v32, %v12636_v7  ;;  %v7376_v25 = vrot.slane %v7228_v8, 2  ;;  %v7379_v12 = vrot.slane %v7229_v52, 2 }
 0x6f0   :  { %v7077_v11 = vsel %vm1704_vm1, %v7075_v9, %v7076_v57  ;;  %v7080_v62 = vsel %vm1704_vm1, %v7078_v24, %v7079_v29  ;;  %v7529_v6 = vmul.f32 %v11796_v56, %v12684_v21  ;;  %v7530_v45 = vmul.f32 %v11806_v37, %v12687_v39 }
 0x6f1   :  { %v7163_v31 = vadd.f32 %v7077_v11, %v6862_v53  ;;  %v7164_v44 = vadd.f32 %v7080_v62, %v6863_v42  ;;  %v7377_v10 = vrot.slane %v7230_v38, 2  ;;  %v7380_v41 = vrot.slane %v7231_v30, 2 }
 0x6f2   :  { %v7531_v17 = vmul.f32 %v11796_v56, %v12716_v16  ;;  %v7532_v23 = vmul.f32 %v11806_v37, %v12718_v51  ;;  %v7677_v1 = vrot.slane %v7529_v6, 2  ;;  %v7680_v36 = vrot.slane %v7530_v45, 2 }
 0x6f3   :  { %v7378_v55 = vsel %vm1704_vm1, %v7376_v25, %v7377_v10  ;;  %v7381_v5 = vsel %vm1704_vm1, %v7379_v12, %v7380_v41  ;;  %v5775_v0 = vmul.f32 %v11810_v26, %v12605_v46  ;;  %v5776_v19 = vmul.f32 %v11814_v22, %v12607_v28 }
 0x6f4   :  { %v7464_v47 = vadd.f32 %v7378_v55, %v7163_v31  ;;  %v7465_v50 = vadd.f32 %v7381_v5, %v7164_v44  ;;  %v7678_v14 = vrot.slane %v7531_v17, 2  ;;  %v7681_v49 = vrot.slane %v7532_v23, 2  ;;  %v12794_v31 = vld [vmem:[#allocation2 + $0x1f0] sm:$0x3]  ;;  %v12800_v23 = vld [vmem:[#allocation2 + $0x1f8] sm:$0x3] }
 0x6f5   :  { %v5852_v40 = vmul.f32 %v11817_v34, %v12684_v21  ;;  %v5853_v48 = vmul.f32 %v11820_v59, %v12687_v39  ;;  %v5929_v9 = vmul.f32 %v11844_v4, %v12764_v43  ;;  %v5930_v24 = vmul.f32 %v11847_v33, %v12766_v35 }
 0x6f6   :  { %v7679_v63 = vsel %vm1704_vm1, %v7677_v1, %v7678_v14  ;;  %v7682_v2 = vsel %vm1704_vm1, %v7680_v36, %v7681_v49  ;;  %v6028_v8 = vmul.f32 %v11771_v27, %v12605_v46  ;;  %v6029_v52 = vmul.f32 %v11777_v3, %v12607_v28 }
 0x6f7   :  { %v7765_v53 = vadd.f32 %v7679_v63, %v7464_v47  ;;  %v7766_v42 = vadd.f32 %v7682_v2, %v7465_v50  ;;  %v5884_v57 = vadd.f32 %v5852_v40, %v5775_v0  ;;  %v5885_v29 = vadd.f32 %v5853_v48, %v5776_v19 }
 0x6f8   :  { %v6030_v38 = vmul.f32 %v11771_v27, %v12634_v58  ;;  %v6031_v30 = vmul.f32 %v11777_v3, %v12636_v7  ;;  %v6178_v25 = vrot.slane %v6028_v8, 1  ;;  %v6181_v12 = vrot.slane %v6029_v52, 1 }
 0x6f9   :  { %v7807_v11 = vadd.f32 %v7766_v42, %v7765_v53  ;;  %v5961_v62 = vadd.f32 %v5929_v9, %v5884_v57  ;;  %v5962_v6 = vadd.f32 %v5930_v24, %v5885_v29  ;;  %v6329_v45 = vmul.f32 %v11774_v13, %v12684_v21 }
 0x6fa   :  { %v6179_v44 = vrot.slane %v6030_v38, 1  ;;  %v6182_v10 = vrot.slane %v6031_v30, 1  ;;  %v6330_v41 = vmul.f32 %v11780_v54, %v12687_v39  ;;  %v6331_v17 = vmul.f32 %v11774_v13, %v12716_v16 }
 0x6fb   :  { %7808 = vadd.xlane.f32.xlu0 %v7807_v11  ;;  %v6332_v1 = vmul.f32 %v11780_v54, %v12718_v51  ;;  %v6479_v36 = vrot.slane %v6329_v45, 1  ;;  %v6630_v55 = vmul.f32 %v11783_v61, %v12764_v43  ;;  %v6631_v5 = vmul.f32 %v11789_v20, %v12766_v35 }
 0x6fc   :  { %v6180_v0 = vsel %vm937_vm0, %v6178_v25, %v6179_v44  ;;  %v6183_v19 = vsel %vm937_vm0, %v6181_v12, %v6182_v10  ;;  %v6480_v47 = vrot.slane %v6331_v17, 1  ;;  %v6482_v50 = vrot.slane %v6330_v41, 1 }
 0x6fd   :  { %v6262_v14 = vadd.f32 %v6180_v0, %v5961_v62  ;;  %v6263_v49 = vadd.f32 %v6183_v19, %v5962_v6  ;;  %v6483_v40 = vrot.slane %v6332_v1, 1  ;;  %v6632_v48 = vmul.f32 %v11783_v61, %v12794_v31 }
 0x6fe   :  { %v6481_v9 = vsel %vm937_vm0, %v6479_v36, %v6480_v47  ;;  %v6633_v24 = vmul.f32 %v11789_v20, %v12800_v23  ;;  %v6780_v63 = vrot.slane %v6630_v55, 1  ;;  %v6783_v2 = vrot.slane %v6631_v5, 1 }
 0x6ff   :  { %v6484_v8 = vsel %vm937_vm0, %v6482_v50, %v6483_v40  ;;  %v6563_v52 = vadd.f32 %v6481_v9, %v6262_v14  ;;  %v6781_v53 = vrot.slane %v6632_v48, 1  ;;  %v6931_v42 = vmul.f32 %v11786_v60, %v12605_v46 }
 0x700   :  { %v6564_v57 = vadd.f32 %v6484_v8, %v6263_v49  ;;  %v6784_v29 = vrot.slane %v6633_v24, 1  ;;  %v6932_v38 = vmul.f32 %v11799_v18, %v12607_v28  ;;  %v6933_v30 = vmul.f32 %v11786_v60, %v12634_v58  ;;  %v12845_v24 = vld [vmem:[#allocation2 + $0x200] sm:$0xff] }
 0x701   :  { %v6782_v25 = vsel %vm937_vm0, %v6780_v63, %v6781_v53  ;;  %v6934_v12 = vmul.f32 %v11799_v18, %v12636_v7  ;;  %v7081_v11 = vrot.slane %v6931_v42, 2  ;;  %v7232_v62 = vmul.f32 %v11793_v15, %v12684_v21  ;;  %v12847_v63 = vld [vmem:[#allocation2 + $0x208] sm:$0xff] }
 0x702   :  { %v6785_v6 = vsel %vm937_vm0, %v6783_v2, %v6784_v29  ;;  %v6864_v46 = vadd.f32 %v6782_v25, %v6563_v52  ;;  %v7082_v45 = vrot.slane %v6933_v30, 2  ;;  %v7084_v44 = vrot.slane %v6932_v38, 2 }
 0x703   :  { %v6865_v10 = vadd.f32 %v6785_v6, %v6564_v57  ;;  %v7085_v41 = vrot.slane %v6934_v12, 2  ;;  %v7233_v28 = vmul.f32 %v11803_v32, %v12687_v39  ;;  %v7234_v58 = vmul.f32 %v11793_v15, %v12716_v16 }
 0x704   :  { %v7083_v17 = vsel %vm1704_vm1, %v7081_v11, %v7082_v45  ;;  %v7235_v7 = vmul.f32 %v11803_v32, %v12718_v51  ;;  %v7382_v1 = vrot.slane %v7232_v62, 2  ;;  %v7533_v36 = vmul.f32 %v11796_v56, %v12764_v43 }
 0x705   :  { %v7086_v55 = vsel %vm1704_vm1, %v7084_v44, %v7085_v41  ;;  %v7165_v5 = vadd.f32 %v7083_v17, %v6864_v46  ;;  %v7383_v0 = vrot.slane %v7234_v58, 2  ;;  %v7385_v19 = vrot.slane %v7233_v28, 2 }
 0x706   :  { %v7166_v47 = vadd.f32 %v7086_v55, %v6865_v10  ;;  %v7386_v50 = vrot.slane %v7235_v7, 2  ;;  %v7534_v14 = vmul.f32 %v11806_v37, %v12766_v35  ;;  %v7535_v49 = vmul.f32 %v11796_v56, %v12794_v31 }
 0x707   :  { %v7384_v40 = vsel %vm1704_vm1, %v7382_v1, %v7383_v0  ;;  %v7536_v48 = vmul.f32 %v11806_v37, %v12800_v23  ;;  %v7683_v9 = vrot.slane %v7533_v36, 2  ;;  %v5777_v2 = vmul.f32 %v11810_v26, %v12684_v21 }
 0x708   :  { %v7387_v8 = vsel %vm1704_vm1, %v7385_v19, %v7386_v50  ;;  %v7466_v52 = vadd.f32 %v7384_v40, %v7165_v5  ;;  %v7684_v53 = vrot.slane %v7535_v49, 2  ;;  %v7686_v42 = vrot.slane %v7534_v14, 2  ;;  %v12876_v50 = vld [vmem:[#allocation2 + $0x218] sm:$0x3] }
 0x709   :  { %v7467_v57 = vadd.f32 %v7387_v8, %v7166_v47  ;;  %v7687_v29 = vrot.slane %v7536_v48, 2  ;;  %v5778_v38 = vmul.f32 %v11814_v22, %v12687_v39  ;;  %v5854_v30 = vmul.f32 %v11817_v34, %v12764_v43  ;;  %v12874_v47 = vld [vmem:[#allocation2 + $0x210] sm:$0x3] }
 0x70a   :  { %v7685_v25 = vsel %vm1704_vm1, %v7683_v9, %v7684_v53  ;;  %v5855_v12 = vmul.f32 %v11820_v59, %v12766_v35  ;;  %v5931_v11 = vmul.f32 %v11844_v4, %v12845_v24  ;;  %v5932_v62 = vmul.f32 %v11847_v33, %v12847_v63 }
 0x70b   :  { %v7688_v6 = vsel %vm1704_vm1, %v7686_v42, %v7687_v29  ;;  %v7767_v46 = vadd.f32 %v7685_v25, %v7466_v52  ;;  %v5886_v45 = vadd.f32 %v5854_v30, %v5777_v2  ;;  %v6032_v44 = vmul.f32 %v11771_v27, %v12684_v21 }
 0x70c   :  { %v7768_v10 = vadd.f32 %v7688_v6, %v7467_v57  ;;  %v5887_v41 = vadd.f32 %v5855_v12, %v5778_v38  ;;  %v6033_v28 = vmul.f32 %v11777_v3, %v12687_v39  ;;  %v6034_v58 = vmul.f32 %v11771_v27, %v12716_v16 }
 0x70d   :  { %v5963_v17 = vadd.f32 %v5931_v11, %v5886_v45  ;;  %v6035_v7 = vmul.f32 %v11777_v3, %v12718_v51  ;;  %v6184_v1 = vrot.slane %v6032_v44, 1  ;;  %v6333_v36 = vmul.f32 %v11774_v13, %v12764_v43 }
 0x70e   :  { %v7810_v55 = vadd.f32 %v7768_v10, %v7767_v46  ;;  %v5964_v5 = vadd.f32 %v5932_v62, %v5887_v41  ;;  %v6185_v0 = vrot.slane %v6034_v58, 1  ;;  %v6187_v19 = vrot.slane %v6033_v28, 1 }
 0x70f   :  { %v6188_v14 = vrot.slane %v6035_v7, 1  ;;  %v6334_v49 = vmul.f32 %v11780_v54, %v12766_v35  ;;  %v6335_v40 = vmul.f32 %v11774_v13, %v12794_v31  ;;  %v6336_v48 = vmul.f32 %v11780_v54, %v12800_v23 }
 0x710   :  { %7811 = vadd.xlane.f32.xlu1 %v7810_v55  ;;  %v6186_v9 = vsel %vm937_vm0, %v6184_v1, %v6185_v0  ;;  %v6485_v2 = vrot.slane %v6333_v36, 1  ;;  %v6634_v8 = vmul.f32 %v11783_v61, %v12845_v24  ;;  %v6635_v52 = vmul.f32 %v11789_v20, %v12847_v63 }
 0x711   :  { %v6189_v53 = vsel %vm937_vm0, %v6187_v19, %v6188_v14  ;;  %v6264_v42 = vadd.f32 %v6186_v9, %v5963_v17  ;;  %v6486_v57 = vrot.slane %v6335_v40, 1  ;;  %v6488_v29 = vrot.slane %v6334_v49, 1 }
 0x712   :  { %v6265_v38 = vadd.f32 %v6189_v53, %v5964_v5  ;;  %v6489_v30 = vrot.slane %v6336_v48, 1  ;;  %v6636_v25 = vmul.f32 %v11783_v61, %v12874_v47  ;;  %v6637_v12 = vmul.f32 %v11789_v20, %v12876_v50 }
 0x713   :  { %v6487_v11 = vsel %vm937_vm0, %v6485_v2, %v6486_v57  ;;  %v6786_v62 = vrot.slane %v6634_v8, 1  ;;  %v6789_v6 = vrot.slane %v6635_v52, 1  ;;  %v6935_v46 = vmul.f32 %v11786_v60, %v12684_v21 }
 0x714   :  { %v6490_v45 = vsel %vm937_vm0, %v6488_v29, %v6489_v30  ;;  %v6565_v44 = vadd.f32 %v6487_v11, %v6264_v42  ;;  %v6787_v10 = vrot.slane %v6636_v25, 1  ;;  %v6790_v41 = vrot.slane %v6637_v12, 1 }
 0x715   :  { %v6566_v28 = vadd.f32 %v6490_v45, %v6265_v38  ;;  %v6936_v58 = vmul.f32 %v11799_v18, %v12687_v39  ;;  %v6937_v17 = vmul.f32 %v11786_v60, %v12716_v16  ;;  %v6938_v7 = vmul.f32 %v11799_v18, %v12718_v51 }
 0x716   :  { %v6788_v1 = vsel %vm937_vm0, %v6786_v62, %v6787_v10  ;;  %v6791_v36 = vsel %vm937_vm0, %v6789_v6, %v6790_v41  ;;  %v7087_v21 = vrot.slane %v6935_v46, 2  ;;  %v7236_v55 = vmul.f32 %v11793_v15, %v12764_v43  ;;  %v12925_v62 = vld [vmem:[#allocation2 + $0x220] sm:$0xff]  ;;  %v12927_v6 = vld [vmem:[#allocation2 + $0x228] sm:$0xff] }
 0x717   :  { %v6866_v5 = vadd.f32 %v6788_v1, %v6565_v44  ;;  %v6867_v0 = vadd.f32 %v6791_v36, %v6566_v28  ;;  %v7088_v19 = vrot.slane %v6937_v17, 2  ;;  %v7090_v14 = vrot.slane %v6936_v58, 2 }
 0x718   :  { %v7091_v49 = vrot.slane %v6938_v7, 2  ;;  %v7237_v39 = vmul.f32 %v11803_v32, %v12766_v35  ;;  %v7238_v16 = vmul.f32 %v11793_v15, %v12794_v31  ;;  %v7239_v51 = vmul.f32 %v11803_v32, %v12800_v23 }
 0x719   :  { %v7089_v40 = vsel %vm1704_vm1, %v7087_v21, %v7088_v19  ;;  %v7388_v48 = vrot.slane %v7236_v55, 2  ;;  %v7537_v9 = vmul.f32 %v11796_v56, %v12845_v24  ;;  %v7538_v2 = vmul.f32 %v11806_v37, %v12847_v63 }
 0x71a   :  { %v7092_v8 = vsel %vm1704_vm1, %v7090_v14, %v7091_v49  ;;  %v7167_v52 = vadd.f32 %v7089_v40, %v6866_v5  ;;  %v7389_v53 = vrot.slane %v7238_v16, 2  ;;  %v7391_v42 = vrot.slane %v7237_v39, 2 }
 0x71b   :  { %v7168_v57 = vadd.f32 %v7092_v8, %v6867_v0  ;;  %v7392_v29 = vrot.slane %v7239_v51, 2  ;;  %v7539_v38 = vmul.f32 %v11796_v56, %v12874_v47  ;;  %v7540_v30 = vmul.f32 %v11806_v37, %v12876_v50 }
 0x71c   :  { %v7390_v25 = vsel %vm1704_vm1, %v7388_v48, %v7389_v53  ;;  %v7689_v12 = vrot.slane %v7537_v9, 2  ;;  %v7692_v11 = vrot.slane %v7538_v2, 2  ;;  %v5779_v46 = vmul.f32 %v11810_v26, %v12764_v43 }
 0x71d   :  { %v7393_v45 = vsel %vm1704_vm1, %v7391_v42, %v7392_v29  ;;  %v7468_v44 = vadd.f32 %v7390_v25, %v7167_v52  ;;  %v7690_v10 = vrot.slane %v7539_v38, 2  ;;  %v7693_v41 = vrot.slane %v7540_v30, 2  ;;  %v12956_v29 = vld [vmem:[#allocation2 + $0x238] sm:$0x3] }
 0x71e   :  { %v7469_v28 = vadd.f32 %v7393_v45, %v7168_v57  ;;  %v5780_v58 = vmul.f32 %v11814_v22, %v12766_v35  ;;  %v5856_v17 = vmul.f32 %v11817_v34, %v12845_v24  ;;  %v5857_v7 = vmul.f32 %v11820_v59, %v12847_v63  ;;  %v12954_v57 = vld [vmem:[#allocation2 + $0x230] sm:$0x3] }
 0x71f   :  { %v7691_v1 = vsel %vm1704_vm1, %v7689_v12, %v7690_v10  ;;  %v7694_v36 = vsel %vm1704_vm1, %v7692_v11, %v7693_v41  ;;  %v5933_v21 = vmul.f32 %v11844_v4, %v12925_v62  ;;  %v5934_v55 = vmul.f32 %v11847_v33, %v12927_v6 }
 0x720   :  { %v7769_v5 = vadd.f32 %v7691_v1, %v7468_v44  ;;  %v7770_v0 = vadd.f32 %v7694_v36, %v7469_v28  ;;  %v5888_v19 = vadd.f32 %v5856_v17, %v5779_v46  ;;  %v5889_v14 = vadd.f32 %v5857_v7, %v5780_v58 }
 0x721   :  { %v6036_v49 = vmul.f32 %v11771_v27, %v12764_v43  ;;  %v6037_v39 = vmul.f32 %v11777_v3, %v12766_v35  ;;  %v6038_v16 = vmul.f32 %v11771_v27, %v12794_v31  ;;  %v6039_v51 = vmul.f32 %v11777_v3, %v12800_v23 }
 0x722   :  { %v7813_v40 = vadd.f32 %v7770_v0, %v7769_v5  ;;  %v5965_v48 = vadd.f32 %v5933_v21, %v5888_v19  ;;  %v5966_v9 = vadd.f32 %v5934_v55, %v5889_v14  ;;  %v6337_v2 = vmul.f32 %v11774_v13, %v12845_v24 }
 0x723   :  { %v6190_v8 = vrot.slane %v6036_v49, 1  ;;  %v6191_v52 = vrot.slane %v6038_v16, 1  ;;  %v6193_v53 = vrot.slane %v6037_v39, 1  ;;  %v6194_v42 = vrot.slane %v6039_v51, 1 }
 0x724   :  { %7814 = vadd.xlane.f32.xlu0 %v7813_v40  ;;  %v6338_v38 = vmul.f32 %v11780_v54, %v12847_v63  ;;  %v6339_v30 = vmul.f32 %v11774_v13, %v12874_v47  ;;  %v6340_v25 = vmul.f32 %v11780_v54, %v12876_v50  ;;  %v6491_v12 = vrot.slane %v6337_v2, 1 }
 0x725   :  { %v6192_v11 = vsel %vm937_vm0, %v6190_v8, %v6191_v52  ;;  %v6195_v46 = vsel %vm937_vm0, %v6193_v53, %v6194_v42  ;;  %v6638_v45 = vmul.f32 %v11783_v61, %v12925_v62  ;;  %v6639_v44 = vmul.f32 %v11789_v20, %v12927_v6 }
 0x726   :  { %v6266_v10 = vadd.f32 %v6192_v11, %v5965_v48  ;;  %v6267_v41 = vadd.f32 %v6195_v46, %v5966_v9  ;;  %v6492_v28 = vrot.slane %v6339_v30, 1  ;;  %v6494_v58 = vrot.slane %v6338_v38, 1 }
 0x727   :  { %v6495_v17 = vrot.slane %v6340_v25, 1  ;;  %v6640_v7 = vmul.f32 %v11783_v61, %v12954_v57  ;;  %v6641_v1 = vmul.f32 %v11789_v20, %v12956_v29  ;;  %v6792_v36 = vrot.slane %v6638_v45, 1 }
 0x728   :  { %v6493_v21 = vsel %vm937_vm0, %v6491_v12, %v6492_v28  ;;  %v6795_v55 = vrot.slane %v6639_v44, 1  ;;  %v6939_v5 = vmul.f32 %v11786_v60, %v12764_v43  ;;  %v6940_v0 = vmul.f32 %v11799_v18, %v12766_v35 }
 0x729   :  { %v6496_v19 = vsel %vm937_vm0, %v6494_v58, %v6495_v17  ;;  %v6567_v14 = vadd.f32 %v6493_v21, %v6266_v10  ;;  %v6793_v49 = vrot.slane %v6640_v7, 1  ;;  %v6796_v39 = vrot.slane %v6641_v1, 1  ;;  %v13004_v1 = vld [vmem:[#allocation2 + $0x240] sm:$0xff] }
 0x72a   :  { %v6568_v16 = vadd.f32 %v6496_v19, %v6267_v41  ;;  %v6941_v51 = vmul.f32 %v11786_v60, %v12794_v31  ;;  %v6942_v40 = vmul.f32 %v11799_v18, %v12800_v23  ;;  %v7093_v48 = vrot.slane %v6939_v5, 2 }
 0x72b   :  { %v6794_v9 = vsel %vm937_vm0, %v6792_v36, %v6793_v49  ;;  %v6797_v43 = vsel %vm937_vm0, %v6795_v55, %v6796_v39  ;;  %v7096_v2 = vrot.slane %v6940_v0, 2  ;;  %v7240_v35 = vmul.f32 %v11793_v15, %v12845_v24  ;;  %v13007_v55 = vld [vmem:[#allocation2 + $0x248] sm:$0xff] }
 0x72c   :  { %v6868_v8 = vadd.f32 %v6794_v9, %v6567_v14  ;;  %v6869_v52 = vadd.f32 %v6797_v43, %v6568_v16  ;;  %v7094_v53 = vrot.slane %v6941_v51, 2  ;;  %v7097_v42 = vrot.slane %v6942_v40, 2 }
 0x72d   :  { %v7241_v38 = vmul.f32 %v11803_v32, %v12847_v63  ;;  %v7242_v31 = vmul.f32 %v11793_v15, %v12874_v47  ;;  %v7243_v23 = vmul.f32 %v11803_v32, %v12876_v50  ;;  %v7394_v30 = vrot.slane %v7240_v35, 2 }
 0x72e   :  { %v7095_v25 = vsel %vm1704_vm1, %v7093_v48, %v7094_v53  ;;  %v7098_v12 = vsel %vm1704_vm1, %v7096_v2, %v7097_v42  ;;  %v7541_v11 = vmul.f32 %v11796_v56, %v12925_v62  ;;  %v7542_v46 = vmul.f32 %v11806_v37, %v12927_v6 }
 0x72f   :  { %v7169_v45 = vadd.f32 %v7095_v25, %v6868_v8  ;;  %v7170_v44 = vadd.f32 %v7098_v12, %v6869_v52  ;;  %v7395_v10 = vrot.slane %v7242_v31, 2  ;;  %v7397_v41 = vrot.slane %v7241_v38, 2 }
 0x730   :  { %v7398_v28 = vrot.slane %v7243_v23, 2  ;;  %v7543_v58 = vmul.f32 %v11796_v56, %v12954_v57  ;;  %v7544_v17 = vmul.f32 %v11806_v37, %v12956_v29  ;;  %v7695_v7 = vrot.slane %v7541_v11, 2 }
 0x731   :  { %v7396_v36 = vsel %vm1704_vm1, %v7394_v30, %v7395_v10  ;;  %v7698_v21 = vrot.slane %v7542_v46, 2  ;;  %v5781_v5 = vmul.f32 %v11810_v26, %v12845_v24  ;;  %v5782_v0 = vmul.f32 %v11814_v22, %v12847_v63 }
 0x732   :  { %v7399_v19 = vsel %vm1704_vm1, %v7397_v41, %v7398_v28  ;;  %v7470_v14 = vadd.f32 %v7396_v36, %v7169_v45  ;;  %v7696_v49 = vrot.slane %v7543_v58, 2  ;;  %v7699_v39 = vrot.slane %v7544_v17, 2  ;;  %v13036_v28 = vld [vmem:[#allocation2 + $0x250] sm:$0x3]  ;;  %v13038_v58 = vld [vmem:[#allocation2 + $0x258] sm:$0x3] }
 0x733   :  { %v7471_v16 = vadd.f32 %v7399_v19, %v7170_v44  ;;  %v5858_v51 = vmul.f32 %v11817_v34, %v12925_v62  ;;  %v5859_v40 = vmul.f32 %v11820_v59, %v12927_v6  ;;  %v5935_v48 = vmul.f32 %v11844_v4, %v13004_v1 }
 0x734   :  { %v7697_v9 = vsel %vm1704_vm1, %v7695_v7, %v7696_v49  ;;  %v7700_v43 = vsel %vm1704_vm1, %v7698_v21, %v7699_v39  ;;  %v5936_v2 = vmul.f32 %v11847_v33, %v13007_v55  ;;  %v6040_v35 = vmul.f32 %v11771_v27, %v12845_v24 }
 0x735   :  { %v7771_v8 = vadd.f32 %v7697_v9, %v7470_v14  ;;  %v7772_v52 = vadd.f32 %v7700_v43, %v7471_v16  ;;  %v5890_v53 = vadd.f32 %v5858_v51, %v5781_v5  ;;  %v5891_v42 = vadd.f32 %v5859_v40, %v5782_v0 }
 0x736   :  { %v6041_v38 = vmul.f32 %v11777_v3, %v12847_v63  ;;  %v6042_v31 = vmul.f32 %v11771_v27, %v12874_v47  ;;  %v6043_v23 = vmul.f32 %v11777_v3, %v12876_v50  ;;  %v6196_v30 = vrot.slane %v6040_v35, 1 }
 0x737   :  { %v7816_v25 = vadd.f32 %v7772_v52, %v7771_v8  ;;  %v5967_v12 = vadd.f32 %v5935_v48, %v5890_v53  ;;  %v5968_v11 = vadd.f32 %v5936_v2, %v5891_v42  ;;  %v6341_v46 = vmul.f32 %v11774_v13, %v12925_v62 }
 0x738   :  { %v6197_v45 = vrot.slane %v6042_v31, 1  ;;  %v6199_v44 = vrot.slane %v6041_v38, 1  ;;  %v6200_v10 = vrot.slane %v6043_v23, 1  ;;  %v6342_v41 = vmul.f32 %v11780_v54, %v12927_v6 }
 0x739   :  { %7817 = vadd.xlane.f32.xlu1 %v7816_v25  ;;  %v6343_v17 = vmul.f32 %v11774_v13, %v12954_v57  ;;  %v6344_v7 = vmul.f32 %v11780_v54, %v12956_v29  ;;  %v6497_v36 = vrot.slane %v6341_v46, 1  ;;  %v6642_v21 = vmul.f32 %v11783_v61, %v13004_v1 }
 0x73a   :  { %v6198_v5 = vsel %vm937_vm0, %v6196_v30, %v6197_v45  ;;  %v6201_v0 = vsel %vm937_vm0, %v6199_v44, %v6200_v10  ;;  %v6500_v19 = vrot.slane %v6342_v41, 1  ;;  %v6643_v14 = vmul.f32 %v11789_v20, %v13007_v55 }
 0x73b   :  { %v6268_v49 = vadd.f32 %v6198_v5, %v5967_v12  ;;  %v6269_v39 = vadd.f32 %v6201_v0, %v5968_v11  ;;  %v6498_v16 = vrot.slane %v6343_v17, 1  ;;  %v6501_v51 = vrot.slane %v6344_v7, 1 }
 0x73c   :  { %v6644_v40 = vmul.f32 %v11783_v61, %v13036_v28  ;;  %v6645_v48 = vmul.f32 %v11789_v20, %v13038_v58  ;;  %v6798_v9 = vrot.slane %v6642_v21, 1  ;;  %v6801_v43 = vrot.slane %v6643_v14, 1 }
 0x73d   :  { %v6499_v2 = vsel %vm937_vm0, %v6497_v36, %v6498_v16  ;;  %v6502_v35 = vsel %vm937_vm0, %v6500_v19, %v6501_v51  ;;  %v6943_v8 = vmul.f32 %v11786_v60, %v12845_v24  ;;  %v6944_v52 = vmul.f32 %v11799_v18, %v12847_v63 }
 0x73e   :  { %v6569_v53 = vadd.f32 %v6499_v2, %v6268_v49  ;;  %v6570_v42 = vadd.f32 %v6502_v35, %v6269_v39  ;;  %v6799_v38 = vrot.slane %v6644_v40, 1  ;;  %v6802_v31 = vrot.slane %v6645_v48, 1 }
 0x73f   :  { %v6945_v23 = vmul.f32 %v11786_v60, %v12874_v47  ;;  %v6946_v30 = vmul.f32 %v11799_v18, %v12876_v50  ;;  %v7099_v25 = vrot.slane %v6943_v8, 2  ;;  %v7102_v12 = vrot.slane %v6944_v52, 2 }
 0x740   :  { %v6800_v11 = vsel %vm937_vm0, %v6798_v9, %v6799_v38  ;;  %v6803_v46 = vsel %vm937_vm0, %v6801_v43, %v6802_v31  ;;  %v7244_v24 = vmul.f32 %v11793_v15, %v12925_v62  ;;  %v7245_v63 = vmul.f32 %v11803_v32, %v12927_v6 }
 0x741   :  { %v6870_v45 = vadd.f32 %v6800_v11, %v6569_v53  ;;  %v6871_v44 = vadd.f32 %v6803_v46, %v6570_v42  ;;  %v7100_v10 = vrot.slane %v6945_v23, 2  ;;  %v7103_v41 = vrot.slane %v6946_v30, 2  ;;  %v13094_v23 = vld [vmem:[#allocation2] sm:$0xff] }
 0x742   :  { %v7246_v47 = vmul.f32 %v11793_v15, %v12954_v57  ;;  %v7247_v50 = vmul.f32 %v11803_v32, %v12956_v29  ;;  %v7400_v17 = vrot.slane %v7244_v24, 2  ;;  %v7403_v7 = vrot.slane %v7245_v63, 2 }
 0x743   :  { %v7101_v36 = vsel %vm1704_vm1, %v7099_v25, %v7100_v10  ;;  %v7104_v21 = vsel %vm1704_vm1, %v7102_v12, %v7103_v41  ;;  %v7545_v5 = vmul.f32 %v11796_v56, %v13004_v1  ;;  %v7546_v0 = vmul.f32 %v11806_v37, %v13007_v55 }
 0x744   :  { %v7171_v19 = vadd.f32 %v7101_v36, %v6870_v45  ;;  %v7172_v14 = vadd.f32 %v7104_v21, %v6871_v44  ;;  %v7401_v49 = vrot.slane %v7246_v47, 2  ;;  %v7404_v39 = vrot.slane %v7247_v50, 2  ;;  %v5739_v50 = vld [vmem:[#allocation2 + $0x270] sm:$0x3]  ;;  %v5740_v21 = vld [vmem:[#allocation2 + $0x278] sm:$0x3] }
 0x745   :  { %v7547_v16 = vmul.f32 %v11796_v56, %v13036_v28  ;;  %v7548_v51 = vmul.f32 %v11806_v37, %v13038_v58  ;;  %v7701_v40 = vrot.slane %v7545_v5, 2  ;;  %v7704_v48 = vrot.slane %v7546_v0, 2 }
 0x746   :  { %v7402_v9 = vsel %vm1704_vm1, %v7400_v17, %v7401_v49  ;;  %v7405_v43 = vsel %vm1704_vm1, %v7403_v7, %v7404_v39  ;;  %v5783_v2 = vmul.f32 %v11810_v26, %v12925_v62  ;;  %v5784_v35 = vmul.f32 %v11814_v22, %v12927_v6 }
 0x747   :  { %v7472_v8 = vadd.f32 %v7402_v9, %v7171_v19  ;;  %v7473_v52 = vadd.f32 %v7405_v43, %v7172_v14  ;;  %v7702_v53 = vrot.slane %v7547_v16, 2  ;;  %v7705_v42 = vrot.slane %v7548_v51, 2 }
 0x748   :  { %v5860_v38 = vmul.f32 %v11817_v34, %v13004_v1  ;;  %v5861_v31 = vmul.f32 %v11820_v59, %v13007_v55  ;;  %v5937_v30 = vmul.f32 %v13094_v23, %v11844_v4  ;;  %v5938_v26 = vmul.f32 %v13094_v23, %v11847_v33 }
 0x749   :  { %v7703_v22 = vsel %vm1704_vm1, %v7701_v40, %v7702_v53  ;;  %v7706_v25 = vsel %vm1704_vm1, %v7704_v48, %v7705_v42  ;;  %v6044_v12 = vmul.f32 %v11771_v27, %v12925_v62  ;;  %v6045_v34 = vmul.f32 %v11777_v3, %v12927_v6 }
 0x74a   :  { %v7773_v11 = vadd.f32 %v7703_v22, %v7472_v8  ;;  %v7774_v59 = vadd.f32 %v7706_v25, %v7473_v52  ;;  %v5892_v46 = vadd.f32 %v5860_v38, %v5783_v2  ;;  %v5893_v24 = vadd.f32 %v5861_v31, %v5784_v35 }
 0x74b   :  { %v6046_v4 = vmul.f32 %v11771_v27, %v12954_v57  ;;  %v6047_v33 = vmul.f32 %v11777_v3, %v12956_v29  ;;  %v6202_v63 = vrot.slane %v6044_v12, 1  ;;  %v6205_v45 = vrot.slane %v6045_v34, 1 }
 0x74c   :  { %v7819_v44 = vadd.f32 %v7774_v59, %v7773_v11  ;;  %v5969_v10 = vadd.f32 %v5937_v30, %v5892_v46  ;;  %v5970_v41 = vadd.f32 %v5938_v26, %v5893_v24  ;;  %v6345_v47 = vmul.f32 %v11774_v13, %v13004_v1 }
 0x74d   :  { %v6203_v17 = vrot.slane %v6046_v4, 1  ;;  %v6206_v7 = vrot.slane %v6047_v33, 1  ;;  %v6346_v36 = vmul.f32 %v11780_v54, %v13007_v55  ;;  %v6347_v27 = vmul.f32 %v11774_v13, %v13036_v28 }
 0x74e   :  { %7820 = vadd.xlane.f32.xlu0 %v7819_v44  ;;  %v6348_v3 = vmul.f32 %v11780_v54, %v13038_v58  ;;  %v6503_v5 = vrot.slane %v6345_v47, 1  ;;  %v6646_v0 = vmul.f32 %v13094_v23, %v11783_v61  ;;  %v6647_v19 = vmul.f32 %v13094_v23, %v11789_v20 }
 0x74f   :  { %v6204_v14 = vsel %vm937_vm0, %v6202_v63, %v6203_v17  ;;  %v6207_v49 = vsel %vm937_vm0, %v6205_v45, %v6206_v7  ;;  %v6504_v39 = vrot.slane %v6347_v27, 1  ;;  %v6506_v16 = vrot.slane %v6346_v36, 1 }
 0x750   :  { %v6270_v51 = vadd.f32 %v6204_v14, %v5969_v10  ;;  %v6271_v13 = vadd.f32 %v6207_v49, %v5970_v41  ;;  %v6507_v40 = vrot.slane %v6348_v3, 1  ;;  %v6648_v48 = vmul.f32 %v11783_v61, %v5739_v50 }
 0x751   :  { %v6505_v54 = vsel %vm937_vm0, %v6503_v5, %v6504_v39  ;;  %v6649_v9 = vmul.f32 %v11789_v20, %v5740_v21  ;;  %v6804_v43 = vrot.slane %v6646_v0, 1  ;;  %v6807_v2 = vrot.slane %v6647_v19, 1 }
 0x752   :  { %v6508_v35 = vsel %vm937_vm0, %v6506_v16, %v6507_v40  ;;  %v6571_v8 = vadd.f32 %v6505_v54, %v6270_v51  ;;  %v6805_v52 = vrot.slane %v6648_v48, 1  ;;  %v6947_v53 = vmul.f32 %v11786_v60, %v12925_v62 }
 0x753   :  { %v6572_v42 = vadd.f32 %v6508_v35, %v6271_v13  ;;  %v6808_v38 = vrot.slane %v6649_v9, 1  ;;  %v6948_v31 = vmul.f32 %v11799_v18, %v12927_v6  ;;  %v6949_v61 = vmul.f32 %v11786_v60, %v12954_v57 }
 0x754   :  { %v6806_v30 = vsel %vm937_vm0, %v6804_v43, %v6805_v52  ;;  %v6950_v20 = vmul.f32 %v11799_v18, %v12956_v29  ;;  %v7105_v26 = vrot.slane %v6947_v53, 2  ;;  %v7248_v22 = vmul.f32 %v11793_v15, %v13004_v1 }
 0x755   :  { %v6809_v25 = vsel %vm937_vm0, %v6807_v2, %v6808_v38  ;;  %v6872_v62 = vadd.f32 %v6806_v30, %v6571_v8  ;;  %v7106_v12 = vrot.slane %v6949_v61, 2  ;;  %v7108_v34 = vrot.slane %v6948_v31, 2 }
 0x756   :  { %v6873_v11 = vadd.f32 %v6809_v25, %v6572_v42  ;;  %v7109_v59 = vrot.slane %v6950_v20, 2  ;;  %v7249_v6 = vmul.f32 %v11803_v32, %v13007_v55  ;;  %v7250_v60 = vmul.f32 %v11793_v15, %v13036_v28 }
 0x757   :  { %v7107_v57 = vsel %vm1704_vm1, %v7105_v26, %v7106_v12  ;;  %v7251_v18 = vmul.f32 %v11803_v32, %v13038_v58  ;;  %v7406_v29 = vrot.slane %v7248_v22, 2  ;;  %v7549_v1 = vmul.f32 %v13094_v23, %v11796_v56 }
 0x758   :  { %v7110_v46 = vsel %vm1704_vm1, %v7108_v34, %v7109_v59  ;;  %v7173_v24 = vadd.f32 %v7107_v57, %v6872_v62  ;;  %v7407_v4 = vrot.slane %v7250_v60, 2  ;;  %v7409_v33 = vrot.slane %v7249_v6, 2 }
 0x759   :  { %v7174_v63 = vadd.f32 %v7110_v46, %v6873_v11  ;;  %v7410_v45 = vrot.slane %v7251_v18, 2  ;;  %v7550_v55 = vmul.f32 %v13094_v23, %v11806_v37  ;;  %v7551_v15 = vmul.f32 %v11796_v56, %v5739_v50  ;;  %v7779_v56 = vpop.xlane.xlu0 %7778  ;;  %v7785_v50 = vpop.xlane.xlu1 %7784 }
 0x75a   :  { %v7408_v28 = vsel %vm1704_vm1, %v7406_v29, %v7407_v4  ;;  %v7552_v32 = vmul.f32 %v11806_v37, %v5740_v21  ;;  %v7707_v58 = vrot.slane %v7549_v1, 2  ;;  %v13161_v37 = vstv %s13359_s6 }
 0x75b   :  { %v7411_v44 = vsel %vm1704_vm1, %v7409_v33, %v7410_v45  ;;  %v7474_v10 = vadd.f32 %v7408_v28, %v7173_v24  ;;  %v7708_v41 = vrot.slane %v7551_v15, 2  ;;  %v7710_v47 = vrot.slane %v7550_v55, 2 }
 0x75c   :  { %v7475_v17 = vadd.f32 %v7411_v44, %v7174_v63  ;;  %v7711_v7 = vrot.slane %v7552_v32, 2  ;;  %v7827_v21 = vadd.f32 %v13161_v37, %v7779_v56  ;;  %v7829_v39 = vadd.f32 %v13161_v37, %v7785_v50 }
 0x75d   :  { %v7709_v36 = vsel %vm1704_vm1, %v7707_v58, %v7708_v41  ;;  %v7782_v0 = vpop.xlane.xlu0 %7781  ;;  %v7788_v19 = vpop.xlane.xlu1 %7787 }
 0x75e   :  { %v7712_v27 = vsel %vm1704_vm1, %v7710_v47, %v7711_v7  ;;  %v7775_v3 = vadd.f32 %v7709_v36, %v7474_v10  ;;  %v7843_v14 = vmax.f32 %v7827_v21, 0.0  ;;  %v7828_v49 = vadd.f32 %v13161_v37, %v7782_v0 }
 0x75f   :  { %v7776_v23 = vadd.f32 %v7712_v27, %v7475_v17  ;;  %v7830_v16 = vadd.f32 %v13161_v37, %v7788_v19  ;;  %v7845_v48 = vmax.f32 %v7829_v39, 0.0 }
 0x760   :  { %v8234_v51 = vmul.f32 -1.442695, %v7843_v14  ;;  %v7844_v13 = vmax.f32 %v7828_v49, 0.0 }
 0x761   :  { %v7822_v5 = vadd.f32 %v7776_v23, %v7775_v3  ;;  %v7791_v40 = vpop.xlane.xlu0 %7790  ;;  %v7794_v54 = vpop.xlane.xlu1 %7793  ;;  %v7846_v9 = vmax.f32 %v7830_v16, 0.0  ;;  %v8236_v35 = vmul.f32 -1.442695, %v7845_v48 }
 0x762   :  { %9731 = vpow2.f32 %v8234_v51  ;;  %v8235_v43 = vmul.f32 -1.442695, %v7844_v13  ;;  %v7831_v53 = vadd.f32 %v13161_v37, %v7791_v40  ;;  %v7832_v42 = vadd.f32 %v13161_v37, %v7794_v54 }
 0x763   :  { %7823 = vadd.xlane.f32.xlu1 %v7822_v5  ;;  %v8237_v52 = vmul.f32 -1.442695, %v7846_v9 }
 0x764   :  { %9733 = vpow2.f32 %v8235_v43  ;;  %v7847_v30 = vmax.f32 %v7831_v53, 0.0  ;;  %v7848_v26 = vmax.f32 %v7832_v42, 0.0 }
 0x765   :  { %v7797_v2 = vpop.xlane.xlu0 %7796  ;;  %v7800_v8 = vpop.xlane.xlu1 %7799  ;;  %9735 = vpow2.f32 %v8236_v35 }
 0x766   :  { %9737 = vpow2.f32 %v8237_v52  ;;  %v7833_v61 = vadd.f32 %v13161_v37, %v7797_v2  ;;  %v7834_v20 = vadd.f32 %v13161_v37, %v7800_v8  ;;  %v8238_v11 = vmul.f32 -1.442695, %v7847_v30 }
 0x767   :  { %v8239_v6 = vmul.f32 -1.442695, %v7848_v26 }
 0x768   :  { %v7849_v34 = vmax.f32 %v7833_v61, 0.0  ;;  %v7850_v59 = vmax.f32 %v7834_v20, 0.0  ;;  %9739 = vpow2.f32 %v8238_v11  ;;  %v9911_v11 = vld [vmem:[%s13353_s0 + $0x18] sm:$0x3] }
 0x769   :  { %v7803_v38 = vpop.xlane.xlu0 %7802  ;;  %9741 = vpow2.f32 %v8239_v6 }
 0x76a   :  { %v7835_v22 = vadd.f32 %v13161_v37, %v7803_v38  ;;  %v8240_v4 = vmul.f32 -1.442695, %v7849_v34  ;;  %v8241_v45 = vmul.f32 -1.442695, %v7850_v59 }
 0x76c   :  { %v9732_v12 = vpop.eup %9731  ;;  %v7851_v60 = vmax.f32 %v7835_v22, 0.0 }
 0x76d   :  { %v7907_v29 = vadd.f32 1.0, %v9732_v12 }
 0x76e   :  { %v9734_v24 = vpop.eup %9733  ;;  %v8242_v28 = vmul.f32 -1.442695, %v7851_v60 }
 0x76f   :  { %v9736_v63 = vpop.eup %9735  ;;  %9743 = vrcp.f32 %v7907_v29  ;;  %v7908_v44 = vadd.f32 1.0, %v9734_v24  ;;  %v9912_v24 = vld [vmem:[%s13353_s0 + $0x20] sm:$0xff] }
 0x770   :  { %v9738_v15 = vpop.eup %9737  ;;  %v7909_v41 = vadd.f32 1.0, %v9736_v63  ;;  %9745 = vpow2.f32 %v8240_v4 }
 0x771   :  { %v7910_v17 = vadd.f32 1.0, %v9738_v15  ;;  %9747 = vpow2.f32 %v8241_v45 }
 0x772   :  { %9749 = vpow2.f32 %v8242_v28  ;;  %v9740_v50 = vpop.eup %9739  ;;  %v9915_v28 = vld [vmem:[%s13353_s0 + $0x38] sm:$0x3] }
 0x773   :  { %v7806_v31 = vpop.xlane.xlu1 %7805  ;;  %9751 = vrcp.f32 %v7908_v44  ;;  %v9742_v21 = vpop.eup %9741  ;;  %v7911_v14 = vadd.f32 1.0, %v9740_v50 }
 0x774   :  { %v7836_v57 = vadd.f32 %v13161_v37, %v7806_v31  ;;  %9753 = vrcp.f32 %v7909_v41  ;;  %v7912_v51 = vadd.f32 1.0, %v9742_v21 }
 0x775   :  { %9755 = vrcp.f32 %v7910_v17 }
 0x776   :  { %v7852_v32 = vmax.f32 %v7836_v57, 0.0 }
 0x778   :  { %v8243_v36 = vmul.f32 -1.442695, %v7852_v32 }
 0x779   :  { %v9744_v0 = vpop.eup %9743 }
 0x77a   :  { %9757 = vpow2.f32 %v8243_v36  ;;  %v9746_v19 = vpop.eup %9745  ;;  %v7955_v16 = vadd.f32 1.0, %v9744_v0 }
 0x77b   :  { %v9748_v49 = vpop.eup %9747  ;;  %v7913_v52 = vadd.f32 1.0, %v9746_v19  ;;  %v9917_v19 = vld [vmem:[%s13353_s0 + $0x48] sm:$0x3] }
 0x77c   :  { %v9750_v39 = vpop.eup %9749  ;;  %v7987_v35 = vrot.slane %v7955_v16, 7  ;;  %v7914_v38 = vadd.f32 1.0, %v9748_v49 }
 0x77d   :  { %v9752_v40 = vpop.eup %9751  ;;  %v7915_v30 = vadd.f32 1.0, %v9750_v39 }
 0x77e   :  { %v9754_v54 = vpop.eup %9753  ;;  %v7956_v8 = vadd.f32 1.0, %v9752_v40  ;;  %v8020_v59 = vmul.f32 %v9911_v11, %v7987_v35 }
 0x77f   :  { %v9756_v9 = vpop.eup %9755  ;;  %v7957_v42 = vadd.f32 1.0, %v9754_v54 }
 0x780   :  { %v7988_v12 = vrot.slane %v7956_v8, 7  ;;  %v7958_v57 = vadd.f32 1.0, %v9756_v9  ;;  %v8054_v45 = vsel %vm8053_vm3, %v8020_v59, -inf }
 0x781   :  { %v7989_v6 = vrot.slane %v7957_v42, 7 }
 0x782   :  { %v8021_v4 = vmul.f32 %v9912_v24, %v7988_v12  ;;  %v7990_v44 = vrot.slane %v7958_v57, 7 }
 0x783   :  { %v8024_v32 = vmul.f32 %v9915_v28, %v7989_v6 }
 0x784   :  { %v9758_v2 = vpop.eup %9757 }
 0x785   :  { %v7916_v26 = vadd.f32 1.0, %v9758_v2 }
 0x788   :  { %v7809_v25 = vpop.xlane.xlu0 %7808 }
 0x789   :  { %v7837_v1 = vadd.f32 %v13161_v37, %v7809_v25  ;;  %v9910_v25 = vld [vmem:[%s13353_s0 + $0x10] sm:$0xff] }
 0x78b   :  { %v7853_v10 = vmax.f32 %v7837_v1, 0.0 }
 0x78d   :  { %v8244_v3 = vmul.f32 -1.442695, %v7853_v10 }
 0x78f   :  { %9759 = vpow2.f32 %v8244_v3 }
 0x799   :  { %v9760_v53 = vpop.eup %9759 }
 0x79a   :  { %v7917_v34 = vadd.f32 1.0, %v9760_v53  ;;  %v9918_v53 = vld [vmem:[%s13353_s0 + $0x50] sm:$0xff] }
 0x79d   :  { %v7812_v62 = vpop.xlane.xlu1 %7811 }
 0x79e   :  { %v7838_v33 = vadd.f32 %v13161_v37, %v7812_v62  ;;  %v8019_v62 = vmul.f32 %v9910_v25, %v7987_v35  ;;  %v9920_v25 = vld [vmem:[%s13353_s0 + $0x60] sm:$0xff] }
 0x7a0   :  { %v7854_v47 = vmax.f32 %v7838_v33, 0.0  ;;  %v9913_v33 = vld [vmem:[%s13353_s0 + $0x28] sm:$0x3] }
 0x7a1   :  { %v8022_v63 = vmul.f32 %v9913_v33, %v7988_v12  ;;  %v9921_v12 = vld [vmem:[%s13353_s0 + $0x68] sm:$0x3] }
 0x7a2   :  { %v8245_v23 = vmul.f32 -1.442695, %v7854_v47  ;;  %v8062_v47 = vsel %vm8051_vm2, %v8021_v4, -inf }
 0x7a3   :  { %v8063_v17 = vsel %vm8053_vm3, %v8022_v63, -inf }
 0x7a4   :  { %9761 = vpow2.f32 %v8245_v23  ;;  %v8064_v0 = vmax.f32 %v8062_v47, %v8063_v17 }
 0x7a6   :  { %v8065_v8 = vrot.slane %v8064_v0, 4 }
 0x7ae   :  { %v9762_v61 = vpop.eup %9761 }
 0x7af   :  { %v7918_v60 = vadd.f32 1.0, %v9762_v61 }
 0x7b1   :  { %v7815_v18 = vpop.xlane.xlu0 %7814 }
 0x7b2   :  { %v7839_v55 = vadd.f32 %v13161_v37, %v7815_v18 }
 0x7b4   :  { %v7855_v7 = vmax.f32 %v7839_v55, 0.0  ;;  %v9914_v55 = vld [vmem:[%s13353_s0 + $0x30] sm:$0xff] }
 0x7b5   :  { %v8023_v15 = vmul.f32 %v9914_v55, %v7989_v6 }
 0x7b6   :  { %v8246_v5 = vmul.f32 -1.442695, %v7855_v7 }
 0x7b7   :  { %v8071_v36 = vsel %vm8051_vm2, %v8023_v15, -inf }
 0x7b8   :  { %9763 = vpow2.f32 %v8246_v5  ;;  %v9916_v5 = vld [vmem:[%s13353_s0 + $0x40] sm:$0xff] }
 0x7c2   :  { %v9764_v20 = vpop.eup %9763 }
 0x7c3   :  { %v7919_v18 = vadd.f32 1.0, %v9764_v20  ;;  %v9919_v20 = vld [vmem:[%s13353_s0 + $0x58] sm:$0x3] }
 0x7c6   :  { %v7818_v46 = vpop.xlane.xlu1 %7817 }
 0x7c7   :  { %v7840_v58 = vadd.f32 %v13161_v37, %v7818_v46  ;;  %v8052_v46 = vsel %vm8051_vm2, %v8019_v62, -inf }
 0x7c8   :  { %v8055_v41 = vmax.f32 %v8052_v46, %v8054_v45 }
 0x7c9   :  { %v7856_v27 = vmax.f32 %v7840_v58, 0.0 }
 0x7ca   :  { %v8056_v16 = vrot.slane %v8055_v41, 4 }
 0x7cb   :  { %v8247_v56 = vmul.f32 -1.442695, %v7856_v27  ;;  %v8072_v27 = vsel %vm8053_vm3, %v8024_v32, -inf }
 0x7cc   :  { %v13216_v61 = vmax.f32 %v8055_v41, %v8056_v16 }
 0x7cd   :  { %9765 = vpow2.f32 %v8247_v56  ;;  %v8025_v56 = vmul.f32 %v9916_v5, %v7990_v44  ;;  %v9924_v5 = vld [vmem:[%s13353_s0 + $0x78] sm:$0x3] }
 0x7ce   :  { %9767 = vrcp.f32 %v7911_v14  ;;  %v8026_v14 = vmul.f32 %v9917_v19, %v7990_v44 }
 0x7cf   :  { %9769 = vrcp.f32 %v7912_v51  ;;  %v13208_v51 = vmax.f32 %v8071_v36, %v8072_v27  ;;  %v8080_v9 = vsel %vm8051_vm2, %v8025_v56, -inf }
 0x7d7   :  { %v9766_v22 = vpop.eup %9765 }
 0x7d8   :  { %v7920_v29 = vadd.f32 1.0, %v9766_v22  ;;  %v9768_v1 = vpop.eup %9767 }
 0x7d9   :  { %v9770_v58 = vpop.eup %9769  ;;  %v7959_v10 = vadd.f32 1.0, %v9768_v1 }
 0x7da   :  { %v7960_v3 = vadd.f32 1.0, %v9770_v58  ;;  %v8058_v58 = vrot.slane %v13216_v61, 2 }
 0x7db   :  { %v7821_v13 = vpop.xlane.xlu0 %7820  ;;  %v7991_v49 = vrot.slane %v7959_v10, 7  ;;  %v9922_v10 = vld [vmem:[%s13353_s0 + $0x70] sm:$0xff] }
 0x7dc   :  { %v7841_v48 = vadd.f32 %v13161_v37, %v7821_v13  ;;  %v7992_v40 = vrot.slane %v7960_v3, 7 }
 0x7dd   :  { %v8027_v42 = vmul.f32 %v9918_v53, %v7991_v49 }
 0x7de   :  { %v7857_v43 = vmax.f32 %v7841_v48, 0.0  ;;  %v8029_v62 = vmul.f32 %v9920_v25, %v7992_v40 }
 0x7df   :  { %v8089_v1 = vsel %vm8051_vm2, %v8027_v42, -inf  ;;  %v9932_v42 = vld [vmem:[%s13353_s0 + $0xc0] sm:$0xff] }
 0x7e0   :  { %v8248_v31 = vmul.f32 -1.442695, %v7857_v43  ;;  %v8098_v45 = vsel %vm8051_vm2, %v8029_v62, -inf  ;;  %v9936_v62 = vld [vmem:[%s13353_s0 + $0x100] sm:$0xff] }
 0x7e2   :  { %9771 = vpow2.f32 %v8248_v31 }
 0x7e3   :  { %9773 = vrcp.f32 %v7913_v52  ;;  %v8081_v52 = vsel %vm8053_vm3, %v8026_v14, -inf  ;;  %v9926_v14 = vld [vmem:[%s13353_s0 + $0xb0] sm:$0xff] }
 0x7e4   :  { %9775 = vrcp.f32 %v7914_v38  ;;  %v13228_v6 = vmax.f32 %v8080_v9, %v8081_v52  ;;  %v9931_v52 = vld [vmem:[%s13353_s0 + $0xb8] sm:$0x3] }
 0x7e5   :  { %9777 = vrcp.f32 %v7915_v30  ;;  %v8074_v30 = vrot.slane %v13208_v51, 4 }
 0x7e6   :  { %9779 = vrcp.f32 %v7916_v26  ;;  %v8083_v44 = vrot.slane %v13228_v6, 4 }
 0x7e7   :  { %9781 = vrcp.f32 %v7917_v34  ;;  %v8030_v34 = vmul.f32 %v9921_v12, %v7992_v40 }
 0x7e8   :  { %9783 = vrcp.f32 %v7918_v60 }
 0x7e9   :  { %9785 = vrcp.f32 %v7919_v18  ;;  %v8099_v55 = vsel %vm8053_vm3, %v8030_v34, -inf  ;;  %v9937_v34 = vld [vmem:[%s13353_s0 + $0x108] sm:$0x3] }
 0x7ea   :  { %9787 = vrcp.f32 %v7920_v29  ;;  %v13230_v29 = vmax.f32 %v8064_v0, %v8065_v8  ;;  %v9925_v0 = vld [vmem:[%s13353_s0 + $0x88] sm:$0x3] }
 0x7ec   :  { %v9772_v7 = vpop.eup %9771 }
 0x7ed   :  { %v9774_v23 = vpop.eup %9773  ;;  %v7921_v50 = vadd.f32 1.0, %v9772_v7  ;;  %v9923_v7 = vld [vmem:[%s13353_s0 + $0x80] sm:$0xff] }
 0x7ee   :  { %v9776_v21 = vpop.eup %9775  ;;  %v7961_v43 = vadd.f32 1.0, %v9774_v23  ;;  %v13246_v23 = vmax.f32 %v8098_v45, %v8099_v55 }
 0x7ef   :  { %v9778_v39 = vpop.eup %9777  ;;  %9789 = vrcp.f32 %v7921_v50  ;;  %v7962_v38 = vadd.f32 1.0, %v9776_v21 }
 0x7f0   :  { %v9780_v13 = vpop.eup %9779  ;;  %v7824_v48 = vpop.xlane.xlu1 %7823  ;;  %v7963_v11 = vadd.f32 1.0, %v9778_v39  ;;  %v7993_v60 = vrot.slane %v7961_v43, 7  ;;  %v9927_v39 = vld [vmem:[%s13353_s0 + $0xd0] sm:$0xff]  ;;  %v9930_v43 = vld [vmem:[%s13353_s0 + $0xe8] sm:$0x3] }
 0x7f1   :  { %v9782_v54 = vpop.eup %9781  ;;  %v7842_v2 = vadd.f32 %v13161_v37, %v7824_v48  ;;  %v8028_v37 = vmul.f32 %v9919_v20, %v7991_v49  ;;  %v7994_v46 = vrot.slane %v7962_v38, 7  ;;  %v7964_v24 = vadd.f32 1.0, %v9780_v13  ;;  %v9928_v13 = vld [vmem:[%s13353_s0 + $0xd8] sm:$0x3] }
 0x7f2   :  { %v9784_v35 = vpop.eup %9783  ;;  %v7965_v59 = vadd.f32 1.0, %v9782_v54  ;;  %v7995_v15 = vrot.slane %v7963_v11, 7  ;;  %v8031_v41 = vmul.f32 %v9922_v10, %v7993_v60  ;;  %v8032_v56 = vmul.f32 %v9924_v5, %v7993_v60  ;;  %v9929_v54 = vld [vmem:[%s13353_s0 + $0xe0] sm:$0xff] }
 0x7f3   :  { %v9786_v31 = vpop.eup %9785  ;;  %v7858_v26 = vmax.f32 %v7842_v2, 0.0  ;;  %v7966_v57 = vadd.f32 1.0, %v9784_v35  ;;  %v8090_v4 = vsel %vm8053_vm3, %v8028_v37, -inf  ;;  %v8033_v36 = vmul.f32 %v9923_v7, %v7994_v46  ;;  %v9934_v37 = vld [vmem:[%s13353_s0 + $0xf0] sm:$0xff] }
 0x7f4   :  { %v9788_v22 = vpop.eup %9787  ;;  %v7967_v33 = vadd.f32 1.0, %v9786_v31  ;;  %v7997_v28 = vrot.slane %v7965_v59, 7  ;;  %v13241_v17 = vmax.f32 %v8089_v1, %v8090_v4  ;;  %v7996_v27 = vrot.slane %v7964_v24, 7  ;;  %v9933_v31 = vld [vmem:[%s13353_s0 + $0xc8] sm:$0x3]  ;;  %v9938_v4 = vld [vmem:[%s13353_s0 + $0x110] sm:$0xff] }
 0x7f5   :  { %v8249_v18 = vmul.f32 -1.442695, %v7858_v26  ;;  %v7968_v63 = vadd.f32 1.0, %v9788_v22  ;;  %v7998_v47 = vrot.slane %v7966_v57, 7  ;;  %v8034_v19 = vmul.f32 %v9925_v0, %v7994_v46  ;;  %v9935_v22 = vld [vmem:[%s13353_s0 + $0xf8] sm:$0x3] }
 0x7f6   :  { %v7999_v50 = vrot.slane %v7967_v33, 7  ;;  %v8035_v49 = vmul.f32 %v9926_v14, %v7995_v15  ;;  %v8039_v16 = vmul.f32 %v9927_v39, %v7997_v28  ;;  %v8040_v40 = vmul.f32 %v9928_v13, %v7997_v28 }
 0x7f7   :  { %9791 = vpow2.f32 %v8249_v18  ;;  %v8000_v21 = vrot.slane %v7968_v63, 7  ;;  %v8107_v48 = vsel %vm8051_vm2, %v8031_v41, -inf  ;;  %v8041_v9 = vmul.f32 %v9929_v54, %v7998_v47  ;;  %v9939_v63 = vld [vmem:[%s13353_s0 + $0x118] sm:$0x3] }
 0x7f8   :  { %v8042_v2 = vmul.f32 %v9930_v43, %v7998_v47  ;;  %v8116_v8 = vsel %vm8051_vm2, %v8033_v36, -inf  ;;  %v8036_v53 = vmul.f32 %v9931_v52, %v7995_v15  ;;  %v8037_v38 = vmul.f32 %v9932_v42, %v7996_v27 }
 0x7f9   :  { %v9790_v32 = vpop.eup %9789  ;;  %v8038_v20 = vmul.f32 %v9933_v31, %v7996_v27  ;;  %v8043_v26 = vmul.f32 %v9934_v37, %v7999_v50  ;;  %v8044_v25 = vmul.f32 %v9935_v22, %v7999_v50  ;;  %v8045_v12 = vmul.f32 %v9936_v62, %v8000_v21 }
 0x7fa   :  { %v7969_v3 = vadd.f32 1.0, %v9790_v32  ;;  %v8046_v11 = vmul.f32 %v9937_v34, %v8000_v21  ;;  %v8117_v59 = vsel %vm8053_vm3, %v8034_v19, -inf  ;;  %v8125_v60 = vsel %vm8051_vm2, %v8035_v49, -inf }
 0x7fb   :  { %v8143_v57 = vsel %vm8051_vm2, %v8039_v16, -inf  ;;  %v8144_v18 = vsel %vm8053_vm3, %v8040_v40, -inf  ;;  %v8152_v46 = vsel %vm8051_vm2, %v8041_v9, -inf  ;;  %v8153_v24 = vsel %vm8053_vm3, %v8042_v2, -inf }
 0x7fc   :  { %v8001_v35 = vrot.slane %v7969_v3, 7  ;;  %v8126_v55 = vsel %vm8053_vm3, %v8036_v53, -inf  ;;  %v8134_v15 = vsel %vm8051_vm2, %v8037_v38, -inf  ;;  %v8135_v28 = vsel %vm8053_vm3, %v8038_v20, -inf }
 0x7fd   :  { %v8161_v10 = vsel %vm8051_vm2, %v8043_v26, -inf  ;;  %v8162_v41 = vsel %vm8053_vm3, %v8044_v25, -inf  ;;  %v8170_v47 = vsel %vm8051_vm2, %v8045_v12, -inf  ;;  %v8171_v7 = vsel %vm8053_vm3, %v8046_v11, -inf }
 0x7fe   :  { %v8047_v33 = vmul.f32 %v9938_v4, %v8001_v35  ;;  %v8048_v45 = vmul.f32 %v9939_v63, %v8001_v35  ;;  %v8108_v36 = vsel %vm8053_vm3, %v8032_v56, -inf  ;;  %v8145_v27 = vmax.f32 %v8143_v57, %v8144_v18 }
 0x7ff   :  { %v8154_v3 = vmax.f32 %v8152_v46, %v8153_v24  ;;  %v8118_v5 = vmax.f32 %v8116_v8, %v8117_v59  ;;  %v8127_v50 = vmax.f32 %v8125_v60, %v8126_v55  ;;  %v8084_v19 = vmax.f32 %v13228_v6, %v8083_v44 }
 0x800   :  { %v8179_v21 = vsel %vm8051_vm2, %v8047_v33, -inf  ;;  %v8180_v0 = vsel %vm8053_vm3, %v8048_v45, -inf  ;;  %v8136_v14 = vmax.f32 %v8134_v15, %v8135_v28  ;;  %v8163_v49 = vmax.f32 %v8161_v10, %v8162_v41  ;;  %v9940_v28 = vld [vmem:[%s13353_s0 + $0x120] sm:$0xff]  ;;  %v9941_v10 = vld [vmem:[%s13353_s0 + $0x128] sm:$0x3]  ;;  %s10090_s0 = smov [#allocation13]  }
 0x801   :  { %v9792_v1 = vpop.eup %9791  ;;  %v8172_v39 = vmax.f32 %v8170_v47, %v8171_v7  ;;  %v8067_v16 = vrot.slane %v13230_v29, 2  ;;  %v8101_v56 = vrot.slane %v13246_v23, 4  ;;  %v8109_v13 = vmax.f32 %v8107_v48, %v8108_v36  ;;  %s8223_s1 = sshll.u32 %s10090_s0, 4  ;;  %s8224_s1 = int_to_ptr.vmem [resolvable:$true] %s8223_s1 }
 0x802   :  { %v7922_v32 = vadd.f32 1.0, %v9792_v1  ;;  %v8092_v40 = vrot.slane %v13241_v17, 4  ;;  %v8146_v54 = vrot.slane %v8145_v27, 4  ;;  %v8155_v9 = vrot.slane %v8154_v3, 4  ;;  %s10052_s24 = scalar_lea.vmem %s8224_s1, 32  ;;  %p10057_p13 = scmp.lt.s32.totalorder %s8224_s1, %s8224_s1 }
 0x803   :  { %v8181_v43 = vmax.f32 %v8179_v21, %v8180_v0  ;;  %v8075_v2 = vmax.f32 %v13208_v51, %v8074_v30  ;;  %v8119_v35 = vrot.slane %v8118_v5, 4  ;;  %v8128_v8 = vrot.slane %v8127_v50, 4  ;;  %p10053_p12 = scmp.ne.s32.totalorder %s8224_s1, %s10052_s24  ;;  %p10058_p0 = scmp.lt.s32.totalorder %s10052_s24, %s10052_s24 }
 0x804   :  { %9793 = vrcp.f32 %v7922_v32  ;;  %v8059_v6 = vmax.f32 %v13216_v61, %v8058_v58  ;;  %v8085_v44 = vrot.slane %v8084_v19, 2  ;;  %v8137_v52 = vrot.slane %v8136_v14, 4 }
 0x805   :  { %v8164_v53 = vrot.slane %v8163_v49, 4  ;;  %v8173_v42 = vrot.slane %v8172_v39, 4  ;;  %v8102_v48 = vmax.f32 %v13246_v23, %v8101_v56  ;;  %v8110_v38 = vrot.slane %v8109_v13, 4  ;;  %p10059_p1 = por %p10058_p0, %p10057_p13 }
 0x806   :  { %v13328_v31 = vmax.f32 %v13230_v29, %v8067_v16  ;;  %v8093_v20 = vmax.f32 %v13241_v17, %v8092_v40  ;;  %v8147_v37 = vmax.f32 %v8145_v27, %v8146_v54  ;;  %v8156_v51 = vmax.f32 %v8154_v3, %v8155_v9 }
 0x807   :  { %v8182_v30 = vrot.slane %v8181_v43, 4  ;;  %v8076_v26 = vrot.slane %v8075_v2, 2  ;;  %v8129_v22 = vmax.f32 %v8127_v50, %v8128_v8  ;;  %v8060_v25 = vrot.slane %v8059_v6, 1  ;;  %p10060_p2 = pnand %p10059_p1, %p10053_p12 }
 0x808   :  { %v8120_v62 = vmax.f32 %v8118_v5, %v8119_v35  ;;  %v8138_v58 = vmax.f32 %v8136_v14, %v8137_v52  ;;  %v8165_v12 = vmax.f32 %v8163_v49, %v8164_v53  ;;  %v8174_v34 = vmax.f32 %v8172_v39, %v8173_v42 }
 0x809   :  { %v8086_v11 = vmax.f32 %v8084_v19, %v8085_v44  ;;  %v8069_v23 = vrot.slane %v13328_v31, 1  ;;  %v8103_v60 = vrot.slane %v8102_v48, 2  ;;  %v8111_v29 = vmax.f32 %v8109_v13, %v8110_v38 }
 0x80a   :  { %v8148_v57 = vrot.slane %v8147_v37, 2  ;;  %v8157_v18 = vrot.slane %v8156_v51, 2  ;;  %v8094_v17 = vrot.slane %v8093_v20, 2  ;;  %v8183_v1 = vmax.f32 %v8181_v43, %v8182_v30 }
 0x80b   :  { %v8130_v46 = vrot.slane %v8129_v22, 2  ;;  %v8077_v4 = vmax.f32 %v8075_v2, %v8076_v26  ;;  %v8121_v33 = vrot.slane %v8120_v62, 2  ;;  %v8139_v63 = vrot.slane %v8138_v58, 2 }
 0x80c   :  { %v8087_v45 = vrot.slane %v8086_v11, 1  ;;  %v8166_v55 = vrot.slane %v8165_v12, 2  ;;  %v8175_v15 = vrot.slane %v8174_v34, 2  ;;  %v8104_v47 = vmax.f32 %v8102_v48, %v8103_v60 }
 0x80d   :  { %v8112_v7 = vrot.slane %v8111_v29, 2  ;;  %v8095_v36 = vmax.f32 %v8093_v20, %v8094_v17  ;;  %v8149_v27 = vmax.f32 %v8147_v37, %v8148_v57  ;;  %v8158_v3 = vmax.f32 %v8156_v51, %v8157_v18 }
 0x80e   :  { %v9794_v61 = vpop.eup %9793  ;;  %v8184_v5 = vrot.slane %v8183_v1, 2  ;;  %v8122_v0 = vmax.f32 %v8120_v62, %v8121_v33  ;;  %v8131_v19 = vmax.f32 %v8129_v22, %v8130_v46  ;;  %v8140_v49 = vmax.f32 %v8138_v58, %v8139_v63 }
 0x80f   :  { %v7970_v59 = vadd.f32 1.0, %v9794_v61  ;;  %v8167_v39 = vmax.f32 %v8165_v12, %v8166_v55  ;;  %v8176_v16 = vmax.f32 %v8174_v34, %v8175_v15  ;;  %v8061_v56 = vmax.f32 %v8059_v6, %v8060_v25 }
 0x810   :  { %v8078_v13 = vrot.slane %v8077_v4, 1  ;;  %v8105_v40 = vrot.slane %v8104_v47, 1  ;;  %v8113_v54 = vmax.f32 %v8111_v29, %v8112_v7  ;;  %v8150_v43 = vrot.slane %v8149_v27, 1 }
 0x811   :  { %v8002_v24 = vrot.slane %v7970_v59, 7  ;;  %v8159_v2 = vrot.slane %v8158_v3, 1  ;;  %v8185_v35 = vmax.f32 %v8183_v1, %v8184_v5  ;;  %v8088_v8 = vmax.f32 %v8086_v11, %v8087_v45 }
 0x812   :  { %v8096_v44 = vrot.slane %v8095_v36, 1  ;;  %v8123_v52 = vrot.slane %v8122_v0, 1  ;;  %v8132_v53 = vrot.slane %v8131_v19, 1  ;;  %v8141_v42 = vrot.slane %v8140_v49, 1 }
 0x813   :  { %v8049_v32 = vmul.f32 %v9940_v28, %v8002_v24  ;;  %v8050_v41 = vmul.f32 %v9941_v10, %v8002_v24  ;;  %v8168_v48 = vrot.slane %v8167_v39, 1  ;;  %v8177_v38 = vrot.slane %v8176_v16, 1 }
 0x814   :  { %v8070_v37 = vmax.f32 %v13328_v31, %v8069_v23  ;;  %v8079_v51 = vmax.f32 %v8077_v4, %v8078_v13  ;;  %v8106_v30 = vmax.f32 %v8104_v47, %v8105_v40  ;;  %v8114_v6 = vrot.slane %v8113_v54, 1 }
 0x815   :  { %v8188_v50 = vsel %vm8051_vm2, %v8049_v32, -inf  ;;  %v8189_v21 = vsel %vm8053_vm3, %v8050_v41, -inf  ;;  %v8151_v26 = vmax.f32 %v8149_v27, %v8150_v43  ;;  %v8160_v22 = vmax.f32 %v8158_v3, %v8159_v2 }
 0x816   :  { %v8190_v14 = vmax.f32 %v8188_v50, %v8189_v21  ;;  %v8186_v25 = vrot.slane %v8185_v35, 1  ;;  %v8097_v61 = vmax.f32 %v8095_v36, %v8096_v44  ;;  %v8124_v58 = vmax.f32 %v8122_v0, %v8123_v52 }
 0x817   :  { %v8133_v12 = vmax.f32 %v8131_v19, %v8132_v53  ;;  %v8198_v34 = vmax.f32 %v8070_v37, %v8088_v8  ;;  %v8142_v11 = vmax.f32 %v8140_v49, %v8141_v42  ;;  %v8169_v59 = vmax.f32 %v8167_v39, %v8168_v48 }
 0x818   :  { %v8191_v9 = vrot.slane %v8190_v14, 4  ;;  %v8178_v60 = vmax.f32 %v8176_v16, %v8177_v38  ;;  %v8115_v57 = vmax.f32 %v8113_v54, %v8114_v6  ;;  %v8197_v18 = vmax.f32 %v8061_v56, %v8079_v51 }
 0x819   :  { %v8200_v17 = vmax.f32 %v8198_v34, %v8106_v30  ;;  %v8187_v1 = vmax.f32 %v8185_v35, %v8186_v25  ;;  %v8204_v23 = vmax.f32 %v8133_v12, %v8151_v26  ;;  %v8205_v46 = vmax.f32 %v8142_v11, %v8160_v22 }
 0x81a   :  { %v8192_v20 = vmax.f32 %v8190_v14, %v8191_v9  ;;  %v8199_v24 = vmax.f32 %v8197_v18, %v8097_v61 }
 0x81b   :  { %v8202_v33 = vmax.f32 %v8200_v17, %v8124_v58  ;;  %v8206_v63 = vmax.f32 %v8204_v23, %v8169_v59  ;;  %v8207_v45 = vmax.f32 %v8205_v46, %v8178_v60 }
 0x81c   :  { %v8193_v62 = vrot.slane %v8192_v20, 2  ;;  %v8201_v55 = vmax.f32 %v8199_v24, %v8115_v57 }
 0x81d   :  { %v8208_v15 = vmax.f32 %v8206_v63, %v8187_v1 }
 0x81e   :  { %v8194_v29 = vmax.f32 %v8192_v20, %v8193_v62  ;;  %v8203_v32 = vmax.f32 %v8201_v55, %v8202_v33 }
 0x820   :  { %v8195_v31 = vrot.slane %v8194_v29, 1 }
 0x822   :  { %v8196_v4 = vmax.f32 %v8194_v29, %v8195_v31 }
 0x824   :  { %v8209_v28 = vmax.f32 %v8207_v45, %v8196_v4 }
 0x826   :  { %v8210_v10 = vmax.f32 %v8208_v15, %v8209_v28 }
 0x828   :  { %v8214_v41 = vsel %vm8213_vm4, %v8210_v10, %v8203_v32 }
 0x829   :  { %8216 = vst [vmem:[#allocation13] sm:$0x3] %v8214_v41 }
 0x82a   :  { %10063 = shalt.err (!%p10060_p2)
}
 0x82b   :  { %s10064_s28 = scalar_lea.hbm %s13360_s7, 32 }
 0x82c   :  { %p10065_p3 = scmp.ne.s32.totalorder %s13360_s7, %s10064_s28  ;;  %p10068_p4 = scmp.lt.u32.totalorder %s10064_s28, %s13360_s7 }
 0x82e   :  { %p10070_p5 = pnand %p10068_p4, %p10065_p3 }
 0x830   :  { %10073 = shalt.err (!%p10070_p5)
}
 0x831   :  { %8226 = dma.vmem_to_hbm [thread:$0]  %s8224_s1, 32, %s13360_s7, [#allocation6]  }
 0x832   :  { %10080 = dma.done.wait [#allocation6], 32  }
 0x833   :  { %10081 = vsyncadd [#allocation6], 4294967264 }
 0x834   :  { %8230 = vsyncpa [#allocation5], 1 }
 0x835   :  { %8231 = vsyncpa [#allocation8], 1 }
 0x836   :  { %8232 = vsyncpa [#allocation11], 1 }
 0x837   :  { %8233 = vsyncpa [#allocation6], 1 }

</bundles_post_ra>
